<compile_context>
chip_gen: v7x
topology: tpu7x:2x2x1
jax: 0.10.0
libtpu: 0.0.40
codegen_flags: <defaults>
</compile_context>

<pallas_src>
import jax
import jax.numpy as jnp
from jax import lax
from jax.experimental import pallas as pl
from jax.experimental.pallas import tpu as pltpu

EPS = 1e-5
LANE = 128


def _round_up(x, m):
    return (x + m - 1) // m * m


def _im2col(src, H, W):
    """src: (N, H+2, W+2, C) ref/value -> (N*H*W, 9*C) patch (dy, dx, c order)."""
    N = src.shape[0]
    C = src.shape[-1]
    taps = [src[:, dy:dy + H, dx:dx + W, :]
            for dy in range(3) for dx in range(3)]
    patch = jnp.concatenate(taps, axis=-1)            # (N, H, W, 9*C)
    return patch.reshape(N * H * W, 9 * C)


def _bn_relu(acc, gamma, beta, n_rows):
    """Training-mode BatchNorm (biased batch stats) fused with ReLU.

    Single pass over `acc` for the stats (sum + sum of squares), then one
    fused multiply-add.  acc: (rows, C) f32; gamma/beta: (1, C) f32.
    """
    inv_n = jnp.float32(1.0 / n_rows)
    mean = jnp.sum(acc, axis=0, keepdims=True) * inv_n
    ex2 = jnp.sum(acc * acc, axis=0, keepdims=True) * inv_n
    var = jnp.maximum(ex2 - mean * mean, 0.0)
    scale = gamma * lax.rsqrt(var + EPS)
    shift = beta - mean * scale
    return jnp.maximum(acc * scale + shift, 0.0)


def conv_block_kernel(x_ref, w1_ref, g1_ref, be1_ref,
                      w2_ref, g2_ref, be2_ref,
                      out_ref, pad_ref):
    """Fused ConvBlock.

    x_ref   : (N, H+2, W+2, Cin_p)   spatially pre-padded NHWC input (lane-padded C)
    w1_ref  : (9*Cin_p,  Cout_p)     conv1 weights, rows ordered (dy, dx, cin)
    w2_ref  : (9*Cout_p, Cout_p)     conv2 weights
    g*, be* : (1, Cout_p)            BN gamma / beta (lane-padded with zeros)
    out_ref : (N, H, W, Cout_p)
    pad_ref : (N, H+2, W+2, Cout_p)  VMEM scratch: re-padded conv1 activation
    """
    N, Hp2, Wp2, _ = x_ref.shape
    H, W = Hp2 - 2, Wp2 - 2
    Cout_p = out_ref.shape[-1]
    NHW = N * H * W

    # ---- conv1 (3x3, pad 1): single K = 9*Cin_p MXU contraction ----
    acc1 = jnp.dot(_im2col(x_ref, H, W), w1_ref[...],
                   preferred_element_type=jnp.float32)
    # conv bias omitted: cancelled exactly by the BN mean subtraction.
    y1 = _bn_relu(acc1, g1_ref[...], be1_ref[...], NHW)

    # ---- re-pad intermediate: zero only the 1-pixel halo, store interior ----
    pad_ref[:, 0:1, :, :] = jnp.zeros((N, 1, Wp2, Cout_p), jnp.float32)
    pad_ref[:, H + 1:H + 2, :, :] = jnp.zeros((N, 1, Wp2, Cout_p), jnp.float32)
    pad_ref[:, 1:H + 1, 0:1, :] = jnp.zeros((N, H, 1, Cout_p), jnp.float32)
    pad_ref[:, 1:H + 1, W + 1:W + 2, :] = jnp.zeros((N, H, 1, Cout_p), jnp.float32)
    pad_ref[:, 1:H + 1, 1:W + 1, :] = y1.reshape(N, H, W, Cout_p)

    # ---- conv2 (3x3, pad 1) + BN + ReLU ----
    acc2 = jnp.dot(_im2col(pad_ref, H, W), w2_ref[...],
                   preferred_element_type=jnp.float32)
    y2 = _bn_relu(acc2, g2_ref[...], be2_ref[...], NHW)

    out_ref[...] = y2.reshape(N, H, W, Cout_p).astype(out_ref.dtype)


def conv_block(x_nchw, params):
    """Runs ConvBlock on a PyTorch-layout NCHW input. Returns NCHW output."""
    N, Cin, H, W = x_nchw.shape
    Cout = params["w1"].shape[0]
    Cin_p = _round_up(Cin, LANE)
    Cout_p = _round_up(Cout, LANE)

    # NCHW -> NHWC, with 1-pixel spatial pad and lane-padding of channels done
    # in a single jnp.pad.
    # TODO(synk): for large shapes, tile H-strips on a grid (two-phase BN
    # reduction) so the pipeline overlaps DMA/compute and shards across the
    # two v7x TensorCores; also move layout/pad handling into the kernel.
    x = jnp.transpose(x_nchw, (0, 2, 3, 1)).astype(jnp.float32)
    x_pad = jnp.pad(x, ((0, 0), (1, 1), (1, 1), (0, Cin_p - Cin)))

    def prep_w(w_oihw, cin, cin_p):
        w = jnp.transpose(w_oihw, (2, 3, 1, 0))                    # (3,3,cin,Cout) HWIO
        w = jnp.pad(w, ((0, 0), (0, 0), (0, cin_p - cin), (0, Cout_p - Cout)))
        return w.reshape(9 * cin_p, Cout_p).astype(jnp.float32)    # rows: (dy, dx, cin)

    w1 = prep_w(params["w1"], Cin, Cin_p)
    w2 = prep_w(params["w2"], Cout, Cout_p)
    row = lambda v: jnp.pad(v.astype(jnp.float32), (0, Cout_p - Cout)).reshape(1, Cout_p)

    vmem = pl.BlockSpec(memory_space=pltpu.MemorySpace.VMEM)
    out_nhwc = pl.pallas_call(
        conv_block_kernel,
        out_shape=jax.ShapeDtypeStruct((N, H, W, Cout_p), jnp.float32),
        in_specs=[vmem] * 7,
        out_specs=vmem,
        scratch_shapes=[pltpu.VMEM((N, H + 2, W + 2, Cout_p), jnp.float32)],
        compiler_params=pltpu.CompilerParams(vmem_limit_bytes=32 * 1024 * 1024),
    )(x_pad, w1, row(params["g1"]), row(params["beta1"]),
      w2, row(params["g2"]), row(params["beta2"]))

    # Drop lane padding, back to NCHW.
    return jnp.transpose(out_nhwc[..., :Cout], (0, 3, 1, 2))


def conv_block_reference(x_nchw, params):
    """Pure-JAX reference (lax.conv + batch-stat BN + ReLU), biases included."""
    def conv_bn_relu(x_nhwc, w_oihw, b, g, be):
        w_hwio = jnp.transpose(w_oihw, (2, 3, 1, 0))
        y = lax.conv_general_dilated(
            x_nhwc, w_hwio, window_strides=(1, 1), padding=((1, 1), (1, 1)),
            dimension_numbers=("NHWC", "HWIO", "NHWC")) + b
        mean = jnp.mean(y, axis=(0, 1, 2), keepdims=True)
        var = jnp.mean((y - mean) ** 2, axis=(0, 1, 2), keepdims=True)
        y = (y - mean) * lax.rsqrt(var + EPS) * g + be
        return jnp.maximum(y, 0.0)

    x = jnp.transpose(x_nchw, (0, 2, 3, 1))
    y = conv_bn_relu(x, params["w1"], params["b1"], params["g1"], params["beta1"])
    y = conv_bn_relu(y, params["w2"], params["b2"], params["g2"], params["beta2"])
    return jnp.transpose(y, (0, 3, 1, 2))


def init_params(key, ch_in, ch_out):
    k1, k2, k3, k4 = jax.random.split(key, 4)
    return {
        "w1": 0.1 * jax.random.normal(k1, (ch_out, ch_in, 3, 3), jnp.float32),
        "b1": 0.1 * jax.random.normal(k2, (ch_out,), jnp.float32),
        "g1": jnp.ones((ch_out,), jnp.float32),      # BatchNorm2d default init
        "beta1": jnp.zeros((ch_out,), jnp.float32),
        "w2": 0.1 * jax.random.normal(k3, (ch_out, ch_out, 3, 3), jnp.float32),
        "b2": 0.1 * jax.random.normal(k4, (ch_out,), jnp.float32),
        "g2": jnp.ones((ch_out,), jnp.float32),
        "beta2": jnp.zeros((ch_out,), jnp.float32),
    }


if __name__ == "__main__":
    key = jax.random.PRNGKey(0)
    kx, kp = jax.random.split(key)

    N, CH_IN, CH_OUT, H, W = 2, 4, 8, 16, 16
    x = jax.random.normal(kx, (N, CH_IN, H, W), jnp.float32)  # PyTorch NCHW
    params = init_params(kp, CH_IN, CH_OUT)

    out = jax.block_until_ready(conv_block(x, params))
    ref = jax.block_until_ready(conv_block_reference(x, params))

    assert out.shape == (N, CH_OUT, H, W)
    assert jnp.allclose(out, ref, rtol=1e-4, atol=1e-4), \
        f"max abs err {jnp.max(jnp.abs(out - ref))}"

    print("KERNEL_OK")
</pallas_src>

<mosaic_0001>
module attributes {stable_mosaic.version = 11 : i64} {
  func.func @conv_block_kernel(%arg0: memref<2x18x18x128xf32, #tpu.memory_space<vmem>>, %arg1: memref<1152x128xf32, #tpu.memory_space<vmem>>, %arg2: memref<1x128xf32, #tpu.memory_space<vmem>>, %arg3: memref<1x128xf32, #tpu.memory_space<vmem>>, %arg4: memref<1152x128xf32, #tpu.memory_space<vmem>>, %arg5: memref<1x128xf32, #tpu.memory_space<vmem>>, %arg6: memref<1x128xf32, #tpu.memory_space<vmem>>, %arg7: memref<2x16x16x128xf32, #tpu.memory_space<vmem>>, %arg8: memref<2x18x18x128xf32, #tpu.memory_space<vmem>>) attributes {dimension_semantics = [], scalar_prefetch = 0 : i64, scratch_operands = 1 : i64, tpu.core_type = #tpu.core_type<tc>} {
    %c0 = arith.constant 0 : index
    %c0_0 = arith.constant 0 : index
    %c0_1 = arith.constant 0 : index
    %c0_2 = arith.constant 0 : index
    %0 = vector.load %arg0[%c0, %c0_0, %c0_1, %c0_2] : memref<2x18x18x128xf32, #tpu.memory_space<vmem>>, vector<2x16x16x128xf32>
    %c0_3 = arith.constant 0 : index
    %c0_4 = arith.constant 0 : index
    %c1 = arith.constant 1 : index
    %c0_5 = arith.constant 0 : index
    %1 = vector.load %arg0[%c0_3, %c0_4, %c1, %c0_5] : memref<2x18x18x128xf32, #tpu.memory_space<vmem>>, vector<2x16x16x128xf32>
    %c0_6 = arith.constant 0 : index
    %c0_7 = arith.constant 0 : index
    %c2 = arith.constant 2 : index
    %c0_8 = arith.constant 0 : index
    %2 = vector.load %arg0[%c0_6, %c0_7, %c2, %c0_8] : memref<2x18x18x128xf32, #tpu.memory_space<vmem>>, vector<2x16x16x128xf32>
    %c0_9 = arith.constant 0 : index
    %c1_10 = arith.constant 1 : index
    %c0_11 = arith.constant 0 : index
    %c0_12 = arith.constant 0 : index
    %3 = vector.load %arg0[%c0_9, %c1_10, %c0_11, %c0_12] : memref<2x18x18x128xf32, #tpu.memory_space<vmem>>, vector<2x16x16x128xf32>
    %c0_13 = arith.constant 0 : index
    %c1_14 = arith.constant 1 : index
    %c1_15 = arith.constant 1 : index
    %c0_16 = arith.constant 0 : index
    %4 = vector.load %arg0[%c0_13, %c1_14, %c1_15, %c0_16] : memref<2x18x18x128xf32, #tpu.memory_space<vmem>>, vector<2x16x16x128xf32>
    %c0_17 = arith.constant 0 : index
    %c1_18 = arith.constant 1 : index
    %c2_19 = arith.constant 2 : index
    %c0_20 = arith.constant 0 : index
    %5 = vector.load %arg0[%c0_17, %c1_18, %c2_19, %c0_20] : memref<2x18x18x128xf32, #tpu.memory_space<vmem>>, vector<2x16x16x128xf32>
    %c0_21 = arith.constant 0 : index
    %c2_22 = arith.constant 2 : index
    %c0_23 = arith.constant 0 : index
    %c0_24 = arith.constant 0 : index
    %6 = vector.load %arg0[%c0_21, %c2_22, %c0_23, %c0_24] : memref<2x18x18x128xf32, #tpu.memory_space<vmem>>, vector<2x16x16x128xf32>
    %c0_25 = arith.constant 0 : index
    %c2_26 = arith.constant 2 : index
    %c1_27 = arith.constant 1 : index
    %c0_28 = arith.constant 0 : index
    %7 = vector.load %arg0[%c0_25, %c2_26, %c1_27, %c0_28] : memref<2x18x18x128xf32, #tpu.memory_space<vmem>>, vector<2x16x16x128xf32>
    %c0_29 = arith.constant 0 : index
    %c2_30 = arith.constant 2 : index
    %c2_31 = arith.constant 2 : index
    %c0_32 = arith.constant 0 : index
    %8 = vector.load %arg0[%c0_29, %c2_30, %c2_31, %c0_32] : memref<2x18x18x128xf32, #tpu.memory_space<vmem>>, vector<2x16x16x128xf32>
    %9 = tpu.concatenate %0, %1, %2, %3, %4, %5, %6, %7, %8 in 3 : vector<2x16x16x128xf32>, vector<2x16x16x128xf32>, vector<2x16x16x128xf32>, vector<2x16x16x128xf32>, vector<2x16x16x128xf32>, vector<2x16x16x128xf32>, vector<2x16x16x128xf32>, vector<2x16x16x128xf32>, vector<2x16x16x128xf32> -> vector<2x16x16x1152xf32>
    %10 = vector.shape_cast %9 : vector<2x16x16x1152xf32> to vector<512x1152xf32>
    %c0_33 = arith.constant 0 : index
    %c0_34 = arith.constant 0 : index
    %11 = vector.load %arg1[%c0_33, %c0_34] : memref<1152x128xf32, #tpu.memory_space<vmem>>, vector<1152x128xf32>
    %cst = arith.constant dense<0.000000e+00> : vector<512x128xf32>
    %12 = tpu.matmul %10, %11, %cst {dimension_numbers = #tpu.dot_dimension_numbers<[1], [0], [0], [1], [0, 0, 1, 1], [], []>} : vector<512x1152xf32>, vector<1152x128xf32>, vector<512x128xf32> -> vector<512x128xf32>
    %c0_35 = arith.constant 0 : index
    %c0_36 = arith.constant 0 : index
    %13 = vector.load %arg2[%c0_35, %c0_36] : memref<1x128xf32, #tpu.memory_space<vmem>>, vector<1x128xf32>
    %c0_37 = arith.constant 0 : index
    %c0_38 = arith.constant 0 : index
    %14 = vector.load %arg3[%c0_37, %c0_38] : memref<1x128xf32, #tpu.memory_space<vmem>>, vector<1x128xf32>
    %cst_39 = arith.constant dense<0.000000e+00> : vector<128xf32>
    %15 = vector.multi_reduction <add>, %12, %cst_39 [0] : vector<512x128xf32> to vector<128xf32>
    %16 = vector.shape_cast %15 : vector<128xf32> to vector<1x128xf32>
    %cst_40 = arith.constant 0.001953125 : f32
    %17 = vector.broadcast %cst_40 : f32 to vector<1x128xf32>
    %18 = arith.mulf %16, %17 : vector<1x128xf32>
    %19 = arith.mulf %12, %12 : vector<512x128xf32>
    %cst_41 = arith.constant dense<0.000000e+00> : vector<128xf32>
    %20 = vector.multi_reduction <add>, %19, %cst_41 [0] : vector<512x128xf32> to vector<128xf32>
    %21 = vector.shape_cast %20 : vector<128xf32> to vector<1x128xf32>
    %cst_42 = arith.constant 0.001953125 : f32
    %22 = vector.broadcast %cst_42 : f32 to vector<1x128xf32>
    %23 = arith.mulf %21, %22 : vector<1x128xf32>
    %24 = arith.mulf %18, %18 : vector<1x128xf32>
    %25 = arith.subf %23, %24 : vector<1x128xf32>
    %cst_43 = arith.constant 0.000000e+00 : f32
    %26 = vector.broadcast %cst_43 : f32 to vector<1x128xf32>
    %27 = arith.maximumf %25, %26 : vector<1x128xf32>
    %cst_44 = arith.constant 9.99999974E-6 : f32
    %28 = vector.broadcast %cst_44 : f32 to vector<1x128xf32>
    %29 = arith.addf %27, %28 : vector<1x128xf32>
    %30 = math.rsqrt %29 : vector<1x128xf32>
    %31 = arith.mulf %13, %30 : vector<1x128xf32>
    %32 = arith.mulf %18, %31 : vector<1x128xf32>
    %33 = arith.subf %14, %32 : vector<1x128xf32>
    %34 = vector.broadcast %31 : vector<1x128xf32> to vector<512x128xf32>
    %35 = arith.mulf %12, %34 : vector<512x128xf32>
    %36 = vector.broadcast %33 : vector<1x128xf32> to vector<512x128xf32>
    %37 = arith.addf %35, %36 : vector<512x128xf32>
    %cst_45 = arith.constant 0.000000e+00 : f32
    %38 = vector.broadcast %cst_45 : f32 to vector<512x128xf32>
    %39 = arith.maximumf %37, %38 : vector<512x128xf32>
    %cst_46 = arith.constant 0.000000e+00 : f32
    %40 = vector.broadcast %cst_46 : f32 to vector<2x1x18x128xf32>
    %c0_47 = arith.constant 0 : index
    %c0_48 = arith.constant 0 : index
    %c0_49 = arith.constant 0 : index
    %c0_50 = arith.constant 0 : index
    %41 = vector.load %arg8[%c0_47, %c0_48, %c0_49, %c0_50] : memref<2x18x18x128xf32, #tpu.memory_space<vmem>>, vector<2x1x18x128xf32>
    tpu.vector_store %arg8[%c0_47, %c0_48, %c0_49, %c0_50], %40 {strides = array<i32>} : memref<2x18x18x128xf32, #tpu.memory_space<vmem>>, vector<2x1x18x128xf32>,
    %cst_51 = arith.constant 0.000000e+00 : f32
    %42 = vector.broadcast %cst_51 : f32 to vector<2x1x18x128xf32>
    %c0_52 = arith.constant 0 : index
    %c17 = arith.constant 17 : index
    %c0_53 = arith.constant 0 : index
    %c0_54 = arith.constant 0 : index
    %43 = vector.load %arg8[%c0_52, %c17, %c0_53, %c0_54] : memref<2x18x18x128xf32, #tpu.memory_space<vmem>>, vector<2x1x18x128xf32>
    tpu.vector_store %arg8[%c0_52, %c17, %c0_53, %c0_54], %42 {strides = array<i32>} : memref<2x18x18x128xf32, #tpu.memory_space<vmem>>, vector<2x1x18x128xf32>,
    %cst_55 = arith.constant 0.000000e+00 : f32
    %44 = vector.broadcast %cst_55 : f32 to vector<2x16x1x128xf32>
    %c0_56 = arith.constant 0 : index
    %c1_57 = arith.constant 1 : index
    %c0_58 = arith.constant 0 : index
    %c0_59 = arith.constant 0 : index
    %45 = vector.load %arg8[%c0_56, %c1_57, %c0_58, %c0_59] : memref<2x18x18x128xf32, #tpu.memory_space<vmem>>, vector<2x16x1x128xf32>
    tpu.vector_store %arg8[%c0_56, %c1_57, %c0_58, %c0_59], %44 {strides = array<i32>} : memref<2x18x18x128xf32, #tpu.memory_space<vmem>>, vector<2x16x1x128xf32>,
    %cst_60 = arith.constant 0.000000e+00 : f32
    %46 = vector.broadcast %cst_60 : f32 to vector<2x16x1x128xf32>
    %c0_61 = arith.constant 0 : index
    %c1_62 = arith.constant 1 : index
    %c17_63 = arith.constant 17 : index
    %c0_64 = arith.constant 0 : index
    %47 = vector.load %arg8[%c0_61, %c1_62, %c17_63, %c0_64] : memref<2x18x18x128xf32, #tpu.memory_space<vmem>>, vector<2x16x1x128xf32>
    tpu.vector_store %arg8[%c0_61, %c1_62, %c17_63, %c0_64], %46 {strides = array<i32>} : memref<2x18x18x128xf32, #tpu.memory_space<vmem>>, vector<2x16x1x128xf32>,
    %48 = vector.shape_cast %39 : vector<512x128xf32> to vector<2x16x16x128xf32>
    %c0_65 = arith.constant 0 : index
    %c1_66 = arith.constant 1 : index
    %c1_67 = arith.constant 1 : index
    %c0_68 = arith.constant 0 : index
    %49 = vector.load %arg8[%c0_65, %c1_66, %c1_67, %c0_68] : memref<2x18x18x128xf32, #tpu.memory_space<vmem>>, vector<2x16x16x128xf32>
    tpu.vector_store %arg8[%c0_65, %c1_66, %c1_67, %c0_68], %48 {strides = array<i32>} : memref<2x18x18x128xf32, #tpu.memory_space<vmem>>, vector<2x16x16x128xf32>,
    %c0_69 = arith.constant 0 : index
    %c0_70 = arith.constant 0 : index
    %c0_71 = arith.constant 0 : index
    %c0_72 = arith.constant 0 : index
    %50 = vector.load %arg8[%c0_69, %c0_70, %c0_71, %c0_72] : memref<2x18x18x128xf32, #tpu.memory_space<vmem>>, vector<2x16x16x128xf32>
    %c0_73 = arith.constant 0 : index
    %c0_74 = arith.constant 0 : index
    %c1_75 = arith.constant 1 : index
    %c0_76 = arith.constant 0 : index
    %51 = vector.load %arg8[%c0_73, %c0_74, %c1_75, %c0_76] : memref<2x18x18x128xf32, #tpu.memory_space<vmem>>, vector<2x16x16x128xf32>
    %c0_77 = arith.constant 0 : index
    %c0_78 = arith.constant 0 : index
    %c2_79 = arith.constant 2 : index
    %c0_80 = arith.constant 0 : index
    %52 = vector.load %arg8[%c0_77, %c0_78, %c2_79, %c0_80] : memref<2x18x18x128xf32, #tpu.memory_space<vmem>>, vector<2x16x16x128xf32>
    %c0_81 = arith.constant 0 : index
    %c1_82 = arith.constant 1 : index
    %c0_83 = arith.constant 0 : index
    %c0_84 = arith.constant 0 : index
    %53 = vector.load %arg8[%c0_81, %c1_82, %c0_83, %c0_84] : memref<2x18x18x128xf32, #tpu.memory_space<vmem>>, vector<2x16x16x128xf32>
    %c0_85 = arith.constant 0 : index
    %c1_86 = arith.constant 1 : index
    %c1_87 = arith.constant 1 : index
    %c0_88 = arith.constant 0 : index
    %54 = vector.load %arg8[%c0_85, %c1_86, %c1_87, %c0_88] : memref<2x18x18x128xf32, #tpu.memory_space<vmem>>, vector<2x16x16x128xf32>
    %c0_89 = arith.constant 0 : index
    %c1_90 = arith.constant 1 : index
    %c2_91 = arith.constant 2 : index
    %c0_92 = arith.constant 0 : index
    %55 = vector.load %arg8[%c0_89, %c1_90, %c2_91, %c0_92] : memref<2x18x18x128xf32, #tpu.memory_space<vmem>>, vector<2x16x16x128xf32>
    %c0_93 = arith.constant 0 : index
    %c2_94 = arith.constant 2 : index
    %c0_95 = arith.constant 0 : index
    %c0_96 = arith.constant 0 : index
    %56 = vector.load %arg8[%c0_93, %c2_94, %c0_95, %c0_96] : memref<2x18x18x128xf32, #tpu.memory_space<vmem>>, vector<2x16x16x128xf32>
    %c0_97 = arith.constant 0 : index
    %c2_98 = arith.constant 2 : index
    %c1_99 = arith.constant 1 : index
    %c0_100 = arith.constant 0 : index
    %57 = vector.load %arg8[%c0_97, %c2_98, %c1_99, %c0_100] : memref<2x18x18x128xf32, #tpu.memory_space<vmem>>, vector<2x16x16x128xf32>
    %c0_101 = arith.constant 0 : index
    %c2_102 = arith.constant 2 : index
    %c2_103 = arith.constant 2 : index
    %c0_104 = arith.constant 0 : index
    %58 = vector.load %arg8[%c0_101, %c2_102, %c2_103, %c0_104] : memref<2x18x18x128xf32, #tpu.memory_space<vmem>>, vector<2x16x16x128xf32>
    %59 = tpu.concatenate %50, %51, %52, %53, %54, %55, %56, %57, %58 in 3 : vector<2x16x16x128xf32>, vector<2x16x16x128xf32>, vector<2x16x16x128xf32>, vector<2x16x16x128xf32>, vector<2x16x16x128xf32>, vector<2x16x16x128xf32>, vector<2x16x16x128xf32>, vector<2x16x16x128xf32>, vector<2x16x16x128xf32> -> vector<2x16x16x1152xf32>
    %60 = vector.shape_cast %59 : vector<2x16x16x1152xf32> to vector<512x1152xf32>
    %c0_105 = arith.constant 0 : index
    %c0_106 = arith.constant 0 : index
    %61 = vector.load %arg4[%c0_105, %c0_106] : memref<1152x128xf32, #tpu.memory_space<vmem>>, vector<1152x128xf32>
    %cst_107 = arith.constant dense<0.000000e+00> : vector<512x128xf32>
    %62 = tpu.matmul %60, %61, %cst_107 {dimension_numbers = #tpu.dot_dimension_numbers<[1], [0], [0], [1], [0, 0, 1, 1], [], []>} : vector<512x1152xf32>, vector<1152x128xf32>, vector<512x128xf32> -> vector<512x128xf32>
    %c0_108 = arith.constant 0 : index
    %c0_109 = arith.constant 0 : index
    %63 = vector.load %arg5[%c0_108, %c0_109] : memref<1x128xf32, #tpu.memory_space<vmem>>, vector<1x128xf32>
    %c0_110 = arith.constant 0 : index
    %c0_111 = arith.constant 0 : index
    %64 = vector.load %arg6[%c0_110, %c0_111] : memref<1x128xf32, #tpu.memory_space<vmem>>, vector<1x128xf32>
    %cst_112 = arith.constant dense<0.000000e+00> : vector<128xf32>
    %65 = vector.multi_reduction <add>, %62, %cst_112 [0] : vector<512x128xf32> to vector<128xf32>
    %66 = vector.shape_cast %65 : vector<128xf32> to vector<1x128xf32>
    %cst_113 = arith.constant 0.001953125 : f32
    %67 = vector.broadcast %cst_113 : f32 to vector<1x128xf32>
    %68 = arith.mulf %66, %67 : vector<1x128xf32>
    %69 = arith.mulf %62, %62 : vector<512x128xf32>
    %cst_114 = arith.constant dense<0.000000e+00> : vector<128xf32>
    %70 = vector.multi_reduction <add>, %69, %cst_114 [0] : vector<512x128xf32> to vector<128xf32>
    %71 = vector.shape_cast %70 : vector<128xf32> to vector<1x128xf32>
    %cst_115 = arith.constant 0.001953125 : f32
    %72 = vector.broadcast %cst_115 : f32 to vector<1x128xf32>
    %73 = arith.mulf %71, %72 : vector<1x128xf32>
    %74 = arith.mulf %68, %68 : vector<1x128xf32>
    %75 = arith.subf %73, %74 : vector<1x128xf32>
    %cst_116 = arith.constant 0.000000e+00 : f32
    %76 = vector.broadcast %cst_116 : f32 to vector<1x128xf32>
    %77 = arith.maximumf %75, %76 : vector<1x128xf32>
    %cst_117 = arith.constant 9.99999974E-6 : f32
    %78 = vector.broadcast %cst_117 : f32 to vector<1x128xf32>
    %79 = arith.addf %77, %78 : vector<1x128xf32>
    %80 = math.rsqrt %79 : vector<1x128xf32>
    %81 = arith.mulf %63, %80 : vector<1x128xf32>
    %82 = arith.mulf %68, %81 : vector<1x128xf32>
    %83 = arith.subf %64, %82 : vector<1x128xf32>
    %84 = vector.broadcast %81 : vector<1x128xf32> to vector<512x128xf32>
    %85 = arith.mulf %62, %84 : vector<512x128xf32>
    %86 = vector.broadcast %83 : vector<1x128xf32> to vector<512x128xf32>
    %87 = arith.addf %85, %86 : vector<512x128xf32>
    %cst_118 = arith.constant 0.000000e+00 : f32
    %88 = vector.broadcast %cst_118 : f32 to vector<512x128xf32>
    %89 = arith.maximumf %87, %88 : vector<512x128xf32>
    %90 = vector.shape_cast %89 : vector<512x128xf32> to vector<2x16x16x128xf32>
    %c0_119 = arith.constant 0 : index
    %c0_120 = arith.constant 0 : index
    %c0_121 = arith.constant 0 : index
    %c0_122 = arith.constant 0 : index
    %91 = vector.load %arg7[%c0_119, %c0_120, %c0_121, %c0_122] : memref<2x16x16x128xf32, #tpu.memory_space<vmem>>, vector<2x16x16x128xf32>
    tpu.vector_store %arg7[%c0_119, %c0_120, %c0_121, %c0_122], %90 {strides = array<i32>} : memref<2x16x16x128xf32, #tpu.memory_space<vmem>>, vector<2x16x16x128xf32>,
    return
  }
}

</mosaic_0001>

<bundles_post_ra>
// kernel: tpu_custom_call.1
= control target key start
LH: loop header
LB: loop body
LE: loop exit
PB: predicated region body
PF: predicated region fallthrough
CT: control target
= control target key end

     0   :  { %12 = vsyncpa [#allocation4], 0  ;;  %s14237_s0 = inlined_call_operand.vmem [shape: f32[2,18,18,128], index: 0, kind: input, shape index: {}]   ;;  %s14238_s1 = inlined_call_operand.vmem [shape: f32[1152,128], index: 1, kind: input, shape index: {}]   ;;  %s14239_s2 = inlined_call_operand.vmem [shape: f32[1,128], index: 2, kind: input, shape index: {}]   ;;  %s14240_s3 = inlined_call_operand.vmem [shape: f32[1,128], index: 3, kind: input, shape index: {}]   ;;  %s14241_s4 = inlined_call_operand.hbm [shape: f32[1152,128], index: 4, kind: input, shape index: {}]   ;;  %s14242_s5 = inlined_call_operand.vmem [shape: f32[1,128], index: 5, kind: input, shape index: {}]   ;;  %s14243_s6 = inlined_call_operand.vmem [shape: f32[1,128], index: 6, kind: input, shape index: {}]   ;;  %s14244_s7 = inlined_call_operand.hbm [shape: f32[2,16,16,128], index: 7, kind: output, shape index: {}]  }
   0x1   :  { %13 = vsyncpa [#allocation5], 0  ;;  %s8485_s24 = smov [#allocation3]   ;;  %s8437_s28 = scalar_lea.hbm %s14241_s4, 18432 }
   0x2   :  { %s27_s25 = sshll.u32 %s8485_s24, 4  ;;  %p8438_p0 = scmp.ne.s32.totalorder %s14241_s4, %s8437_s28  ;;  %s28_s25 = int_to_ptr.vmem [resolvable:$true] %s27_s25 }
   0x3   :  { %p8441_p1 = scmp.lt.u32.totalorder %s8437_s28, %s14241_s4 }
   0x5   :  { %p8443_p2 = pnand %p8441_p1, %p8438_p0 }
   0x7   :  { %8446 = shalt.err (!%p8443_p2)
}
   0x8   :  { %s8447_s10 = scalar_lea.vmem %s28_s25, 18432  ;;  %p8452_p4 = scmp.lt.s32.totalorder %s28_s25, %s28_s25 }
   0x9   :  { %p8448_p3 = scmp.ne.s32.totalorder %s28_s25, %s8447_s10  ;;  %p8453_p5 = scmp.lt.s32.totalorder %s8447_s10, %s8447_s10 }
   0xb   :  { %p8454_p6 = por %p8453_p5, %p8452_p4 }
   0xd   :  { %p8455_p7 = pnand %p8454_p6, %p8448_p3 }
   0xf   :  { %8458 = shalt.err (!%p8455_p7)
}
  0x10   :  { %s8486_s11 = smov 128   ;;  %s8487_s12 = smov 8  }
  0x11   :  { %33 = dma.hbm_to_vmem [thread:$0]  %s14241_s4, 18432, %s28_s25, [#allocation4], %s8486_s11, %s8486_s11, %s8487_s12  }
  0x12   :  { %8481 = dma.done.wait [#allocation4], 18432  }
  0x13   :  { %8482 = vsyncadd [#allocation4], 4294948864  ;;  %v14245_v0 = vmov 0.0|0.0   ;;  %v619_v1 = vld [vmem:[%s14238_s1] sm:$0xff]  ;;  %v620_v2 = vld [vmem:[%s14238_s1 + $0x8] sm:$0xff] }
  0x14   :  { %7193 = vmatprep.subr.bf16.mxu0 %v14245_v0  ;;  %v621_v3 = vld [vmem:[%s14238_s1 + $0x10] sm:$0xff]  ;;  %v7194_v4 = vpack.c.bf16 %v620_v2, %v619_v1  ;;  %v622_v5 = vld [vmem:[%s14238_s1 + $0x18] sm:$0xff]  ;;  %v623_v7 = vld [vmem:[%s14238_s1 + $0x20] sm:$0xff] }
  0x15   :  { %v7197_v6 = vpack.c.bf16 %v622_v5, %v621_v3  ;;  %v624_v8 = vld [vmem:[%s14238_s1 + $0x28] sm:$0xff]  ;;  %v625_v10 = vld [vmem:[%s14238_s1 + $0x30] sm:$0xff]  ;;  %v626_v11 = vld [vmem:[%s14238_s1 + $0x38] sm:$0xff] }
  0x16   :  { %7195 = vmatpush1.bf16.msra.mxu0 %v7194_v4  ;;  %v7200_v9 = vpack.c.bf16 %v624_v8, %v623_v7  ;;  %v105_v12 = vld [vmem:[%s14237_s0 + $0x1] sm:$0xff]  ;;  %v7203_v13 = vpack.c.bf16 %v626_v11, %v625_v10  ;;  %v629_v17 = vld [vmem:[%s14238_s1 + $0x50] sm:$0xff]  ;;  %v630_v18 = vld [vmem:[%s14238_s1 + $0x58] sm:$0xff] }
  0x17   :  { %7196 = vmatprep.subr.bf16.mxu0 %v14245_v0  ;;  %827 = vmatprep.mubr.f32.mxu0 %v105_v12  ;;  %v627_v14 = vld [vmem:[%s14238_s1 + $0x40] sm:$0xff]  ;;  %v628_v15 = vld [vmem:[%s14238_s1 + $0x48] sm:$0xff]  ;;  %v7209_v19 = vpack.c.bf16 %v630_v18, %v629_v17  ;;  %v633_v23 = vld [vmem:[%s14238_s1 + $0x70] sm:$0xff] }
  0x18   :  { %v7206_v16 = vpack.c.bf16 %v628_v15, %v627_v14  ;;  %v631_v20 = vld [vmem:[%s14238_s1 + $0x60] sm:$0xff]  ;;  %v632_v21 = vld [vmem:[%s14238_s1 + $0x68] sm:$0xff]  ;;  %v634_v24 = vld [vmem:[%s14238_s1 + $0x78] sm:$0xff] }
  0x19   :  { %v7212_v22 = vpack.c.bf16 %v632_v21, %v631_v20  ;;  %v7215_v25 = vpack.c.bf16 %v634_v24, %v633_v23  ;;  %v635_v26 = vld [vmem:[%s14238_s1 + $0x80] sm:$0xff]  ;;  %v636_v27 = vld [vmem:[%s14238_s1 + $0x88] sm:$0xff]  ;;  %v637_v29 = vld [vmem:[%s14238_s1 + $0x90] sm:$0xff] }
  0x1a   :  { %7198 = vmatpush1.bf16.msra.mxu0 %v7197_v6  ;;  %v7218_v28 = vpack.c.bf16 %v636_v27, %v635_v26  ;;  %v638_v30 = vld [vmem:[%s14238_s1 + $0x98] sm:$0xff]  ;;  %v639_v32 = vld [vmem:[%s14238_s1 + $0xa0] sm:$0xff]  ;;  %v640_v33 = vld [vmem:[%s14238_s1 + $0xa8] sm:$0xff] }
  0x1b   :  { %7199 = vmatprep.subr.bf16.mxu0 %v14245_v0  ;;  %v7221_v31 = vpack.c.bf16 %v638_v30, %v637_v29  ;;  %v7224_v34 = vpack.c.bf16 %v640_v33, %v639_v32  ;;  %v641_v35 = vld [vmem:[%s14238_s1 + $0xb0] sm:$0xff]  ;;  %v642_v36 = vld [vmem:[%s14238_s1 + $0xb8] sm:$0xff]  ;;  %v643_v38 = vld [vmem:[%s14238_s1 + $0xc0] sm:$0xff] }
  0x1c   :  { %v7227_v37 = vpack.c.bf16 %v642_v36, %v641_v35  ;;  %v644_v39 = vld [vmem:[%s14238_s1 + $0xc8] sm:$0xff]  ;;  %v645_v41 = vld [vmem:[%s14238_s1 + $0xd0] sm:$0xff]  ;;  %v646_v42 = vld [vmem:[%s14238_s1 + $0xd8] sm:$0xff] }
  0x1d   :  { %v7230_v40 = vpack.c.bf16 %v644_v39, %v643_v38  ;;  %v7233_v43 = vpack.c.bf16 %v646_v42, %v645_v41  ;;  %v647_v44 = vld [vmem:[%s14238_s1 + $0xe0] sm:$0xff]  ;;  %v648_v45 = vld [vmem:[%s14238_s1 + $0xe8] sm:$0xff]  ;;  %v649_v47 = vld [vmem:[%s14238_s1 + $0xf0] sm:$0xff] }
  0x1e   :  { %7201 = vmatpush1.bf16.msra.mxu0 %v7200_v9  ;;  %v7236_v46 = vpack.c.bf16 %v648_v45, %v647_v44  ;;  %v650_v48 = vld [vmem:[%s14238_s1 + $0xf8] sm:$0xff]  ;;  %v651_v50 = vld [vmem:[%s14238_s1 + $0x100] sm:$0xff]  ;;  %v652_v51 = vld [vmem:[%s14238_s1 + $0x108] sm:$0xff] }
  0x1f   :  { %7202 = vmatprep.subr.bf16.mxu0 %v14245_v0  ;;  %v7239_v49 = vpack.c.bf16 %v650_v48, %v649_v47  ;;  %v41_v52 = vld [vmem:[%s14237_s0] sm:$0xff]  ;;  %v7242_v53 = vpack.c.bf16 %v652_v51, %v651_v50  ;;  %v106_v54 = vld [vmem:[%s14237_s0 + $0x9] sm:$0xff]  ;;  %v654_v56 = vld [vmem:[%s14238_s1 + $0x118] sm:$0xff] }
  0x20   :  { %v653_v55 = vld [vmem:[%s14238_s1 + $0x110] sm:$0xff]  ;;  %v42_v57 = vld [vmem:[%s14237_s0 + $0x8] sm:$0xff]  ;;  %v107_v59 = vld [vmem:[%s14237_s0 + $0x19] sm:$0xff] }
  0x21   :  { %v7245_v58 = vpack.c.bf16 %v654_v56, %v653_v55  ;;  %v655_v60 = vld [vmem:[%s14238_s1 + $0x120] sm:$0xff]  ;;  %v656_v61 = vld [vmem:[%s14238_s1 + $0x128] sm:$0xff]  ;;  %v8696_v62 = vld [vmem:[%s14237_s0 + $0x18] sm:$0xff] }
  0x22   :  { %7204 = vmatpush1.bf16.msra.mxu0 %v7203_v13  ;;  %v7248_v63 = vpack.c.bf16 %v656_v61, %v655_v60  ;;  %v108_v1 = vld [vmem:[%s14237_s0 + $0x21] sm:$0xff]  ;;  %v657_v2 = vld [vmem:[%s14238_s1 + $0x130] sm:$0xff]  ;;  %v658_v3 = vld [vmem:[%s14238_s1 + $0x138] sm:$0xff] }
  0x23   :  { %7205 = vmatprep.subr.bf16.mxu0 %v14245_v0  ;;  %v8712_v4 = vld [vmem:[%s14237_s0 + $0x20] sm:$0xff]  ;;  %v7251_v5 = vpack.c.bf16 %v658_v3, %v657_v2  ;;  %v109_v6 = vld [vmem:[%s14237_s0 + $0x31] sm:$0xff]  ;;  %v660_v8 = vld [vmem:[%s14238_s1 + $0x148] sm:$0xff] }
  0x24   :  { %v659_v7 = vld [vmem:[%s14238_s1 + $0x140] sm:$0xff]  ;;  %v8728_v9 = vld [vmem:[%s14237_s0 + $0x30] sm:$0xff]  ;;  %v662_v13 = vld [vmem:[%s14238_s1 + $0x158] sm:$0xff] }
  0x25   :  { %v7254_v10 = vpack.c.bf16 %v660_v8, %v659_v7  ;;  %v110_v11 = vld [vmem:[%s14237_s0 + $0x39] sm:$0xff]  ;;  %v661_v12 = vld [vmem:[%s14238_s1 + $0x150] sm:$0xff]  ;;  %v664_v18 = vld [vmem:[%s14238_s1 + $0x168] sm:$0xff] }
  0x26   :  { %7207 = vmatpush1.bf16.msra.mxu0 %v7206_v16  ;;  %v8744_v14 = vld [vmem:[%s14237_s0 + $0x38] sm:$0xff]  ;;  %v7257_v15 = vpack.c.bf16 %v662_v13, %v661_v12  ;;  %v111_v16 = vld [vmem:[%s14237_s0 + $0x49] sm:$0xff]  ;;  %v663_v17 = vld [vmem:[%s14238_s1 + $0x160] sm:$0xff] }
  0x27   :  { %7208 = vmatprep.subr.bf16.mxu0 %v14245_v0  ;;  %v7260_v20 = vpack.c.bf16 %v664_v18, %v663_v17  ;;  %v112_v21 = vld [vmem:[%s14237_s0 + $0x51] sm:$0xff]  ;;  %v113_v26 = vld [vmem:[%s14237_s0 + $0x61] sm:$0xff]  ;;  %v115_v36 = vld [vmem:[%s14237_s0 + $0x79] sm:$0xff] }
  0x28   :  { %v666_v23 = vld [vmem:[%s14238_s1 + $0x178] sm:$0xff]  ;;  %v8776_v24 = vld [vmem:[%s14237_s0 + $0x50] sm:$0xff]  ;;  %v667_v27 = vld [vmem:[%s14238_s1 + $0x180] sm:$0xff] }
  0x29   :  { %v8792_v29 = vld [vmem:[%s14237_s0 + $0x60] sm:$0xff]  ;;  %v669_v32 = vld [vmem:[%s14238_s1 + $0x190] sm:$0xff]  ;;  %v670_v33 = vld [vmem:[%s14238_s1 + $0x198] sm:$0xff] }
  0x2a   :  { %7210 = vmatpush1.bf16.msra.mxu0 %v7209_v19  ;;  %v8760_v19 = vld [vmem:[%s14237_s0 + $0x48] sm:$0xff]  ;;  %v7269_v35 = vpack.c.bf16 %v670_v33, %v669_v32  ;;  %v8824_v39 = vld [vmem:[%s14237_s0 + $0x78] sm:$0xff]  ;;  %v8834_v42 = vld [vmem:[%s14237_s0 + $0x80] sm:$0xff] }
  0x2b   :  { %7211 = vmatprep.subr.bf16.mxu0 %v14245_v0  ;;  %v672_v38 = vld [vmem:[%s14238_s1 + $0x1a8] sm:$0xff]  ;;  %v8844_v44 = vld [vmem:[%s14237_s0 + $0x90] sm:$0xff]  ;;  %v118_v45 = vld [vmem:[%s14237_s0 + $0x99] sm:$0xff] }
  0x2c   :  { %v116_v41 = vld [vmem:[%s14237_s0 + $0x81] sm:$0xff]  ;;  %v674_v47 = vld [vmem:[%s14238_s1 + $0x1b8] sm:$0xff]  ;;  %v119_v50 = vld [vmem:[%s14237_s0 + $0xa9] sm:$0xff] }
  0x2d   :  { %v8859_v48 = vld [vmem:[%s14237_s0 + $0x98] sm:$0xff]  ;;  %v8869_v51 = vld [vmem:[%s14237_s0 + $0xa8] sm:$0xff]  ;;  %v8887_v55 = vld [vmem:[%s14237_s0 + $0xc0] sm:$0xff] }
  0x2e   :  { %7213 = vmatpush1.bf16.msra.mxu0 %v7212_v22  ;;  %v665_v22 = vld [vmem:[%s14238_s1 + $0x170] sm:$0xff]  ;;  %v123_v61 = vld [vmem:[%s14237_s0 + $0xd9] sm:$0xff]  ;;  %v8955_v13 = vld [vmem:[%s14237_s0 + $0x108] sm:$0xff] }
  0x2f   :  { %7214 = vmatprep.subr.bf16.mxu0 %v14245_v0  ;;  %v122_v56 = vld [vmem:[%s14237_s0 + $0xc9] sm:$0xff]  ;;  %v8921_v2 = vld [vmem:[%s14237_s0 + $0xe0] sm:$0xff]  ;;  %v125_v3 = vld [vmem:[%s14237_s0 + $0xf1] sm:$0xff] }
  0x30   :  { %v677_v7 = vld [vmem:[%s14238_s1 + $0x1d0] sm:$0xff]  ;;  %v678_v8 = vld [vmem:[%s14238_s1 + $0x1d8] sm:$0xff]  ;;  %v129_v17 = vld [vmem:[%s14237_s0 + $0x121] sm:$0xff] }
  0x31   :  { %v127_v12 = vld [vmem:[%s14237_s0 + $0x109] sm:$0xff]  ;;  %v8973_v18 = vld [vmem:[%s14237_s0 + $0x120] sm:$0xff] }
  0x32   :  { %7216 = vmatpush1.bf16.msra.mxu0 %v7215_v25  ;;  %v7263_v25 = vpack.c.bf16 %v666_v23, %v665_v22  ;;  %v680_v22 = vld [vmem:[%s14238_s1 + $0x1e8] sm:$0xff]  ;;  %v9016_v32 = vld [vmem:[%s14237_s0 + $0x150] sm:$0xff]  ;;  %v134_v33 = vld [vmem:[%s14237_s0 + $0x159] sm:$0xff] }
  0x33   :  { %7217 = vmatprep.subr.bf16.mxu0 %v14245_v0  ;;  %v8988_v23 = vld [vmem:[%s14237_s0 + $0x128] sm:$0xff] }
  0x36   :  { %7219 = vmatpush1.bf16.msra.mxu0 %v7218_v28  ;;  %v668_v28 = vld [vmem:[%s14238_s1 + $0x188] sm:$0xff] }
  0x37   :  { %7220 = vmatprep.subr.bf16.mxu0 %v14245_v0  ;;  %v7266_v30 = vpack.c.bf16 %v668_v28, %v667_v27  ;;  %v8998_v27 = vld [vmem:[%s14237_s0 + $0x138] sm:$0xff]  ;;  %v132_v28 = vld [vmem:[%s14237_s0 + $0x141] sm:$0xff] }
  0x3a   :  { %7222 = vmatpush1.bf16.msra.mxu0 %v7221_v31  ;;  %v114_v31 = vld [vmem:[%s14237_s0 + $0x69] sm:$0xff] }
  0x3b   :  { %7223 = vmatprep.subr.bf16.mxu0 %v14245_v0 }
  0x3e   :  { %7225 = vmatpush1.bf16.msra.mxu0 %v7224_v34  ;;  %v8808_v34 = vld [vmem:[%s14237_s0 + $0x68] sm:$0xff] }
  0x3f   :  { %7226 = vmatprep.subr.bf16.mxu0 %v14245_v0 }
  0x42   :  { %7228 = vmatpush1.bf16.msra.mxu0 %v7227_v37  ;;  %v671_v37 = vld [vmem:[%s14238_s1 + $0x1a0] sm:$0xff] }
  0x43   :  { %7229 = vmatprep.subr.bf16.mxu0 %v14245_v0 }
  0x46   :  { %7231 = vmatpush1.bf16.msra.mxu0 %v7230_v40  ;;  %v7272_v40 = vpack.c.bf16 %v672_v38, %v671_v37  ;;  %v9031_v37 = vld [vmem:[%s14237_s0 + $0x158] sm:$0xff] }
  0x47   :  { %7232 = vmatprep.subr.bf16.mxu0 %v14245_v0 }
  0x4a   :  { %7234 = vmatpush1.bf16.msra.mxu0 %v7233_v43  ;;  %v117_v43 = vld [vmem:[%s14237_s0 + $0x91] sm:$0xff] }
  0x4b   :  { %7235 = vmatprep.subr.bf16.mxu0 %v14245_v0 }
  0x4e   :  { %7237 = vmatpush1.bf16.msra.mxu0 %v7236_v46  ;;  %v673_v46 = vld [vmem:[%s14238_s1 + $0x1b0] sm:$0xff] }
  0x4f   :  { %7238 = vmatprep.subr.bf16.mxu0 %v14245_v0 }
  0x52   :  { %7240 = vmatpush1.bf16.msra.mxu0 %v7239_v49  ;;  %v7275_v49 = vpack.c.bf16 %v674_v47, %v673_v46  ;;  %v137_v46 = vld [vmem:[%s14237_s0 + $0x1b1] sm:$0xff] }
  0x53   :  { %7241 = vmatprep.subr.bf16.mxu0 %v14245_v0  ;;  %v73_v47 = vld [vmem:[%s14237_s0 + $0x1b0] sm:$0xff] }
  0x55   :  { %828 = vmatmul.mubr.f32.vlgmr.msra.gmra.mrb[0].mxu0 %v41_v52  ;;  %v120_v52 = vld [vmem:[%s14237_s0 + $0xb1] sm:$0xff] }
  0x56   :  { %7243 = vmatpush1.bf16.msra.mxu0 %v7242_v53  ;;  %832 = vmatprep.mubr.f32.mxu0 %v106_v54  ;;  %v8878_v53 = vld [vmem:[%s14237_s0 + $0xb0] sm:$0xff]  ;;  %v121_v54 = vld [vmem:[%s14237_s0 + $0xc1] sm:$0xff] }
  0x57   :  { %7244 = vmatprep.subr.bf16.mxu0 %v14245_v0 }
  0x59   :  { %833 = vmatmul.mubr.f32.gmra.mrb[2].mxu0 %v42_v57  ;;  %v675_v57 = vld [vmem:[%s14238_s1 + $0x1c0] sm:$0xff] }
  0x5a   :  { %837 = vmatprep.mubr.f32.mxu0 %v107_v59  ;;  %7246 = vmatpush1.bf16.msra.mxu0 %v7245_v58  ;;  %v676_v58 = vld [vmem:[%s14238_s1 + $0x1c8] sm:$0xff] }
  0x5b   :  { %7247 = vmatprep.subr.bf16.mxu0 %v14245_v0  ;;  %v8902_v59 = vld [vmem:[%s14237_s0 + $0xc8] sm:$0xff]  ;;  %v7278_v60 = vpack.c.bf16 %v676_v58, %v675_v57  ;;  %v9080_v57 = vld [vmem:[%s14237_s0 + $0x1d0] sm:$0xff] }
  0x5c   :  { %v141_v58 = vld [vmem:[%s14237_s0 + $0x1e1] sm:$0xff] }
  0x5d   :  { %838 = vmatmul.mubr.f32.gmra.mrb[4].mxu0 %v8696_v62 }
  0x5e   :  { %842 = vmatprep.mubr.f32.mxu0 %v108_v1  ;;  %7249 = vmatpush1.bf16.msra.mxu0 %v7248_v63  ;;  %v8912_v63 = vld [vmem:[%s14237_s0 + $0xd8] sm:$0xff]  ;;  %v124_v1 = vld [vmem:[%s14237_s0 + $0xe1] sm:$0xff] }
  0x5f   :  { %7250 = vmatprep.subr.bf16.mxu0 %v14245_v0 }
  0x61   :  { %843 = vmatmul.mubr.f32.gmra.mrb[6].mxu0 %v8712_v4 }
  0x62   :  { %847 = vmatprep.mubr.f32.mxu0 %v109_v6  ;;  %7252 = vmatpush1.bf16.msra.mxu0 %v7251_v5  ;;  %v8930_v5 = vld [vmem:[%s14237_s0 + $0xf0] sm:$0xff]  ;;  %v126_v6 = vld [vmem:[%s14237_s0 + $0xf9] sm:$0xff] }
  0x63   :  { %7253 = vmatprep.subr.bf16.mxu0 %v14245_v0 }
  0x65   :  { %848 = vmatmul.mubr.f32.gmra.mrb[8].mxu0 %v8728_v9 }
  0x66   :  { %852 = vmatprep.mubr.f32.mxu0 %v110_v11  ;;  %7255 = vmatpush1.bf16.msra.mxu0 %v7254_v10  ;;  %v8945_v10 = vld [vmem:[%s14237_s0 + $0xf8] sm:$0xff]  ;;  %v7281_v11 = vpack.c.bf16 %v678_v8, %v677_v7  ;;  %v144_v7 = vld [vmem:[%s14237_s0 + $0x201] sm:$0xff] }
  0x67   :  { %7256 = vmatprep.subr.bf16.mxu0 %v14245_v0  ;;  %v9116_v8 = vld [vmem:[%s14237_s0 + $0x200] sm:$0xff] }
  0x69   :  { %853 = vmatmul.mubr.f32.gmra.mrb[10].mxu0 %v8744_v14 }
  0x6a   :  { %857 = vmatprep.mubr.f32.mxu0 %v111_v16  ;;  %7258 = vmatpush1.bf16.msra.mxu0 %v7257_v15  ;;  %v128_v15 = vld [vmem:[%s14237_s0 + $0x111] sm:$0xff] }
  0x6b   :  { %7259 = vmatprep.subr.bf16.mxu0 %v14245_v0  ;;  %v8964_v16 = vld [vmem:[%s14237_s0 + $0x110] sm:$0xff] }
  0x6d   :  { %858 = vmatmul.mubr.f32.gmra.mrb[12].mxu0 %v8760_v19 }
  0x6e   :  { %862 = vmatprep.mubr.f32.mxu0 %v112_v21  ;;  %7261 = vmatpush1.bf16.msra.mxu0 %v7260_v20  ;;  %v130_v20 = vld [vmem:[%s14237_s0 + $0x129] sm:$0xff]  ;;  %v679_v21 = vld [vmem:[%s14238_s1 + $0x1e0] sm:$0xff] }
  0x6f   :  { %7262 = vmatprep.subr.bf16.mxu0 %v14245_v0 }
  0x71   :  { %863 = vmatmul.mubr.f32.gmra.mrb[14].mxu0 %v8776_v24 }
  0x72   :  { %867 = vmatprep.mubr.f32.mxu0 %v113_v26  ;;  %7264 = vmatpush1.bf16.msra.mxu0 %v7263_v25  ;;  %v7284_v25 = vpack.c.bf16 %v680_v22, %v679_v21  ;;  %v131_v26 = vld [vmem:[%s14237_s0 + $0x139] sm:$0xff]  ;;  %v9143_v21 = vld [vmem:[%s14237_s0 + $0x228] sm:$0xff]  ;;  %v148_v22 = vld [vmem:[%s14237_s0 + $0x231] sm:$0xff] }
  0x73   :  { %7265 = vmatprep.subr.bf16.mxu0 %v14245_v0 }
  0x75   :  { %868 = vmatmul.mubr.f32.gmra.mrb[16].mxu0 %v8792_v29 }
  0x76   :  { %872 = vmatprep.mubr.f32.mxu0 %v114_v31  ;;  %7267 = vmatpush1.bf16.msra.mxu0 %v7266_v30  ;;  %v9007_v30 = vld [vmem:[%s14237_s0 + $0x140] sm:$0xff]  ;;  %v133_v31 = vld [vmem:[%s14237_s0 + $0x151] sm:$0xff] }
  0x77   :  { %7268 = vmatprep.subr.bf16.mxu0 %v14245_v0 }
  0x79   :  { %873 = vmatmul.mubr.f32.gmra.mrb[18].mxu0 %v8808_v34 }
  0x7a   :  { %877 = vmatprep.mubr.f32.mxu0 %v115_v36  ;;  %7270 = vmatpush1.bf16.msra.mxu0 %v7269_v35  ;;  %v681_v35 = vld [vmem:[%s14238_s1 + $0x1f0] sm:$0xff]  ;;  %v682_v36 = vld [vmem:[%s14238_s1 + $0x1f8] sm:$0xff] }
  0x7b   :  { %7271 = vmatprep.subr.bf16.mxu0 %v14245_v0  ;;  %v7287_v38 = vpack.c.bf16 %v682_v36, %v681_v35  ;;  %v151_v35 = vld [vmem:[%s14237_s0 + $0x259] sm:$0xff] }
  0x7c   :  { %v9179_v36 = vld [vmem:[%s14237_s0 + $0x258] sm:$0xff] }
  0x7d   :  { %878 = vmatmul.mubr.f32.gmra.mrb[20].mxu0 %v8824_v39 }
  0x7e   :  { %882 = vmatprep.mubr.f32.mxu0 %v116_v41  ;;  %7273 = vmatpush1.bf16.msra.mxu0 %v7272_v40  ;;  %v135_v40 = vld [vmem:[%s14237_s0 + $0x169] sm:$0xff] }
  0x7f   :  { %7274 = vmatprep.subr.bf16.mxu0 %v14245_v0  ;;  %v9041_v41 = vld [vmem:[%s14237_s0 + $0x168] sm:$0xff] }
  0x81   :  { %883 = vmatmul.mubr.f32.gmra.mrb[22].mxu0 %v8834_v42 }
  0x82   :  { %887 = vmatprep.mubr.f32.mxu0 %v117_v43  ;;  %7276 = vmatpush1.bf16.msra.mxu0 %v7275_v49  ;;  %v136_v43 = vld [vmem:[%s14237_s0 + $0x171] sm:$0xff]  ;;  %v138_v49 = vld [vmem:[%s14237_s0 + $0x1b9] sm:$0xff] }
  0x83   :  { %7277 = vmatprep.subr.bf16.mxu0 %v14245_v0 }
  0x85   :  { %888 = vmatmul.mubr.f32.gmra.mrb[24].mxu0 %v8844_v44 }
  0x86   :  { %892 = vmatprep.mubr.f32.mxu0 %v118_v45  ;;  %7279 = vmatpush1.bf16.msra.mxu0 %v7278_v60  ;;  %v9050_v45 = vld [vmem:[%s14237_s0 + $0x170] sm:$0xff]  ;;  %v9089_v60 = vld [vmem:[%s14237_s0 + $0x1e0] sm:$0xff] }
  0x87   :  { %7280 = vmatprep.subr.bf16.mxu0 %v14245_v0 }
  0x89   :  { %893 = vmatmul.mubr.f32.gmra.mrb[26].mxu0 %v8859_v48 }
  0x8a   :  { %897 = vmatprep.mubr.f32.mxu0 %v119_v50  ;;  %7282 = vmatpush1.bf16.msra.mxu0 %v7281_v11  ;;  %v74_v50 = vld [vmem:[%s14237_s0 + $0x1b8] sm:$0xff] }
  0x8b   :  { %7283 = vmatprep.subr.bf16.mxu0 %v14245_v0  ;;  %v145_v11 = vld [vmem:[%s14237_s0 + $0x211] sm:$0xff] }
  0x8d   :  { %898 = vmatmul.mubr.f32.gmra.mrb[28].mxu0 %v8869_v51 }
  0x8e   :  { %902 = vmatprep.mubr.f32.mxu0 %v120_v52  ;;  %7285 = vmatpush1.bf16.msra.mxu0 %v7284_v25  ;;  %v139_v52 = vld [vmem:[%s14237_s0 + $0x1c9] sm:$0xff] }
  0x8f   :  { %7286 = vmatprep.subr.bf16.mxu0 %v14245_v0  ;;  %v9152_v25 = vld [vmem:[%s14237_s0 + $0x230] sm:$0xff] }
  0x91   :  { %903 = vmatmul.mubr.f32.gmra.mrb[30].mxu0 %v8878_v53 }
  0x92   :  { %907 = vmatprep.mubr.f32.mxu0 %v121_v54  ;;  %7288 = vmatpush1.bf16.msra.mxu0 %v7287_v38  ;;  %v9071_v54 = vld [vmem:[%s14237_s0 + $0x1c8] sm:$0xff] }
  0x93   :  { %7289 = vmatprep.subr.bf16.mxu0 %v14245_v0  ;;  %v152_v38 = vld [vmem:[%s14237_s0 + $0x261] sm:$0xff] }
  0x95   :  { %908 = vmatmul.mubr.f32.gmra.mrb[32].mxu0 %v8887_v55 }
  0x96   :  { %912 = vmatprep.mubr.f32.mxu0 %v122_v56  ;;  %v140_v56 = vld [vmem:[%s14237_s0 + $0x1d1] sm:$0xff] }
  0x99   :  { %913 = vmatmul.mubr.f32.gmra.mrb[34].mxu0 %v8902_v59 }
  0x9a   :  { %917 = vmatprep.mubr.f32.mxu0 %v123_v61  ;;  %v142_v61 = vld [vmem:[%s14237_s0 + $0x1e9] sm:$0xff] }
  0x9d   :  { %918 = vmatmul.mubr.f32.gmra.mrb[36].mxu0 %v8912_v63 }
  0x9e   :  { %922 = vmatprep.mubr.f32.mxu0 %v124_v1  ;;  %v9098_v1 = vld [vmem:[%s14237_s0 + $0x1e8] sm:$0xff] }
  0xa1   :  { %923 = vmatmul.mubr.f32.gmra.mrb[38].mxu0 %v8921_v2 }
  0xa2   :  { %927 = vmatprep.mubr.f32.mxu0 %v125_v3  ;;  %v143_v3 = vld [vmem:[%s14237_s0 + $0x1f9] sm:$0xff] }
  0xa5   :  { %928 = vmatmul.mubr.f32.gmra.mrb[40].mxu0 %v8930_v5 }
  0xa6   :  { %932 = vmatprep.mubr.f32.mxu0 %v126_v6  ;;  %v9107_v6 = vld [vmem:[%s14237_s0 + $0x1f8] sm:$0xff] }
  0xa9   :  { %933 = vmatmul.mubr.f32.gmra.mrb[42].mxu0 %v8945_v10 }
  0xaa   :  { %937 = vmatprep.mubr.f32.mxu0 %v127_v12  ;;  %v9125_v12 = vld [vmem:[%s14237_s0 + $0x210] sm:$0xff] }
  0xad   :  { %938 = vmatmul.mubr.f32.gmra.mrb[44].mxu0 %v8955_v13 }
  0xae   :  { %942 = vmatprep.mubr.f32.mxu0 %v128_v15  ;;  %v146_v15 = vld [vmem:[%s14237_s0 + $0x219] sm:$0xff] }
  0xb1   :  { %943 = vmatmul.mubr.f32.gmra.mrb[46].mxu0 %v8964_v16 }
  0xb2   :  { %947 = vmatprep.mubr.f32.mxu0 %v129_v17  ;;  %v9134_v17 = vld [vmem:[%s14237_s0 + $0x218] sm:$0xff] }
  0xb5   :  { %948 = vmatmul.mubr.f32.gmra.mrb[48].mxu0 %v8973_v18 }
  0xb6   :  { %952 = vmatprep.mubr.f32.mxu0 %v130_v20  ;;  %v147_v20 = vld [vmem:[%s14237_s0 + $0x229] sm:$0xff] }
  0xb9   :  { %953 = vmatmul.mubr.f32.gmra.mrb[50].mxu0 %v8988_v23 }
  0xba   :  { %957 = vmatprep.mubr.f32.mxu0 %v131_v26  ;;  %v149_v26 = vld [vmem:[%s14237_s0 + $0x241] sm:$0xff] }
  0xbd   :  { %958 = vmatmul.mubr.f32.gmra.mrb[52].mxu0 %v8998_v27 }
  0xbe   :  { %962 = vmatprep.mubr.f32.mxu0 %v132_v28  ;;  %v9161_v28 = vld [vmem:[%s14237_s0 + $0x240] sm:$0xff] }
  0xc1   :  { %963 = vmatmul.mubr.f32.gmra.mrb[54].mxu0 %v9007_v30 }
  0xc2   :  { %967 = vmatprep.mubr.f32.mxu0 %v133_v31  ;;  %v150_v31 = vld [vmem:[%s14237_s0 + $0x249] sm:$0xff] }
  0xc5   :  { %968 = vmatmul.mubr.f32.gmra.mrb[56].mxu0 %v9016_v32 }
  0xc6   :  { %972 = vmatprep.mubr.f32.mxu0 %v134_v33  ;;  %v9170_v33 = vld [vmem:[%s14237_s0 + $0x248] sm:$0xff] }
  0xc9   :  { %973 = vmatmul.mubr.f32.gmra.mrb[58].mxu0 %v9031_v37 }
  0xca   :  { %977 = vmatprep.mubr.f32.mxu0 %v135_v40  ;;  %v9188_v40 = vld [vmem:[%s14237_s0 + $0x260] sm:$0xff] }
  0xcd   :  { %978 = vmatmul.mubr.f32.gmra.mrb[60].mxu0 %v9041_v41 }
  0xce   :  { %982 = vmatprep.mubr.f32.mxu0 %v136_v43  ;;  %v153_v43 = vld [vmem:[%s14237_s0 + $0x271] sm:$0xff] }
  0xd1   :  { %983 = vmatmul.mubr.f32.gmra.mrb[62].mxu0 %v9050_v45 }
  0xd2   :  { %987 = vmatprep.mubr.f32.mxu0 %v137_v46  ;;  %v9197_v46 = vld [vmem:[%s14237_s0 + $0x270] sm:$0xff] }
  0xd5   :  { %988 = vmatmul.mubr.f32.gmra.mrb[64].mxu0 %v73_v47  ;;  %v154_v47 = vld [vmem:[%s14237_s0 + $0x279] sm:$0xff] }
  0xd6   :  { %992 = vmatprep.mubr.f32.mxu0 %v138_v49  ;;  %v9206_v49 = vld [vmem:[%s14237_s0 + $0x278] sm:$0xff] }
  0xd9   :  { %993 = vmatmul.mubr.f32.gmra.mrb[66].mxu0 %v74_v50  ;;  %v155_v50 = vld [vmem:[%s14237_s0 + $0x289] sm:$0xff] }
  0xda   :  { %997 = vmatprep.mubr.f32.mxu0 %v139_v52  ;;  %v9215_v52 = vld [vmem:[%s14237_s0 + $0x288] sm:$0xff] }
  0xdd   :  { %998 = vmatmul.mubr.f32.gmra.mrb[68].mxu0 %v9071_v54 }
  0xde   :  { %1002 = vmatprep.mubr.f32.mxu0 %v140_v56  ;;  %v156_v56 = vld [vmem:[%s14237_s0 + $0x291] sm:$0xff] }
  0xe1   :  { %1003 = vmatmul.mubr.f32.gmra.mrb[70].mxu0 %v9080_v57 }
  0xe2   :  { %1007 = vmatprep.mubr.f32.mxu0 %v141_v58  ;;  %v9224_v58 = vld [vmem:[%s14237_s0 + $0x290] sm:$0xff] }
  0xe5   :  { %1008 = vmatmul.mubr.f32.gmra.mrb[72].mxu0 %v9089_v60 }
  0xe6   :  { %1012 = vmatprep.mubr.f32.mxu0 %v142_v61  ;;  %v157_v61 = vld [vmem:[%s14237_s0 + $0x2a1] sm:$0xff] }
  0xe9   :  { %1013 = vmatmul.mubr.f32.gmra.mrb[74].mxu0 %v9098_v1 }
  0xea   :  { %1017 = vmatprep.mubr.f32.mxu0 %v143_v3  ;;  %v9233_v3 = vld [vmem:[%s14237_s0 + $0x2a0] sm:$0xff] }
  0xed   :  { %1018 = vmatmul.mubr.f32.gmra.mrb[76].mxu0 %v9107_v6 }
  0xee   :  { %1022 = vmatprep.mubr.f32.mxu0 %v144_v7  ;;  %v158_v7 = vld [vmem:[%s14237_s0 + $0x2a9] sm:$0xff] }
  0xf1   :  { %1023 = vmatmul.mubr.f32.gmra.mrb[78].mxu0 %v9116_v8 }
  0xf2   :  { %1027 = vmatprep.mubr.f32.mxu0 %v145_v11  ;;  %v9242_v11 = vld [vmem:[%s14237_s0 + $0x2a8] sm:$0xff] }
  0xf5   :  { %1028 = vmatmul.mubr.f32.gmra.mrb[80].mxu0 %v9125_v12 }
  0xf6   :  { %1032 = vmatprep.mubr.f32.mxu0 %v146_v15  ;;  %v159_v15 = vld [vmem:[%s14237_s0 + $0x2b9] sm:$0xff] }
  0xf9   :  { %1033 = vmatmul.mubr.f32.gmra.mrb[82].mxu0 %v9134_v17 }
  0xfa   :  { %1037 = vmatprep.mubr.f32.mxu0 %v147_v20  ;;  %v9251_v20 = vld [vmem:[%s14237_s0 + $0x2b8] sm:$0xff] }
  0xfd   :  { %1038 = vmatmul.mubr.f32.gmra.mrb[84].mxu0 %v9143_v21 }
  0xfe   :  { %1042 = vmatprep.mubr.f32.mxu0 %v148_v22  ;;  %v160_v22 = vld [vmem:[%s14237_s0 + $0x2c1] sm:$0xff] }
 0x101   :  { %1043 = vmatmul.mubr.f32.gmra.mrb[86].mxu0 %v9152_v25 }
 0x102   :  { %1047 = vmatprep.mubr.f32.mxu0 %v149_v26  ;;  %v9260_v26 = vld [vmem:[%s14237_s0 + $0x2c0] sm:$0xff] }
 0x105   :  { %1048 = vmatmul.mubr.f32.gmra.mrb[88].mxu0 %v9161_v28 }
 0x106   :  { %1052 = vmatprep.mubr.f32.mxu0 %v150_v31  ;;  %v161_v31 = vld [vmem:[%s14237_s0 + $0x2d1] sm:$0xff] }
 0x109   :  { %1053 = vmatmul.mubr.f32.gmra.mrb[90].mxu0 %v9170_v33 }
 0x10a   :  { %1057 = vmatprep.mubr.f32.mxu0 %v151_v35  ;;  %v9269_v35 = vld [vmem:[%s14237_s0 + $0x2d0] sm:$0xff] }
 0x10d   :  { %1058 = vmatmul.mubr.f32.gmra.mrb[92].mxu0 %v9179_v36 }
 0x10e   :  { %1062 = vmatprep.mubr.f32.mxu0 %v152_v38  ;;  %v162_v38 = vld [vmem:[%s14237_s0 + $0x2d9] sm:$0xff] }
 0x111   :  { %1063 = vmatmul.mubr.f32.gmra.mrb[94].mxu0 %v9188_v40 }
 0x112   :  { %1067 = vmatprep.mubr.f32.mxu0 %v153_v43  ;;  %v9278_v43 = vld [vmem:[%s14237_s0 + $0x2d8] sm:$0xff] }
 0x115   :  { %1068 = vmatmul.mubr.f32.gmra.mrb[96].mxu0 %v9197_v46 }
 0x116   :  { %1072 = vmatprep.mubr.f32.mxu0 %v154_v47  ;;  %v163_v47 = vld [vmem:[%s14237_s0 + $0x2e9] sm:$0xff] }
 0x119   :  { %1073 = vmatmul.mubr.f32.gmra.mrb[98].mxu0 %v9206_v49 }
 0x11a   :  { %1077 = vmatprep.mubr.f32.mxu0 %v155_v50  ;;  %v9287_v50 = vld [vmem:[%s14237_s0 + $0x2e8] sm:$0xff] }
 0x11d   :  { %1078 = vmatmul.mubr.f32.gmra.mrb[100].mxu0 %v9215_v52 }
 0x11e   :  { %1082 = vmatprep.mubr.f32.mxu0 %v156_v56  ;;  %v164_v56 = vld [vmem:[%s14237_s0 + $0x2f1] sm:$0xff] }
 0x121   :  { %1083 = vmatmul.mubr.f32.gmra.mrb[102].mxu0 %v9224_v58 }
 0x122   :  { %1087 = vmatprep.mubr.f32.mxu0 %v157_v61  ;;  %v9296_v61 = vld [vmem:[%s14237_s0 + $0x2f0] sm:$0xff] }
 0x125   :  { %1088 = vmatmul.mubr.f32.gmra.mrb[104].mxu0 %v9233_v3 }
 0x126   :  { %1092 = vmatprep.mubr.f32.mxu0 %v158_v7  ;;  %v165_v7 = vld [vmem:[%s14237_s0 + $0x301] sm:$0xff] }
 0x129   :  { %1093 = vmatmul.mubr.f32.gmra.mrb[106].mxu0 %v9242_v11 }
 0x12a   :  { %1097 = vmatprep.mubr.f32.mxu0 %v159_v15  ;;  %v9305_v15 = vld [vmem:[%s14237_s0 + $0x300] sm:$0xff] }
 0x12b   :  { %14371 = vst [vmem:[#allocation9_spill] sm:$0xff] %v9305_v15 }
 0x12d   :  { %1098 = vmatmul.mubr.f32.gmra.mrb[108].mxu0 %v9251_v20 }
 0x12e   :  { %1102 = vmatprep.mubr.f32.mxu0 %v160_v22  ;;  %v166_v22 = vld [vmem:[%s14237_s0 + $0x309] sm:$0xff] }
 0x131   :  { %1103 = vmatmul.mubr.f32.gmra.mrb[110].mxu0 %v9260_v26 }
 0x132   :  { %1107 = vmatprep.mubr.f32.mxu0 %v161_v31  ;;  %v9314_v31 = vld [vmem:[%s14237_s0 + $0x308] sm:$0xff] }
 0x133   :  { %14372 = vst [vmem:[#allocation10_spill] sm:$0xff] %v9314_v31 }
 0x135   :  { %1108 = vmatmul.mubr.f32.gmra.mrb[112].mxu0 %v9269_v35 }
 0x136   :  { %1112 = vmatprep.mubr.f32.mxu0 %v162_v38  ;;  %v167_v38 = vld [vmem:[%s14237_s0 + $0x319] sm:$0xff] }
 0x139   :  { %1113 = vmatmul.mubr.f32.gmra.mrb[114].mxu0 %v9278_v43 }
 0x13a   :  { %1117 = vmatprep.mubr.f32.mxu0 %v163_v47  ;;  %v9323_v47 = vld [vmem:[%s14237_s0 + $0x318] sm:$0xff] }
 0x13b   :  { %14373 = vst [vmem:[#allocation11_spill] sm:$0xff] %v9323_v47 }
 0x13d   :  { %1118 = vmatmul.mubr.f32.gmra.mrb[116].mxu0 %v9287_v50 }
 0x13e   :  { %1122 = vmatprep.mubr.f32.mxu0 %v164_v56  ;;  %v168_v56 = vld [vmem:[%s14237_s0 + $0x321] sm:$0xff] }
 0x141   :  { %1123 = vmatmul.mubr.f32.gmra.mrb[118].mxu0 %v9296_v61 }
 0x142   :  { %1127 = vmatprep.mubr.f32.mxu0 %v165_v7  ;;  %v9332_v7 = vld [vmem:[%s14237_s0 + $0x320] sm:$0xff] }
 0x143   :  { %14374 = vst [vmem:[#allocation12_spill] sm:$0xff] %v9332_v7 }
 0x145   :  { %1128 = vmatmul.mubr.f32.gmra.mrb[120].mxu0 %v9305_v15  ;;  %v14375_v15 = vmov 0.0|0.0  }
 0x146   :  { %1132 = vmatprep.mubr.f32.mxu0 %v166_v22  ;;  %v683_v22 = vld [vmem:[%s14238_s1 + $0x200] sm:$0xff] }
 0x149   :  { %1133 = vmatmul.mubr.f32.gmra.mrb[122].mxu0 %v9314_v31  ;;  %v686_v31 = vld [vmem:[%s14238_s1 + $0x218] sm:$0xff] }
 0x14a   :  { %1137 = vmatprep.mubr.f32.mxu0 %v167_v38  ;;  %v684_v38 = vld [vmem:[%s14238_s1 + $0x208] sm:$0xff] }
 0x14b   :  { %v7290_v0 = vpack.c.bf16 %v684_v38, %v683_v22  ;;  %v687_v22 = vld [vmem:[%s14238_s1 + $0x220] sm:$0xff]  ;;  %v688_v38 = vld [vmem:[%s14238_s1 + $0x228] sm:$0xff] }
 0x14d   :  { %1138 = vmatmul.mubr.f32.gmra.mrb[124].mxu0 %v9323_v47  ;;  %v685_v47 = vld [vmem:[%s14238_s1 + $0x210] sm:$0xff] }
 0x14e   :  { %1142 = vmatprep.mubr.f32.mxu0 %v168_v56  ;;  %v169_v56 = vld [vmem:[%s14237_s0 + $0x2] sm:$0xff] }
 0x151   :  { %1143 = vmatmul.mubr.f32.gmra.mrb[126].mxu0 %v9332_v7  ;;  %v7293_v7 = vpack.c.bf16 %v686_v31, %v685_v47  ;;  %v689_v31 = vld [vmem:[%s14238_s1 + $0x230] sm:$0xff]  ;;  %v690_v47 = vld [vmem:[%s14238_s1 + $0x238] sm:$0xff] }
 0x152   :  { %1212 = vmatprep.mubr.f32.mxu0 %v8696_v62  ;;  %v170_v62 = vld [vmem:[%s14237_s0 + $0xa] sm:$0xff] }
 0x155   :  { %1213 = vmatmul.mubr.f32.vlgmr.msra.gmra.mrb[0].mxu0 %v169_v56  ;;  %v691_v56 = vld [vmem:[%s14238_s1 + $0x240] sm:$0xff] }
 0x156   :  { %7291 = vmatpush1.bf16.msra.mxu0 %v7290_v0  ;;  %1217 = vmatprep.mubr.f32.mxu0 %v8712_v4  ;;  %v9366_v0 = vld [vmem:[%s14237_s0 + $0x1a] sm:$0xff]  ;;  %v7296_v4 = vpack.c.bf16 %v688_v38, %v687_v22  ;;  %v693_v38 = vld [vmem:[%s14238_s1 + $0x250] sm:$0xff] }
 0x157   :  { %7292 = vmatprep.subr.bf16.mxu0 %v14375_v15 }
 0x159   :  { %1218 = vmatmul.mubr.f32.gmra.mrb[2].mxu0 %v170_v62  ;;  %v692_v62 = vld [vmem:[%s14238_s1 + $0x248] sm:$0xff] }
 0x15a   :  { %1222 = vmatprep.mubr.f32.mxu0 %v8728_v9  ;;  %7294 = vmatpush1.bf16.msra.mxu0 %v7293_v7  ;;  %v9380_v9 = vld [vmem:[%s14237_s0 + $0x22] sm:$0xff]  ;;  %v7299_v7 = vpack.c.bf16 %v690_v47, %v689_v31  ;;  %v7302_v22 = vpack.c.bf16 %v692_v62, %v691_v56  ;;  %v697_v62 = vld [vmem:[%s14238_s1 + $0x270] sm:$0xff] }
 0x15b   :  { %7295 = vmatprep.subr.bf16.mxu0 %v14375_v15  ;;  %v695_v47 = vld [vmem:[%s14238_s1 + $0x260] sm:$0xff] }
 0x15d   :  { %1223 = vmatmul.mubr.f32.gmra.mrb[4].mxu0 %v9366_v0 }
 0x15e   :  { %1227 = vmatprep.mubr.f32.mxu0 %v8744_v14  ;;  %7297 = vmatpush1.bf16.msra.mxu0 %v7296_v4  ;;  %v9394_v14 = vld [vmem:[%s14237_s0 + $0x32] sm:$0xff] }
 0x15f   :  { %7298 = vmatprep.subr.bf16.mxu0 %v14375_v15  ;;  %v694_v4 = vld [vmem:[%s14238_s1 + $0x258] sm:$0xff] }
 0x160   :  { %v7305_v31 = vpack.c.bf16 %v694_v4, %v693_v38  ;;  %v699_v4 = vld [vmem:[%s14238_s1 + $0x280] sm:$0xff] }
 0x161   :  { %1228 = vmatmul.mubr.f32.gmra.mrb[6].mxu0 %v9380_v9 }
 0x162   :  { %1232 = vmatprep.mubr.f32.mxu0 %v8760_v19  ;;  %7300 = vmatpush1.bf16.msra.mxu0 %v7299_v7  ;;  %v9408_v19 = vld [vmem:[%s14237_s0 + $0x3a] sm:$0xff]  ;;  %v696_v7 = vld [vmem:[%s14238_s1 + $0x268] sm:$0xff] }
 0x163   :  { %7301 = vmatprep.subr.bf16.mxu0 %v14375_v15  ;;  %v7308_v56 = vpack.c.bf16 %v696_v7, %v695_v47  ;;  %v701_v7 = vld [vmem:[%s14238_s1 + $0x290] sm:$0xff] }
 0x165   :  { %1233 = vmatmul.mubr.f32.gmra.mrb[8].mxu0 %v9394_v14 }
 0x166   :  { %1237 = vmatprep.mubr.f32.mxu0 %v8776_v24  ;;  %7303 = vmatpush1.bf16.msra.mxu0 %v7302_v22  ;;  %v9422_v24 = vld [vmem:[%s14237_s0 + $0x4a] sm:$0xff]  ;;  %v698_v22 = vld [vmem:[%s14238_s1 + $0x278] sm:$0xff] }
 0x167   :  { %7304 = vmatprep.subr.bf16.mxu0 %v14375_v15  ;;  %v7311_v38 = vpack.c.bf16 %v698_v22, %v697_v62  ;;  %v703_v22 = vld [vmem:[%s14238_s1 + $0x2a0] sm:$0xff] }
 0x169   :  { %1238 = vmatmul.mubr.f32.gmra.mrb[10].mxu0 %v9408_v19 }
 0x16a   :  { %1242 = vmatprep.mubr.f32.mxu0 %v8792_v29  ;;  %7306 = vmatpush1.bf16.msra.mxu0 %v7305_v31  ;;  %v9436_v29 = vld [vmem:[%s14237_s0 + $0x52] sm:$0xff]  ;;  %v700_v31 = vld [vmem:[%s14238_s1 + $0x288] sm:$0xff] }
 0x16b   :  { %7307 = vmatprep.subr.bf16.mxu0 %v14375_v15  ;;  %v7314_v47 = vpack.c.bf16 %v700_v31, %v699_v4  ;;  %v9486_v31 = vld [vmem:[%s14237_s0 + $0x82] sm:$0xff] }
 0x16d   :  { %1243 = vmatmul.mubr.f32.gmra.mrb[12].mxu0 %v9422_v24 }
 0x16e   :  { %1247 = vmatprep.mubr.f32.mxu0 %v8808_v34  ;;  %7309 = vmatpush1.bf16.msra.mxu0 %v7308_v56  ;;  %v9450_v34 = vld [vmem:[%s14237_s0 + $0x62] sm:$0xff]  ;;  %v702_v56 = vld [vmem:[%s14238_s1 + $0x298] sm:$0xff] }
 0x16f   :  { %7310 = vmatprep.subr.bf16.mxu0 %v14375_v15  ;;  %v7317_v62 = vpack.c.bf16 %v702_v56, %v701_v7  ;;  %v9515_v56 = vld [vmem:[%s14237_s0 + $0xaa] sm:$0xff] }
 0x171   :  { %1248 = vmatmul.mubr.f32.gmra.mrb[14].mxu0 %v9436_v29 }
 0x172   :  { %1252 = vmatprep.mubr.f32.mxu0 %v8824_v39  ;;  %7312 = vmatpush1.bf16.msra.mxu0 %v7311_v38  ;;  %v9464_v39 = vld [vmem:[%s14237_s0 + $0x6a] sm:$0xff] }
 0x173   :  { %7313 = vmatprep.subr.bf16.mxu0 %v14375_v15  ;;  %v704_v38 = vld [vmem:[%s14238_s1 + $0x2a8] sm:$0xff] }
 0x174   :  { %v7320_v4 = vpack.c.bf16 %v704_v38, %v703_v22  ;;  %v9550_v38 = vld [vmem:[%s14237_s0 + $0xda] sm:$0xff] }
 0x175   :  { %1253 = vmatmul.mubr.f32.gmra.mrb[16].mxu0 %v9450_v34 }
 0x176   :  { %1257 = vmatprep.mubr.f32.mxu0 %v8834_v42  ;;  %7315 = vmatpush1.bf16.msra.mxu0 %v7314_v47  ;;  %v9478_v42 = vld [vmem:[%s14237_s0 + $0x7a] sm:$0xff] }
 0x177   :  { %7316 = vmatprep.subr.bf16.mxu0 %v14375_v15  ;;  %v706_v47 = vld [vmem:[%s14238_s1 + $0x2b8] sm:$0xff] }
 0x179   :  { %1258 = vmatmul.mubr.f32.gmra.mrb[18].mxu0 %v9464_v39 }
 0x17a   :  { %1262 = vmatprep.mubr.f32.mxu0 %v8844_v44  ;;  %7318 = vmatpush1.bf16.msra.mxu0 %v7317_v62  ;;  %v9494_v44 = vld [vmem:[%s14237_s0 + $0x92] sm:$0xff]  ;;  %v708_v62 = vld [vmem:[%s14238_s1 + $0x2c8] sm:$0xff] }
 0x17b   :  { %7319 = vmatprep.subr.bf16.mxu0 %v14375_v15 }
 0x17d   :  { %1263 = vmatmul.mubr.f32.gmra.mrb[20].mxu0 %v9478_v42 }
 0x17e   :  { %1267 = vmatprep.mubr.f32.mxu0 %v8859_v48  ;;  %7321 = vmatpush1.bf16.msra.mxu0 %v7320_v4  ;;  %v705_v48 = vld [vmem:[%s14238_s1 + $0x2b0] sm:$0xff]  ;;  %v710_v4 = vld [vmem:[%s14238_s1 + $0x2d8] sm:$0xff] }
 0x17f   :  { %7322 = vmatprep.subr.bf16.mxu0 %v14375_v15  ;;  %v7323_v7 = vpack.c.bf16 %v706_v47, %v705_v48  ;;  %v9585_v47 = vld [vmem:[%s14237_s0 + $0x10a] sm:$0xff] }
 0x181   :  { %1268 = vmatmul.mubr.f32.gmra.mrb[22].mxu0 %v9486_v31 }
 0x182   :  { %1272 = vmatprep.mubr.f32.mxu0 %v8869_v51  ;;  %v9507_v51 = vld [vmem:[%s14237_s0 + $0x9a] sm:$0xff]  ;;  %7324 = vmatpush1.bf16.msra.mxu0 %v7323_v7  ;;  %v712_v7 = vld [vmem:[%s14238_s1 + $0x2e8] sm:$0xff] }
 0x183   :  { %7325 = vmatprep.subr.bf16.mxu0 %v14375_v15 }
 0x185   :  { %1273 = vmatmul.mubr.f32.gmra.mrb[24].mxu0 %v9494_v44 }
 0x186   :  { %1277 = vmatprep.mubr.f32.mxu0 %v8878_v53  ;;  %v9522_v53 = vld [vmem:[%s14237_s0 + $0xb2] sm:$0xff] }
 0x189   :  { %1278 = vmatmul.mubr.f32.gmra.mrb[26].mxu0 %v9507_v51 }
 0x18a   :  { %1282 = vmatprep.mubr.f32.mxu0 %v8887_v55  ;;  %v9529_v55 = vld [vmem:[%s14237_s0 + $0xc2] sm:$0xff] }
 0x18d   :  { %1283 = vmatmul.mubr.f32.gmra.mrb[28].mxu0 %v9515_v56 }
 0x18e   :  { %1287 = vmatprep.mubr.f32.mxu0 %v8902_v59  ;;  %v707_v59 = vld [vmem:[%s14238_s1 + $0x2c0] sm:$0xff] }
 0x18f   :  { %v7326_v22 = vpack.c.bf16 %v708_v62, %v707_v59  ;;  %v9620_v62 = vld [vmem:[%s14237_s0 + $0x13a] sm:$0xff] }
 0x191   :  { %1288 = vmatmul.mubr.f32.gmra.mrb[30].mxu0 %v9522_v53 }
 0x192   :  { %1292 = vmatprep.mubr.f32.mxu0 %v8912_v63  ;;  %v9542_v63 = vld [vmem:[%s14237_s0 + $0xca] sm:$0xff]  ;;  %7327 = vmatpush1.bf16.msra.mxu0 %v7326_v22  ;;  %v714_v22 = vld [vmem:[%s14238_s1 + $0x2f8] sm:$0xff] }
 0x193   :  { %7328 = vmatprep.subr.bf16.mxu0 %v14375_v15 }
 0x195   :  { %1293 = vmatmul.mubr.f32.gmra.mrb[32].mxu0 %v9529_v55 }
 0x196   :  { %1297 = vmatprep.mubr.f32.mxu0 %v8921_v2  ;;  %v9557_v2 = vld [vmem:[%s14237_s0 + $0xe2] sm:$0xff] }
 0x199   :  { %1298 = vmatmul.mubr.f32.gmra.mrb[34].mxu0 %v9542_v63 }
 0x19a   :  { %1302 = vmatprep.mubr.f32.mxu0 %v8930_v5  ;;  %v9564_v5 = vld [vmem:[%s14237_s0 + $0xf2] sm:$0xff] }
 0x19d   :  { %1303 = vmatmul.mubr.f32.gmra.mrb[36].mxu0 %v9550_v38 }
 0x19e   :  { %1307 = vmatprep.mubr.f32.mxu0 %v8945_v10  ;;  %v709_v10 = vld [vmem:[%s14238_s1 + $0x2d0] sm:$0xff] }
 0x19f   :  { %v7329_v48 = vpack.c.bf16 %v710_v4, %v709_v10  ;;  %v6423_v4 = vld [vmem:[%s14237_s0 + $0x180] sm:$0xff] }
 0x1a1   :  { %1308 = vmatmul.mubr.f32.gmra.mrb[38].mxu0 %v9557_v2 }
 0x1a2   :  { %1312 = vmatprep.mubr.f32.mxu0 %v8955_v13  ;;  %v9577_v13 = vld [vmem:[%s14237_s0 + $0xfa] sm:$0xff]  ;;  %7330 = vmatpush1.bf16.msra.mxu0 %v7329_v48  ;;  %v6424_v48 = vld [vmem:[%s14237_s0 + $0x188] sm:$0xff] }
 0x1a3   :  { %7331 = vmatprep.subr.bf16.mxu0 %v14375_v15 }
 0x1a5   :  { %1313 = vmatmul.mubr.f32.gmra.mrb[40].mxu0 %v9564_v5 }
 0x1a6   :  { %1317 = vmatprep.mubr.f32.mxu0 %v8964_v16  ;;  %v9592_v16 = vld [vmem:[%s14237_s0 + $0x112] sm:$0xff] }
 0x1a9   :  { %1318 = vmatmul.mubr.f32.gmra.mrb[42].mxu0 %v9577_v13 }
 0x1aa   :  { %1322 = vmatprep.mubr.f32.mxu0 %v8973_v18  ;;  %v9599_v18 = vld [vmem:[%s14237_s0 + $0x122] sm:$0xff] }
 0x1ad   :  { %1323 = vmatmul.mubr.f32.gmra.mrb[44].mxu0 %v9585_v47 }
 0x1ae   :  { %1327 = vmatprep.mubr.f32.mxu0 %v8988_v23  ;;  %v711_v23 = vld [vmem:[%s14238_s1 + $0x2e0] sm:$0xff] }
 0x1af   :  { %v7332_v59 = vpack.c.bf16 %v712_v7, %v711_v23  ;;  %v9666_v23 = vld [vmem:[%s14237_s0 + $0x172] sm:$0xff] }
 0x1b0   :  { %v201_v7 = vld [vmem:[%s14237_s0 + $0x1b2] sm:$0xff] }
 0x1b1   :  { %1328 = vmatmul.mubr.f32.gmra.mrb[46].mxu0 %v9592_v16 }
 0x1b2   :  { %1332 = vmatprep.mubr.f32.mxu0 %v8998_v27  ;;  %v9612_v27 = vld [vmem:[%s14237_s0 + $0x12a] sm:$0xff]  ;;  %7333 = vmatpush1.bf16.msra.mxu0 %v7332_v59  ;;  %v202_v59 = vld [vmem:[%s14237_s0 + $0x1ba] sm:$0xff] }
 0x1b3   :  { %7334 = vmatprep.subr.bf16.mxu0 %v14375_v15 }
 0x1b5   :  { %1333 = vmatmul.mubr.f32.gmra.mrb[48].mxu0 %v9599_v18 }
 0x1b6   :  { %1337 = vmatprep.mubr.f32.mxu0 %v9007_v30  ;;  %v9627_v30 = vld [vmem:[%s14237_s0 + $0x142] sm:$0xff] }
 0x1b9   :  { %1338 = vmatmul.mubr.f32.gmra.mrb[50].mxu0 %v9612_v27 }
 0x1ba   :  { %1342 = vmatprep.mubr.f32.mxu0 %v9016_v32  ;;  %v9634_v32 = vld [vmem:[%s14237_s0 + $0x152] sm:$0xff] }
 0x1bd   :  { %1343 = vmatmul.mubr.f32.gmra.mrb[52].mxu0 %v9620_v62 }
 0x1be   :  { %1347 = vmatprep.mubr.f32.mxu0 %v9031_v37  ;;  %v713_v37 = vld [vmem:[%s14238_s1 + $0x2f0] sm:$0xff] }
 0x1bf   :  { %v7335_v10 = vpack.c.bf16 %v714_v22, %v713_v37  ;;  %v9681_v37 = vld [vmem:[%s14237_s0 + $0x1ca] sm:$0xff] }
 0x1c0   :  { %v14377_v22 = vld [vmem:[#allocation10_spill] sm:$0xff] }
 0x1c1   :  { %1348 = vmatmul.mubr.f32.gmra.mrb[54].mxu0 %v9627_v30 }
 0x1c2   :  { %1352 = vmatprep.mubr.f32.mxu0 %v9041_v41  ;;  %v9647_v41 = vld [vmem:[%s14237_s0 + $0x15a] sm:$0xff]  ;;  %7336 = vmatpush1.bf16.msra.mxu0 %v7335_v10  ;;  %v14378_v10 = vld [vmem:[#allocation11_spill] sm:$0xff] }
 0x1c3   :  { %7337 = vmatprep.subr.bf16.mxu0 %v14375_v15 }
 0x1c5   :  { %1353 = vmatmul.mubr.f32.gmra.mrb[56].mxu0 %v9634_v32 }
 0x1c6   :  { %1357 = vmatprep.mubr.f32.mxu0 %v9050_v45  ;;  %v9657_v45 = vld [vmem:[%s14237_s0 + $0x16a] sm:$0xff] }
 0x1c9   :  { %1358 = vmatmul.mubr.f32.gmra.mrb[58].mxu0 %v9647_v41 }
 0x1ca   :  { %1362 = vmatprep.mubr.f32.mxu0 %v6423_v4  ;;  %v9863_v4 = vld [vmem:[%s14237_s0 + $0x302] sm:$0xff] }
 0x1cd   :  { %1363 = vmatmul.mubr.f32.gmra.mrb[60].mxu0 %v9657_v45 }
 0x1ce   :  { %1367 = vmatprep.mubr.f32.mxu0 %v6424_v48  ;;  %v14380_v48 = vld [vmem:[#allocation12_spill] sm:$0xff] }
 0x1d1   :  { %1368 = vmatmul.mubr.f32.gmra.mrb[62].mxu0 %v9666_v23 }
 0x1d2   :  { %1372 = vmatprep.mubr.f32.mxu0 %v9071_v54  ;;  %v9688_v54 = vld [vmem:[%s14237_s0 + $0x1d2] sm:$0xff] }
 0x1d5   :  { %1373 = vmatmul.mubr.f32.gmra.mrb[64].mxu0 %v201_v7  ;;  %v9870_v7 = vld [vmem:[%s14237_s0 + $0x30a] sm:$0xff] }
 0x1d6   :  { %1377 = vmatprep.mubr.f32.mxu0 %v9080_v57  ;;  %v9695_v57 = vld [vmem:[%s14237_s0 + $0x1e2] sm:$0xff]  ;;  %14381 = vst [vmem:[#allocation10_spill] sm:$0xff] %v9870_v7 }
 0x1d9   :  { %1378 = vmatmul.mubr.f32.gmra.mrb[66].mxu0 %v202_v59  ;;  %v6455_v59 = vld [vmem:[%s14237_s0 + $0x330] sm:$0xff] }
 0x1da   :  { %1382 = vmatprep.mubr.f32.mxu0 %v9089_v60  ;;  %v9702_v60 = vld [vmem:[%s14237_s0 + $0x1ea] sm:$0xff] }
 0x1dd   :  { %1383 = vmatmul.mubr.f32.gmra.mrb[68].mxu0 %v9681_v37 }
 0x1de   :  { %1387 = vmatprep.mubr.f32.mxu0 %v9098_v1  ;;  %v9709_v1 = vld [vmem:[%s14237_s0 + $0x1fa] sm:$0xff] }
 0x1e1   :  { %1388 = vmatmul.mubr.f32.gmra.mrb[70].mxu0 %v9688_v54 }
 0x1e2   :  { %1392 = vmatprep.mubr.f32.mxu0 %v9107_v6  ;;  %v9716_v6 = vld [vmem:[%s14237_s0 + $0x202] sm:$0xff] }
 0x1e5   :  { %1393 = vmatmul.mubr.f32.gmra.mrb[72].mxu0 %v9695_v57 }
 0x1e6   :  { %1397 = vmatprep.mubr.f32.mxu0 %v9116_v8  ;;  %v9723_v8 = vld [vmem:[%s14237_s0 + $0x212] sm:$0xff] }
 0x1e9   :  { %1398 = vmatmul.mubr.f32.gmra.mrb[74].mxu0 %v9702_v60 }
 0x1ea   :  { %1402 = vmatprep.mubr.f32.mxu0 %v9125_v12  ;;  %v9730_v12 = vld [vmem:[%s14237_s0 + $0x21a] sm:$0xff] }
 0x1ed   :  { %1403 = vmatmul.mubr.f32.gmra.mrb[76].mxu0 %v9709_v1 }
 0x1ee   :  { %1407 = vmatprep.mubr.f32.mxu0 %v9134_v17  ;;  %v9737_v17 = vld [vmem:[%s14237_s0 + $0x22a] sm:$0xff] }
 0x1f1   :  { %1408 = vmatmul.mubr.f32.gmra.mrb[78].mxu0 %v9716_v6 }
 0x1f2   :  { %1412 = vmatprep.mubr.f32.mxu0 %v9143_v21  ;;  %v9744_v21 = vld [vmem:[%s14237_s0 + $0x232] sm:$0xff] }
 0x1f5   :  { %1413 = vmatmul.mubr.f32.gmra.mrb[80].mxu0 %v9723_v8 }
 0x1f6   :  { %1417 = vmatprep.mubr.f32.mxu0 %v9152_v25  ;;  %v9751_v25 = vld [vmem:[%s14237_s0 + $0x242] sm:$0xff] }
 0x1f9   :  { %1418 = vmatmul.mubr.f32.gmra.mrb[82].mxu0 %v9730_v12 }
 0x1fa   :  { %1422 = vmatprep.mubr.f32.mxu0 %v9161_v28  ;;  %v9758_v28 = vld [vmem:[%s14237_s0 + $0x24a] sm:$0xff] }
 0x1fd   :  { %1423 = vmatmul.mubr.f32.gmra.mrb[84].mxu0 %v9737_v17 }
 0x1fe   :  { %1427 = vmatprep.mubr.f32.mxu0 %v9170_v33  ;;  %v9765_v33 = vld [vmem:[%s14237_s0 + $0x25a] sm:$0xff] }
 0x201   :  { %1428 = vmatmul.mubr.f32.gmra.mrb[86].mxu0 %v9744_v21 }
 0x202   :  { %1432 = vmatprep.mubr.f32.mxu0 %v9179_v36  ;;  %v9772_v36 = vld [vmem:[%s14237_s0 + $0x262] sm:$0xff] }
 0x205   :  { %1433 = vmatmul.mubr.f32.gmra.mrb[88].mxu0 %v9751_v25 }
 0x206   :  { %1437 = vmatprep.mubr.f32.mxu0 %v9188_v40  ;;  %v9779_v40 = vld [vmem:[%s14237_s0 + $0x272] sm:$0xff] }
 0x209   :  { %1438 = vmatmul.mubr.f32.gmra.mrb[90].mxu0 %v9758_v28 }
 0x20a   :  { %1442 = vmatprep.mubr.f32.mxu0 %v9197_v46  ;;  %v9786_v46 = vld [vmem:[%s14237_s0 + $0x27a] sm:$0xff] }
 0x20d   :  { %1443 = vmatmul.mubr.f32.gmra.mrb[92].mxu0 %v9765_v33 }
 0x20e   :  { %1447 = vmatprep.mubr.f32.mxu0 %v9206_v49  ;;  %v9793_v49 = vld [vmem:[%s14237_s0 + $0x28a] sm:$0xff] }
 0x211   :  { %1448 = vmatmul.mubr.f32.gmra.mrb[94].mxu0 %v9772_v36 }
 0x212   :  { %1452 = vmatprep.mubr.f32.mxu0 %v9215_v52  ;;  %v9800_v52 = vld [vmem:[%s14237_s0 + $0x292] sm:$0xff] }
 0x215   :  { %1453 = vmatmul.mubr.f32.gmra.mrb[96].mxu0 %v9779_v40 }
 0x216   :  { %1457 = vmatprep.mubr.f32.mxu0 %v9224_v58  ;;  %v9807_v58 = vld [vmem:[%s14237_s0 + $0x2a2] sm:$0xff] }
 0x219   :  { %1458 = vmatmul.mubr.f32.gmra.mrb[98].mxu0 %v9786_v46 }
 0x21a   :  { %1462 = vmatprep.mubr.f32.mxu0 %v9233_v3  ;;  %v9814_v3 = vld [vmem:[%s14237_s0 + $0x2aa] sm:$0xff] }
 0x21d   :  { %1463 = vmatmul.mubr.f32.gmra.mrb[100].mxu0 %v9793_v49 }
 0x21e   :  { %1467 = vmatprep.mubr.f32.mxu0 %v9242_v11  ;;  %v9821_v11 = vld [vmem:[%s14237_s0 + $0x2ba] sm:$0xff] }
 0x221   :  { %1468 = vmatmul.mubr.f32.gmra.mrb[102].mxu0 %v9800_v52 }
 0x222   :  { %1472 = vmatprep.mubr.f32.mxu0 %v9251_v20  ;;  %v9828_v20 = vld [vmem:[%s14237_s0 + $0x2c2] sm:$0xff] }
 0x225   :  { %1473 = vmatmul.mubr.f32.gmra.mrb[104].mxu0 %v9807_v58 }
 0x226   :  { %1477 = vmatprep.mubr.f32.mxu0 %v9260_v26  ;;  %v9835_v26 = vld [vmem:[%s14237_s0 + $0x2d2] sm:$0xff] }
 0x229   :  { %1478 = vmatmul.mubr.f32.gmra.mrb[106].mxu0 %v9814_v3 }
 0x22a   :  { %1482 = vmatprep.mubr.f32.mxu0 %v9269_v35  ;;  %v9842_v35 = vld [vmem:[%s14237_s0 + $0x2da] sm:$0xff] }
 0x22d   :  { %1483 = vmatmul.mubr.f32.gmra.mrb[108].mxu0 %v9821_v11 }
 0x22e   :  { %1487 = vmatprep.mubr.f32.mxu0 %v9278_v43  ;;  %v14376_v43 = vld [vmem:[#allocation9_spill] sm:$0xff] }
 0x22f   :  { %14379 = vst [vmem:[#allocation9_spill] sm:$0xff] %v9863_v4 }
 0x231   :  { %1488 = vmatmul.mubr.f32.gmra.mrb[110].mxu0 %v9828_v20 }
 0x232   :  { %1492 = vmatprep.mubr.f32.mxu0 %v9287_v50  ;;  %v9849_v50 = vld [vmem:[%s14237_s0 + $0x2ea] sm:$0xff] }
 0x235   :  { %1493 = vmatmul.mubr.f32.gmra.mrb[112].mxu0 %v9835_v26 }
 0x236   :  { %1497 = vmatprep.mubr.f32.mxu0 %v9296_v61  ;;  %v9856_v61 = vld [vmem:[%s14237_s0 + $0x2f2] sm:$0xff] }
 0x239   :  { %1498 = vmatmul.mubr.f32.gmra.mrb[114].mxu0 %v9842_v35 }
 0x23a   :  { %1502 = vmatprep.mubr.f32.mxu0 %v14376_v43  ;;  %v9879_v43 = vld [vmem:[%s14237_s0 + $0x31a] sm:$0xff] }
 0x23b   :  { %14382 = vst [vmem:[#allocation11_spill] sm:$0xff] %v9879_v43 }
 0x23d   :  { %1503 = vmatmul.mubr.f32.gmra.mrb[116].mxu0 %v9849_v50 }
 0x23e   :  { %1507 = vmatprep.mubr.f32.mxu0 %v14377_v22  ;;  %v6456_v22 = vld [vmem:[%s14237_s0 + $0x338] sm:$0xff] }
 0x241   :  { %1508 = vmatmul.mubr.f32.gmra.mrb[118].mxu0 %v9856_v61 }
 0x242   :  { %1512 = vmatprep.mubr.f32.mxu0 %v14378_v10  ;;  %v9888_v10 = vld [vmem:[%s14237_s0 + $0x322] sm:$0xff] }
 0x243   :  { %14383 = vst [vmem:[#allocation12_spill] sm:$0xff] %v9888_v10 }
 0x245   :  { %1513 = vmatmul.mubr.f32.gmra.mrb[120].mxu0 %v9863_v4  ;;  %v718_v4 = vld [vmem:[%s14238_s1 + $0x318] sm:$0xff] }
 0x246   :  { %1517 = vmatprep.mubr.f32.mxu0 %v14380_v48  ;;  %v715_v48 = vld [vmem:[%s14238_s1 + $0x300] sm:$0xff] }
 0x249   :  { %1518 = vmatmul.mubr.f32.gmra.mrb[122].mxu0 %v9870_v7  ;;  %v717_v7 = vld [vmem:[%s14238_s1 + $0x310] sm:$0xff] }
 0x24a   :  { %1522 = vmatprep.mubr.f32.mxu0 %v6455_v59  ;;  %v716_v59 = vld [vmem:[%s14238_s1 + $0x308] sm:$0xff] }
 0x24d   :  { %1523 = vmatmul.mubr.f32.gmra.mrb[124].mxu0 %v9879_v43  ;;  %v7338_v43 = vpack.c.bf16 %v716_v59, %v715_v48  ;;  %v719_v48 = vld [vmem:[%s14238_s1 + $0x320] sm:$0xff]  ;;  %v720_v59 = vld [vmem:[%s14238_s1 + $0x328] sm:$0xff] }
 0x24e   :  { %1527 = vmatprep.mubr.f32.mxu0 %v6456_v22  ;;  %v6457_v22 = vld [vmem:[%s14237_s0 + $0x19] sm:$0xff] }
 0x251   :  { %1528 = vmatmul.mubr.f32.gmra.mrb[126].mxu0 %v9888_v10  ;;  %v7341_v10 = vpack.c.bf16 %v718_v4, %v717_v7  ;;  %v7344_v4 = vpack.c.bf16 %v720_v59, %v719_v48  ;;  %v721_v7 = vld [vmem:[%s14238_s1 + $0x330] sm:$0xff] }
 0x252   :  { %1597 = vmatprep.mubr.f32.mxu0 %v9366_v0  ;;  %v6458_v0 = vld [vmem:[%s14237_s0 + $0x21] sm:$0xff]  ;;  %v725_v59 = vld [vmem:[%s14238_s1 + $0x350] sm:$0xff] }
 0x255   :  { %1598 = vmatmul.mubr.f32.vlgmr.msra.gmra.mrb[0].mxu0 %v6457_v22  ;;  %v723_v22 = vld [vmem:[%s14238_s1 + $0x340] sm:$0xff] }
 0x256   :  { %7339 = vmatpush1.bf16.msra.mxu0 %v7338_v43  ;;  %1602 = vmatprep.mubr.f32.mxu0 %v9380_v9  ;;  %v9922_v9 = vld [vmem:[%s14237_s0 + $0x31] sm:$0xff] }
 0x257   :  { %7340 = vmatprep.subr.bf16.mxu0 %v14375_v15  ;;  %v722_v43 = vld [vmem:[%s14238_s1 + $0x338] sm:$0xff] }
 0x259   :  { %1603 = vmatmul.mubr.f32.gmra.mrb[2].mxu0 %v6458_v0  ;;  %v724_v0 = vld [vmem:[%s14238_s1 + $0x348] sm:$0xff] }
 0x25a   :  { %1607 = vmatprep.mubr.f32.mxu0 %v9394_v14  ;;  %7342 = vmatpush1.bf16.msra.mxu0 %v7341_v10  ;;  %v9936_v14 = vld [vmem:[%s14237_s0 + $0x39] sm:$0xff]  ;;  %v7347_v10 = vpack.c.bf16 %v722_v43, %v721_v7  ;;  %v7350_v48 = vpack.c.bf16 %v724_v0, %v723_v22  ;;  %v729_v0 = vld [vmem:[%s14238_s1 + $0x370] sm:$0xff] }
 0x25b   :  { %7343 = vmatprep.subr.bf16.mxu0 %v14375_v15  ;;  %v727_v43 = vld [vmem:[%s14238_s1 + $0x360] sm:$0xff] }
 0x25d   :  { %1608 = vmatmul.mubr.f32.gmra.mrb[4].mxu0 %v9922_v9 }
 0x25e   :  { %1612 = vmatprep.mubr.f32.mxu0 %v9408_v19  ;;  %7345 = vmatpush1.bf16.msra.mxu0 %v7344_v4  ;;  %v9950_v19 = vld [vmem:[%s14237_s0 + $0x49] sm:$0xff]  ;;  %v726_v4 = vld [vmem:[%s14238_s1 + $0x358] sm:$0xff] }
 0x25f   :  { %7346 = vmatprep.subr.bf16.mxu0 %v14375_v15  ;;  %v7353_v7 = vpack.c.bf16 %v726_v4, %v725_v59  ;;  %v731_v4 = vld [vmem:[%s14238_s1 + $0x380] sm:$0xff] }
 0x261   :  { %1613 = vmatmul.mubr.f32.gmra.mrb[6].mxu0 %v9936_v14 }
 0x262   :  { %1617 = vmatprep.mubr.f32.mxu0 %v9422_v24  ;;  %7348 = vmatpush1.bf16.msra.mxu0 %v7347_v10  ;;  %v9964_v24 = vld [vmem:[%s14237_s0 + $0x51] sm:$0xff]  ;;  %v728_v10 = vld [vmem:[%s14238_s1 + $0x368] sm:$0xff] }
 0x263   :  { %7349 = vmatprep.subr.bf16.mxu0 %v14375_v15  ;;  %v7356_v22 = vpack.c.bf16 %v728_v10, %v727_v43  ;;  %v733_v10 = vld [vmem:[%s14238_s1 + $0x390] sm:$0xff] }
 0x265   :  { %1618 = vmatmul.mubr.f32.gmra.mrb[8].mxu0 %v9950_v19 }
 0x266   :  { %1622 = vmatprep.mubr.f32.mxu0 %v9436_v29  ;;  %7351 = vmatpush1.bf16.msra.mxu0 %v7350_v48  ;;  %v9978_v29 = vld [vmem:[%s14237_s0 + $0x61] sm:$0xff]  ;;  %v730_v48 = vld [vmem:[%s14238_s1 + $0x378] sm:$0xff] }
 0x267   :  { %7352 = vmatprep.subr.bf16.mxu0 %v14375_v15  ;;  %v7359_v59 = vpack.c.bf16 %v730_v48, %v729_v0  ;;  %v735_v48 = vld [vmem:[%s14238_s1 + $0x3a0] sm:$0xff] }
 0x269   :  { %1623 = vmatmul.mubr.f32.gmra.mrb[10].mxu0 %v9964_v24 }
 0x26a   :  { %1627 = vmatprep.mubr.f32.mxu0 %v9450_v34  ;;  %7354 = vmatpush1.bf16.msra.mxu0 %v7353_v7  ;;  %v9992_v34 = vld [vmem:[%s14237_s0 + $0x69] sm:$0xff] }
 0x26b   :  { %7355 = vmatprep.subr.bf16.mxu0 %v14375_v15  ;;  %v732_v7 = vld [vmem:[%s14238_s1 + $0x388] sm:$0xff] }
 0x26c   :  { %v7362_v43 = vpack.c.bf16 %v732_v7, %v731_v4  ;;  %v10042_v7 = vld [vmem:[%s14237_s0 + $0x99] sm:$0xff] }
 0x26d   :  { %1628 = vmatmul.mubr.f32.gmra.mrb[12].mxu0 %v9978_v29 }
 0x26e   :  { %1632 = vmatprep.mubr.f32.mxu0 %v9464_v39  ;;  %7357 = vmatpush1.bf16.msra.mxu0 %v7356_v22  ;;  %v10006_v39 = vld [vmem:[%s14237_s0 + $0x79] sm:$0xff] }
 0x26f   :  { %7358 = vmatprep.subr.bf16.mxu0 %v14375_v15  ;;  %v734_v22 = vld [vmem:[%s14238_s1 + $0x398] sm:$0xff] }
 0x270   :  { %v7365_v0 = vpack.c.bf16 %v734_v22, %v733_v10  ;;  %v10071_v22 = vld [vmem:[%s14237_s0 + $0xc1] sm:$0xff] }
 0x271   :  { %1633 = vmatmul.mubr.f32.gmra.mrb[14].mxu0 %v9992_v34 }
 0x272   :  { %1637 = vmatprep.mubr.f32.mxu0 %v9478_v42  ;;  %7360 = vmatpush1.bf16.msra.mxu0 %v7359_v59  ;;  %v10020_v42 = vld [vmem:[%s14237_s0 + $0x81] sm:$0xff] }
 0x273   :  { %7361 = vmatprep.subr.bf16.mxu0 %v14375_v15  ;;  %v736_v59 = vld [vmem:[%s14238_s1 + $0x3a8] sm:$0xff] }
 0x274   :  { %v7368_v4 = vpack.c.bf16 %v736_v59, %v735_v48  ;;  %v10106_v59 = vld [vmem:[%s14237_s0 + $0xf1] sm:$0xff] }
 0x275   :  { %1638 = vmatmul.mubr.f32.gmra.mrb[16].mxu0 %v10006_v39 }
 0x276   :  { %1642 = vmatprep.mubr.f32.mxu0 %v9486_v31  ;;  %7363 = vmatpush1.bf16.msra.mxu0 %v7362_v43  ;;  %v10034_v31 = vld [vmem:[%s14237_s0 + $0x91] sm:$0xff] }
 0x277   :  { %7364 = vmatprep.subr.bf16.mxu0 %v14375_v15  ;;  %v738_v43 = vld [vmem:[%s14238_s1 + $0x3b8] sm:$0xff] }
 0x279   :  { %1643 = vmatmul.mubr.f32.gmra.mrb[18].mxu0 %v10020_v42 }
 0x27a   :  { %1647 = vmatprep.mubr.f32.mxu0 %v9494_v44  ;;  %7366 = vmatpush1.bf16.msra.mxu0 %v7365_v0  ;;  %v10050_v44 = vld [vmem:[%s14237_s0 + $0xa9] sm:$0xff] }
 0x27b   :  { %7367 = vmatprep.subr.bf16.mxu0 %v14375_v15  ;;  %v740_v0 = vld [vmem:[%s14238_s1 + $0x3c8] sm:$0xff] }
 0x27d   :  { %1648 = vmatmul.mubr.f32.gmra.mrb[20].mxu0 %v10034_v31 }
 0x27e   :  { %1652 = vmatprep.mubr.f32.mxu0 %v9507_v51  ;;  %7369 = vmatpush1.bf16.msra.mxu0 %v7368_v4  ;;  %v737_v51 = vld [vmem:[%s14238_s1 + $0x3b0] sm:$0xff]  ;;  %v742_v4 = vld [vmem:[%s14238_s1 + $0x3d8] sm:$0xff] }
 0x27f   :  { %7370 = vmatprep.subr.bf16.mxu0 %v14375_v15  ;;  %v7371_v10 = vpack.c.bf16 %v738_v43, %v737_v51  ;;  %v10141_v43 = vld [vmem:[%s14237_s0 + $0x121] sm:$0xff] }
 0x281   :  { %1653 = vmatmul.mubr.f32.gmra.mrb[22].mxu0 %v10042_v7 }
 0x282   :  { %1657 = vmatprep.mubr.f32.mxu0 %v9515_v56  ;;  %v10063_v56 = vld [vmem:[%s14237_s0 + $0xb1] sm:$0xff]  ;;  %7372 = vmatpush1.bf16.msra.mxu0 %v7371_v10  ;;  %v748_v10 = vld [vmem:[%s14238_s1 + $0x408] sm:$0xff] }
 0x283   :  { %7373 = vmatprep.subr.bf16.mxu0 %v14375_v15 }
 0x285   :  { %1658 = vmatmul.mubr.f32.gmra.mrb[24].mxu0 %v10050_v44 }
 0x286   :  { %1662 = vmatprep.mubr.f32.mxu0 %v9522_v53  ;;  %v10078_v53 = vld [vmem:[%s14237_s0 + $0xc9] sm:$0xff] }
 0x289   :  { %1663 = vmatmul.mubr.f32.gmra.mrb[26].mxu0 %v10063_v56 }
 0x28a   :  { %1667 = vmatprep.mubr.f32.mxu0 %v9529_v55  ;;  %v10085_v55 = vld [vmem:[%s14237_s0 + $0xd9] sm:$0xff] }
 0x28d   :  { %1668 = vmatmul.mubr.f32.gmra.mrb[28].mxu0 %v10071_v22 }
 0x28e   :  { %1672 = vmatprep.mubr.f32.mxu0 %v9542_v63  ;;  %v739_v63 = vld [vmem:[%s14238_s1 + $0x3c0] sm:$0xff] }
 0x28f   :  { %v7374_v48 = vpack.c.bf16 %v740_v0, %v739_v63  ;;  %v743_v0 = vld [vmem:[%s14238_s1 + $0x3e0] sm:$0xff] }
 0x291   :  { %1673 = vmatmul.mubr.f32.gmra.mrb[30].mxu0 %v10078_v53 }
 0x292   :  { %1677 = vmatprep.mubr.f32.mxu0 %v9550_v38  ;;  %v10098_v38 = vld [vmem:[%s14237_s0 + $0xe1] sm:$0xff]  ;;  %7375 = vmatpush1.bf16.msra.mxu0 %v7374_v48 }
 0x293   :  { %7376 = vmatprep.subr.bf16.mxu0 %v14375_v15  ;;  %v744_v48 = vld [vmem:[%s14238_s1 + $0x3e8] sm:$0xff] }
 0x295   :  { %1678 = vmatmul.mubr.f32.gmra.mrb[32].mxu0 %v10085_v55 }
 0x296   :  { %1682 = vmatprep.mubr.f32.mxu0 %v9557_v2  ;;  %v10113_v2 = vld [vmem:[%s14237_s0 + $0xf9] sm:$0xff] }
 0x299   :  { %1683 = vmatmul.mubr.f32.gmra.mrb[34].mxu0 %v10098_v38 }
 0x29a   :  { %1687 = vmatprep.mubr.f32.mxu0 %v9564_v5  ;;  %v10120_v5 = vld [vmem:[%s14237_s0 + $0x109] sm:$0xff] }
 0x29d   :  { %1688 = vmatmul.mubr.f32.gmra.mrb[36].mxu0 %v10106_v59 }
 0x29e   :  { %1692 = vmatprep.mubr.f32.mxu0 %v9577_v13  ;;  %v741_v13 = vld [vmem:[%s14238_s1 + $0x3d0] sm:$0xff] }
 0x29f   :  { %v7377_v51 = vpack.c.bf16 %v742_v4, %v741_v13  ;;  %v10177_v13 = vld [vmem:[%s14237_s0 + $0x141] sm:$0xff]  ;;  %v7380_v4 = vpack.c.bf16 %v744_v48, %v743_v0  ;;  %v753_v48 = vld [vmem:[%s14238_s1 + $0x430] sm:$0xff] }
 0x2a1   :  { %1693 = vmatmul.mubr.f32.gmra.mrb[38].mxu0 %v10113_v2 }
 0x2a2   :  { %1697 = vmatprep.mubr.f32.mxu0 %v9585_v47  ;;  %v10133_v47 = vld [vmem:[%s14237_s0 + $0x111] sm:$0xff]  ;;  %7378 = vmatpush1.bf16.msra.mxu0 %v7377_v51 }
 0x2a3   :  { %7379 = vmatprep.subr.bf16.mxu0 %v14375_v15  ;;  %v750_v51 = vld [vmem:[%s14238_s1 + $0x418] sm:$0xff] }
 0x2a5   :  { %1698 = vmatmul.mubr.f32.gmra.mrb[40].mxu0 %v10120_v5 }
 0x2a6   :  { %1702 = vmatprep.mubr.f32.mxu0 %v9592_v16  ;;  %v10148_v16 = vld [vmem:[%s14237_s0 + $0x129] sm:$0xff]  ;;  %7381 = vmatpush1.bf16.msra.mxu0 %v7380_v4 }
 0x2a7   :  { %7382 = vmatprep.subr.bf16.mxu0 %v14375_v15 }
 0x2a9   :  { %1703 = vmatmul.mubr.f32.gmra.mrb[42].mxu0 %v10133_v47 }
 0x2aa   :  { %1707 = vmatprep.mubr.f32.mxu0 %v9599_v18  ;;  %v747_v18 = vld [vmem:[%s14238_s1 + $0x400] sm:$0xff] }
 0x2ab   :  { %v7385_v63 = vpack.c.bf16 %v748_v10, %v747_v18  ;;  %v751_v10 = vld [vmem:[%s14238_s1 + $0x420] sm:$0xff] }
 0x2ad   :  { %1708 = vmatmul.mubr.f32.gmra.mrb[44].mxu0 %v10141_v43  ;;  %7386 = vmatprep.subr.bf16.mxu1 %v7385_v63 }
 0x2ae   :  { %1712 = vmatprep.mubr.f32.mxu0 %v9612_v27  ;;  %v10161_v27 = vld [vmem:[%s14237_s0 + $0x139] sm:$0xff]  ;;  %7388 = vmatpush3.bf16.msra.mxu1 %v7385_v63  ;;  %v10193_v63 = vld [vmem:[%s14237_s0 + $0x151] sm:$0xff] }
 0x2b1   :  { %1713 = vmatmul.mubr.f32.gmra.mrb[46].mxu0 %v10148_v16 }
 0x2b2   :  { %1717 = vmatprep.mubr.f32.mxu0 %v9620_v62  ;;  %v749_v62 = vld [vmem:[%s14238_s1 + $0x410] sm:$0xff] }
 0x2b3   :  { %v7389_v18 = vpack.c.bf16 %v750_v51, %v749_v62  ;;  %v10207_v62 = vld [vmem:[%s14237_s0 + $0x159] sm:$0xff] }
 0x2b4   :  { %v755_v51 = vld [vmem:[%s14238_s1 + $0x440] sm:$0xff] }
 0x2b5   :  { %1718 = vmatmul.mubr.f32.gmra.mrb[48].mxu0 %v10161_v27  ;;  %7390 = vmatprep.subr.bf16.mxu1 %v7389_v18 }
 0x2b6   :  { %1722 = vmatprep.mubr.f32.mxu0 %v9627_v30  ;;  %v752_v30 = vld [vmem:[%s14238_s1 + $0x428] sm:$0xff]  ;;  %7392 = vmatpush3.bf16.msra.mxu1 %v7389_v18 }
 0x2b7   :  { %v7393_v0 = vpack.c.bf16 %v752_v30, %v751_v10  ;;  %v756_v18 = vld [vmem:[%s14238_s1 + $0x448] sm:$0xff]  ;;  %v745_v30 = vld [vmem:[%s14238_s1 + $0x3f0] sm:$0xff] }
 0x2b8   :  { %v7401_v10 = vpack.c.bf16 %v756_v18, %v755_v51  ;;  %v10244_v51 = vld [vmem:[%s14237_s0 + $0x182] sm:$0xff] }
 0x2b9   :  { %1723 = vmatmul.mubr.f32.gmra.mrb[50].mxu0 %v10177_v13  ;;  %7394 = vmatprep.subr.bf16.mxu1 %v7393_v0 }
 0x2ba   :  { %1727 = vmatprep.mubr.f32.mxu0 %v9634_v32  ;;  %v754_v32 = vld [vmem:[%s14238_s1 + $0x438] sm:$0xff]  ;;  %7396 = vmatpush3.bf16.msra.mxu1 %v7393_v0 }
 0x2bb   :  { %v7397_v4 = vpack.c.bf16 %v754_v32, %v753_v48  ;;  %v746_v0 = vld [vmem:[%s14238_s1 + $0x3f8] sm:$0xff] }
 0x2bc   :  { %v10236_v48 = vld [vmem:[%s14237_s0 + $0x171] sm:$0xff]  ;;  %v7383_v32 = vpack.c.bf16 %v746_v0, %v745_v30  ;;  %v10257_v30 = vld [vmem:[%s14237_s0 + $0x181] sm:$0xff] }
 0x2bd   :  { %1728 = vmatmul.mubr.f32.gmra.mrb[52].mxu0 %v10193_v63  ;;  %7398 = vmatprep.subr.bf16.mxu1 %v7397_v4  ;;  %14384 = vst [vmem:[#allocation13_spill] sm:$0xff] %v10236_v48  ;;  %14385 = vst [vmem:[#allocation14_spill] sm:$0xff] %v10257_v30 }
 0x2be   :  { %1732 = vmatprep.mubr.f32.mxu0 %v9647_v41  ;;  %v10220_v41 = vld [vmem:[%s14237_s0 + $0x169] sm:$0xff]  ;;  %7400 = vmatpush3.bf16.msra.mxu1 %v7397_v4  ;;  %v758_v4 = vld [vmem:[%s14238_s1 + $0x458] sm:$0xff] }
 0x2bf   :  { %7402 = vmatprep.subr.bf16.mxu1 %v7401_v10  ;;  %7384 = vmatpush1.bf16.msra.mxu0 %v7383_v32  ;;  %v761_v32 = vld [vmem:[%s14238_s1 + $0x470] sm:$0xff] }
 0x2c1   :  { %1733 = vmatmul.mubr.f32.gmra.mrb[54].mxu0 %v10207_v62 }
 0x2c2   :  { %1737 = vmatprep.mubr.f32.mxu0 %v9657_v45  ;;  %v757_v45 = vld [vmem:[%s14238_s1 + $0x450] sm:$0xff]  ;;  %7404 = vmatpush3.bf16.msra.mxu1 %v7401_v10  ;;  %v760_v10 = vld [vmem:[%s14238_s1 + $0x468] sm:$0xff] }
 0x2c3   :  { %v7405_v18 = vpack.c.bf16 %v758_v4, %v757_v45  ;;  %v10262_v45 = vld [vmem:[%s14237_s0 + $0x18a] sm:$0xff]  ;;  %v762_v4 = vld [vmem:[%s14238_s1 + $0x478] sm:$0xff] }
 0x2c5   :  { %1738 = vmatmul.mubr.f32.gmra.mrb[56].mxu0 %v10220_v41  ;;  %7406 = vmatprep.subr.bf16.mxu1 %v7405_v18 }
 0x2c6   :  { %1742 = vmatprep.mubr.f32.mxu0 %v9666_v23  ;;  %v759_v23 = vld [vmem:[%s14238_s1 + $0x460] sm:$0xff]  ;;  %7408 = vmatpush3.bf16.msra.mxu1 %v7405_v18  ;;  %v10275_v18 = vld [vmem:[%s14237_s0 + $0x189] sm:$0xff] }
 0x2c7   :  { %v7409_v0 = vpack.c.bf16 %v760_v10, %v759_v23  ;;  %v7413_v23 = vpack.c.bf16 %v762_v4, %v761_v32  ;;  %v6713_v10 = vld [vmem:[%s14237_s0 + $0x32] sm:$0xff]  ;;  %v10300_v32 = vld [vmem:[%s14237_s0 + $0x1e1] sm:$0xff] }
 0x2c8   :  { %6969 = vmatprep.mubr.f32.mxu1 %v6713_v10  ;;  %v10330_v4 = vld [vmem:[%s14237_s0 + $0x201] sm:$0xff]  ;;  %v10350_v10 = vld [vmem:[%s14237_s0 + $0x219] sm:$0xff] }
 0x2c9   :  { %1743 = vmatmul.mubr.f32.gmra.mrb[58].mxu0 %v10236_v48  ;;  %7410 = vmatprep.subr.bf16.mxu1 %v7409_v0  ;;  %v6714_v48 = vld [vmem:[%s14237_s0 + $0x3a] sm:$0xff] }
 0x2ca   :  { %1747 = vmatprep.mubr.f32.mxu0 %v10244_v51  ;;  %7412 = vmatpush3.bf16.msra.mxu1 %v7409_v0  ;;  %v6715_v0 = vld [vmem:[%s14237_s0 + $0x4a] sm:$0xff] }
 0x2cb   :  { %7414 = vmatprep.subr.bf16.mxu1 %v7413_v23 }
 0x2cd   :  { %1748 = vmatmul.mubr.f32.gmra.mrb[60].mxu0 %v10257_v30  ;;  %v6489_v30 = vld [vmem:[%s14237_s0 + $0x1c9] sm:$0xff] }
 0x2ce   :  { %1752 = vmatprep.mubr.f32.mxu0 %v10262_v45  ;;  %7416 = vmatpush3.bf16.msra.mxu1 %v7413_v23  ;;  %v10340_v23 = vld [vmem:[%s14237_s0 + $0x211] sm:$0xff] }
 0x2cf   :  { %7417 = vmatprep.subr.bf16.mxu1 %v14375_v15  ;;  %v6586_v15 = vld [vmem:[%s14237_s0 + $0x38] sm:$0xff] }
 0x2d1   :  { %1753 = vmatmul.mubr.f32.gmra.mrb[62].mxu0 %v10275_v18  ;;  %6970 = vmatmul.mubr.f32.vlgmr.msra.gmra.mrb[0].mxu1 %v6714_v48  ;;  %v10310_v48 = vld [vmem:[%s14237_s0 + $0x1e9] sm:$0xff] }
 0x2d2   :  { %1757 = vmatprep.mubr.f32.mxu0 %v9681_v37  ;;  %v6490_v37 = vld [vmem:[%s14237_s0 + $0x1d1] sm:$0xff]  ;;  %6972 = vmatprep.mubr.f32.mxu1 %v6715_v0 }
 0x2d3   :  { %v10370_v0 = vld [vmem:[%s14237_s0 + $0x231] sm:$0xff] }
 0x2d5   :  { %1758 = vmatmul.mubr.f32.gmra.mrb[64].mxu0 %v6489_v30  ;;  %v10320_v30 = vld [vmem:[%s14237_s0 + $0x1f9] sm:$0xff] }
 0x2d6   :  { %1762 = vmatprep.mubr.f32.mxu0 %v9688_v54  ;;  %v6716_v54 = vld [vmem:[%s14237_s0 + $0x52] sm:$0xff] }
 0x2d7   :  { %6973 = vmatmul.mubr.f32.gmra.mrb[2].mxu1 %v6716_v54  ;;  %v10380_v54 = vld [vmem:[%s14237_s0 + $0x241] sm:$0xff] }
 0x2d9   :  { %1763 = vmatmul.mubr.f32.gmra.mrb[66].mxu0 %v6490_v37  ;;  %v10360_v37 = vld [vmem:[%s14237_s0 + $0x229] sm:$0xff] }
 0x2da   :  { %1767 = vmatprep.mubr.f32.mxu0 %v9695_v57  ;;  %v6717_v57 = vld [vmem:[%s14237_s0 + $0x62] sm:$0xff] }
 0x2db   :  { %6975 = vmatprep.mubr.f32.mxu1 %v6717_v57  ;;  %v10390_v57 = vld [vmem:[%s14237_s0 + $0x249] sm:$0xff] }
 0x2dd   :  { %1768 = vmatmul.mubr.f32.gmra.mrb[68].mxu0 %v10300_v32 }
 0x2de   :  { %1772 = vmatprep.mubr.f32.mxu0 %v9702_v60  ;;  %v6718_v60 = vld [vmem:[%s14237_s0 + $0x6a] sm:$0xff] }
 0x2df   :  { %6976 = vmatmul.mubr.f32.gmra.mrb[4].mxu1 %v6718_v60  ;;  %v10400_v60 = vld [vmem:[%s14237_s0 + $0x259] sm:$0xff] }
 0x2e1   :  { %1773 = vmatmul.mubr.f32.gmra.mrb[70].mxu0 %v10310_v48 }
 0x2e2   :  { %1777 = vmatprep.mubr.f32.mxu0 %v9709_v1  ;;  %v6719_v1 = vld [vmem:[%s14237_s0 + $0x7a] sm:$0xff] }
 0x2e3   :  { %6978 = vmatprep.mubr.f32.mxu1 %v6719_v1  ;;  %v10410_v1 = vld [vmem:[%s14237_s0 + $0x261] sm:$0xff] }
 0x2e5   :  { %1778 = vmatmul.mubr.f32.gmra.mrb[72].mxu0 %v10320_v30 }
 0x2e6   :  { %1782 = vmatprep.mubr.f32.mxu0 %v9716_v6  ;;  %v6720_v6 = vld [vmem:[%s14237_s0 + $0x82] sm:$0xff] }
 0x2e7   :  { %6979 = vmatmul.mubr.f32.gmra.mrb[6].mxu1 %v6720_v6  ;;  %v10420_v6 = vld [vmem:[%s14237_s0 + $0x271] sm:$0xff] }
 0x2e9   :  { %1783 = vmatmul.mubr.f32.gmra.mrb[74].mxu0 %v10330_v4 }
 0x2ea   :  { %1787 = vmatprep.mubr.f32.mxu0 %v9723_v8  ;;  %v6721_v8 = vld [vmem:[%s14237_s0 + $0x92] sm:$0xff] }
 0x2eb   :  { %6981 = vmatprep.mubr.f32.mxu1 %v6721_v8  ;;  %v10430_v8 = vld [vmem:[%s14237_s0 + $0x279] sm:$0xff] }
 0x2ed   :  { %1788 = vmatmul.mubr.f32.gmra.mrb[76].mxu0 %v10340_v23 }
 0x2ee   :  { %1792 = vmatprep.mubr.f32.mxu0 %v9730_v12  ;;  %v6722_v12 = vld [vmem:[%s14237_s0 + $0x9a] sm:$0xff] }
 0x2ef   :  { %6982 = vmatmul.mubr.f32.gmra.mrb[8].mxu1 %v6722_v12  ;;  %v10440_v12 = vld [vmem:[%s14237_s0 + $0x289] sm:$0xff] }
 0x2f1   :  { %1793 = vmatmul.mubr.f32.gmra.mrb[78].mxu0 %v10350_v10 }
 0x2f2   :  { %1797 = vmatprep.mubr.f32.mxu0 %v9737_v17  ;;  %v6723_v17 = vld [vmem:[%s14237_s0 + $0xaa] sm:$0xff] }
 0x2f3   :  { %6984 = vmatprep.mubr.f32.mxu1 %v6723_v17  ;;  %v10450_v17 = vld [vmem:[%s14237_s0 + $0x291] sm:$0xff] }
 0x2f5   :  { %1798 = vmatmul.mubr.f32.gmra.mrb[80].mxu0 %v10360_v37 }
 0x2f6   :  { %1802 = vmatprep.mubr.f32.mxu0 %v9744_v21  ;;  %v6724_v21 = vld [vmem:[%s14237_s0 + $0xb2] sm:$0xff] }
 0x2f7   :  { %6985 = vmatmul.mubr.f32.gmra.mrb[10].mxu1 %v6724_v21  ;;  %v10460_v21 = vld [vmem:[%s14237_s0 + $0x2a1] sm:$0xff] }
 0x2f9   :  { %1803 = vmatmul.mubr.f32.gmra.mrb[82].mxu0 %v10370_v0 }
 0x2fa   :  { %1807 = vmatprep.mubr.f32.mxu0 %v9751_v25  ;;  %v6725_v25 = vld [vmem:[%s14237_s0 + $0xc2] sm:$0xff] }
 0x2fb   :  { %6987 = vmatprep.mubr.f32.mxu1 %v6725_v25  ;;  %v10470_v25 = vld [vmem:[%s14237_s0 + $0x2a9] sm:$0xff] }
 0x2fd   :  { %1808 = vmatmul.mubr.f32.gmra.mrb[84].mxu0 %v10380_v54 }
 0x2fe   :  { %1812 = vmatprep.mubr.f32.mxu0 %v9758_v28  ;;  %v6726_v28 = vld [vmem:[%s14237_s0 + $0xca] sm:$0xff] }
 0x2ff   :  { %6988 = vmatmul.mubr.f32.gmra.mrb[12].mxu1 %v6726_v28  ;;  %v10480_v28 = vld [vmem:[%s14237_s0 + $0x2b9] sm:$0xff] }
 0x301   :  { %1813 = vmatmul.mubr.f32.gmra.mrb[86].mxu0 %v10390_v57 }
 0x302   :  { %1817 = vmatprep.mubr.f32.mxu0 %v9765_v33  ;;  %v6727_v33 = vld [vmem:[%s14237_s0 + $0xda] sm:$0xff] }
 0x303   :  { %6990 = vmatprep.mubr.f32.mxu1 %v6727_v33  ;;  %v10490_v33 = vld [vmem:[%s14237_s0 + $0x2c1] sm:$0xff] }
 0x305   :  { %1818 = vmatmul.mubr.f32.gmra.mrb[88].mxu0 %v10400_v60 }
 0x306   :  { %1822 = vmatprep.mubr.f32.mxu0 %v9772_v36  ;;  %v6728_v36 = vld [vmem:[%s14237_s0 + $0xe2] sm:$0xff] }
 0x307   :  { %6991 = vmatmul.mubr.f32.gmra.mrb[14].mxu1 %v6728_v36  ;;  %v10500_v36 = vld [vmem:[%s14237_s0 + $0x2d1] sm:$0xff] }
 0x309   :  { %1823 = vmatmul.mubr.f32.gmra.mrb[90].mxu0 %v10410_v1 }
 0x30a   :  { %1827 = vmatprep.mubr.f32.mxu0 %v9779_v40  ;;  %v6729_v40 = vld [vmem:[%s14237_s0 + $0xf2] sm:$0xff] }
 0x30b   :  { %6993 = vmatprep.mubr.f32.mxu1 %v6729_v40  ;;  %v10510_v40 = vld [vmem:[%s14237_s0 + $0x2d9] sm:$0xff] }
 0x30d   :  { %1828 = vmatmul.mubr.f32.gmra.mrb[92].mxu0 %v10420_v6 }
 0x30e   :  { %1832 = vmatprep.mubr.f32.mxu0 %v9786_v46  ;;  %v6730_v46 = vld [vmem:[%s14237_s0 + $0xfa] sm:$0xff] }
 0x30f   :  { %6994 = vmatmul.mubr.f32.gmra.mrb[16].mxu1 %v6730_v46  ;;  %v10520_v46 = vld [vmem:[%s14237_s0 + $0x2e9] sm:$0xff] }
 0x311   :  { %1833 = vmatmul.mubr.f32.gmra.mrb[94].mxu0 %v10430_v8 }
 0x312   :  { %1837 = vmatprep.mubr.f32.mxu0 %v9793_v49  ;;  %v6731_v49 = vld [vmem:[%s14237_s0 + $0x10a] sm:$0xff] }
 0x313   :  { %6996 = vmatprep.mubr.f32.mxu1 %v6731_v49  ;;  %v10530_v49 = vld [vmem:[%s14237_s0 + $0x2f1] sm:$0xff] }
 0x315   :  { %1838 = vmatmul.mubr.f32.gmra.mrb[96].mxu0 %v10440_v12 }
 0x316   :  { %1842 = vmatprep.mubr.f32.mxu0 %v9800_v52  ;;  %v6732_v52 = vld [vmem:[%s14237_s0 + $0x112] sm:$0xff] }
 0x317   :  { %6997 = vmatmul.mubr.f32.gmra.mrb[18].mxu1 %v6732_v52  ;;  %v14386_v52 = vld [vmem:[#allocation9_spill] sm:$0xff] }
 0x319   :  { %1843 = vmatmul.mubr.f32.gmra.mrb[98].mxu0 %v10450_v17 }
 0x31a   :  { %1847 = vmatprep.mubr.f32.mxu0 %v9807_v58  ;;  %v6733_v58 = vld [vmem:[%s14237_s0 + $0x122] sm:$0xff] }
 0x31b   :  { %6999 = vmatprep.mubr.f32.mxu1 %v6733_v58  ;;  %v10540_v58 = vld [vmem:[%s14237_s0 + $0x301] sm:$0xff] }
 0x31d   :  { %1848 = vmatmul.mubr.f32.gmra.mrb[100].mxu0 %v10460_v21 }
 0x31e   :  { %1852 = vmatprep.mubr.f32.mxu0 %v9814_v3  ;;  %v6734_v3 = vld [vmem:[%s14237_s0 + $0x12a] sm:$0xff] }
 0x31f   :  { %7000 = vmatmul.mubr.f32.gmra.mrb[20].mxu1 %v6734_v3  ;;  %v14387_v3 = vld [vmem:[#allocation10_spill] sm:$0xff] }
 0x321   :  { %1853 = vmatmul.mubr.f32.gmra.mrb[102].mxu0 %v10470_v25 }
 0x322   :  { %1857 = vmatprep.mubr.f32.mxu0 %v9821_v11  ;;  %v6735_v11 = vld [vmem:[%s14237_s0 + $0x13a] sm:$0xff] }
 0x323   :  { %7002 = vmatprep.mubr.f32.mxu1 %v6735_v11  ;;  %v10551_v11 = vld [vmem:[%s14237_s0 + $0x309] sm:$0xff] }
 0x325   :  { %1858 = vmatmul.mubr.f32.gmra.mrb[104].mxu0 %v10480_v28 }
 0x326   :  { %1862 = vmatprep.mubr.f32.mxu0 %v9828_v20  ;;  %v6736_v20 = vld [vmem:[%s14237_s0 + $0x142] sm:$0xff] }
 0x327   :  { %7003 = vmatmul.mubr.f32.gmra.mrb[22].mxu1 %v6736_v20  ;;  %v14388_v20 = vld [vmem:[#allocation11_spill] sm:$0xff] }
 0x329   :  { %1863 = vmatmul.mubr.f32.gmra.mrb[106].mxu0 %v10490_v33 }
 0x32a   :  { %1867 = vmatprep.mubr.f32.mxu0 %v9835_v26  ;;  %v6737_v26 = vld [vmem:[%s14237_s0 + $0x152] sm:$0xff] }
 0x32b   :  { %7005 = vmatprep.mubr.f32.mxu1 %v6737_v26  ;;  %v10559_v26 = vld [vmem:[%s14237_s0 + $0x319] sm:$0xff] }
 0x32d   :  { %1868 = vmatmul.mubr.f32.gmra.mrb[108].mxu0 %v10500_v36 }
 0x32e   :  { %1872 = vmatprep.mubr.f32.mxu0 %v9842_v35  ;;  %v6738_v35 = vld [vmem:[%s14237_s0 + $0x15a] sm:$0xff] }
 0x32f   :  { %7006 = vmatmul.mubr.f32.gmra.mrb[24].mxu1 %v6738_v35  ;;  %v10566_v35 = vld [vmem:[%s14237_s0 + $0x321] sm:$0xff] }
 0x331   :  { %1873 = vmatmul.mubr.f32.gmra.mrb[110].mxu0 %v10510_v40 }
 0x332   :  { %1877 = vmatprep.mubr.f32.mxu0 %v9849_v50  ;;  %v6739_v50 = vld [vmem:[%s14237_s0 + $0x16a] sm:$0xff] }
 0x333   :  { %7008 = vmatprep.mubr.f32.mxu1 %v6739_v50  ;;  %v6743_v50 = vld [vmem:[%s14237_s0 + $0x19a] sm:$0xff] }
 0x335   :  { %1878 = vmatmul.mubr.f32.gmra.mrb[112].mxu0 %v10520_v46 }
 0x336   :  { %1882 = vmatprep.mubr.f32.mxu0 %v9856_v61  ;;  %v6740_v61 = vld [vmem:[%s14237_s0 + $0x172] sm:$0xff] }
 0x337   :  { %7009 = vmatmul.mubr.f32.gmra.mrb[26].mxu1 %v6740_v61  ;;  %v6744_v61 = vld [vmem:[%s14237_s0 + $0x1a2] sm:$0xff] }
 0x338   :  { %7011 = vmatprep.mubr.f32.mxu1 %v10244_v51  ;;  %v14389_v51 = vld [vmem:[#allocation12_spill] sm:$0xff] }
 0x339   :  { %1883 = vmatmul.mubr.f32.gmra.mrb[114].mxu0 %v10530_v49 }
 0x33a   :  { %1887 = vmatprep.mubr.f32.mxu0 %v14386_v52  ;;  %v10581_v52 = vld [vmem:[%s14237_s0 + $0x331] sm:$0xff] }
 0x33b   :  { %7012 = vmatmul.mubr.f32.gmra.mrb[28].mxu1 %v10262_v45  ;;  %v10571_v45 = vld [vmem:[%s14237_s0 + $0x332] sm:$0xff] }
 0x33c   :  { %7014 = vmatprep.mubr.f32.mxu1 %v6743_v50  ;;  %v6585_v50 = vld [vmem:[%s14237_s0 + $0x30] sm:$0xff] }
 0x33d   :  { %1888 = vmatmul.mubr.f32.gmra.mrb[116].mxu0 %v10540_v58 }
 0x33e   :  { %1892 = vmatprep.mubr.f32.mxu0 %v14387_v3  ;;  %v10589_v3 = vld [vmem:[%s14237_s0 + $0x33a] sm:$0xff] }
 0x33f   :  { %7015 = vmatmul.mubr.f32.gmra.mrb[30].mxu1 %v6744_v61  ;;  %v6746_v61 = vld [vmem:[%s14237_s0 + $0x1ea] sm:$0xff] }
 0x341   :  { %1893 = vmatmul.mubr.f32.gmra.mrb[118].mxu0 %v10551_v11 }
 0x342   :  { %1897 = vmatprep.mubr.f32.mxu0 %v14388_v20  ;;  %v10596_v20 = vld [vmem:[%s14237_s0 + $0x339] sm:$0xff] }
 0x345   :  { %1898 = vmatmul.mubr.f32.gmra.mrb[120].mxu0 %v10559_v26 }
 0x346   :  { %1902 = vmatprep.mubr.f32.mxu0 %v14389_v51  ;;  %v6745_v51 = vld [vmem:[%s14237_s0 + $0x1e2] sm:$0xff] }
 0x347   :  { %7017 = vmatprep.mubr.f32.mxu1 %v6745_v51  ;;  %v6587_v51 = vld [vmem:[%s14237_s0 + $0x48] sm:$0xff] }
 0x348   :  { %7018 = vmatmul.mubr.f32.gmra.mrb[32].mxu1 %v6746_v61  ;;  %v6590_v61 = vld [vmem:[%s14237_s0 + $0x68] sm:$0xff] }
 0x349   :  { %1903 = vmatmul.mubr.f32.gmra.mrb[122].mxu0 %v10566_v35 }
 0x34a   :  { %1907 = vmatprep.mubr.f32.mxu0 %v10571_v45 }
 0x34d   :  { %1908 = vmatmul.mubr.f32.gmra.mrb[124].mxu0 %v10581_v52 }
 0x34e   :  { %1912 = vmatprep.mubr.f32.mxu0 %v10589_v3 }
 0x351   :  { %1913 = vmatmul.mubr.f32.gmra.mrb[126].mxu0 %v10596_v20 }
 0x352   :  { %1982 = vmatprep.mubr.f32.mxu0 %v9922_v9  ;;  %v6747_v9 = vld [vmem:[%s14237_s0 + $0x1fa] sm:$0xff] }
 0x353   :  { %7020 = vmatprep.mubr.f32.mxu1 %v6747_v9  ;;  %v6591_v9 = vld [vmem:[%s14237_s0 + $0x78] sm:$0xff] }
 0x355   :  { %1983 = vmatmul.mubr.f32.vlgmr.msra.gmra.mrb[0].mxu0 %v6585_v50  ;;  %v6589_v50 = vld [vmem:[%s14237_s0 + $0x60] sm:$0xff] }
 0x356   :  { %1987 = vmatprep.mubr.f32.mxu0 %v9936_v14  ;;  %v6748_v14 = vld [vmem:[%s14237_s0 + $0x202] sm:$0xff] }
 0x357   :  { %7021 = vmatmul.mubr.f32.gmra.mrb[34].mxu1 %v6748_v14  ;;  %v6593_v14 = vld [vmem:[%s14237_s0 + $0x90] sm:$0xff] }
 0x359   :  { %1988 = vmatmul.mubr.f32.gmra.mrb[2].mxu0 %v6586_v15  ;;  %v6588_v15 = vld [vmem:[%s14237_s0 + $0x50] sm:$0xff] }
 0x35a   :  { %1992 = vmatprep.mubr.f32.mxu0 %v9950_v19  ;;  %v6749_v19 = vld [vmem:[%s14237_s0 + $0x212] sm:$0xff] }
 0x35b   :  { %7023 = vmatprep.mubr.f32.mxu1 %v6749_v19  ;;  %v6595_v19 = vld [vmem:[%s14237_s0 + $0xa8] sm:$0xff] }
 0x35d   :  { %1993 = vmatmul.mubr.f32.gmra.mrb[4].mxu0 %v6587_v51  ;;  %v6592_v51 = vld [vmem:[%s14237_s0 + $0x80] sm:$0xff] }
 0x35e   :  { %1997 = vmatprep.mubr.f32.mxu0 %v9964_v24  ;;  %v6750_v24 = vld [vmem:[%s14237_s0 + $0x21a] sm:$0xff] }
 0x35f   :  { %7024 = vmatmul.mubr.f32.gmra.mrb[36].mxu1 %v6750_v24  ;;  %v6597_v24 = vld [vmem:[%s14237_s0 + $0xc0] sm:$0xff] }
 0x361   :  { %1998 = vmatmul.mubr.f32.gmra.mrb[6].mxu0 %v6588_v15  ;;  %v6594_v15 = vld [vmem:[%s14237_s0 + $0x98] sm:$0xff] }
 0x362   :  { %2002 = vmatprep.mubr.f32.mxu0 %v9978_v29  ;;  %v6751_v29 = vld [vmem:[%s14237_s0 + $0x22a] sm:$0xff] }
 0x363   :  { %7026 = vmatprep.mubr.f32.mxu1 %v6751_v29  ;;  %v6599_v29 = vld [vmem:[%s14237_s0 + $0xd8] sm:$0xff] }
 0x365   :  { %2003 = vmatmul.mubr.f32.gmra.mrb[8].mxu0 %v6589_v50  ;;  %v6596_v50 = vld [vmem:[%s14237_s0 + $0xb0] sm:$0xff] }
 0x366   :  { %2007 = vmatprep.mubr.f32.mxu0 %v9992_v34  ;;  %v6752_v34 = vld [vmem:[%s14237_s0 + $0x232] sm:$0xff] }
 0x367   :  { %7027 = vmatmul.mubr.f32.gmra.mrb[38].mxu1 %v6752_v34  ;;  %v6601_v34 = vld [vmem:[%s14237_s0 + $0xf0] sm:$0xff] }
 0x369   :  { %2008 = vmatmul.mubr.f32.gmra.mrb[10].mxu0 %v6590_v61  ;;  %v6598_v61 = vld [vmem:[%s14237_s0 + $0xc8] sm:$0xff] }
 0x36a   :  { %2012 = vmatprep.mubr.f32.mxu0 %v10006_v39  ;;  %v6753_v39 = vld [vmem:[%s14237_s0 + $0x242] sm:$0xff] }
 0x36b   :  { %7029 = vmatprep.mubr.f32.mxu1 %v6753_v39  ;;  %v6603_v39 = vld [vmem:[%s14237_s0 + $0x108] sm:$0xff] }
 0x36d   :  { %2013 = vmatmul.mubr.f32.gmra.mrb[12].mxu0 %v6591_v9  ;;  %v6600_v9 = vld [vmem:[%s14237_s0 + $0xe0] sm:$0xff] }
 0x36e   :  { %2017 = vmatprep.mubr.f32.mxu0 %v10020_v42  ;;  %v6754_v42 = vld [vmem:[%s14237_s0 + $0x24a] sm:$0xff] }
 0x36f   :  { %7030 = vmatmul.mubr.f32.gmra.mrb[40].mxu1 %v6754_v42  ;;  %v6605_v42 = vld [vmem:[%s14237_s0 + $0x120] sm:$0xff] }
 0x371   :  { %2018 = vmatmul.mubr.f32.gmra.mrb[14].mxu0 %v6592_v51  ;;  %v6602_v51 = vld [vmem:[%s14237_s0 + $0xf8] sm:$0xff] }
 0x372   :  { %2022 = vmatprep.mubr.f32.mxu0 %v10034_v31  ;;  %v6755_v31 = vld [vmem:[%s14237_s0 + $0x25a] sm:$0xff] }
 0x373   :  { %7032 = vmatprep.mubr.f32.mxu1 %v6755_v31 }
 0x375   :  { %2023 = vmatmul.mubr.f32.gmra.mrb[16].mxu0 %v6593_v14  ;;  %v6604_v14 = vld [vmem:[%s14237_s0 + $0x110] sm:$0xff] }
 0x376   :  { %2027 = vmatprep.mubr.f32.mxu0 %v10042_v7  ;;  %v6756_v7 = vld [vmem:[%s14237_s0 + $0x262] sm:$0xff] }
 0x377   :  { %7033 = vmatmul.mubr.f32.gmra.mrb[42].mxu1 %v6756_v7  ;;  %v6767_v7 = vld [vmem:[%s14237_s0 + $0x2ea] sm:$0xff] }
 0x379   :  { %2028 = vmatmul.mubr.f32.gmra.mrb[18].mxu0 %v6594_v15  ;;  %v6606_v15 = vld [vmem:[%s14237_s0 + $0x128] sm:$0xff] }
 0x37a   :  { %2032 = vmatprep.mubr.f32.mxu0 %v10050_v44  ;;  %v6757_v44 = vld [vmem:[%s14237_s0 + $0x272] sm:$0xff] }
 0x37b   :  { %7035 = vmatprep.mubr.f32.mxu1 %v6757_v44 }
 0x37d   :  { %2033 = vmatmul.mubr.f32.gmra.mrb[20].mxu0 %v6595_v19  ;;  %v6607_v19 = vld [vmem:[%s14237_s0 + $0x138] sm:$0xff] }
 0x37e   :  { %2037 = vmatprep.mubr.f32.mxu0 %v10063_v56  ;;  %v6758_v56 = vld [vmem:[%s14237_s0 + $0x27a] sm:$0xff] }
 0x37f   :  { %7036 = vmatmul.mubr.f32.gmra.mrb[44].mxu1 %v6758_v56  ;;  %v6769_v56 = vld [vmem:[%s14237_s0 + $0x302] sm:$0xff] }
 0x381   :  { %2038 = vmatmul.mubr.f32.gmra.mrb[22].mxu0 %v6596_v50 }
 0x382   :  { %2042 = vmatprep.mubr.f32.mxu0 %v10071_v22  ;;  %v6759_v22 = vld [vmem:[%s14237_s0 + $0x28a] sm:$0xff] }
 0x383   :  { %7038 = vmatprep.mubr.f32.mxu1 %v6759_v22 }
 0x385   :  { %2043 = vmatmul.mubr.f32.gmra.mrb[24].mxu0 %v6597_v24  ;;  %v6609_v24 = vld [vmem:[%s14237_s0 + $0x150] sm:$0xff] }
 0x386   :  { %2047 = vmatprep.mubr.f32.mxu0 %v10078_v53  ;;  %v6760_v53 = vld [vmem:[%s14237_s0 + $0x292] sm:$0xff] }
 0x387   :  { %7039 = vmatmul.mubr.f32.gmra.mrb[46].mxu1 %v6760_v53  ;;  %v6771_v53 = vld [vmem:[%s14237_s0 + $0x31a] sm:$0xff] }
 0x389   :  { %2048 = vmatmul.mubr.f32.gmra.mrb[26].mxu0 %v6598_v61 }
 0x38a   :  { %2052 = vmatprep.mubr.f32.mxu0 %v10085_v55  ;;  %v6761_v55 = vld [vmem:[%s14237_s0 + $0x2a2] sm:$0xff] }
 0x38b   :  { %7041 = vmatprep.mubr.f32.mxu1 %v6761_v55 }
 0x38d   :  { %2053 = vmatmul.mubr.f32.gmra.mrb[28].mxu0 %v6599_v29  ;;  %v6611_v29 = vld [vmem:[%s14237_s0 + $0x168] sm:$0xff] }
 0x38e   :  { %2057 = vmatprep.mubr.f32.mxu0 %v10098_v38  ;;  %v6762_v38 = vld [vmem:[%s14237_s0 + $0x2aa] sm:$0xff] }
 0x38f   :  { %7042 = vmatmul.mubr.f32.gmra.mrb[48].mxu1 %v6762_v38  ;;  %v14391_v38 = vld [vmem:[#allocation14_spill] sm:$0xff] }
 0x391   :  { %2058 = vmatmul.mubr.f32.gmra.mrb[30].mxu0 %v6600_v9  ;;  %v14390_v9 = vld [vmem:[#allocation13_spill] sm:$0xff] }
 0x392   :  { %2062 = vmatprep.mubr.f32.mxu0 %v10106_v59  ;;  %v6763_v59 = vld [vmem:[%s14237_s0 + $0x2ba] sm:$0xff] }
 0x393   :  { %7044 = vmatprep.mubr.f32.mxu1 %v6763_v59  ;;  %v6679_v59 = vld [vmem:[%s14237_s0 + $0x199] sm:$0xff] }
 0x395   :  { %2063 = vmatmul.mubr.f32.gmra.mrb[32].mxu0 %v6601_v34 }
 0x396   :  { %2067 = vmatprep.mubr.f32.mxu0 %v10113_v2  ;;  %v6764_v2 = vld [vmem:[%s14237_s0 + $0x2c2] sm:$0xff] }
 0x397   :  { %7045 = vmatmul.mubr.f32.gmra.mrb[50].mxu1 %v6764_v2  ;;  %v6615_v2 = vld [vmem:[%s14237_s0 + $0x198] sm:$0xff] }
 0x399   :  { %2068 = vmatmul.mubr.f32.gmra.mrb[34].mxu0 %v6602_v51  ;;  %v6613_v51 = vld [vmem:[%s14237_s0 + $0x180] sm:$0xff] }
 0x39a   :  { %2072 = vmatprep.mubr.f32.mxu0 %v10120_v5  ;;  %v6765_v5 = vld [vmem:[%s14237_s0 + $0x2d2] sm:$0xff] }
 0x39b   :  { %7047 = vmatprep.mubr.f32.mxu1 %v6765_v5  ;;  %v6776_v5 = vld [vmem:[%s14237_s0 + $0x352] sm:$0xff] }
 0x39d   :  { %2073 = vmatmul.mubr.f32.gmra.mrb[36].mxu0 %v6603_v39 }
 0x39e   :  { %2077 = vmatprep.mubr.f32.mxu0 %v10133_v47  ;;  %v6766_v47 = vld [vmem:[%s14237_s0 + $0x2da] sm:$0xff] }
 0x39f   :  { %7048 = vmatmul.mubr.f32.gmra.mrb[52].mxu1 %v6766_v47 }
 0x3a0   :  { %7050 = vmatprep.mubr.f32.mxu1 %v6767_v7  ;;  %v6618_v7 = vld [vmem:[%s14237_s0 + $0x1e8] sm:$0xff] }
 0x3a1   :  { %2078 = vmatmul.mubr.f32.gmra.mrb[38].mxu0 %v6604_v14  ;;  %v6680_v14 = vld [vmem:[%s14237_s0 + $0x1a1] sm:$0xff] }
 0x3a2   :  { %2082 = vmatprep.mubr.f32.mxu0 %v10141_v43 }
 0x3a4   :  { %v10753_v31 = vpop.f32.mrb[0].mxu1 }
 0x3a5   :  { %2083 = vmatmul.mubr.f32.gmra.mrb[40].mxu0 %v6605_v42  ;;  %v10755_v43 = vpop.f32.mrb[1].mxu1  ;;  %v6616_v42 = vld [vmem:[%s14237_s0 + $0x1a0] sm:$0xff] }
 0x3a6   :  { %2087 = vmatprep.mubr.f32.mxu0 %v10148_v16  ;;  %v6768_v16 = vld [vmem:[%s14237_s0 + $0x2f2] sm:$0xff] }
 0x3a7   :  { %7051 = vmatmul.mubr.f32.gmra.mrb[54].mxu1 %v6768_v16 }
 0x3a8   :  { %7053 = vmatprep.mubr.f32.mxu1 %v6769_v56 }
 0x3a9   :  { %2088 = vmatmul.mubr.f32.gmra.mrb[42].mxu0 %v6606_v15 }
 0x3aa   :  { %2092 = vmatprep.mubr.f32.mxu0 %v10161_v27  ;;  %v6608_v27 = vld [vmem:[%s14237_s0 + $0x140] sm:$0xff]  ;;  %v10771_v50 = vpop.f32.mrb[2].mxu1 }
 0x3ab   :  { %v10773_v44 = vpop.f32.mrb[3].mxu1 }
 0x3ad   :  { %2093 = vmatmul.mubr.f32.gmra.mrb[44].mxu0 %v6607_v19  ;;  %v6617_v19 = vld [vmem:[%s14237_s0 + $0x1e0] sm:$0xff] }
 0x3ae   :  { %2097 = vmatprep.mubr.f32.mxu0 %v10177_v13  ;;  %v6770_v13 = vld [vmem:[%s14237_s0 + $0x30a] sm:$0xff] }
 0x3af   :  { %7054 = vmatmul.mubr.f32.gmra.mrb[56].mxu1 %v6770_v13 }
 0x3b0   :  { %7056 = vmatprep.mubr.f32.mxu1 %v6771_v53 }
 0x3b1   :  { %2098 = vmatmul.mubr.f32.gmra.mrb[46].mxu0 %v6608_v27 }
 0x3b2   :  { %2102 = vmatprep.mubr.f32.mxu0 %v10193_v63  ;;  %v6610_v63 = vld [vmem:[%s14237_s0 + $0x158] sm:$0xff]  ;;  %v10789_v61 = vpop.f32.mrb[4].mxu1 }
 0x3b3   :  { %v10791_v22 = vpop.f32.mrb[5].mxu1 }
 0x3b5   :  { %2103 = vmatmul.mubr.f32.gmra.mrb[48].mxu0 %v6609_v24 }
 0x3b6   :  { %2107 = vmatprep.mubr.f32.mxu0 %v10207_v62  ;;  %v6772_v62 = vld [vmem:[%s14237_s0 + $0x322] sm:$0xff] }
 0x3b7   :  { %7057 = vmatmul.mubr.f32.gmra.mrb[58].mxu1 %v6772_v62 }
 0x3b8   :  { %7059 = vmatprep.mubr.f32.mxu1 %v10571_v45  ;;  %v6614_v45 = vld [vmem:[%s14237_s0 + $0x188] sm:$0xff] }
 0x3b9   :  { %2108 = vmatmul.mubr.f32.gmra.mrb[50].mxu0 %v6610_v63 }
 0x3ba   :  { %2112 = vmatprep.mubr.f32.mxu0 %v10220_v41  ;;  %v6612_v41 = vld [vmem:[%s14237_s0 + $0x170] sm:$0xff]  ;;  %v10808_v55 = vpop.f32.mrb[6].mxu1 }
 0x3bb   :  { %v10810_v34 = vpop.f32.mrb[7].mxu1  ;;  %7060 = vmatmul.mubr.f32.gmra.mrb[60].mxu1 %v10589_v3 }
 0x3bd   :  { %2113 = vmatmul.mubr.f32.gmra.mrb[52].mxu0 %v6611_v29 }
 0x3be   :  { %2117 = vmatprep.mubr.f32.mxu0 %v14390_v9 }
 0x3c1   :  { %2118 = vmatmul.mubr.f32.gmra.mrb[54].mxu0 %v6612_v41 }
 0x3c2   :  { %2122 = vmatprep.mubr.f32.mxu0 %v14391_v38  ;;  %v10824_v39 = vpop.f32.mrb[8].mxu1 }
 0x3c3   :  { %v10826_v3 = vpop.f32.mrb[9].mxu1 }
 0x3c5   :  { %2123 = vmatmul.mubr.f32.gmra.mrb[56].mxu0 %v6613_v51 }
 0x3c6   :  { %2127 = vmatprep.mubr.f32.mxu0 %v10275_v18  ;;  %v6775_v18 = vld [vmem:[%s14237_s0 + $0x34a] sm:$0xff] }
 0x3c7   :  { %7062 = vmatprep.mubr.f32.mxu1 %v6775_v18 }
 0x3c8   :  { %7063 = vmatmul.mubr.f32.gmra.mrb[62].mxu1 %v6776_v5 }
 0x3c9   :  { %2128 = vmatmul.mubr.f32.gmra.mrb[58].mxu0 %v6614_v45 }
 0x3ca   :  { %2132 = vmatprep.mubr.f32.mxu0 %v6679_v59  ;;  %v10843_v47 = vpop.f32.mrb[10].mxu1 }
 0x3cb   :  { %v10845_v15 = vpop.f32.mrb[11].mxu1 }
 0x3cd   :  { %2133 = vmatmul.mubr.f32.gmra.mrb[60].mxu0 %v6615_v2 }
 0x3ce   :  { %2137 = vmatprep.mubr.f32.mxu0 %v6680_v14 }
 0x3d1   :  { %2138 = vmatmul.mubr.f32.gmra.mrb[62].mxu0 %v6616_v42 }
 0x3d2   :  { %2142 = vmatprep.mubr.f32.mxu0 %v10300_v32  ;;  %v10855_v16 = vpop.f32.mrb[12].mxu1  ;;  %v6619_v32 = vld [vmem:[%s14237_s0 + $0x1f8] sm:$0xff] }
 0x3d3   :  { %v10857_v27 = vpop.f32.mrb[13].mxu1 }
 0x3d5   :  { %2143 = vmatmul.mubr.f32.gmra.mrb[64].mxu0 %v6617_v19 }
 0x3d6   :  { %2147 = vmatprep.mubr.f32.mxu0 %v10310_v48  ;;  %v6620_v48 = vld [vmem:[%s14237_s0 + $0x200] sm:$0xff] }
 0x3d9   :  { %2148 = vmatmul.mubr.f32.gmra.mrb[66].mxu0 %v6618_v7 }
 0x3da   :  { %2152 = vmatprep.mubr.f32.mxu0 %v10320_v30  ;;  %v10867_v24 = vpop.f32.mrb[14].mxu1  ;;  %v6621_v30 = vld [vmem:[%s14237_s0 + $0x210] sm:$0xff] }
 0x3db   :  { %v10869_v56 = vpop.f32.mrb[15].mxu1 }
 0x3dd   :  { %2153 = vmatmul.mubr.f32.gmra.mrb[68].mxu0 %v6619_v32 }
 0x3de   :  { %2157 = vmatprep.mubr.f32.mxu0 %v10330_v4  ;;  %v6622_v4 = vld [vmem:[%s14237_s0 + $0x218] sm:$0xff] }
 0x3e1   :  { %2158 = vmatmul.mubr.f32.gmra.mrb[70].mxu0 %v6620_v48 }
 0x3e2   :  { %2162 = vmatprep.mubr.f32.mxu0 %v10340_v23  ;;  %v10879_v13 = vpop.f32.mrb[16].mxu1  ;;  %v6623_v23 = vld [vmem:[%s14237_s0 + $0x228] sm:$0xff] }
 0x3e3   :  { %v10881_v63 = vpop.f32.mrb[17].mxu1 }
 0x3e5   :  { %2163 = vmatmul.mubr.f32.gmra.mrb[72].mxu0 %v6621_v30 }
 0x3e6   :  { %2167 = vmatprep.mubr.f32.mxu0 %v10350_v10  ;;  %v6624_v10 = vld [vmem:[%s14237_s0 + $0x230] sm:$0xff] }
 0x3e9   :  { %2168 = vmatmul.mubr.f32.gmra.mrb[74].mxu0 %v6622_v4 }
 0x3ea   :  { %2172 = vmatprep.mubr.f32.mxu0 %v10360_v37  ;;  %v10891_v29 = vpop.f32.mrb[18].mxu1  ;;  %v6625_v37 = vld [vmem:[%s14237_s0 + $0x240] sm:$0xff] }
 0x3eb   :  { %v10893_v53 = vpop.f32.mrb[19].mxu1 }
 0x3ed   :  { %2173 = vmatmul.mubr.f32.gmra.mrb[76].mxu0 %v6623_v23 }
 0x3ee   :  { %2177 = vmatprep.mubr.f32.mxu0 %v10370_v0  ;;  %v6626_v0 = vld [vmem:[%s14237_s0 + $0x248] sm:$0xff] }
 0x3f1   :  { %2178 = vmatmul.mubr.f32.gmra.mrb[78].mxu0 %v6624_v10 }
 0x3f2   :  { %2182 = vmatprep.mubr.f32.mxu0 %v10380_v54  ;;  %v10903_v62 = vpop.f32.mrb[20].mxu1  ;;  %v6627_v54 = vld [vmem:[%s14237_s0 + $0x258] sm:$0xff] }
 0x3f3   :  { %v10905_v9 = vpop.f32.mrb[21].mxu1 }
 0x3f5   :  { %2183 = vmatmul.mubr.f32.gmra.mrb[80].mxu0 %v6625_v37 }
 0x3f6   :  { %2187 = vmatprep.mubr.f32.mxu0 %v10390_v57  ;;  %v6628_v57 = vld [vmem:[%s14237_s0 + $0x260] sm:$0xff] }
 0x3f9   :  { %2188 = vmatmul.mubr.f32.gmra.mrb[82].mxu0 %v6626_v0 }
 0x3fa   :  { %2192 = vmatprep.mubr.f32.mxu0 %v10400_v60  ;;  %v10915_v41 = vpop.f32.mrb[22].mxu1  ;;  %v6629_v60 = vld [vmem:[%s14237_s0 + $0x270] sm:$0xff] }
 0x3fb   :  { %v10917_v38 = vpop.f32.mrb[23].mxu1 }
 0x3fd   :  { %2193 = vmatmul.mubr.f32.gmra.mrb[84].mxu0 %v6627_v54 }
 0x3fe   :  { %2197 = vmatprep.mubr.f32.mxu0 %v10410_v1  ;;  %v6630_v1 = vld [vmem:[%s14237_s0 + $0x278] sm:$0xff] }
 0x401   :  { %2198 = vmatmul.mubr.f32.gmra.mrb[86].mxu0 %v6628_v57 }
 0x402   :  { %2202 = vmatprep.mubr.f32.mxu0 %v10420_v6  ;;  %v10927_v51 = vpop.f32.mrb[24].mxu1  ;;  %v6631_v6 = vld [vmem:[%s14237_s0 + $0x288] sm:$0xff] }
 0x403   :  { %v10929_v45 = vpop.f32.mrb[25].mxu1 }
 0x405   :  { %2203 = vmatmul.mubr.f32.gmra.mrb[88].mxu0 %v6629_v60 }
 0x406   :  { %2207 = vmatprep.mubr.f32.mxu0 %v10430_v8  ;;  %v6632_v8 = vld [vmem:[%s14237_s0 + $0x290] sm:$0xff] }
 0x409   :  { %2208 = vmatmul.mubr.f32.gmra.mrb[90].mxu0 %v6630_v1 }
 0x40a   :  { %2212 = vmatprep.mubr.f32.mxu0 %v10440_v12  ;;  %v10939_v59 = vpop.f32.mrb[26].mxu1  ;;  %v6633_v12 = vld [vmem:[%s14237_s0 + $0x2a0] sm:$0xff] }
 0x40b   :  { %v10941_v2 = vpop.f32.mrb[27].mxu1 }
 0x40d   :  { %2213 = vmatmul.mubr.f32.gmra.mrb[92].mxu0 %v6631_v6 }
 0x40e   :  { %2217 = vmatprep.mubr.f32.mxu0 %v10450_v17  ;;  %v6634_v17 = vld [vmem:[%s14237_s0 + $0x2a8] sm:$0xff]  ;;  %v10951_v18 = vpop.f32.mrb[28].mxu1 }
 0x40f   :  { %v10953_v14 = vpop.f32.mrb[29].mxu1 }
 0x411   :  { %2218 = vmatmul.mubr.f32.gmra.mrb[94].mxu0 %v6632_v8 }
 0x412   :  { %2222 = vmatprep.mubr.f32.mxu0 %v10460_v21  ;;  %v6635_v21 = vld [vmem:[%s14237_s0 + $0x2b8] sm:$0xff]  ;;  %v10963_v5 = vpop.f32.mrb[30].mxu1 }
 0x413   :  { %v10965_v42 = vpop.f32.mrb[31].mxu1 }
 0x415   :  { %2223 = vmatmul.mubr.f32.gmra.mrb[96].mxu0 %v6633_v12 }
 0x416   :  { %2227 = vmatprep.mubr.f32.mxu0 %v10470_v25  ;;  %v6636_v25 = vld [vmem:[%s14237_s0 + $0x2c0] sm:$0xff] }
 0x419   :  { %2228 = vmatmul.mubr.f32.gmra.mrb[98].mxu0 %v6634_v17 }
 0x41a   :  { %2232 = vmatprep.mubr.f32.mxu0 %v10480_v28  ;;  %v6637_v28 = vld [vmem:[%s14237_s0 + $0x2d0] sm:$0xff] }
 0x41b   :  { %v10975_v19 = vpop.f32.mrb[32].mxu1 }
 0x41c   :  { %v10977_v32 = vpop.f32.mrb[33].mxu1 }
 0x41d   :  { %2233 = vmatmul.mubr.f32.gmra.mrb[100].mxu0 %v6635_v21 }
 0x41e   :  { %2237 = vmatprep.mubr.f32.mxu0 %v10490_v33  ;;  %v6638_v33 = vld [vmem:[%s14237_s0 + $0x2d8] sm:$0xff] }
 0x421   :  { %2238 = vmatmul.mubr.f32.gmra.mrb[102].mxu0 %v6636_v25 }
 0x422   :  { %2242 = vmatprep.mubr.f32.mxu0 %v10500_v36 }
 0x425   :  { %2243 = vmatmul.mubr.f32.gmra.mrb[104].mxu0 %v6637_v28 }
 0x426   :  { %2247 = vmatprep.mubr.f32.mxu0 %v10510_v40  ;;  %v6639_v40 = vld [vmem:[%s14237_s0 + $0x2e8] sm:$0xff] }
 0x428   :  { %v1984_v7 = vpop.f32.mrb[0].mxu0 }
 0x429   :  { %v10980_v48 = vadd.f32 %v10755_v43, %v1984_v7  ;;  %v1986_v36 = vpop.f32.mrb[1].mxu0  ;;  %2248 = vmatmul.mubr.f32.gmra.mrb[106].mxu0 %v6638_v33  ;;  %v6640_v43 = vld [vmem:[%s14237_s0 + $0x2f0] sm:$0xff] }
 0x42a   :  { %2252 = vmatprep.mubr.f32.mxu0 %v10520_v46  ;;  %v10993_v10 = vpop.f32.mrb[34].mxu1 }
 0x42b   :  { %v10995_v46 = vpop.f32.mrb[35].mxu1 }
 0x42c   :  { %v1989_v30 = vpop.f32.mrb[2].mxu0 }
 0x42d   :  { %v10987_v4 = vadd.f32 %v10753_v31, %v1989_v30  ;;  %v1991_v23 = vpop.f32.mrb[3].mxu0  ;;  %2253 = vmatmul.mubr.f32.gmra.mrb[108].mxu0 %v6639_v40 }
 0x42e   :  { %2257 = vmatprep.mubr.f32.mxu0 %v10530_v49  ;;  %v6641_v49 = vld [vmem:[%s14237_s0 + $0x300] sm:$0xff] }
 0x42f   :  { %14392 = vst [vmem:[#allocation9_spill] sm:$0xff] %v10987_v4 }
 0x430   :  { %v1994_v37 = vpop.f32.mrb[4].mxu0 }
 0x431   :  { %v10998_v0 = vadd.f32 %v10773_v44, %v1994_v37  ;;  %v1996_v54 = vpop.f32.mrb[5].mxu0  ;;  %2258 = vmatmul.mubr.f32.gmra.mrb[110].mxu0 %v6640_v43  ;;  %v6642_v44 = vld [vmem:[%s14237_s0 + $0x308] sm:$0xff] }
 0x432   :  { %2262 = vmatprep.mubr.f32.mxu0 %v10540_v58  ;;  %v11011_v1 = vpop.f32.mrb[36].mxu1  ;;  %v6712_v54 = vld [vmem:[%s14237_s0 + $0x351] sm:$0xff] }
 0x433   :  { %14393 = vst [vmem:[#allocation10_spill] sm:$0xff] %v10998_v0  ;;  %v11013_v58 = vpop.f32.mrb[37].mxu1 }
 0x434   :  { %v1999_v31 = vpop.f32.mrb[6].mxu0 }
 0x435   :  { %v11005_v57 = vadd.f32 %v10771_v50, %v1999_v31  ;;  %v2001_v60 = vpop.f32.mrb[7].mxu0  ;;  %2263 = vmatmul.mubr.f32.gmra.mrb[112].mxu0 %v6641_v49 }
 0x436   :  { %2267 = vmatprep.mubr.f32.mxu0 %v10551_v11  ;;  %v6643_v11 = vld [vmem:[%s14237_s0 + $0x318] sm:$0xff] }
 0x438   :  { %v2004_v6 = vpop.f32.mrb[8].mxu0 }
 0x439   :  { %v11016_v8 = vadd.f32 %v10791_v22, %v2004_v6  ;;  %v2006_v12 = vpop.f32.mrb[9].mxu0  ;;  %2268 = vmatmul.mubr.f32.gmra.mrb[114].mxu0 %v6642_v44  ;;  %v6644_v22 = vld [vmem:[%s14237_s0 + $0x320] sm:$0xff] }
 0x43a   :  { %2272 = vmatprep.mubr.f32.mxu0 %v10559_v26  ;;  %v11029_v25 = vpop.f32.mrb[38].mxu1 }
 0x43b   :  { %v11031_v26 = vpop.f32.mrb[39].mxu1 }
 0x43c   :  { %v2009_v50 = vpop.f32.mrb[10].mxu0 }
 0x43d   :  { %v11023_v17 = vadd.f32 %v10789_v61, %v2009_v50  ;;  %v2011_v21 = vpop.f32.mrb[11].mxu0  ;;  %2273 = vmatmul.mubr.f32.gmra.mrb[116].mxu0 %v6643_v11 }
 0x43e   :  { %2277 = vmatprep.mubr.f32.mxu0 %v10566_v35  ;;  %v6645_v35 = vld [vmem:[%s14237_s0 + $0x330] sm:$0xff] }
 0x440   :  { %v2014_v28 = vpop.f32.mrb[12].mxu0 }
 0x441   :  { %v11034_v33 = vadd.f32 %v10810_v34, %v2014_v28  ;;  %v2016_v7 = vpop.f32.mrb[13].mxu0  ;;  %2278 = vmatmul.mubr.f32.gmra.mrb[118].mxu0 %v6644_v22  ;;  %v6646_v34 = vld [vmem:[%s14237_s0 + $0x338] sm:$0xff] }
 0x442   :  { %2282 = vmatprep.mubr.f32.mxu0 %v10581_v52  ;;  %v6711_v52 = vld [vmem:[%s14237_s0 + $0x349] sm:$0xff]  ;;  %v11050_v30 = vpop.f32.mrb[40].mxu1 }
 0x443   :  { %v11052_v43 = vpop.f32.mrb[41].mxu1 }
 0x444   :  { %v2019_v61 = vpop.f32.mrb[14].mxu0 }
 0x445   :  { %v11041_v36 = vadd.f32 %v10808_v55, %v2019_v61  ;;  %v2021_v40 = vpop.f32.mrb[15].mxu0  ;;  %2283 = vmatmul.mubr.f32.gmra.mrb[120].mxu0 %v6645_v35 }
 0x446   :  { %2287 = vmatprep.mubr.f32.mxu0 %v10596_v20  ;;  %v6647_v20 = vld [vmem:[%s14237_s0 + $0x348] sm:$0xff] }
 0x448   :  { %v2024_v23 = vpop.f32.mrb[16].mxu0 }
 0x449   :  { %v11055_v55 = vadd.f32 %v10826_v3, %v2024_v23  ;;  %v2026_v37 = vpop.f32.mrb[17].mxu0  ;;  %2288 = vmatmul.mubr.f32.gmra.mrb[122].mxu0 %v6646_v34  ;;  %v6648_v3 = vld [vmem:[%s14237_s0 + $0x350] sm:$0xff]  ;;  %v3825_v23 = vld [vmem:[#allocation3] sm:$0xff] }
 0x44a   :  { %2292 = vmatprep.mubr.f32.mxu0 %v6711_v52  ;;  %v11069_v44 = vpop.f32.mrb[42].mxu1  ;;  %v3826_v37 = vld [vmem:[#allocation3 + $0x8] sm:$0xff] }
 0x44b   :  { %v11071_v12 = vpop.f32.mrb[43].mxu1 }
 0x44c   :  { %v2029_v49 = vpop.f32.mrb[18].mxu0 }
 0x44d   :  { %v11064_v31 = vadd.f32 %v10824_v39, %v2029_v49  ;;  %v2031_v60 = vpop.f32.mrb[19].mxu0  ;;  %2293 = vmatmul.mubr.f32.gmra.mrb[124].mxu0 %v6647_v20  ;;  %v7418_v20 = vpack.c.bf16 %v3826_v37, %v3825_v23 }
 0x44e   :  { %2297 = vmatprep.mubr.f32.mxu0 %v6712_v54 }
 0x44f   :  { %7419 = vmatpush1.bf16.msra.mxu1 %v7418_v20 }
 0x450   :  { %v2034_v6 = vpop.f32.mrb[20].mxu0 }
 0x451   :  { %v11074_v11 = vadd.f32 %v10845_v15, %v2034_v6  ;;  %v2036_v50 = vpop.f32.mrb[21].mxu0  ;;  %2298 = vmatmul.mubr.f32.gmra.mrb[126].mxu0 %v6648_v3  ;;  %v14394_v3 = vmov 0.0|0.0  }
 0x452   :  { %v11079_v28 = vpop.f32.mrb[44].mxu1  ;;  %7420 = vmatprep.subr.bf16.mxu1 %v14394_v3 }
 0x453   :  { %v11081_v35 = vpop.f32.mrb[45].mxu1 }
 0x454   :  { %v2039_v21 = vpop.f32.mrb[22].mxu0 }
 0x455   :  { %v11077_v39 = vadd.f32 %v10843_v47, %v2039_v21  ;;  %v2041_v22 = vpop.f32.mrb[23].mxu0  ;;  %v3827_v21 = vld [vmem:[#allocation3 + $0x10] sm:$0xff] }
 0x456   :  { %v3828_v22 = vld [vmem:[#allocation3 + $0x18] sm:$0xff] }
 0x458   :  { %v2044_v7 = vpop.f32.mrb[24].mxu0 }
 0x459   :  { %v11084_v61 = vadd.f32 %v10857_v27, %v2044_v7  ;;  %v2046_v40 = vpop.f32.mrb[25].mxu0  ;;  %v7421_v7 = vpack.c.bf16 %v3828_v22, %v3827_v21 }
 0x45a   :  { %v11089_v47 = vpop.f32.mrb[46].mxu1 }
 0x45b   :  { %v11091_v49 = vpop.f32.mrb[47].mxu1  ;;  %7422 = vmatpush1.bf16.msra.mxu1 %v7421_v7 }
 0x45c   :  { %v2049_v34 = vpop.f32.mrb[26].mxu0  ;;  %7423 = vmatprep.subr.bf16.mxu1 %v14394_v3 }
 0x45d   :  { %v11087_v15 = vadd.f32 %v10855_v16, %v2049_v34  ;;  %v2051_v52 = vpop.f32.mrb[27].mxu0 }
 0x460   :  { %v2054_v54 = vpop.f32.mrb[28].mxu0 }
 0x461   :  { %v11094_v60 = vadd.f32 %v10869_v56, %v2054_v54  ;;  %v2056_v27 = vpop.f32.mrb[29].mxu0  ;;  %v3829_v54 = vld [vmem:[#allocation3 + $0x20] sm:$0xff] }
 0x462   :  { %v11100_v40 = vpop.f32.mrb[48].mxu1  ;;  %v3830_v27 = vld [vmem:[#allocation3 + $0x28] sm:$0xff] }
 0x463   :  { %14395 = vst [vmem:[#allocation11_spill] sm:$0xff] %v11100_v40  ;;  %v11102_v52 = vpop.f32.mrb[49].mxu1 }
 0x464   :  { %v2059_v6 = vpop.f32.mrb[30].mxu0 }
 0x465   :  { %v11098_v16 = vadd.f32 %v10867_v24, %v2059_v6  ;;  %v2061_v50 = vpop.f32.mrb[31].mxu0  ;;  %v7424_v6 = vpack.c.bf16 %v3830_v27, %v3829_v54 }
 0x467   :  { %7425 = vmatpush1.bf16.msra.mxu1 %v7424_v6 }
 0x468   :  { %v2064_v34 = vpop.f32.mrb[32].mxu0  ;;  %7426 = vmatprep.subr.bf16.mxu1 %v14394_v3 }
 0x469   :  { %v11105_v56 = vadd.f32 %v10881_v63, %v2064_v34  ;;  %v2066_v23 = vpop.f32.mrb[33].mxu0 }
 0x46a   :  { %v11111_v50 = vpop.f32.mrb[50].mxu1 }
 0x46b   :  { %14396 = vst [vmem:[#allocation12_spill] sm:$0xff] %v11111_v50  ;;  %v11113_v22 = vpop.f32.mrb[51].mxu1 }
 0x46c   :  { %v2069_v37 = vpop.f32.mrb[34].mxu0  ;;  %14397 = vst [vmem:[#allocation13_spill] sm:$0xff] %v11113_v22  ;;  %v3834_v22 = vld [vmem:[#allocation3 + $0x48] sm:$0xff] }
 0x46d   :  { %v11109_v24 = vadd.f32 %v10879_v13, %v2069_v37  ;;  %v2071_v20 = vpop.f32.mrb[35].mxu0  ;;  %v3831_v37 = vld [vmem:[#allocation3 + $0x30] sm:$0xff] }
 0x46e   :  { %v3832_v20 = vld [vmem:[#allocation3 + $0x38] sm:$0xff] }
 0x46f   :  { %v7427_v54 = vpack.c.bf16 %v3832_v20, %v3831_v37 }
 0x470   :  { %v2074_v21 = vpop.f32.mrb[36].mxu0 }
 0x471   :  { %v11116_v63 = vadd.f32 %v10893_v53, %v2074_v21  ;;  %v2076_v7 = vpop.f32.mrb[37].mxu0  ;;  %7428 = vmatpush1.bf16.msra.mxu1 %v7427_v54 }
 0x472   :  { %v11122_v27 = vpop.f32.mrb[52].mxu1  ;;  %7429 = vmatprep.subr.bf16.mxu1 %v14394_v3 }
 0x473   :  { %14398 = vst [vmem:[#allocation14_spill] sm:$0xff] %v11122_v27  ;;  %v11124_v6 = vpop.f32.mrb[53].mxu1 }
 0x474   :  { %v2079_v34 = vpop.f32.mrb[38].mxu0  ;;  %14399 = vst [vmem:[#allocation15_spill] sm:$0xff] %v11124_v6  ;;  %v3836_v6 = vld [vmem:[#allocation3 + $0x58] sm:$0xff] }
 0x475   :  { %v11120_v13 = vadd.f32 %v10891_v29, %v2079_v34  ;;  %v2081_v23 = vpop.f32.mrb[39].mxu0 }
 0x476   :  { %v3833_v23 = vld [vmem:[#allocation3 + $0x40] sm:$0xff] }
 0x477   :  { %v7430_v37 = vpack.c.bf16 %v3834_v22, %v3833_v23 }
 0x478   :  { %v2084_v50 = vpop.f32.mrb[40].mxu0 }
 0x479   :  { %v11127_v53 = vadd.f32 %v10905_v9, %v2084_v50  ;;  %v2086_v21 = vpop.f32.mrb[41].mxu0  ;;  %7431 = vmatpush1.bf16.msra.mxu1 %v7430_v37 }
 0x47a   :  { %v11133_v20 = vpop.f32.mrb[54].mxu1  ;;  %7432 = vmatprep.subr.bf16.mxu1 %v14394_v3 }
 0x47b   :  { %14400 = vst [vmem:[#allocation16_spill] sm:$0xff] %v11133_v20  ;;  %v11135_v54 = vpop.f32.mrb[55].mxu1 }
 0x47c   :  { %v2089_v7 = vpop.f32.mrb[42].mxu0  ;;  %14401 = vst [vmem:[#allocation17_spill] sm:$0xff] %v11135_v54  ;;  %v3838_v54 = vld [vmem:[#allocation3 + $0x68] sm:$0xff] }
 0x47d   :  { %v11131_v29 = vadd.f32 %v10903_v62, %v2089_v7  ;;  %v2091_v34 = vpop.f32.mrb[43].mxu0 }
 0x47e   :  { %v3835_v34 = vld [vmem:[#allocation3 + $0x50] sm:$0xff] }
 0x47f   :  { %v7433_v22 = vpack.c.bf16 %v3836_v6, %v3835_v34 }
 0x480   :  { %v2094_v27 = vpop.f32.mrb[44].mxu0 }
 0x481   :  { %v11138_v9 = vadd.f32 %v10917_v38, %v2094_v27  ;;  %v2096_v50 = vpop.f32.mrb[45].mxu0  ;;  %7434 = vmatpush1.bf16.msra.mxu1 %v7433_v22 }
 0x482   :  { %v11144_v23 = vpop.f32.mrb[56].mxu1  ;;  %7435 = vmatprep.subr.bf16.mxu1 %v14394_v3 }
 0x483   :  { %14402 = vst [vmem:[#allocation18_spill] sm:$0xff] %v11144_v23  ;;  %v11146_v37 = vpop.f32.mrb[57].mxu1 }
 0x484   :  { %v2099_v21 = vpop.f32.mrb[46].mxu0  ;;  %14403 = vst [vmem:[#allocation19_spill] sm:$0xff] %v11146_v37  ;;  %v3840_v37 = vld [vmem:[#allocation3 + $0x78] sm:$0xff] }
 0x485   :  { %v11142_v62 = vadd.f32 %v10915_v41, %v2099_v21  ;;  %v2101_v7 = vpop.f32.mrb[47].mxu0 }
 0x486   :  { %v3837_v7 = vld [vmem:[#allocation3 + $0x60] sm:$0xff] }
 0x487   :  { %v7436_v6 = vpack.c.bf16 %v3838_v54, %v3837_v7 }
 0x488   :  { %v2104_v20 = vpop.f32.mrb[48].mxu0 }
 0x489   :  { %v11149_v38 = vadd.f32 %v10929_v45, %v2104_v20  ;;  %v2106_v27 = vpop.f32.mrb[49].mxu0  ;;  %7437 = vmatpush1.bf16.msra.mxu1 %v7436_v6 }
 0x48a   :  { %v11155_v34 = vpop.f32.mrb[58].mxu1  ;;  %7438 = vmatprep.subr.bf16.mxu1 %v14394_v3 }
 0x48b   :  { %14404 = vst [vmem:[#allocation20_spill] sm:$0xff] %v11155_v34  ;;  %v11157_v22 = vpop.f32.mrb[59].mxu1 }
 0x48c   :  { %v2109_v50 = vpop.f32.mrb[50].mxu0  ;;  %14405 = vst [vmem:[#allocation21_spill] sm:$0xff] %v11157_v22  ;;  %v3842_v22 = vld [vmem:[#allocation3 + $0x88] sm:$0xff] }
 0x48d   :  { %v11153_v41 = vadd.f32 %v10927_v51, %v2109_v50  ;;  %v2111_v21 = vpop.f32.mrb[51].mxu0 }
 0x48e   :  { %v3839_v21 = vld [vmem:[#allocation3 + $0x70] sm:$0xff]  ;;  %v11166_v7 = vpop.f32.mrb[60].mxu1 }
 0x48f   :  { %v7439_v54 = vpack.c.bf16 %v3840_v37, %v3839_v21  ;;  %14406 = vst [vmem:[#allocation22_spill] sm:$0xff] %v11166_v7  ;;  %v11168_v6 = vpop.f32.mrb[61].mxu1 }
 0x490   :  { %v2114_v23 = vpop.f32.mrb[52].mxu0  ;;  %14407 = vst [vmem:[#allocation23_spill] sm:$0xff] %v11168_v6  ;;  %v3844_v6 = vld [vmem:[#allocation3 + $0x98] sm:$0xff] }
 0x491   :  { %v11160_v45 = vadd.f32 %v10941_v2, %v2114_v23  ;;  %v2116_v20 = vpop.f32.mrb[53].mxu0  ;;  %7440 = vmatpush1.bf16.msra.mxu1 %v7439_v54 }
 0x492   :  { %7441 = vmatprep.subr.bf16.mxu1 %v14394_v3 }
 0x494   :  { %v2119_v27 = vpop.f32.mrb[54].mxu0 }
 0x495   :  { %v11164_v51 = vadd.f32 %v10939_v59, %v2119_v27  ;;  %v2121_v50 = vpop.f32.mrb[55].mxu0 }
 0x496   :  { %v3841_v50 = vld [vmem:[#allocation3 + $0x80] sm:$0xff] }
 0x497   :  { %v7442_v37 = vpack.c.bf16 %v3842_v22, %v3841_v50  ;;  %v2761_v22 = vmul.f32 %v10987_v4, %v10987_v4 }
 0x498   :  { %v2124_v34 = vpop.f32.mrb[56].mxu0 }
 0x499   :  { %v11171_v2 = vadd.f32 %v10953_v14, %v2124_v34  ;;  %v2126_v23 = vpop.f32.mrb[57].mxu0  ;;  %7443 = vmatpush1.bf16.msra.mxu1 %v7442_v37  ;;  %v2760_v37 = vmul.f32 %v10980_v48, %v10980_v48 }
 0x49a   :  { %7444 = vmatprep.subr.bf16.mxu1 %v14394_v3 }
 0x49b   :  { %14408 = vst [vmem:[#allocation24_spill] sm:$0xff] %v11171_v2  ;;  %v11177_v21 = vpop.f32.mrb[62].mxu1 }
 0x49c   :  { %v2129_v20 = vpop.f32.mrb[58].mxu0  ;;  %14409 = vst [vmem:[#allocation25_spill] sm:$0xff] %v11177_v21  ;;  %v11179_v54 = vpop.f32.mrb[63].mxu1 }
 0x49d   :  { %v11175_v59 = vadd.f32 %v10951_v18, %v2129_v20  ;;  %v2131_v27 = vpop.f32.mrb[59].mxu0  ;;  %14410 = vst [vmem:[#allocation26_spill] sm:$0xff] %v11179_v54  ;;  %v2764_v54 = vmul.f32 %v11016_v8, %v11016_v8 }
 0x49e   :  { %v3843_v27 = vld [vmem:[#allocation3 + $0x90] sm:$0xff] }
 0x49f   :  { %v7445_v50 = vpack.c.bf16 %v3844_v6, %v3843_v27  ;;  %v2763_v6 = vmul.f32 %v11005_v57, %v11005_v57 }
 0x4a0   :  { %v2134_v7 = vpop.f32.mrb[60].mxu0 }
 0x4a1   :  { %v11182_v14 = vadd.f32 %v10965_v42, %v2134_v7  ;;  %v2136_v34 = vpop.f32.mrb[61].mxu0  ;;  %v2762_v42 = vmul.f32 %v10998_v0, %v10998_v0  ;;  %7446 = vmatpush1.bf16.msra.mxu1 %v7445_v50 }
 0x4a2   :  { %v2690_v34 = vadd.f32 %v10987_v4, %v10980_v48  ;;  %7447 = vmatprep.subr.bf16.mxu1 %v14394_v3 }
 0x4a4   :  { %v2139_v23 = vpop.f32.mrb[62].mxu0  ;;  %v2691_v27 = vadd.f32 %v2690_v34, %v10998_v0 }
 0x4a5   :  { %v11186_v18 = vadd.f32 %v10963_v5, %v2139_v23  ;;  %v2141_v20 = vpop.f32.mrb[63].mxu0 }
 0x4a6   :  { %v2824_v20 = vadd.f32 %v2761_v22, %v2760_v37  ;;  %v2692_v40 = vadd.f32 %v2691_v27, %v11005_v57  ;;  %v2765_v22 = vmul.f32 %v11023_v17, %v11023_v17 }
 0x4a8   :  { %v2144_v7 = vpop.f32.mrb[64].mxu0  ;;  %v2825_v21 = vadd.f32 %v2824_v20, %v2762_v42  ;;  %v2693_v37 = vadd.f32 %v2692_v40, %v11016_v8  ;;  %v2766_v42 = vmul.f32 %v11034_v33, %v11034_v33  ;;  %v2768_v40 = vmul.f32 %v11055_v55, %v11055_v55 }
 0x4a9   :  { %v11197_v5 = vadd.f32 %v10977_v32, %v2144_v7  ;;  %v2146_v23 = vpop.f32.mrb[65].mxu0 }
 0x4aa   :  { %v2826_v7 = vadd.f32 %v2825_v21, %v2763_v6  ;;  %v2694_v20 = vadd.f32 %v2693_v37, %v11023_v17  ;;  %v2767_v21 = vmul.f32 %v11041_v36, %v11041_v36 }
 0x4ac   :  { %v2149_v50 = vpop.f32.mrb[66].mxu0  ;;  %v2827_v23 = vadd.f32 %v2826_v7, %v2764_v54  ;;  %v2695_v6 = vadd.f32 %v2694_v20, %v11034_v33 }
 0x4ad   :  { %v11207_v4 = vadd.f32 %v10975_v19, %v2149_v50  ;;  %v2151_v32 = vpop.f32.mrb[67].mxu0 }
 0x4ae   :  { %v2828_v19 = vadd.f32 %v2827_v23, %v2765_v22  ;;  %v2696_v32 = vadd.f32 %v2695_v6, %v11041_v36  ;;  %v2769_v22 = vmul.f32 %v11064_v31, %v11064_v31 }
 0x4af   :  { %14411 = vst [vmem:[#allocation27_spill] sm:$0xff] %v11207_v4 }
 0x4b0   :  { %v2154_v34 = vpop.f32.mrb[68].mxu0  ;;  %v2829_v50 = vadd.f32 %v2828_v19, %v2766_v42  ;;  %v2697_v23 = vadd.f32 %v2696_v32, %v11055_v55  ;;  %v2770_v42 = vmul.f32 %v11074_v11, %v11074_v11 }
 0x4b1   :  { %v11216_v0 = vadd.f32 %v10995_v46, %v2154_v34  ;;  %v2156_v27 = vpop.f32.mrb[69].mxu0 }
 0x4b2   :  { %v2830_v46 = vadd.f32 %v2829_v50, %v2767_v21  ;;  %v2698_v27 = vadd.f32 %v2697_v23, %v11064_v31  ;;  %v2771_v21 = vmul.f32 %v11077_v39, %v11077_v39 }
 0x4b4   :  { %v2159_v54 = vpop.f32.mrb[70].mxu0  ;;  %v2831_v34 = vadd.f32 %v2830_v46, %v2768_v40  ;;  %v2699_v50 = vadd.f32 %v2698_v27, %v11074_v11  ;;  %v2772_v40 = vmul.f32 %v11084_v61, %v11084_v61 }
 0x4b5   :  { %v11225_v7 = vadd.f32 %v10993_v10, %v2159_v54  ;;  %v2161_v37 = vpop.f32.mrb[71].mxu0 }
 0x4b6   :  { %v2832_v10 = vadd.f32 %v2831_v34, %v2769_v22  ;;  %v2700_v37 = vadd.f32 %v2699_v50, %v11077_v39  ;;  %v2773_v22 = vmul.f32 %v11087_v15, %v11087_v15 }
 0x4b8   :  { %v2164_v20 = vpop.f32.mrb[72].mxu0  ;;  %v2833_v54 = vadd.f32 %v2832_v10, %v2770_v42  ;;  %v2701_v34 = vadd.f32 %v2700_v37, %v11084_v61  ;;  %v2774_v42 = vmul.f32 %v11094_v60, %v11094_v60 }
 0x4b9   :  { %v11234_v19 = vadd.f32 %v11013_v58, %v2164_v20  ;;  %v2166_v6 = vpop.f32.mrb[73].mxu0 }
 0x4ba   :  { %v2834_v58 = vadd.f32 %v2833_v54, %v2771_v21  ;;  %v2702_v6 = vadd.f32 %v2701_v34, %v11087_v15  ;;  %v2775_v21 = vmul.f32 %v11098_v16, %v11098_v16 }
 0x4bb   :  { %14412 = vst [vmem:[#allocation28_spill] sm:$0xff] %v11234_v19 }
 0x4bc   :  { %v2169_v32 = vpop.f32.mrb[74].mxu0  ;;  %v2835_v20 = vadd.f32 %v2834_v58, %v2772_v40  ;;  %v2703_v54 = vadd.f32 %v2702_v6, %v11094_v60  ;;  %v2776_v40 = vmul.f32 %v11105_v56, %v11105_v56 }
 0x4bd   :  { %v11243_v46 = vadd.f32 %v11011_v1, %v2169_v32  ;;  %v2171_v23 = vpop.f32.mrb[75].mxu0 }
 0x4be   :  { %v2836_v1 = vadd.f32 %v2835_v20, %v2773_v22  ;;  %v2704_v23 = vadd.f32 %v2703_v54, %v11098_v16  ;;  %v2777_v22 = vmul.f32 %v11109_v24, %v11109_v24 }
 0x4bf   :  { %14413 = vst [vmem:[#allocation29_spill] sm:$0xff] %v11243_v46 }
 0x4c0   :  { %v2174_v27 = vpop.f32.mrb[76].mxu0  ;;  %v2837_v32 = vadd.f32 %v2836_v1, %v2774_v42  ;;  %v2705_v20 = vadd.f32 %v2704_v23, %v11105_v56  ;;  %v2778_v42 = vmul.f32 %v11116_v63, %v11116_v63 }
 0x4c1   :  { %v11252_v10 = vadd.f32 %v11031_v26, %v2174_v27  ;;  %v2176_v50 = vpop.f32.mrb[77].mxu0 }
 0x4c2   :  { %v2838_v26 = vadd.f32 %v2837_v32, %v2775_v21  ;;  %v2706_v50 = vadd.f32 %v2705_v20, %v11109_v24  ;;  %v2779_v21 = vmul.f32 %v11120_v13, %v11120_v13 }
 0x4c3   :  { %14414 = vst [vmem:[#allocation30_spill] sm:$0xff] %v11252_v10 }
 0x4c4   :  { %v2179_v37 = vpop.f32.mrb[78].mxu0  ;;  %v2839_v27 = vadd.f32 %v2838_v26, %v2776_v40  ;;  %v2707_v32 = vadd.f32 %v2706_v50, %v11116_v63  ;;  %v2780_v40 = vmul.f32 %v11127_v53, %v11127_v53 }
 0x4c5   :  { %v11261_v58 = vadd.f32 %v11029_v25, %v2179_v37  ;;  %v2181_v34 = vpop.f32.mrb[79].mxu0 }
 0x4c6   :  { %v2840_v25 = vadd.f32 %v2839_v27, %v2777_v22  ;;  %v2708_v34 = vadd.f32 %v2707_v32, %v11120_v13  ;;  %v2781_v22 = vmul.f32 %v11131_v29, %v11131_v29 }
 0x4c7   :  { %14415 = vst [vmem:[#allocation31_spill] sm:$0xff] %v11261_v58 }
 0x4c8   :  { %v2184_v6 = vpop.f32.mrb[80].mxu0  ;;  %v2841_v37 = vadd.f32 %v2840_v25, %v2778_v42  ;;  %v2709_v27 = vadd.f32 %v2708_v34, %v11127_v53  ;;  %v2782_v42 = vmul.f32 %v11138_v9, %v11138_v9 }
 0x4c9   :  { %v11270_v1 = vadd.f32 %v11052_v43, %v2184_v6  ;;  %v2186_v54 = vpop.f32.mrb[81].mxu0 }
 0x4ca   :  { %v2842_v43 = vadd.f32 %v2841_v37, %v2779_v21  ;;  %v2710_v54 = vadd.f32 %v2709_v27, %v11131_v29  ;;  %v2783_v21 = vmul.f32 %v11142_v62, %v11142_v62 }
 0x4cc   :  { %v2189_v23 = vpop.f32.mrb[82].mxu0  ;;  %v2843_v6 = vadd.f32 %v2842_v43, %v2780_v40  ;;  %v2711_v37 = vadd.f32 %v2710_v54, %v11138_v9  ;;  %v2784_v40 = vmul.f32 %v11149_v38, %v11149_v38 }
 0x4cd   :  { %v11279_v26 = vadd.f32 %v11050_v30, %v2189_v23  ;;  %v2191_v20 = vpop.f32.mrb[83].mxu0 }
 0x4ce   :  { %v2844_v30 = vadd.f32 %v2843_v6, %v2781_v22  ;;  %v2712_v20 = vadd.f32 %v2711_v37, %v11142_v62  ;;  %v2785_v22 = vmul.f32 %v11153_v41, %v11153_v41 }
 0x4d0   :  { %v2194_v50 = vpop.f32.mrb[84].mxu0  ;;  %v2845_v23 = vadd.f32 %v2844_v30, %v2782_v42  ;;  %v2713_v6 = vadd.f32 %v2712_v20, %v11149_v38  ;;  %v2786_v42 = vmul.f32 %v11160_v45, %v11160_v45 }
 0x4d1   :  { %v11288_v25 = vadd.f32 %v11071_v12, %v2194_v50  ;;  %v2196_v32 = vpop.f32.mrb[85].mxu0 }
 0x4d2   :  { %v2846_v12 = vadd.f32 %v2845_v23, %v2783_v21  ;;  %v2714_v32 = vadd.f32 %v2713_v6, %v11153_v41  ;;  %v2787_v21 = vmul.f32 %v11164_v51, %v11164_v51 }
 0x4d4   :  { %v2199_v34 = vpop.f32.mrb[86].mxu0  ;;  %v2847_v50 = vadd.f32 %v2846_v12, %v2784_v40  ;;  %v2715_v23 = vadd.f32 %v2714_v32, %v11160_v45  ;;  %v2788_v40 = vmul.f32 %v11171_v2, %v11171_v2 }
 0x4d5   :  { %v11297_v43 = vadd.f32 %v11069_v44, %v2199_v34  ;;  %v2201_v27 = vpop.f32.mrb[87].mxu0 }
 0x4d6   :  { %v2848_v44 = vadd.f32 %v2847_v50, %v2785_v22  ;;  %v2716_v27 = vadd.f32 %v2715_v23, %v11164_v51  ;;  %v2789_v22 = vmul.f32 %v11175_v59, %v11175_v59 }
 0x4d7   :  { %14416 = vst [vmem:[#allocation32_spill] sm:$0xff] %v11297_v43 }
 0x4d8   :  { %v2204_v54 = vpop.f32.mrb[88].mxu0  ;;  %v2849_v34 = vadd.f32 %v2848_v44, %v2786_v42  ;;  %v2717_v50 = vadd.f32 %v2716_v27, %v11171_v2  ;;  %v2790_v42 = vmul.f32 %v11182_v14, %v11182_v14 }
 0x4d9   :  { %v11306_v30 = vadd.f32 %v11081_v35, %v2204_v54  ;;  %v2206_v37 = vpop.f32.mrb[89].mxu0 }
 0x4da   :  { %v2850_v35 = vadd.f32 %v2849_v34, %v2787_v21  ;;  %v2718_v37 = vadd.f32 %v2717_v50, %v11175_v59  ;;  %v2791_v21 = vmul.f32 %v11186_v18, %v11186_v18 }
 0x4db   :  { %14417 = vst [vmem:[#allocation33_spill] sm:$0xff] %v11306_v30 }
 0x4dc   :  { %v2209_v20 = vpop.f32.mrb[90].mxu0  ;;  %v2851_v54 = vadd.f32 %v2850_v35, %v2788_v40  ;;  %v2719_v27 = vadd.f32 %v2718_v37, %v11182_v14  ;;  %v2792_v35 = vmul.f32 %v11197_v5, %v11197_v5  ;;  %v2793_v37 = vmul.f32 %v11207_v4, %v11207_v4 }
 0x4dd   :  { %v11315_v12 = vadd.f32 %v11079_v28, %v2209_v20  ;;  %v2211_v6 = vpop.f32.mrb[91].mxu0  ;;  %v3845_v28 = vld [vmem:[#allocation3 + $0xa0] sm:$0xff]  ;;  %v3846_v20 = vld [vmem:[#allocation3 + $0xa8] sm:$0xff] }
 0x4de   :  { %v2852_v6 = vadd.f32 %v2851_v54, %v2789_v22  ;;  %v7448_v34 = vpack.c.bf16 %v3846_v20, %v3845_v28  ;;  %v2720_v50 = vadd.f32 %v2719_v27, %v11186_v18  ;;  %v3847_v22 = vld [vmem:[#allocation3 + $0xb0] sm:$0xff]  ;;  %v3848_v54 = vld [vmem:[#allocation3 + $0xb8] sm:$0xff]  ;;  %v3953_v28 = vld [vmem:[#allocation3 + $0x400] sm:$0xff] }
 0x4df   :  { %14418 = vst [vmem:[#allocation34_spill] sm:$0xff] %v11315_v12  ;;  %v3954_v20 = vld [vmem:[#allocation3 + $0x408] sm:$0xff] }
 0x4e0   :  { %v2214_v32 = vpop.f32.mrb[92].mxu0  ;;  %v2853_v40 = vadd.f32 %v2852_v6, %v2790_v42  ;;  %7449 = vmatpush1.bf16.msra.mxu1 %v7448_v34  ;;  %v7451_v42 = vpack.c.bf16 %v3848_v54, %v3847_v22  ;;  %v2721_v6 = vadd.f32 %v2720_v50, %v11197_v5  ;;  %v11339_v34 = vpack.c.bf16 %v3954_v20, %v3953_v28  ;;  %v3849_v22 = vld [vmem:[#allocation3 + $0xc0] sm:$0xff]  ;;  %v3850_v54 = vld [vmem:[#allocation3 + $0xc8] sm:$0xff]  ;;  %v3956_v28 = vld [vmem:[#allocation3 + $0x418] sm:$0xff] }
 0x4e1   :  { %v11324_v44 = vadd.f32 %v11091_v49, %v2214_v32  ;;  %v2216_v23 = vpop.f32.mrb[93].mxu0  ;;  %7450 = vmatprep.subr.bf16.mxu1 %v14394_v3 }
 0x4e2   :  { %v2854_v23 = vadd.f32 %v2853_v40, %v2791_v21  ;;  %14419 = vst [vmem:[#allocation35_spill] sm:$0xff] %v11339_v34  ;;  %7610 = vmatprep.subr.bf16.mxu0 %v11339_v34 }
 0x4e3   :  { %7612 = vmatpush3.bf16.msra.mxu0 %v11339_v34  ;;  %v3852_v34 = vld [vmem:[#allocation3 + $0xd8] sm:$0xff] }
 0x4e4   :  { %v2219_v2 = vpop.f32.mrb[94].mxu0  ;;  %v2855_v27 = vadd.f32 %v2854_v23, %v2792_v35  ;;  %7452 = vmatpush1.bf16.msra.mxu1 %v7451_v42  ;;  %v2795_v35 = vmul.f32 %v11225_v7, %v11225_v7  ;;  %v7454_v23 = vpack.c.bf16 %v3850_v54, %v3849_v22  ;;  %v3955_v42 = vld [vmem:[#allocation3 + $0x410] sm:$0xff] }
 0x4e5   :  { %v11333_v49 = vadd.f32 %v11089_v47, %v2219_v2  ;;  %v2221_v32 = vpop.f32.mrb[95].mxu0  ;;  %v2794_v47 = vmul.f32 %v11216_v0, %v11216_v0  ;;  %7453 = vmatprep.subr.bf16.mxu1 %v14394_v3  ;;  %v3851_v54 = vld [vmem:[#allocation3 + $0xd0] sm:$0xff] }
 0x4e6   :  { %v2722_v32 = vadd.f32 %v2721_v6, %v11207_v4  ;;  %v2856_v50 = vadd.f32 %v2855_v27, %v2793_v37  ;;  %v14421_v27 = vld [vmem:[#allocation11_spill] sm:$0xff] }
 0x4e8   :  { %v2224_v2 = vpop.f32.mrb[96].mxu0  ;;  %v2723_v20 = vadd.f32 %v2722_v32, %v11216_v0  ;;  %v2857_v6 = vadd.f32 %v2856_v50, %v2794_v47  ;;  %7455 = vmatpush1.bf16.msra.mxu1 %v7454_v23  ;;  %v2797_v47 = vmul.f32 %v11243_v46, %v11243_v46  ;;  %v7457_v50 = vpack.c.bf16 %v3852_v34, %v3851_v54  ;;  %v3957_v23 = vld [vmem:[#allocation3 + $0x420] sm:$0xff] }
 0x4e9   :  { %v11345_v21 = vadd.f32 %v11102_v52, %v2224_v2  ;;  %v2226_v40 = vpop.f32.mrb[97].mxu0  ;;  %v11353_v52 = vpack.c.bf16 %v3956_v28, %v3955_v42  ;;  %v2796_v2 = vmul.f32 %v11234_v19, %v11234_v19  ;;  %7456 = vmatprep.subr.bf16.mxu1 %v14394_v3  ;;  %v3958_v42 = vld [vmem:[#allocation3 + $0x428] sm:$0xff] }
 0x4ea   :  { %v2724_v37 = vadd.f32 %v2723_v20, %v11225_v7  ;;  %v2858_v32 = vadd.f32 %v2857_v6, %v2795_v35  ;;  %v11367_v20 = vpack.c.bf16 %v3958_v42, %v3957_v23  ;;  %v14423_v6 = vld [vmem:[#allocation13_spill] sm:$0xff]  ;;  %v11394_v42 = vld [vmem:[#allocation3 + $0x430] sm:$0xff] }
 0x4eb   :  { %14420 = vst [vmem:[#allocation36_spill] sm:$0xff] %v11353_v52  ;;  %7614 = vmatprep.subr.bf16.mxu0 %v11353_v52 }
 0x4ec   :  { %v2229_v40 = vpop.f32.mrb[98].mxu0  ;;  %7616 = vmatpush3.bf16.msra.mxu0 %v11353_v52  ;;  %v2725_v28 = vadd.f32 %v2724_v37, %v11234_v19  ;;  %14422 = vst [vmem:[#allocation11_spill] sm:$0xff] %v11367_v20  ;;  %7458 = vmatpush1.bf16.msra.mxu1 %v7457_v50  ;;  %v11381_v37 = vld [vmem:[#allocation3 + $0xe0] sm:$0xff]  ;;  %v11389_v50 = vmul.f32 %v11261_v58, %v11261_v58  ;;  %v14426_v52 = vld [vmem:[#allocation12_spill] sm:$0xff] }
 0x4ed   :  { %v11359_v4 = vadd.f32 %v14421_v27, %v2229_v40  ;;  %v2231_v22 = vpop.f32.mrb[99].mxu0  ;;  %v2859_v40 = vadd.f32 %v2858_v32, %v2796_v2  ;;  %v11371_v27 = vmul.f32 %v11252_v10, %v11252_v10  ;;  %7459 = vmatprep.subr.bf16.mxu1 %v14394_v3  ;;  %7618 = vmatprep.subr.bf16.mxu0 %v11367_v20  ;;  %v11383_v2 = vld [vmem:[#allocation3 + $0xe8] sm:$0xff] }
 0x4ee   :  { %v11374_v35 = vadd.f32 %v2725_v28, %v11243_v46  ;;  %v11396_v28 = vld [vmem:[#allocation3 + $0x438] sm:$0xff] }
 0x4ef   :  { %v11385_v32 = vadd.f32 %v2859_v40, %v2797_v47  ;;  %v11478_v40 = vpack.c.bf16 %v11396_v28, %v11394_v42  ;;  %v3855_v42 = vld [vmem:[#allocation3 + $0xf0] sm:$0xff]  ;;  %v2801_v28 = vmul.f32 %v11279_v26, %v11279_v26 }
 0x4f0   :  { %v2234_v22 = vpop.f32.mrb[100].mxu0  ;;  %7620 = vmatpush3.bf16.msra.mxu0 %v11367_v20  ;;  %v2727_v47 = vadd.f32 %v11374_v35, %v11252_v10  ;;  %v14425_v20 = vpack.c.bf16 %v11383_v2, %v11381_v37  ;;  %v3962_v37 = vld [vmem:[#allocation3 + $0x448] sm:$0xff] }
 0x4f1   :  { %v11377_v34 = vadd.f32 %v14423_v6, %v2234_v22  ;;  %v2236_v54 = vpop.f32.mrb[101].mxu0  ;;  %v14266_v22 = vmov 0.0   ;;  %14424 = vst [vmem:[#allocation13_spill] sm:$0xff] %v11478_v40  ;;  %v2861_v6 = vadd.f32 %v11385_v32, %v11371_v27  ;;  %7622 = vmatprep.subr.bf16.mxu0 %v11478_v40  ;;  %v3856_v27 = vld [vmem:[#allocation3 + $0xf8] sm:$0xff] }
 0x4f2   :  { %3106 = vst [vmem:[#allocation2] sm:$0xff] %v14266_v22  ;;  %3107 = vst [vmem:[#allocation2 + $0x8] sm:$0xff] %v14266_v22  ;;  %v2800_v54 = vmul.f32 %v11270_v1, %v11270_v1  ;;  %7461 = vmatpush1.bf16.msra.mxu1 %v14425_v20  ;;  %v3961_v20 = vld [vmem:[#allocation3 + $0x440] sm:$0xff]  ;;  %v7463_v2 = vpack.c.bf16 %v3856_v27, %v3855_v42  ;;  %v3963_v42 = vld [vmem:[#allocation3 + $0x450] sm:$0xff] }
 0x4f3   :  { %3108 = vst [vmem:[#allocation2 + $0x10] sm:$0x3] %v14266_v22  ;;  %3109 = vst [vmem:[#allocation2 + $0x1b0] sm:$0xff] %v14266_v22  ;;  %7462 = vmatprep.subr.bf16.mxu1 %v14394_v3  ;;  %v2862_v32 = vadd.f32 %v2861_v6, %v11389_v50  ;;  %v14429_v6 = vld [vmem:[#allocation15_spill] sm:$0xff]  ;;  %v3964_v27 = vld [vmem:[#allocation3 + $0x458] sm:$0xff] }
 0x4f4   :  { %3110 = vst [vmem:[#allocation2 + $0x1b8] sm:$0xff] %v14266_v22  ;;  %3111 = vst [vmem:[#allocation2 + $0x1c0] sm:$0x3] %v14266_v22  ;;  %v2239_v23 = vpop.f32.mrb[102].mxu0  ;;  %7624 = vmatpush3.bf16.msra.mxu0 %v11478_v40 }
 0x4f5   :  { %3113 = vst [vmem:[#allocation2 + $0x198] sm:$0xff] %v14266_v22  ;;  %3114 = vst [vmem:[#allocation2 + $0x1a0] sm:$0xff] %v14266_v22  ;;  %v11489_v46 = vadd.f32 %v14426_v52, %v2239_v23  ;;  %v2241_v35 = vpop.f32.mrb[103].mxu0  ;;  %v11498_v23 = vpack.c.bf16 %v3962_v37, %v3961_v20  ;;  %v11512_v20 = vpack.c.bf16 %v3964_v27, %v3963_v42  ;;  %v3966_v42 = vld [vmem:[#allocation3 + $0x468] sm:$0xff] }
 0x4f6   :  { %3115 = vst [vmem:[#allocation2 + $0x1a8] sm:$0x3] %v14266_v22  ;;  %3116 = vst [vmem:[#allocation2 + $0x348] sm:$0xff] %v14266_v22  ;;  %v2802_v35 = vmul.f32 %v11288_v25, %v11288_v25  ;;  %7464 = vmatpush1.bf16.msra.mxu1 %v7463_v2  ;;  %v2804_v37 = vmul.f32 %v11306_v30, %v11306_v30 }
 0x4f7   :  { %3117 = vst [vmem:[#allocation2 + $0x350] sm:$0xff] %v14266_v22  ;;  %3118 = vst [vmem:[#allocation2 + $0x358] sm:$0x3] %v14266_v22  ;;  %7626 = vmatprep.subr.bf16.mxu0 %v11498_v23  ;;  %7465 = vmatprep.subr.bf16.mxu1 %v14394_v3 }
 0x4f8   :  { %3120 = vst [vmem:[#allocation2 + $0x18] sm:$0x1] %v14266_v22  ;;  %3121 = vst [vmem:[#allocation2 + $0x30] sm:$0x1] %v14266_v22  ;;  %7628 = vmatpush3.bf16.msra.mxu0 %v11498_v23 }
 0x4f9   :  { %3122 = vst [vmem:[#allocation2 + $0x48] sm:$0x1] %v14266_v22  ;;  %3123 = vst [vmem:[#allocation2 + $0x60] sm:$0x1] %v14266_v22  ;;  %v3312_v40 = vld [vmem:[#allocation2 + $0x1] sm:$0xff]  ;;  %7630 = vmatprep.subr.bf16.mxu0 %v11512_v20 }
 0x4fa   :  { %3124 = vst [vmem:[#allocation2 + $0x78] sm:$0x1] %v14266_v22  ;;  %3125 = vst [vmem:[#allocation2 + $0x90] sm:$0x1] %v14266_v22  ;;  %4033 = vmatprep.mubr.f32.mxu1 %v3312_v40  ;;  %v3313_v40 = vld [vmem:[#allocation2 + $0x9] sm:$0xff] }
 0x4fb   :  { %3126 = vst [vmem:[#allocation2 + $0xa8] sm:$0x1] %v14266_v22  ;;  %3127 = vst [vmem:[#allocation2 + $0xc0] sm:$0x1] %v14266_v22 }
 0x4fc   :  { %3128 = vst [vmem:[#allocation2 + $0xd8] sm:$0x1] %v14266_v22  ;;  %3129 = vst [vmem:[#allocation2 + $0xf0] sm:$0x1] %v14266_v22  ;;  %7632 = vmatpush3.bf16.msra.mxu0 %v11512_v20 }
 0x4fd   :  { %3130 = vst [vmem:[#allocation2 + $0x108] sm:$0x1] %v14266_v22  ;;  %3131 = vst [vmem:[#allocation2 + $0x120] sm:$0x1] %v14266_v22 }
 0x4fe   :  { %3132 = vst [vmem:[#allocation2 + $0x138] sm:$0x1] %v14266_v22  ;;  %3133 = vst [vmem:[#allocation2 + $0x150] sm:$0x1] %v14266_v22 }
 0x4ff   :  { %3134 = vst [vmem:[#allocation2 + $0x168] sm:$0x1] %v14266_v22  ;;  %3135 = vst [vmem:[#allocation2 + $0x180] sm:$0x1] %v14266_v22 }
 0x500   :  { %3136 = vst [vmem:[#allocation2 + $0x1c8] sm:$0x1] %v14266_v22  ;;  %3137 = vst [vmem:[#allocation2 + $0x1e0] sm:$0x1] %v14266_v22 }
 0x501   :  { %3138 = vst [vmem:[#allocation2 + $0x1f8] sm:$0x1] %v14266_v22  ;;  %3139 = vst [vmem:[#allocation2 + $0x210] sm:$0x1] %v14266_v22 }
 0x502   :  { %3140 = vst [vmem:[#allocation2 + $0x228] sm:$0x1] %v14266_v22  ;;  %3141 = vst [vmem:[#allocation2 + $0x240] sm:$0x1] %v14266_v22 }
 0x503   :  { %3142 = vst [vmem:[#allocation2 + $0x258] sm:$0x1] %v14266_v22  ;;  %3143 = vst [vmem:[#allocation2 + $0x270] sm:$0x1] %v14266_v22 }
 0x504   :  { %3144 = vst [vmem:[#allocation2 + $0x288] sm:$0x1] %v14266_v22  ;;  %3145 = vst [vmem:[#allocation2 + $0x2a0] sm:$0x1] %v14266_v22 }
 0x505   :  { %3146 = vst [vmem:[#allocation2 + $0x2b8] sm:$0x1] %v14266_v22  ;;  %3147 = vst [vmem:[#allocation2 + $0x2d0] sm:$0x1] %v14266_v22 }
 0x506   :  { %3148 = vst [vmem:[#allocation2 + $0x2e8] sm:$0x1] %v14266_v22  ;;  %3149 = vst [vmem:[#allocation2 + $0x300] sm:$0x1] %v14266_v22 }
 0x507   :  { %3150 = vst [vmem:[#allocation2 + $0x318] sm:$0x1] %v14266_v22  ;;  %3151 = vst [vmem:[#allocation2 + $0x330] sm:$0x1] %v14266_v22 }
 0x508   :  { %3152 = vst [vmem:[#allocation2 + $0x29] sm:$0x1] %v14266_v22  ;;  %3153 = vst [vmem:[#allocation2 + $0x41] sm:$0x1] %v14266_v22 }
 0x509   :  { %3154 = vst [vmem:[#allocation2 + $0x59] sm:$0x1] %v14266_v22  ;;  %3155 = vst [vmem:[#allocation2 + $0x71] sm:$0x1] %v14266_v22 }
 0x50a   :  { %3156 = vst [vmem:[#allocation2 + $0x89] sm:$0x1] %v14266_v22  ;;  %3157 = vst [vmem:[#allocation2 + $0xa1] sm:$0x1] %v14266_v22 }
 0x50b   :  { %3158 = vst [vmem:[#allocation2 + $0xb9] sm:$0x1] %v14266_v22  ;;  %3159 = vst [vmem:[#allocation2 + $0xd1] sm:$0x1] %v14266_v22 }
 0x50c   :  { %3160 = vst [vmem:[#allocation2 + $0xe9] sm:$0x1] %v14266_v22  ;;  %3161 = vst [vmem:[#allocation2 + $0x101] sm:$0x1] %v14266_v22 }
 0x50d   :  { %3162 = vst [vmem:[#allocation2 + $0x119] sm:$0x1] %v14266_v22  ;;  %3163 = vst [vmem:[#allocation2 + $0x131] sm:$0x1] %v14266_v22 }
 0x50e   :  { %3164 = vst [vmem:[#allocation2 + $0x149] sm:$0x1] %v14266_v22  ;;  %3165 = vst [vmem:[#allocation2 + $0x161] sm:$0x1] %v14266_v22 }
 0x50f   :  { %3166 = vst [vmem:[#allocation2 + $0x179] sm:$0x1] %v14266_v22  ;;  %3167 = vst [vmem:[#allocation2 + $0x191] sm:$0x1] %v14266_v22 }
 0x510   :  { %3168 = vst [vmem:[#allocation2 + $0x1d9] sm:$0x1] %v14266_v22  ;;  %3169 = vst [vmem:[#allocation2 + $0x1f1] sm:$0x1] %v14266_v22 }
 0x511   :  { %3170 = vst [vmem:[#allocation2 + $0x209] sm:$0x1] %v14266_v22  ;;  %3171 = vst [vmem:[#allocation2 + $0x221] sm:$0x1] %v14266_v22 }
 0x512   :  { %3172 = vst [vmem:[#allocation2 + $0x239] sm:$0x1] %v14266_v22  ;;  %3173 = vst [vmem:[#allocation2 + $0x251] sm:$0x1] %v14266_v22 }
 0x513   :  { %3174 = vst [vmem:[#allocation2 + $0x269] sm:$0x1] %v14266_v22  ;;  %3175 = vst [vmem:[#allocation2 + $0x281] sm:$0x1] %v14266_v22 }
 0x514   :  { %3176 = vst [vmem:[#allocation2 + $0x299] sm:$0x1] %v14266_v22  ;;  %3177 = vst [vmem:[#allocation2 + $0x2b1] sm:$0x1] %v14266_v22 }
 0x515   :  { %3178 = vst [vmem:[#allocation2 + $0x2c9] sm:$0x1] %v14266_v22  ;;  %3179 = vst [vmem:[#allocation2 + $0x2e1] sm:$0x1] %v14266_v22 }
 0x516   :  { %3180 = vst [vmem:[#allocation2 + $0x2f9] sm:$0x1] %v14266_v22  ;;  %3181 = vst [vmem:[#allocation2 + $0x311] sm:$0x1] %v14266_v22 }
 0x517   :  { %3182 = vst [vmem:[#allocation2 + $0x329] sm:$0x1] %v14266_v22  ;;  %3183 = vst [vmem:[#allocation2 + $0x341] sm:$0x1] %v14266_v22  ;;  %v2728_v22 = vadd.f32 %v2727_v47, %v11261_v58  ;;  %v2863_v47 = vadd.f32 %v2862_v32, %v2800_v54  ;;  %v2244_v58 = vpop.f32.mrb[104].mxu0  ;;  %v2803_v54 = vmul.f32 %v11297_v43, %v11297_v43 }
 0x518   :  { %14427 = vst [vmem:[#allocation12_spill] sm:$0xff] %v11489_v46  ;;  %14428 = vst [vmem:[#allocation37_spill] sm:$0xff] %v11498_v23  ;;  %v11504_v10 = vadd.f32 %v14429_v6, %v2244_v58  ;;  %v2246_v19 = vpop.f32.mrb[105].mxu0  ;;  %v14432_v58 = vmov 0.0  }
 0x519   :  { %v2729_v52 = vadd.f32 %v2728_v22, %v11270_v1  ;;  %v2864_v22 = vadd.f32 %v2863_v47, %v2801_v28  ;;  %14431 = vst [vmem:[#allocation38_spill] sm:$0xff] %v11512_v20  ;;  %4034 = vmatmul.mubr.f32.vlgmr.msra.gmra.mrb[64].mxu1 %v14432_v58  ;;  %v2249_v2 = vpop.f32.mrb[106].mxu0 }
 0x51a   :  { %14430 = vst [vmem:[#allocation15_spill] sm:$0xff] %v11504_v10  ;;  %v2251_v6 = vpop.f32.mrb[107].mxu0  ;;  %4038 = vmatprep.mubr.f32.mxu1 %v3313_v40  ;;  %v14436_v40 = vld [vmem:[#allocation17_spill] sm:$0xff] }
 0x51b   :  { %v2730_v50 = vadd.f32 %v2729_v52, %v11279_v26  ;;  %v2865_v19 = vadd.f32 %v2864_v22, %v2802_v35  ;;  %v14433_v52 = vld [vmem:[#allocation14_spill] sm:$0xff]  ;;  %v2805_v22 = vmul.f32 %v11315_v12, %v11315_v12 }
 0x51c   :  { %v11519_v47 = vadd.f32 %v14433_v52, %v2249_v2  ;;  %v2254_v2 = vpop.f32.mrb[108].mxu0  ;;  %v3857_v52 = vld [vmem:[#allocation3 + $0x100] sm:$0xff]  ;;  %v3858_v6 = vld [vmem:[#allocation3 + $0x108] sm:$0xff] }
 0x51d   :  { %v2731_v32 = vadd.f32 %v2730_v50, %v11288_v25  ;;  %v2866_v23 = vadd.f32 %v2865_v19, %v2803_v54  ;;  %v3965_v50 = vld [vmem:[#allocation3 + $0x460] sm:$0xff]  ;;  %4039 = vmatmul.mubr.f32.gmra.mrb[66].mxu1 %v14432_v58  ;;  %v2806_v19 = vmul.f32 %v11324_v44, %v11324_v44  ;;  %v11533_v20 = vadd.f32 %v14436_v40, %v2254_v2  ;;  %v3859_v58 = vld [vmem:[#allocation3 + $0x110] sm:$0xff] }
 0x51e   :  { %14434 = vst [vmem:[#allocation14_spill] sm:$0xff] %v11519_v47  ;;  %v11526_v27 = vpack.c.bf16 %v3966_v42, %v3965_v50  ;;  %v7466_v50 = vpack.c.bf16 %v3858_v6, %v3857_v52  ;;  %v3968_v42 = vld [vmem:[#allocation3 + $0x478] sm:$0xff] }
 0x51f   :  { %v2732_v28 = vadd.f32 %v2731_v32, %v11297_v43  ;;  %v2867_v32 = vadd.f32 %v2866_v23, %v2804_v37  ;;  %v3967_v43 = vld [vmem:[#allocation3 + $0x470] sm:$0xff]  ;;  %v3860_v37 = vld [vmem:[#allocation3 + $0x118] sm:$0xff] }
 0x520   :  { %14435 = vst [vmem:[#allocation39_spill] sm:$0xff] %v11526_v27  ;;  %7634 = vmatprep.subr.bf16.mxu0 %v11526_v27  ;;  %v11537_v23 = vpack.c.bf16 %v3968_v42, %v3967_v43  ;;  %7467 = vmatpush1.bf16.msra.mxu1 %v7466_v50  ;;  %v7469_v2 = vpack.c.bf16 %v3860_v37, %v3859_v58 }
 0x521   :  { %v2733_v35 = vadd.f32 %v2732_v28, %v11306_v30  ;;  %v2256_v28 = vpop.f32.mrb[109].mxu0  ;;  %7636 = vmatpush3.bf16.msra.mxu0 %v11526_v27  ;;  %v2868_v30 = vadd.f32 %v2867_v32, %v2805_v22  ;;  %7468 = vmatprep.subr.bf16.mxu1 %v14394_v3  ;;  %v2808_v43 = vmul.f32 %v11345_v21, %v11345_v21 }
 0x522   :  { %14437 = vst [vmem:[#allocation17_spill] sm:$0xff] %v11537_v23  ;;  %v2259_v40 = vpop.f32.mrb[110].mxu0  ;;  %7638 = vmatprep.subr.bf16.mxu0 %v11537_v23  ;;  %v14438_v28 = vld [vmem:[#allocation16_spill] sm:$0xff]  ;;  %v2809_v42 = vmul.f32 %v11359_v4, %v11359_v4  ;;  %v2810_v37 = vmul.f32 %v11377_v34, %v11377_v34 }
 0x523   :  { %v2734_v54 = vadd.f32 %v2733_v35, %v11315_v12  ;;  %v2807_v12 = vmul.f32 %v11333_v49, %v11333_v49  ;;  %v2869_v52 = vadd.f32 %v2868_v30, %v2806_v19  ;;  %v11548_v22 = vadd.f32 %v14438_v28, %v2259_v40  ;;  %v2261_v32 = vpop.f32.mrb[111].mxu0 }
 0x524   :  { %7470 = vmatpush1.bf16.msra.mxu1 %v7469_v2  ;;  %v2264_v58 = vpop.f32.mrb[112].mxu0 }
 0x525   :  { %v2735_v35 = vadd.f32 %v2734_v54, %v11324_v44  ;;  %14439 = vst [vmem:[#allocation16_spill] sm:$0xff] %v11548_v22  ;;  %7640 = vmatpush3.bf16.msra.mxu0 %v11537_v23  ;;  %v2870_v54 = vadd.f32 %v2869_v52, %v2807_v12  ;;  %7471 = vmatprep.subr.bf16.mxu1 %v14394_v3  ;;  %v2266_v28 = vpop.f32.mrb[113].mxu0 }
 0x526   :  { %v2269_v2 = vpop.f32.mrb[114].mxu0 }
 0x527   :  { %v2736_v6 = vadd.f32 %v2735_v35, %v11333_v49  ;;  %v2871_v30 = vadd.f32 %v2870_v54, %v2808_v43  ;;  %v14440_v35 = vld [vmem:[#allocation19_spill] sm:$0xff]  ;;  %v2812_v43 = vmul.f32 %v11504_v10, %v11504_v10  ;;  %v14442_v54 = vld [vmem:[#allocation18_spill] sm:$0xff]  ;;  %v2271_v27 = vpop.f32.mrb[115].mxu0 }
 0x528   :  { %v11559_v40 = vadd.f32 %v14440_v35, %v2264_v58 }
 0x529   :  { %v2737_v50 = vadd.f32 %v2736_v6, %v11345_v21  ;;  %v2872_v12 = vadd.f32 %v2871_v30, %v2809_v42  ;;  %v2811_v6 = vmul.f32 %v11489_v46, %v11489_v46  ;;  %v2813_v42 = vmul.f32 %v11519_v47, %v11519_v47  ;;  %v2274_v30 = vpop.f32.mrb[116].mxu0 }
 0x52a   :  { %14441 = vst [vmem:[#allocation19_spill] sm:$0xff] %v11559_v40 }
 0x52b   :  { %v2738_v19 = vadd.f32 %v2737_v50, %v11359_v4  ;;  %v2873_v32 = vadd.f32 %v2872_v12, %v2810_v37  ;;  %v11568_v50 = vadd.f32 %v14442_v54, %v2269_v2  ;;  %v2814_v37 = vmul.f32 %v11533_v20, %v11533_v20  ;;  %v14444_v12 = vld [vmem:[#allocation21_spill] sm:$0xff]  ;;  %v3862_v54 = vld [vmem:[#allocation3 + $0x128] sm:$0xff] }
 0x52c   :  { %v3861_v2 = vld [vmem:[#allocation3 + $0x120] sm:$0xff] }
 0x52d   :  { %v2739_v52 = vadd.f32 %v2738_v19, %v11377_v34  ;;  %14443 = vst [vmem:[#allocation18_spill] sm:$0xff] %v11568_v50  ;;  %v2874_v58 = vadd.f32 %v2873_v32, %v2811_v6  ;;  %v7472_v32 = vpack.c.bf16 %v3862_v54, %v3861_v2 }
 0x52f   :  { %v2740_v23 = vadd.f32 %v2739_v52, %v11489_v46  ;;  %v2875_v19 = vadd.f32 %v2874_v58, %v2812_v43  ;;  %v11577_v52 = vadd.f32 %v14444_v12, %v2274_v30  ;;  %v2276_v46 = vpop.f32.mrb[117].mxu0  ;;  %7473 = vmatpush1.bf16.msra.mxu1 %v7472_v32 }
 0x530   :  { %7474 = vmatprep.subr.bf16.mxu1 %v14394_v3 }
 0x531   :  { %v2741_v35 = vadd.f32 %v2740_v23, %v11504_v10  ;;  %14445 = vst [vmem:[#allocation21_spill] sm:$0xff] %v11577_v52  ;;  %v2876_v27 = vadd.f32 %v2875_v19, %v2813_v42  ;;  %v2815_v23 = vmul.f32 %v11548_v22, %v11548_v22  ;;  %v2279_v10 = vpop.f32.mrb[118].mxu0  ;;  %v2818_v54 = vmul.f32 %v11577_v52, %v11577_v52 }
 0x532   :  { %v2281_v46 = vpop.f32.mrb[119].mxu0 }
 0x533   :  { %v2742_v28 = vadd.f32 %v2741_v35, %v11519_v47  ;;  %v2877_v43 = vadd.f32 %v2876_v27, %v2814_v37  ;;  %v2816_v35 = vmul.f32 %v11559_v40, %v11559_v40  ;;  %v14446_v47 = vld [vmem:[#allocation20_spill] sm:$0xff]  ;;  %v2284_v12 = vpop.f32.mrb[120].mxu0  ;;  %v14448_v27 = vld [vmem:[#allocation23_spill] sm:$0xff] }
 0x534   :  { %v11586_v30 = vadd.f32 %v14446_v47, %v2279_v10  ;;  %v11596_v10 = vadd.f32 %v14448_v27, %v2284_v12  ;;  %v2286_v47 = vpop.f32.mrb[121].mxu0 }
 0x535   :  { %v2743_v6 = vadd.f32 %v2742_v28, %v11533_v20  ;;  %v2878_v42 = vadd.f32 %v2877_v43, %v2815_v23  ;;  %v2817_v28 = vmul.f32 %v11568_v50, %v11568_v50  ;;  %v2289_v43 = vpop.f32.mrb[122].mxu0 }
 0x536   :  { %14447 = vst [vmem:[#allocation20_spill] sm:$0xff] %v11586_v30  ;;  %14449 = vst [vmem:[#allocation23_spill] sm:$0xff] %v11596_v10  ;;  %v2819_v23 = vmul.f32 %v11586_v30, %v11586_v30 }
 0x537   :  { %v2744_v58 = vadd.f32 %v2743_v6, %v11548_v22  ;;  %v2879_v37 = vadd.f32 %v2878_v42, %v2816_v35  ;;  %v2820_v35 = vmul.f32 %v11596_v10, %v11596_v10  ;;  %v14450_v42 = vld [vmem:[#allocation22_spill] sm:$0xff] }
 0x539   :  { %v2745_v19 = vadd.f32 %v2744_v58, %v11559_v40  ;;  %v2880_v6 = vadd.f32 %v2879_v37, %v2817_v28 }
 0x53b   :  { %v2746_v2 = vadd.f32 %v2745_v19, %v11568_v50  ;;  %v2881_v58 = vadd.f32 %v2880_v6, %v2818_v54  ;;  %v11605_v19 = vadd.f32 %v14450_v42, %v2289_v43  ;;  %v2291_v50 = vpop.f32.mrb[123].mxu0  ;;  %v14452_v54 = vld [vmem:[#allocation26_spill] sm:$0xff]  ;;  %v14454_v42 = vld [vmem:[#allocation25_spill] sm:$0xff] }
 0x53c   :  { %v2294_v37 = vpop.f32.mrb[124].mxu0 }
 0x53d   :  { %v2747_v32 = vadd.f32 %v2746_v2, %v11577_v52  ;;  %14451 = vst [vmem:[#allocation22_spill] sm:$0xff] %v11605_v19  ;;  %v2882_v12 = vadd.f32 %v2881_v58, %v2819_v23  ;;  %v2821_v28 = vmul.f32 %v11605_v19, %v11605_v19  ;;  %v11612_v6 = vadd.f32 %v14452_v54, %v2294_v37  ;;  %v3864_v52 = vld [vmem:[#allocation3 + $0x138] sm:$0xff] }
 0x53f   :  { %v2748_v46 = vadd.f32 %v2747_v32, %v11586_v30  ;;  %v2883_v2 = vadd.f32 %v2882_v12, %v2820_v35  ;;  %14453 = vst [vmem:[#allocation26_spill] sm:$0xff] %v11612_v6  ;;  %v2296_v32 = vpop.f32.mrb[125].mxu0  ;;  %v3863_v30 = vld [vmem:[#allocation3 + $0x130] sm:$0xff]  ;;  %v2822_v50 = vmul.f32 %v11612_v6, %v11612_v6 }
 0x540   :  { %v7475_v23 = vpack.c.bf16 %v3864_v52, %v3863_v30  ;;  %v2299_v58 = vpop.f32.mrb[126].mxu0  ;;  %v3865_v30 = vld [vmem:[#allocation3 + $0x140] sm:$0xff] }
 0x541   :  { %v2749_v27 = vadd.f32 %v2748_v46, %v11596_v10  ;;  %v2884_v40 = vadd.f32 %v2883_v2, %v2821_v28  ;;  %v2685_v10 = vadd.f32 %v14454_v42, %v2299_v58  ;;  %v2301_v35 = vpop.f32.mrb[127].mxu0 }
 0x542   :  { %7476 = vmatpush1.bf16.msra.mxu1 %v7475_v23 }
 0x543   :  { %v2750_v47 = vadd.f32 %v2749_v27, %v11605_v19  ;;  %v2885_v46 = vadd.f32 %v2884_v40, %v2822_v50  ;;  %7477 = vmatprep.subr.bf16.mxu1 %v14394_v3  ;;  %v2823_v27 = vmul.f32 %v2685_v10, %v2685_v10  ;;  %v3866_v40 = vld [vmem:[#allocation3 + $0x148] sm:$0xff] }
 0x544   :  { %v7478_v42 = vpack.c.bf16 %v3866_v40, %v3865_v30  ;;  %v2689_v30 = vld [vmem:[%s14240_s3] sm:$0x1] }
 0x545   :  { %v2751_v43 = vadd.f32 %v2750_v47, %v11612_v6  ;;  %v2886_v54 = vadd.f32 %v2885_v46, %v2823_v27 }
 0x546   :  { %7479 = vmatpush1.bf16.msra.mxu1 %v7478_v42 }
 0x547   :  { %v2752_v12 = vadd.f32 %v2751_v43, %v2685_v10  ;;  %v2887_v28 = vrot.slane %v2886_v54, 4  ;;  %7480 = vmatprep.subr.bf16.mxu1 %v14394_v3 }
 0x549   :  { %v2753_v37 = vrot.slane %v2752_v12, 4  ;;  %v2888_v47 = vadd.f32 %v2887_v28, %v2886_v54  ;;  %v2903_v54 = vlaneseq  ;;  %v3868_v28 = vld [vmem:[#allocation3 + $0x158] sm:$0xff] }
 0x54b   :  { %v2754_v32 = vadd.f32 %v2753_v37, %v2752_v12  ;;  %v2889_v22 = vrot.slane %v2888_v47, 2 }
 0x54d   :  { %v2755_v2 = vrot.slane %v2754_v32, 2  ;;  %v2890_v52 = vadd.f32 %v2889_v22, %v2888_v47 }
 0x54f   :  { %v2756_v19 = vadd.f32 %v2755_v2, %v2754_v32  ;;  %v2891_v58 = vrot.slane %v2890_v52, 1  ;;  %v3867_v32 = vld [vmem:[#allocation3 + $0x150] sm:$0xff]  ;;  %v2904_v2 = vshrl.u32 %v2903_v54, 7 }
 0x550   :  { %v7481_v22 = vpack.c.bf16 %v3868_v28, %v3867_v32 }
 0x551   :  { %v2757_v6 = vrot.slane %v2756_v19, 1  ;;  %v2892_v35 = vadd.f32 %v2891_v58, %v2890_v52 }
 0x552   :  { %7482 = vmatpush1.bf16.msra.mxu1 %v7481_v22 }
 0x553   :  { %v2758_v50 = vadd.f32 %v2757_v6, %v2756_v19  ;;  %v2893_v43 = vmul.f32 0.001953125, %v2892_v35  ;;  %7483 = vmatprep.subr.bf16.mxu1 %v14394_v3  ;;  %v2688_v19 = vld [vmem:[%s14239_s2] sm:$0x1]  ;;  %v11624_v6 = vsub.s32 0, %v2904_v2  ;;  %v14458_v2 = vld [vmem:[#allocation24_spill] sm:$0xff]  ;;  %v14476_v3 = vld [vmem:[#allocation19_spill] sm:$0xff] }
 0x555   :  { %v2759_v23 = vmul.f32 0.001953125, %v2758_v50  ;;  %14455 = vst [vmem:[#allocation25_spill] sm:$0xff] %v11624_v6 }
 0x557   :  { %v2894_v46 = vmul.f32 %v2759_v23, %v2759_v23 }
 0x559   :  { %v2895_v12 = vsub.f32 %v2893_v43, %v2894_v46  ;;  %v14456_v43 = vld [vmem:[#allocation9_spill] sm:$0xff] }
 0x55b   :  { %v2896_v27 = vmax.f32 %v2895_v12, 0.0  ;;  %v14457_v12 = vld [vmem:[#allocation10_spill] sm:$0xff] }
 0x55d   :  { %v2897_v37 = vadd.f32 1e-05, %v2896_v27 }
 0x55f   :  { %8431 = vrsqrt.f32 %v2897_v37 }
 0x569   :  { %v8432_v47 = vpop.eup %8431 }
 0x56a   :  { %v2899_v52 = vmul.f32 %v8432_v47, %v2688_v19  ;;  %v14459_v19 = vld [vmem:[#allocation27_spill] sm:$0xff] }
 0x56c   :  { %v2900_v40 = vmul.f32 %v2899_v52, %v2759_v23  ;;  %v11630_v50 = vrot.slane %v2899_v52, %v11624_v6  ;;  %v14460_v52 = vld [vmem:[#allocation28_spill] sm:$0xff] }
 0x56e   :  { %v2901_v58 = vsub.f32 %v2689_v30, %v2900_v40  ;;  %v2971_v42 = vmul.f32 %v11630_v50, %v2685_v10  ;;  %v11635_v35 = vmul.f32 %v11630_v50, %v10980_v48  ;;  %v11639_v46 = vmul.f32 %v11630_v50, %v14456_v43  ;;  %v14461_v30 = vld [vmem:[#allocation29_spill] sm:$0xff]  ;;  %v14462_v40 = vld [vmem:[#allocation30_spill] sm:$0xff] }
 0x56f   :  { %v11643_v27 = vmul.f32 %v11630_v50, %v14457_v12  ;;  %v11647_v23 = vmul.f32 %v11630_v50, %v11005_v57  ;;  %v11651_v37 = vmul.f32 %v11630_v50, %v11016_v8  ;;  %v11655_v48 = vmul.f32 %v11630_v50, %v11023_v17 }
 0x570   :  { %v11658_v10 = vrot.slane %v2901_v58, %v11624_v6  ;;  %v11662_v54 = vmul.f32 %v11630_v50, %v11034_v33  ;;  %v11666_v32 = vmul.f32 %v11630_v50, %v11041_v36  ;;  %v11670_v57 = vmul.f32 %v11630_v50, %v11055_v55  ;;  %v14474_v6 = vld [vmem:[#allocation16_spill] sm:$0xff] }
 0x571   :  { %v11674_v8 = vmul.f32 %v11630_v50, %v11064_v31  ;;  %v11678_v17 = vmul.f32 %v11630_v50, %v11074_v11  ;;  %v11682_v33 = vmul.f32 %v11630_v50, %v11077_v39  ;;  %v11686_v36 = vmul.f32 %v11630_v50, %v11084_v61 }
 0x572   :  { %v3041_v28 = vadd.f32 %v11658_v10, %v2971_v42  ;;  %v11691_v55 = vmul.f32 %v11630_v50, %v11087_v15  ;;  %v11695_v31 = vmul.f32 %v11630_v50, %v11094_v60  ;;  %v11699_v11 = vmul.f32 %v11630_v50, %v11098_v16  ;;  %v14463_v42 = vld [vmem:[#allocation31_spill] sm:$0xff] }
 0x573   :  { %v11703_v39 = vmul.f32 %v11630_v50, %v11105_v56  ;;  %v11707_v61 = vmul.f32 %v11630_v50, %v11109_v24  ;;  %v11711_v15 = vmul.f32 %v11630_v50, %v11116_v63  ;;  %v11715_v60 = vmul.f32 %v11630_v50, %v11120_v13 }
 0x574   :  { %v3105_v22 = vmax.f32 %v3041_v28, 0.0  ;;  %v11719_v16 = vmul.f32 %v11630_v50, %v11127_v53  ;;  %v11723_v56 = vmul.f32 %v11630_v50, %v11131_v29  ;;  %v11727_v24 = vmul.f32 %v11630_v50, %v11138_v9  ;;  %v14464_v28 = vld [vmem:[#allocation32_spill] sm:$0xff] }
 0x575   :  { %v11731_v63 = vmul.f32 %v11630_v50, %v11142_v62  ;;  %v11735_v13 = vmul.f32 %v11630_v50, %v11149_v38  ;;  %v11739_v53 = vmul.f32 %v11630_v50, %v11153_v41  ;;  %v11743_v29 = vmul.f32 %v11630_v50, %v11160_v45 }
 0x576   :  { %3247 = vst [vmem:[#allocation2 + $0x339] sm:$0xff] %v3105_v22  ;;  %v11747_v9 = vmul.f32 %v11630_v50, %v11164_v51  ;;  %v11751_v62 = vmul.f32 %v11630_v50, %v14458_v2  ;;  %v11755_v38 = vmul.f32 %v11630_v50, %v11175_v59  ;;  %v11759_v41 = vmul.f32 %v11630_v50, %v11182_v14  ;;  %v14465_v2 = vld [vmem:[#allocation33_spill] sm:$0xff] }
 0x577   :  { %v11763_v45 = vmul.f32 %v11630_v50, %v11186_v18  ;;  %v11767_v51 = vmul.f32 %v11630_v50, %v11197_v5  ;;  %v11771_v47 = vmul.f32 %v11630_v50, %v14459_v19  ;;  %v11775_v59 = vmul.f32 %v11630_v50, %v11216_v0 }
 0x578   :  { %v11779_v14 = vmul.f32 %v11630_v50, %v11225_v7  ;;  %v11783_v18 = vmul.f32 %v11630_v50, %v14460_v52  ;;  %v11787_v5 = vmul.f32 %v11630_v50, %v14461_v30  ;;  %v11791_v58 = vmul.f32 %v11630_v50, %v14462_v40  ;;  %v14466_v52 = vld [vmem:[#allocation34_spill] sm:$0xff] }
 0x579   :  { %v11795_v0 = vmul.f32 %v11630_v50, %v14463_v42  ;;  %v11799_v7 = vmul.f32 %v11630_v50, %v11270_v1  ;;  %v11803_v43 = vmul.f32 %v11630_v50, %v11279_v26  ;;  %v11807_v12 = vmul.f32 %v11630_v50, %v11288_v25 }
 0x57a   :  { %v11811_v22 = vmul.f32 %v11630_v50, %v14464_v28  ;;  %v11815_v19 = vmul.f32 %v11630_v50, %v14465_v2  ;;  %v11819_v1 = vmul.f32 %v11630_v50, %v14466_v52  ;;  %v11823_v26 = vmul.f32 %v11630_v50, %v11324_v44  ;;  %v14467_v28 = vld [vmem:[#allocation12_spill] sm:$0xff]  ;;  %v14469_v2 = vld [vmem:[#allocation15_spill] sm:$0xff]  ;;  %v14471_v52 = vld [vmem:[#allocation14_spill] sm:$0xff] }
 0x57b   :  { %v11827_v25 = vmul.f32 %v11630_v50, %v11333_v49  ;;  %v11831_v30 = vmul.f32 %v11630_v50, %v11345_v21  ;;  %v11835_v40 = vmul.f32 %v11630_v50, %v11359_v4  ;;  %v11839_v42 = vmul.f32 %v11630_v50, %v11377_v34 }
 0x57c   :  { %v11843_v44 = vmul.f32 %v11630_v50, %v14467_v28  ;;  %v11847_v49 = vmul.f32 %v11630_v50, %v14469_v2  ;;  %v11851_v21 = vmul.f32 %v11630_v50, %v14471_v52  ;;  %v11855_v4 = vmul.f32 %v11630_v50, %v11533_v20 }
 0x57d   :  { %v11859_v34 = vmul.f32 %v11630_v50, %v14474_v6  ;;  %v11863_v28 = vmul.f32 %v11630_v50, %v14476_v3 }
 0x57e   :  { %14468 = vst [vmem:[#allocation9_spill] sm:$0xff] %v11843_v44  ;;  %14470 = vst [vmem:[#allocation10_spill] sm:$0xff] %v11847_v49  ;;  %v14478_v44 = vld [vmem:[#allocation18_spill] sm:$0xff]  ;;  %v14479_v49 = vld [vmem:[#allocation21_spill] sm:$0xff] }
 0x57f   :  { %14472 = vst [vmem:[#allocation24_spill] sm:$0xff] %v11851_v21  ;;  %14473 = vst [vmem:[#allocation27_spill] sm:$0xff] %v11855_v4  ;;  %v11867_v2 = vmul.f32 %v11630_v50, %v14478_v44  ;;  %v11871_v52 = vmul.f32 %v11630_v50, %v14479_v49  ;;  %v14480_v21 = vld [vmem:[#allocation20_spill] sm:$0xff]  ;;  %v14481_v4 = vld [vmem:[#allocation23_spill] sm:$0xff]  ;;  %v11891_v49 = vadd.f32 %v11658_v10, %v11635_v35 }
 0x580   :  { %14475 = vst [vmem:[#allocation28_spill] sm:$0xff] %v11859_v34  ;;  %14477 = vst [vmem:[#allocation29_spill] sm:$0xff] %v11863_v28  ;;  %v11875_v20 = vmul.f32 %v11630_v50, %v14480_v21  ;;  %v11879_v6 = vmul.f32 %v11630_v50, %v14481_v4  ;;  %v14482_v34 = vld [vmem:[#allocation22_spill] sm:$0xff]  ;;  %v11895_v21 = vadd.f32 %v11658_v10, %v11639_v46 }
 0x581   :  { %v11883_v3 = vmul.f32 %v11630_v50, %v14482_v34  ;;  %v14483_v28 = vld [vmem:[#allocation26_spill] sm:$0xff]  ;;  %v11899_v4 = vadd.f32 %v11658_v10, %v11643_v27  ;;  %v11903_v34 = vadd.f32 %v11658_v10, %v11647_v23  ;;  %v11911_v35 = vadd.f32 %v11658_v10, %v11655_v48 }
 0x582   :  { %v11887_v44 = vmul.f32 %v11630_v50, %v14483_v28  ;;  %v11907_v50 = vadd.f32 %v11658_v10, %v11651_v37  ;;  %v11915_v46 = vadd.f32 %v11658_v10, %v11662_v54  ;;  %v11919_v27 = vadd.f32 %v11658_v10, %v11666_v32 }
 0x583   :  { %v11923_v23 = vadd.f32 %v11658_v10, %v11670_v57  ;;  %v11927_v37 = vadd.f32 %v11658_v10, %v11674_v8  ;;  %v11931_v48 = vadd.f32 %v11658_v10, %v11678_v17  ;;  %v11935_v54 = vadd.f32 %v11658_v10, %v11682_v33 }
 0x584   :  { %v11939_v32 = vadd.f32 %v11658_v10, %v11686_v36  ;;  %v11943_v57 = vadd.f32 %v11658_v10, %v11691_v55  ;;  %v11947_v8 = vadd.f32 %v11658_v10, %v11695_v31  ;;  %v11951_v17 = vadd.f32 %v11658_v10, %v11699_v11 }
 0x585   :  { %v11955_v33 = vadd.f32 %v11658_v10, %v11703_v39  ;;  %v11959_v36 = vadd.f32 %v11658_v10, %v11707_v61  ;;  %v11963_v55 = vadd.f32 %v11658_v10, %v11711_v15  ;;  %v11967_v31 = vadd.f32 %v11658_v10, %v11715_v60  ;;  %v14491_v28 = vld [vmem:[#allocation9_spill] sm:$0xff] }
 0x586   :  { %v11971_v11 = vadd.f32 %v11658_v10, %v11719_v16  ;;  %v11975_v39 = vadd.f32 %v11658_v10, %v11723_v56  ;;  %v11979_v61 = vadd.f32 %v11658_v10, %v11727_v24  ;;  %v11983_v15 = vadd.f32 %v11658_v10, %v11731_v63 }
 0x587   :  { %v11987_v60 = vadd.f32 %v11658_v10, %v11735_v13  ;;  %v11991_v16 = vadd.f32 %v11658_v10, %v11739_v53  ;;  %v11995_v56 = vadd.f32 %v11658_v10, %v11743_v29  ;;  %v11999_v24 = vadd.f32 %v11658_v10, %v11747_v9 }
 0x588   :  { %v12003_v63 = vadd.f32 %v11658_v10, %v11751_v62  ;;  %v12007_v13 = vadd.f32 %v11658_v10, %v11755_v38  ;;  %v12011_v53 = vadd.f32 %v11658_v10, %v11759_v41  ;;  %v12015_v29 = vadd.f32 %v11658_v10, %v11763_v45 }
 0x589   :  { %v12019_v9 = vadd.f32 %v11658_v10, %v11767_v51  ;;  %v12023_v62 = vadd.f32 %v11658_v10, %v11771_v47  ;;  %v12027_v38 = vadd.f32 %v11658_v10, %v11775_v59  ;;  %v12031_v41 = vadd.f32 %v11658_v10, %v11779_v14 }
 0x58a   :  { %v12035_v45 = vadd.f32 %v11658_v10, %v11783_v18  ;;  %v12039_v51 = vadd.f32 %v11658_v10, %v11787_v5  ;;  %v12043_v47 = vadd.f32 %v11658_v10, %v11791_v58  ;;  %v12047_v59 = vadd.f32 %v11658_v10, %v11795_v0 }
 0x58b   :  { %v12051_v14 = vadd.f32 %v11658_v10, %v11799_v7  ;;  %v12055_v18 = vadd.f32 %v11658_v10, %v11803_v43  ;;  %v12059_v5 = vadd.f32 %v11658_v10, %v11807_v12  ;;  %v12063_v58 = vadd.f32 %v11658_v10, %v11811_v22 }
 0x58c   :  { %v12067_v0 = vadd.f32 %v11658_v10, %v11815_v19  ;;  %v12071_v7 = vadd.f32 %v11658_v10, %v11819_v1  ;;  %v12075_v43 = vadd.f32 %v11658_v10, %v11823_v26  ;;  %v12079_v12 = vadd.f32 %v11658_v10, %v11827_v25 }
 0x58d   :  { %14484 = vst [vmem:[#allocation30_spill] sm:$0xff] %v12055_v18  ;;  %14485 = vst [vmem:[#allocation31_spill] sm:$0xff] %v12059_v5  ;;  %v12083_v22 = vadd.f32 %v11658_v10, %v11831_v30  ;;  %v12087_v19 = vadd.f32 %v11658_v10, %v11835_v40  ;;  %v12091_v1 = vadd.f32 %v11658_v10, %v11839_v42 }
 0x58e   :  { %14486 = vst [vmem:[#allocation32_spill] sm:$0xff] %v12075_v43  ;;  %14487 = vst [vmem:[#allocation33_spill] sm:$0xff] %v12079_v12  ;;  %v12095_v26 = vadd.f32 %v11658_v10, %v14491_v28  ;;  %v14492_v43 = vld [vmem:[#allocation10_spill] sm:$0xff]  ;;  %v14493_v12 = vld [vmem:[#allocation24_spill] sm:$0xff] }
 0x58f   :  { %14488 = vst [vmem:[#allocation34_spill] sm:$0xff] %v12083_v22  ;;  %14489 = vst [vmem:[#allocation12_spill] sm:$0xff] %v12087_v19  ;;  %v12099_v25 = vadd.f32 %v11658_v10, %v14492_v43  ;;  %v12103_v30 = vadd.f32 %v11658_v10, %v14493_v12  ;;  %v14494_v22 = vld [vmem:[#allocation27_spill] sm:$0xff]  ;;  %v14495_v19 = vld [vmem:[#allocation28_spill] sm:$0xff]  ;;  %v12119_v43 = vadd.f32 %v11658_v10, %v11867_v2 }
 0x590   :  { %14490 = vst [vmem:[#allocation15_spill] sm:$0xff] %v12091_v1  ;;  %v12107_v40 = vadd.f32 %v11658_v10, %v14494_v22  ;;  %v12111_v42 = vadd.f32 %v11658_v10, %v14495_v19  ;;  %v14496_v1 = vld [vmem:[#allocation29_spill] sm:$0xff]  ;;  %v12123_v12 = vadd.f32 %v11658_v10, %v11871_v52  ;;  %v12127_v22 = vadd.f32 %v11658_v10, %v11875_v20 }
 0x591   :  { %v12115_v28 = vadd.f32 %v11658_v10, %v14496_v1  ;;  %14497 = vst [vmem:[#allocation14_spill] sm:$0xff] %v12119_v43  ;;  %v12131_v19 = vadd.f32 %v11658_v10, %v11879_v6  ;;  %v12135_v1 = vadd.f32 %v11658_v10, %v11883_v3  ;;  %v12139_v2 = vadd.f32 %v11658_v10, %v11887_v44 }
 0x592   :  { %14498 = vst [vmem:[#allocation16_spill] sm:$0xff] %v12123_v12  ;;  %14499 = vst [vmem:[#allocation19_spill] sm:$0xff] %v12127_v22  ;;  %v3042_v43 = vmax.f32 %v11891_v49, 0.0  ;;  %v14303_v52 = vmax.f32 %v11895_v21, 0.0  ;;  %v14301_v12 = vmax.f32 %v11899_v4, 0.0  ;;  %v14302_v22 = vmax.f32 %v11907_v50, 0.0 }
 0x593   :  { %14500 = vst [vmem:[#allocation18_spill] sm:$0xff] %v12131_v19  ;;  %14501 = vst [vmem:[#allocation21_spill] sm:$0xff] %v12135_v1  ;;  %v14304_v6 = vmax.f32 %v11911_v35, 0.0  ;;  %v14305_v19 = vmax.f32 %v11915_v46, 0.0  ;;  %v14306_v1 = vmax.f32 %v11923_v23, 0.0  ;;  %v14307_v10 = vmax.f32 %v11927_v37, 0.0 }
 0x594   :  { %3184 = vst [vmem:[#allocation2 + $0x19] sm:$0xff] %v3042_v43  ;;  %4043 = vmatprep.mubr.f32.mxu1 %v3042_v43  ;;  %3185 = vst [vmem:[#allocation2 + $0x21] sm:$0xff] %v14303_v52  ;;  %v14502_v3 = vmax.f32 %v11903_v34, 0.0  ;;  %v14308_v43 = vmax.f32 %v11943_v57, 0.0  ;;  %v14309_v44 = vmax.f32 %v11947_v8, 0.0  ;;  %v14310_v49 = vmax.f32 %v11951_v17, 0.0 }
 0x595   :  { %3186 = vst [vmem:[#allocation2 + $0x31] sm:$0xff] %v14301_v12  ;;  %3188 = vst [vmem:[#allocation2 + $0x49] sm:$0xff] %v14302_v22  ;;  %v14503_v12 = vmax.f32 %v11919_v27, 0.0  ;;  %v14312_v22 = vmax.f32 %v11979_v61, 0.0  ;;  %v14313_v52 = vmax.f32 %v11983_v15, 0.0  ;;  %v14316_v20 = vmax.f32 %v12019_v9, 0.0 }
 0x596   :  { %3187 = vst [vmem:[#allocation2 + $0x39] sm:$0xff] %v14502_v3  ;;  %3189 = vst [vmem:[#allocation2 + $0x51] sm:$0xff] %v14304_v6  ;;  %v14314_v3 = vmax.f32 %v11959_v36, 0.0  ;;  %v14504_v6 = vmax.f32 %v11931_v48, 0.0 }
 0x597   :  { %3190 = vst [vmem:[#allocation2 + $0x61] sm:$0xff] %v14305_v19  ;;  %3191 = vst [vmem:[#allocation2 + $0x69] sm:$0xff] %v14503_v12  ;;  %v14505_v19 = vmax.f32 %v11935_v54, 0.0  ;;  %v14506_v12 = vmax.f32 %v11939_v32, 0.0 }
 0x598   :  { %3192 = vst [vmem:[#allocation2 + $0x79] sm:$0xff] %v14306_v1  ;;  %3193 = vst [vmem:[#allocation2 + $0x81] sm:$0xff] %v14307_v10  ;;  %v14311_v1 = vmax.f32 %v11975_v39, 0.0  ;;  %v3073_v10 = vmax.f32 %v12015_v29, 0.0  ;;  %v14524_v29 = vld [vmem:[#allocation34_spill] sm:$0xff] }
 0x599   :  { %3194 = vst [vmem:[#allocation2 + $0x91] sm:$0xff] %v14504_v6  ;;  %3195 = vst [vmem:[#allocation2 + $0x99] sm:$0xff] %v14505_v19  ;;  %v14507_v19 = vmax.f32 %v11955_v33, 0.0  ;;  %v14315_v6 = vmax.f32 %v11991_v16, 0.0 }
 0x59a   :  { %3196 = vst [vmem:[#allocation2 + $0xa9] sm:$0xff] %v14506_v12  ;;  %3197 = vst [vmem:[#allocation2 + $0xb1] sm:$0xff] %v14308_v43  ;;  %v14508_v43 = vmax.f32 %v11963_v55, 0.0  ;;  %v3072_v12 = vmax.f32 %v12011_v53, 0.0  ;;  %v3085_v53 = vmax.f32 %v12063_v58, 0.0  ;;  %v3087_v58 = vmax.f32 %v12071_v7, 0.0 }
 0x59b   :  { %3198 = vst [vmem:[#allocation2 + $0xc1] sm:$0xff] %v14309_v44  ;;  %3199 = vst [vmem:[#allocation2 + $0xc9] sm:$0xff] %v14310_v49  ;;  %v14509_v44 = vmax.f32 %v11967_v31, 0.0  ;;  %v14510_v49 = vmax.f32 %v11971_v11, 0.0 }
 0x59c   :  { %3200 = vst [vmem:[#allocation2 + $0xd9] sm:$0xff] %v14507_v19  ;;  %3201 = vst [vmem:[#allocation2 + $0xe1] sm:$0xff] %v14314_v3  ;;  %v14317_v19 = vmax.f32 %v12007_v13, 0.0  ;;  %v3090_v3 = vmax.f32 %v14524_v29, 0.0  ;;  %v14531_v29 = vld [vmem:[#allocation15_spill] sm:$0xff] }
 0x59d   :  { %3202 = vst [vmem:[#allocation2 + $0xf1] sm:$0xff] %v14508_v43  ;;  %3203 = vst [vmem:[#allocation2 + $0xf9] sm:$0xff] %v14509_v44  ;;  %v14511_v44 = vmax.f32 %v11987_v60, 0.0  ;;  %v3086_v43 = vmax.f32 %v12067_v0, 0.0  ;;  %v14522_v0 = vld [vmem:[#allocation32_spill] sm:$0xff]  ;;  %v12277_v7 = vld [vmem:[#allocation2 + $0x4a] sm:$0xff] }
 0x59e   :  { %3204 = vst [vmem:[#allocation2 + $0x109] sm:$0xff] %v14510_v49  ;;  %3205 = vst [vmem:[#allocation2 + $0x111] sm:$0xff] %v14311_v1  ;;  %v14318_v49 = vmax.f32 %v12023_v62, 0.0  ;;  %v14512_v1 = vmax.f32 %v11995_v56, 0.0 }
 0x59f   :  { %3206 = vst [vmem:[#allocation2 + $0x121] sm:$0xff] %v14312_v22  ;;  %3207 = vst [vmem:[#allocation2 + $0x129] sm:$0xff] %v14313_v52  ;;  %v14513_v22 = vmax.f32 %v11999_v24, 0.0  ;;  %v14514_v52 = vmax.f32 %v12003_v63, 0.0 }
 0x5a0   :  { %3208 = vst [vmem:[#allocation2 + $0x139] sm:$0xff] %v14511_v44  ;;  %3209 = vst [vmem:[#allocation2 + $0x141] sm:$0xff] %v14315_v6  ;;  %v12234_v44 = vld [vmem:[#allocation2 + $0x18] sm:$0xff]  ;;  %v3088_v6 = vmax.f32 %v14522_v0, 0.0 }
 0x5a1   :  { %3210 = vst [vmem:[#allocation2 + $0x151] sm:$0xff] %v14512_v1  ;;  %3211 = vst [vmem:[#allocation2 + $0x159] sm:$0xff] %v14513_v22  ;;  %v12244_v22 = vld [vmem:[#allocation2 + $0x32] sm:$0xff]  ;;  %4044 = vmatmul.mubr.f32.gmra.mrb[68].mxu1 %v12234_v44  ;;  %v12247_v1 = vld [vmem:[#allocation2 + $0x3a] sm:$0xff] }
 0x5a2   :  { %3212 = vst [vmem:[#allocation2 + $0x169] sm:$0xff] %v14514_v52  ;;  %14515 = vst [vmem:[#allocation20_spill] sm:$0xff] %v12234_v44  ;;  %7097 = vmatprep.mubr.f32.mxu0 %v12244_v22  ;;  %v14523_v52 = vld [vmem:[#allocation33_spill] sm:$0xff]  ;;  %v3094_v44 = vmax.f32 %v12099_v25, 0.0  ;;  %v3098_v25 = vmax.f32 %v12115_v28, 0.0 }
 0x5a3   :  { %3213 = vst [vmem:[#allocation2 + $0x171] sm:$0xff] %v14317_v19  ;;  %3214 = vst [vmem:[#allocation2 + $0x181] sm:$0xff] %v3072_v12  ;;  %v14519_v12 = vmax.f32 %v12031_v41, 0.0  ;;  %v14521_v19 = vmax.f32 %v11895_v21, 0.0  ;;  %v14528_v21 = vmax.f32 %v12051_v14, 0.0  ;;  %7098 = vmatmul.mubr.f32.vlgmr.msra.gmra.mrb[128].mxu0 %v12247_v1  ;;  %v14539_v28 = vld [vmem:[#allocation21_spill] sm:$0xff] }
 0x5a4   :  { %3215 = vst [vmem:[#allocation2 + $0x189] sm:$0xff] %v3073_v10  ;;  %3216 = vst [vmem:[#allocation2 + $0x1c9] sm:$0xff] %v14316_v20  ;;  %v14518_v10 = vmax.f32 %v12027_v38, 0.0  ;;  %v14520_v20 = vmax.f32 %v12035_v45, 0.0  ;;  %7100 = vmatprep.mubr.f32.mxu0 %v12277_v7 }
 0x5a5   :  { %14516 = vst [vmem:[#allocation23_spill] sm:$0xff] %v12244_v22  ;;  %14517 = vst [vmem:[#allocation22_spill] sm:$0xff] %v12247_v1  ;;  %4048 = vmatprep.mubr.f32.mxu1 %v14521_v19  ;;  %v3869_v19 = vld [vmem:[#allocation3 + $0x160] sm:$0xff]  ;;  %v3092_v22 = vmax.f32 %v14531_v29, 0.0  ;;  %v3870_v1 = vld [vmem:[#allocation3 + $0x168] sm:$0xff]  ;;  %v3096_v29 = vmax.f32 %v12107_v40, 0.0 }
 0x5a6   :  { %3217 = vst [vmem:[#allocation2 + $0x1d1] sm:$0xff] %v14318_v49  ;;  %3218 = vst [vmem:[#allocation2 + $0x1e1] sm:$0xff] %v14518_v10  ;;  %v3089_v49 = vmax.f32 %v14523_v52, 0.0  ;;  %v14525_v10 = vmax.f32 %v12039_v51, 0.0  ;;  %v14530_v52 = vld [vmem:[#allocation12_spill] sm:$0xff] }
 0x5a7   :  { %3219 = vst [vmem:[#allocation2 + $0x1e9] sm:$0xff] %v14519_v12  ;;  %3220 = vst [vmem:[#allocation2 + $0x1f9] sm:$0xff] %v14520_v20  ;;  %v14526_v12 = vmax.f32 %v12043_v47, 0.0  ;;  %v14527_v20 = vmax.f32 %v12047_v59, 0.0  ;;  %v3091_v0 = vmax.f32 %v14530_v52, 0.0  ;;  %v3095_v52 = vmax.f32 %v12103_v30, 0.0 }
 0x5a8   :  { %3221 = vst [vmem:[#allocation2 + $0x201] sm:$0xff] %v14525_v10  ;;  %3224 = vst [vmem:[#allocation2 + $0x229] sm:$0xff] %v14528_v21  ;;  %v3093_v10 = vmax.f32 %v12095_v26, 0.0  ;;  %v12288_v21 = vld [vmem:[#allocation2 + $0x20] sm:$0xff]  ;;  %v3097_v26 = vmax.f32 %v12111_v42, 0.0  ;;  %v12299_v40 = vld [vmem:[#allocation2 + $0x52] sm:$0xff] }
 0x5a9   :  { %3222 = vst [vmem:[#allocation2 + $0x211] sm:$0xff] %v14526_v12  ;;  %3223 = vst [vmem:[#allocation2 + $0x219] sm:$0xff] %v14527_v20  ;;  %v14532_v12 = vmax.f32 %v12055_v18, 0.0  ;;  %v14533_v20 = vmax.f32 %v12059_v5, 0.0  ;;  %4049 = vmatmul.mubr.f32.gmra.mrb[70].mxu1 %v12288_v21  ;;  %v14537_v18 = vld [vmem:[#allocation18_spill] sm:$0xff]  ;;  %v14538_v42 = vmax.f32 %v11899_v4, 0.0  ;;  %7101 = vmatmul.mubr.f32.gmra.mrb[130].mxu0 %v12299_v40 }
 0x5aa   :  { %14529 = vst [vmem:[#allocation26_spill] sm:$0xff] %v12277_v7  ;;  %3227 = vst [vmem:[#allocation2 + $0x249] sm:$0xff] %v3085_v53  ;;  %v14534_v53 = vld [vmem:[#allocation14_spill] sm:$0xff]  ;;  %v14536_v7 = vld [vmem:[#allocation19_spill] sm:$0xff]  ;;  %v3102_v30 = vmax.f32 %v14537_v18, 0.0 }
 0x5ab   :  { %3225 = vst [vmem:[#allocation2 + $0x231] sm:$0xff] %v14532_v12  ;;  %3226 = vst [vmem:[#allocation2 + $0x241] sm:$0xff] %v14533_v20  ;;  %v14535_v12 = vld [vmem:[#allocation16_spill] sm:$0xff]  ;;  %v3101_v5 = vmax.f32 %v14536_v7, 0.0  ;;  %4053 = vmatprep.mubr.f32.mxu1 %v14538_v42  ;;  %v12306_v18 = vld [vmem:[#allocation2 + $0x62] sm:$0xff] }
 0x5ac   :  { %3228 = vst [vmem:[#allocation2 + $0x259] sm:$0xff] %v3086_v43  ;;  %3229 = vst [vmem:[#allocation2 + $0x261] sm:$0xff] %v3087_v58  ;;  %v3099_v43 = vmax.f32 %v14534_v53, 0.0  ;;  %v3100_v20 = vmax.f32 %v14535_v12, 0.0  ;;  %7103 = vmatprep.mubr.f32.mxu0 %v12306_v18  ;;  %v12309_v4 = vld [vmem:[#allocation2 + $0x30] sm:$0xff]  ;;  %v14540_v58 = vmax.f32 %v11903_v34, 0.0 }
 0x5ad   :  { %3230 = vst [vmem:[#allocation2 + $0x271] sm:$0xff] %v3088_v6  ;;  %3231 = vst [vmem:[#allocation2 + $0x279] sm:$0xff] %v3089_v49  ;;  %v3104_v6 = vmax.f32 %v12139_v2, 0.0  ;;  %v7484_v49 = vpack.c.bf16 %v3870_v1, %v3869_v19  ;;  %4054 = vmatmul.mubr.f32.gmra.mrb[72].mxu1 %v12309_v4  ;;  %v12312_v2 = vld [vmem:[#allocation2 + $0x6a] sm:$0xff]  ;;  %v12317_v7 = vld [vmem:[#allocation2 + $0x7a] sm:$0xff]  ;;  %v14542_v34 = vmax.f32 %v11907_v50, 0.0 }
 0x5ae   :  { %3232 = vst [vmem:[#allocation2 + $0x289] sm:$0xff] %v3090_v3  ;;  %3233 = vst [vmem:[#allocation2 + $0x291] sm:$0xff] %v3091_v0  ;;  %v3103_v3 = vmax.f32 %v14539_v28, 0.0  ;;  %4058 = vmatprep.mubr.f32.mxu1 %v14540_v58  ;;  %7104 = vmatmul.mubr.f32.gmra.mrb[132].mxu0 %v12312_v2  ;;  %v3873_v19 = vld [vmem:[#allocation3 + $0x180] sm:$0xff]  ;;  %v3874_v0 = vld [vmem:[#allocation3 + $0x188] sm:$0xff] }
 0x5af   :  { %3234 = vst [vmem:[#allocation2 + $0x2a1] sm:$0xff] %v3092_v22  ;;  %3235 = vst [vmem:[#allocation2 + $0x2a9] sm:$0xff] %v3093_v10  ;;  %v3871_v22 = vld [vmem:[#allocation3 + $0x170] sm:$0xff]  ;;  %7485 = vmatpush1.bf16.msra.mxu1 %v7484_v49  ;;  %7106 = vmatprep.mubr.f32.mxu0 %v12317_v7  ;;  %v12321_v10 = vld [vmem:[#allocation2 + $0x38] sm:$0xff] }
 0x5b0   :  { %3236 = vst [vmem:[#allocation2 + $0x2b9] sm:$0xff] %v3094_v44  ;;  %3237 = vst [vmem:[#allocation2 + $0x2c1] sm:$0xff] %v3095_v52  ;;  %v3872_v44 = vld [vmem:[#allocation3 + $0x178] sm:$0xff]  ;;  %v12324_v52 = vld [vmem:[#allocation2 + $0x82] sm:$0xff] }
 0x5b1   :  { %3238 = vst [vmem:[#allocation2 + $0x2d1] sm:$0xff] %v3096_v29  ;;  %3239 = vst [vmem:[#allocation2 + $0x2d9] sm:$0xff] %v3097_v26  ;;  %v7487_v1 = vpack.c.bf16 %v3872_v44, %v3871_v22  ;;  %4059 = vmatmul.mubr.f32.gmra.mrb[74].mxu1 %v12321_v10  ;;  %v7490_v29 = vpack.c.bf16 %v3874_v0, %v3873_v19  ;;  %v12329_v26 = vld [vmem:[#allocation2 + $0x92] sm:$0xff]  ;;  %v12336_v53 = vld [vmem:[#allocation2 + $0x9a] sm:$0xff]  ;;  %v14546_v22 = vmax.f32 %v11923_v23, 0.0 }
 0x5b2   :  { %3240 = vst [vmem:[#allocation2 + $0x2e9] sm:$0xff] %v3098_v25  ;;  %3241 = vst [vmem:[#allocation2 + $0x2f1] sm:$0xff] %v3099_v43  ;;  %4063 = vmatprep.mubr.f32.mxu1 %v14542_v34  ;;  %7107 = vmatmul.mubr.f32.gmra.mrb[134].mxu0 %v12324_v52  ;;  %v12333_v25 = vld [vmem:[#allocation2 + $0x48] sm:$0xff]  ;;  %v14543_v43 = vmax.f32 %v11911_v35, 0.0  ;;  %v12342_v12 = vld [vmem:[#allocation2 + $0x50] sm:$0xff] }
 0x5b3   :  { %3242 = vst [vmem:[#allocation2 + $0x301] sm:$0xff] %v3100_v20  ;;  %3243 = vst [vmem:[#allocation2 + $0x309] sm:$0xff] %v3101_v5  ;;  %v14541_v5 = vmov 0.0|0.0   ;;  %7109 = vmatprep.mubr.f32.mxu0 %v12329_v26  ;;  %v3771_v50 = vld [vmem:[#allocation2 + $0xaa] sm:$0xff]  ;;  %v3772_v20 = vld [vmem:[#allocation2 + $0xb2] sm:$0xff] }
 0x5b4   :  { %3244 = vst [vmem:[#allocation2 + $0x319] sm:$0xff] %v3102_v30  ;;  %3245 = vst [vmem:[#allocation2 + $0x321] sm:$0xff] %v3103_v3  ;;  %7486 = vmatprep.subr.bf16.mxu1 %v14541_v5  ;;  %v14544_v30 = vmax.f32 %v11915_v46, 0.0  ;;  %v3773_v42 = vld [vmem:[#allocation2 + $0xc2] sm:$0xff]  ;;  %v3774_v28 = vld [vmem:[#allocation2 + $0xca] sm:$0xff]  ;;  %v14545_v3 = vmax.f32 %v11919_v27, 0.0 }
 0x5b5   :  { %3246 = vst [vmem:[#allocation2 + $0x331] sm:$0xff] %v3104_v6  ;;  %7488 = vmatpush1.bf16.msra.mxu1 %v7487_v1  ;;  %v12347_v35 = vld [vmem:[#allocation2 + $0x60] sm:$0xff]  ;;  %v12352_v49 = vld [vmem:[#allocation2 + $0x68] sm:$0xff]  ;;  %v3777_v44 = vld [vmem:[#allocation2 + $0xf2] sm:$0xff] }
 0x5b6   :  { %7489 = vmatprep.subr.bf16.mxu1 %v14541_v5  ;;  %4064 = vmatmul.mubr.f32.gmra.mrb[76].mxu1 %v12333_v25  ;;  %v3775_v6 = vld [vmem:[#allocation2 + $0xda] sm:$0xff]  ;;  %v3776_v46 = vld [vmem:[#allocation2 + $0xe2] sm:$0xff]  ;;  %v3875_v58 = vld [vmem:[#allocation3 + $0x190] sm:$0xff] }
 0x5b7   :  { %4068 = vmatprep.mubr.f32.mxu1 %v14543_v43  ;;  %7110 = vmatmul.mubr.f32.gmra.mrb[136].mxu0 %v12336_v53  ;;  %v12357_v1 = vld [vmem:[#allocation2 + $0x78] sm:$0xff]  ;;  %v3877_v0 = vld [vmem:[#allocation3 + $0x1a0] sm:$0xff]  ;;  %v3878_v43 = vld [vmem:[#allocation3 + $0x1a8] sm:$0xff] }
 0x5b8   :  { %7112 = vmatprep.mubr.f32.mxu0 %v3771_v50  ;;  %v3876_v19 = vld [vmem:[#allocation3 + $0x198] sm:$0xff]  ;;  %v3779_v50 = vld [vmem:[#allocation2 + $0x10a] sm:$0xff]  ;;  %v7496_v23 = vpack.c.bf16 %v3878_v43, %v3877_v0 }
 0x5b9   :  { %7491 = vmatpush1.bf16.msra.mxu1 %v7490_v29  ;;  %v7493_v27 = vpack.c.bf16 %v3876_v19, %v3875_v58  ;;  %v3778_v34 = vld [vmem:[#allocation2 + $0xfa] sm:$0xff]  ;;  %v14547_v29 = vmax.f32 %v11927_v37, 0.0  ;;  %v12368_v37 = vld [vmem:[#allocation2 + $0x90] sm:$0xff]  ;;  %v3784_v19 = vld [vmem:[#allocation2 + $0x142] sm:$0xff] }
 0x5ba   :  { %7492 = vmatprep.subr.bf16.mxu1 %v14541_v5  ;;  %4069 = vmatmul.mubr.f32.gmra.mrb[78].mxu1 %v12342_v12  ;;  %v12374_v58 = vld [vmem:[#allocation2 + $0x98] sm:$0xff]  ;;  %v3787_v43 = vld [vmem:[#allocation2 + $0x16a] sm:$0xff] }
 0x5bb   :  { %4073 = vmatprep.mubr.f32.mxu1 %v14544_v30  ;;  %7113 = vmatmul.mubr.f32.gmra.mrb[138].mxu0 %v3772_v20  ;;  %v12362_v20 = vld [vmem:[#allocation2 + $0x80] sm:$0xff]  ;;  %v3780_v30 = vld [vmem:[#allocation2 + $0x112] sm:$0xff] }
 0x5bc   :  { %7115 = vmatprep.mubr.f32.mxu0 %v3773_v42  ;;  %v14548_v42 = vmax.f32 %v11931_v48, 0.0  ;;  %v3785_v0 = vld [vmem:[#allocation2 + $0x152] sm:$0xff] }
 0x5bd   :  { %7494 = vmatpush1.bf16.msra.mxu1 %v7493_v27  ;;  %v14550_v27 = vmax.f32 %v11939_v32, 0.0  ;;  %v3788_v32 = vld [vmem:[#allocation2 + $0x172] sm:$0xff] }
 0x5be   :  { %4074 = vmatmul.mubr.f32.gmra.mrb[80].mxu1 %v12347_v35  ;;  %7495 = vmatprep.subr.bf16.mxu1 %v14541_v5 }
 0x5bf   :  { %4078 = vmatprep.mubr.f32.mxu1 %v14545_v3  ;;  %7116 = vmatmul.mubr.f32.gmra.mrb[140].mxu0 %v3774_v28  ;;  %v3781_v28 = vld [vmem:[#allocation2 + $0x122] sm:$0xff]  ;;  %v3782_v3 = vld [vmem:[#allocation2 + $0x12a] sm:$0xff] }
 0x5c0   :  { %7118 = vmatprep.mubr.f32.mxu0 %v3775_v6  ;;  %v14549_v6 = vmax.f32 %v11935_v54, 0.0  ;;  %v12380_v54 = vld [vmem:[#allocation2 + $0xa8] sm:$0xff] }
 0x5c1   :  { %7497 = vmatpush1.bf16.msra.mxu1 %v7496_v23  ;;  %v14552_v23 = vmax.f32 %v11947_v8, 0.0  ;;  %v3792_v8 = vld [vmem:[#allocation2 + $0x1a2] sm:$0xff] }
 0x5c2   :  { %4079 = vmatmul.mubr.f32.gmra.mrb[82].mxu1 %v12352_v49  ;;  %7498 = vmatprep.subr.bf16.mxu1 %v14541_v5 }
 0x5c3   :  { %4083 = vmatprep.mubr.f32.mxu1 %v14546_v22  ;;  %7119 = vmatmul.mubr.f32.gmra.mrb[142].mxu0 %v3776_v46  ;;  %v3879_v46 = vld [vmem:[#allocation3 + $0x1b0] sm:$0xff]  ;;  %v3880_v22 = vld [vmem:[#allocation3 + $0x1b8] sm:$0xff] }
 0x5c4   :  { %7121 = vmatprep.mubr.f32.mxu0 %v3777_v44  ;;  %v3783_v44 = vld [vmem:[#allocation2 + $0x13a] sm:$0xff]  ;;  %v7499_v48 = vpack.c.bf16 %v3880_v22, %v3879_v46  ;;  %v3882_v46 = vld [vmem:[#allocation3 + $0x1c8] sm:$0xff] }
 0x5c6   :  { %4084 = vmatmul.mubr.f32.gmra.mrb[84].mxu1 %v12357_v1 }
 0x5c7   :  { %4088 = vmatprep.mubr.f32.mxu1 %v14547_v29  ;;  %7122 = vmatmul.mubr.f32.gmra.mrb[144].mxu0 %v3778_v34  ;;  %v3786_v34 = vld [vmem:[#allocation2 + $0x15a] sm:$0xff]  ;;  %v14551_v29 = vmax.f32 %v11943_v57, 0.0 }
 0x5c8   :  { %7124 = vmatprep.mubr.f32.mxu0 %v3779_v50  ;;  %7500 = vmatpush1.bf16.msra.mxu1 %v7499_v48  ;;  %v12385_v50 = vld [vmem:[#allocation2 + $0xb0] sm:$0xff]  ;;  %v3791_v57 = vld [vmem:[#allocation2 + $0x19a] sm:$0xff]  ;;  %v14554_v48 = vmax.f32 %v11955_v33, 0.0  ;;  %v3796_v33 = vld [vmem:[#allocation2 + $0x202] sm:$0xff] }
 0x5c9   :  { %7501 = vmatprep.subr.bf16.mxu1 %v14541_v5 }
 0x5ca   :  { %4089 = vmatmul.mubr.f32.gmra.mrb[86].mxu1 %v12362_v20 }
 0x5cb   :  { %4093 = vmatprep.mubr.f32.mxu1 %v14548_v42  ;;  %7125 = vmatmul.mubr.f32.gmra.mrb[146].mxu0 %v3780_v30  ;;  %v3789_v30 = vld [vmem:[#allocation2 + $0x182] sm:$0xff] }
 0x5cc   :  { %7127 = vmatprep.mubr.f32.mxu0 %v3781_v28  ;;  %v12390_v42 = vld [vmem:[#allocation2 + $0xc0] sm:$0xff]  ;;  %v3790_v28 = vld [vmem:[#allocation2 + $0x18a] sm:$0xff] }
 0x5ce   :  { %4094 = vmatmul.mubr.f32.gmra.mrb[88].mxu1 %v12368_v37 }
 0x5cf   :  { %4098 = vmatprep.mubr.f32.mxu1 %v14549_v6  ;;  %7128 = vmatmul.mubr.f32.gmra.mrb[148].mxu0 %v3782_v3  ;;  %v14553_v3 = vmax.f32 %v11951_v17, 0.0  ;;  %v3881_v6 = vld [vmem:[#allocation3 + $0x1c0] sm:$0xff]  ;;  %v12401_v17 = vld [vmem:[#allocation2 + $0xd8] sm:$0xff] }
 0x5d0   :  { %7130 = vmatprep.mubr.f32.mxu0 %v3783_v44  ;;  %v7502_v22 = vpack.c.bf16 %v3882_v46, %v3881_v6  ;;  %v12395_v44 = vld [vmem:[#allocation2 + $0xc8] sm:$0xff]  ;;  %v12416_v46 = vld [vmem:[#allocation2 + $0xf8] sm:$0xff] }
 0x5d2   :  { %4099 = vmatmul.mubr.f32.gmra.mrb[90].mxu1 %v12374_v58 }
 0x5d3   :  { %4103 = vmatprep.mubr.f32.mxu1 %v14550_v27  ;;  %7131 = vmatmul.mubr.f32.gmra.mrb[150].mxu0 %v3784_v19  ;;  %v3793_v19 = vld [vmem:[#allocation2 + $0x1e2] sm:$0xff]  ;;  %v3794_v27 = vld [vmem:[#allocation2 + $0x1ea] sm:$0xff] }
 0x5d4   :  { %7133 = vmatprep.mubr.f32.mxu0 %v3785_v0  ;;  %7503 = vmatpush1.bf16.msra.mxu1 %v7502_v22  ;;  %v14555_v0 = vmax.f32 %v11959_v36, 0.0  ;;  %v3798_v36 = vld [vmem:[#allocation2 + $0x21a] sm:$0xff]  ;;  %v14558_v22 = vmax.f32 %v11971_v11, 0.0  ;;  %v3804_v11 = vld [vmem:[#allocation2 + $0x262] sm:$0xff] }
 0x5d5   :  { %7504 = vmatprep.subr.bf16.mxu1 %v14541_v5 }
 0x5d6   :  { %4104 = vmatmul.mubr.f32.gmra.mrb[92].mxu1 %v12380_v54 }
 0x5d7   :  { %4108 = vmatprep.mubr.f32.mxu1 %v14551_v29  ;;  %7134 = vmatmul.mubr.f32.gmra.mrb[152].mxu0 %v3786_v34  ;;  %v3795_v34 = vld [vmem:[#allocation2 + $0x1fa] sm:$0xff] }
 0x5d8   :  { %7136 = vmatprep.mubr.f32.mxu0 %v3787_v43  ;;  %v12406_v29 = vld [vmem:[#allocation2 + $0xe0] sm:$0xff]  ;;  %v14556_v43 = vmax.f32 %v11963_v55, 0.0  ;;  %v3800_v55 = vld [vmem:[#allocation2 + $0x232] sm:$0xff] }
 0x5da   :  { %4109 = vmatmul.mubr.f32.gmra.mrb[94].mxu1 %v12385_v50 }
 0x5db   :  { %4113 = vmatprep.mubr.f32.mxu1 %v14552_v23  ;;  %7137 = vmatmul.mubr.f32.gmra.mrb[154].mxu0 %v3788_v32  ;;  %v3797_v32 = vld [vmem:[#allocation2 + $0x212] sm:$0xff] }
 0x5dc   :  { %7139 = vmatprep.mubr.f32.mxu0 %v3789_v30  ;;  %v12411_v23 = vld [vmem:[#allocation2 + $0xf0] sm:$0xff]  ;;  %v14557_v30 = vmax.f32 %v11967_v31, 0.0  ;;  %v12422_v31 = vld [vmem:[#allocation2 + $0x108] sm:$0xff] }
 0x5de   :  { %4114 = vmatmul.mubr.f32.gmra.mrb[96].mxu1 %v12390_v42 }
 0x5df   :  { %4118 = vmatprep.mubr.f32.mxu1 %v14553_v3  ;;  %7140 = vmatmul.mubr.f32.gmra.mrb[156].mxu0 %v3790_v28  ;;  %v3884_v28 = vld [vmem:[#allocation3 + $0x1d8] sm:$0xff]  ;;  %v3799_v3 = vld [vmem:[#allocation2 + $0x22a] sm:$0xff] }
 0x5e0   :  { %7142 = vmatprep.mubr.f32.mxu0 %v3791_v57  ;;  %v3883_v57 = vld [vmem:[#allocation3 + $0x1d0] sm:$0xff] }
 0x5e1   :  { %v7505_v6 = vpack.c.bf16 %v3884_v28, %v3883_v57  ;;  %v3886_v57 = vld [vmem:[#allocation3 + $0x1e8] sm:$0xff] }
 0x5e2   :  { %4119 = vmatmul.mubr.f32.gmra.mrb[98].mxu1 %v12395_v44  ;;  %v12437_v28 = vld [vmem:[#allocation2 + $0x128] sm:$0xff] }
 0x5e3   :  { %4123 = vmatprep.mubr.f32.mxu1 %v14554_v48  ;;  %7143 = vmatmul.mubr.f32.gmra.mrb[158].mxu0 %v3792_v8  ;;  %v3801_v8 = vld [vmem:[#allocation2 + $0x242] sm:$0xff]  ;;  %v3802_v48 = vld [vmem:[#allocation2 + $0x24a] sm:$0xff] }
 0x5e4   :  { %7145 = vmatprep.mubr.f32.mxu0 %v3793_v19  ;;  %7506 = vmatpush1.bf16.msra.mxu1 %v7505_v6  ;;  %v14559_v19 = vmax.f32 %v11975_v39, 0.0  ;;  %v3806_v39 = vld [vmem:[#allocation2 + $0x27a] sm:$0xff]  ;;  %v14562_v6 = vmax.f32 %v11987_v60, 0.0  ;;  %v3812_v60 = vld [vmem:[#allocation2 + $0x2c2] sm:$0xff] }
 0x5e5   :  { %7507 = vmatprep.subr.bf16.mxu1 %v14541_v5 }
 0x5e6   :  { %4124 = vmatmul.mubr.f32.gmra.mrb[100].mxu1 %v12401_v17 }
 0x5e7   :  { %4128 = vmatprep.mubr.f32.mxu1 %v14555_v0  ;;  %7146 = vmatmul.mubr.f32.gmra.mrb[160].mxu0 %v3794_v27  ;;  %v3803_v27 = vld [vmem:[#allocation2 + $0x25a] sm:$0xff]  ;;  %v12427_v0 = vld [vmem:[#allocation2 + $0x110] sm:$0xff] }
 0x5e8   :  { %7148 = vmatprep.mubr.f32.mxu0 %v3795_v34  ;;  %v14560_v34 = vmax.f32 %v11979_v61, 0.0 }
 0x5ea   :  { %4129 = vmatmul.mubr.f32.gmra.mrb[102].mxu1 %v12406_v29 }
 0x5eb   :  { %4133 = vmatprep.mubr.f32.mxu1 %v14556_v43  ;;  %7149 = vmatmul.mubr.f32.gmra.mrb[162].mxu0 %v3796_v33  ;;  %v3805_v33 = vld [vmem:[#allocation2 + $0x272] sm:$0xff]  ;;  %v12432_v43 = vld [vmem:[#allocation2 + $0x120] sm:$0xff] }
 0x5ec   :  { %7151 = vmatprep.mubr.f32.mxu0 %v3797_v32  ;;  %v14561_v32 = vmax.f32 %v11983_v15, 0.0  ;;  %v12443_v15 = vld [vmem:[#allocation2 + $0x138] sm:$0xff] }
 0x5ee   :  { %4134 = vmatmul.mubr.f32.gmra.mrb[104].mxu1 %v12411_v23 }
 0x5ef   :  { %4138 = vmatprep.mubr.f32.mxu1 %v14557_v30  ;;  %7152 = vmatmul.mubr.f32.gmra.mrb[164].mxu0 %v3798_v36  ;;  %v3807_v36 = vld [vmem:[#allocation2 + $0x28a] sm:$0xff]  ;;  %v3885_v30 = vld [vmem:[#allocation3 + $0x1e0] sm:$0xff] }
 0x5f0   :  { %7154 = vmatprep.mubr.f32.mxu0 %v3799_v3  ;;  %v7508_v61 = vpack.c.bf16 %v3886_v57, %v3885_v30  ;;  %v3808_v3 = vld [vmem:[#allocation2 + $0x292] sm:$0xff] }
 0x5f1   :  { %v12458_v30 = vld [vmem:[#allocation2 + $0x158] sm:$0xff] }
 0x5f2   :  { %4139 = vmatmul.mubr.f32.gmra.mrb[106].mxu1 %v12416_v46  ;;  %v3816_v57 = vld [vmem:[#allocation2 + $0x2f2] sm:$0xff] }
 0x5f3   :  { %4143 = vmatprep.mubr.f32.mxu1 %v14558_v22  ;;  %7155 = vmatmul.mubr.f32.gmra.mrb[166].mxu0 %v3800_v55  ;;  %v3809_v55 = vld [vmem:[#allocation2 + $0x2a2] sm:$0xff]  ;;  %v3810_v22 = vld [vmem:[#allocation2 + $0x2aa] sm:$0xff] }
 0x5f4   :  { %7157 = vmatprep.mubr.f32.mxu0 %v3801_v8  ;;  %7509 = vmatpush1.bf16.msra.mxu1 %v7508_v61  ;;  %v14563_v8 = vmax.f32 %v11991_v16, 0.0  ;;  %v3814_v16 = vld [vmem:[#allocation2 + $0x2da] sm:$0xff]  ;;  %v14566_v61 = vmax.f32 %v12003_v63, 0.0 }
 0x5f5   :  { %7510 = vmatprep.subr.bf16.mxu1 %v14541_v5  ;;  %v8435_v63 = vld [vmem:[#allocation2] sm:$0xff] }
 0x5f6   :  { %4144 = vmatmul.mubr.f32.gmra.mrb[108].mxu1 %v12422_v31 }
 0x5f7   :  { %4148 = vmatprep.mubr.f32.mxu1 %v14559_v19  ;;  %7158 = vmatmul.mubr.f32.gmra.mrb[168].mxu0 %v3802_v48  ;;  %v3811_v48 = vld [vmem:[#allocation2 + $0x2ba] sm:$0xff] }
 0x5f8   :  { %7160 = vmatprep.mubr.f32.mxu0 %v3803_v27  ;;  %v12448_v19 = vld [vmem:[#allocation2 + $0x140] sm:$0xff]  ;;  %v14564_v27 = vmax.f32 %v11995_v56, 0.0 }
 0x5fa   :  { %4149 = vmatmul.mubr.f32.gmra.mrb[110].mxu1 %v12427_v0 }
 0x5fb   :  { %4153 = vmatprep.mubr.f32.mxu1 %v14560_v34  ;;  %7161 = vmatmul.mubr.f32.gmra.mrb[170].mxu0 %v3804_v11  ;;  %v3813_v11 = vld [vmem:[#allocation2 + $0x2d2] sm:$0xff] }
 0x5fc   :  { %7163 = vmatprep.mubr.f32.mxu0 %v3805_v33  ;;  %v12453_v34 = vld [vmem:[#allocation2 + $0x150] sm:$0xff]  ;;  %v14565_v33 = vmax.f32 %v11999_v24, 0.0  ;;  %v12464_v24 = vld [vmem:[#allocation2 + $0x168] sm:$0xff] }
 0x5fe   :  { %4154 = vmatmul.mubr.f32.gmra.mrb[112].mxu1 %v12432_v43 }
 0x5ff   :  { %4158 = vmatprep.mubr.f32.mxu1 %v14561_v32  ;;  %7164 = vmatmul.mubr.f32.gmra.mrb[172].mxu0 %v3806_v39  ;;  %v3815_v39 = vld [vmem:[#allocation2 + $0x2ea] sm:$0xff] }
 0x600   :  { %7166 = vmatprep.mubr.f32.mxu0 %v3807_v36  ;;  %v3887_v32 = vld [vmem:[#allocation3 + $0x1f0] sm:$0xff]  ;;  %v3888_v36 = vld [vmem:[#allocation3 + $0x1f8] sm:$0xff] }
 0x601   :  { %v7511_v56 = vpack.c.bf16 %v3888_v36, %v3887_v32  ;;  %v12504_v32 = vld [vmem:[#allocation2 + $0x210] sm:$0xff]  ;;  %v12509_v36 = vld [vmem:[#allocation2 + $0x218] sm:$0xff] }
 0x602   :  { %4159 = vmatmul.mubr.f32.gmra.mrb[114].mxu1 %v12437_v28 }
 0x603   :  { %4163 = vmatprep.mubr.f32.mxu1 %v14562_v6  ;;  %7167 = vmatmul.mubr.f32.gmra.mrb[174].mxu0 %v3808_v3  ;;  %v14567_v3 = vmax.f32 %v12007_v13, 0.0  ;;  %v3344_v6 = vld [vmem:[#allocation2 + $0x1b1] sm:$0xff]  ;;  %v14569_v13 = vmax.f32 %v12023_v62, 0.0  ;;  %v14572_v62 = vmax.f32 %v12035_v45, 0.0  ;;  %v14575_v45 = vmax.f32 %v12047_v59, 0.0 }
 0x604   :  { %7169 = vmatprep.mubr.f32.mxu0 %v3809_v55  ;;  %7512 = vmatpush1.bf16.msra.mxu1 %v7511_v56  ;;  %v12469_v55 = vld [vmem:[#allocation2 + $0x170] sm:$0xff]  ;;  %v12514_v56 = vld [vmem:[#allocation2 + $0x228] sm:$0xff] }
 0x605   :  { %7513 = vmatprep.subr.bf16.mxu1 %v14541_v5  ;;  %v14579_v59 = vld [vmem:[#allocation31_spill] sm:$0xff] }
 0x606   :  { %4164 = vmatmul.mubr.f32.gmra.mrb[116].mxu1 %v12443_v15 }
 0x607   :  { %4168 = vmatprep.mubr.f32.mxu1 %v14563_v8  ;;  %7170 = vmatmul.mubr.f32.gmra.mrb[176].mxu0 %v3810_v22  ;;  %v3345_v22 = vld [vmem:[#allocation2 + $0x1b9] sm:$0xff]  ;;  %v14568_v8 = vmax.f32 %v12019_v9, 0.0  ;;  %v14571_v9 = vmax.f32 %v12031_v41, 0.0  ;;  %v14574_v41 = vmax.f32 %v12043_v47, 0.0  ;;  %v14577_v47 = vld [vmem:[#allocation30_spill] sm:$0xff] }
 0x608   :  { %7172 = vmatprep.mubr.f32.mxu0 %v3811_v48  ;;  %v12474_v48 = vld [vmem:[#allocation2 + $0x1c8] sm:$0xff] }
 0x60a   :  { %4169 = vmatmul.mubr.f32.gmra.mrb[118].mxu1 %v12448_v19 }
 0x60b   :  { %4173 = vmatprep.mubr.f32.mxu1 %v14564_v27  ;;  %7173 = vmatmul.mubr.f32.gmra.mrb[178].mxu0 %v3812_v60  ;;  %v12479_v60 = vld [vmem:[#allocation2 + $0x1d0] sm:$0xff]  ;;  %v14570_v27 = vmax.f32 %v12027_v38, 0.0  ;;  %v14573_v38 = vmax.f32 %v12039_v51, 0.0  ;;  %v14576_v51 = vmax.f32 %v12051_v14, 0.0 }
 0x60c   :  { %7175 = vmatprep.mubr.f32.mxu0 %v3813_v11  ;;  %v12484_v11 = vld [vmem:[#allocation2 + $0x1e0] sm:$0xff]  ;;  %v3357_v14 = vld [vmem:[#allocation2 + $0x249] sm:$0xff] }
 0x60e   :  { %4174 = vmatmul.mubr.f32.gmra.mrb[120].mxu1 %v12453_v34 }
 0x60f   :  { %4178 = vmatprep.mubr.f32.mxu1 %v14565_v33  ;;  %7176 = vmatmul.mubr.f32.gmra.mrb[180].mxu0 %v3814_v16  ;;  %v12489_v16 = vld [vmem:[#allocation2 + $0x1e8] sm:$0xff]  ;;  %v12494_v33 = vld [vmem:[#allocation2 + $0x1f8] sm:$0xff] }
 0x610   :  { %7178 = vmatprep.mubr.f32.mxu0 %v3815_v39  ;;  %v12499_v39 = vld [vmem:[#allocation2 + $0x200] sm:$0xff] }
 0x612   :  { %4179 = vmatmul.mubr.f32.gmra.mrb[122].mxu1 %v12458_v30 }
 0x613   :  { %4183 = vmatprep.mubr.f32.mxu1 %v14566_v61  ;;  %7179 = vmatmul.mubr.f32.gmra.mrb[182].mxu0 %v3816_v57  ;;  %v14578_v57 = vmax.f32 %v14577_v47, 0.0  ;;  %v12519_v61 = vld [vmem:[#allocation2 + $0x230] sm:$0xff] }
 0x614   :  { %v3363_v47 = vld [vmem:[#allocation2 + $0x291] sm:$0xff] }
 0x616   :  { %4184 = vmatmul.mubr.f32.gmra.mrb[124].mxu1 %v12464_v24 }
 0x617   :  { %4188 = vmatprep.mubr.f32.mxu1 %v14567_v3  ;;  %v14580_v3 = vmax.f32 %v14579_v59, 0.0  ;;  %v3364_v59 = vld [vmem:[#allocation2 + $0x2a1] sm:$0xff] }
 0x61a   :  { %4189 = vmatmul.mubr.f32.gmra.mrb[126].mxu1 %v12469_v55 }
 0x61b   :  { %4193 = vmatprep.mubr.f32.mxu1 %v3344_v6  ;;  %v12524_v6 = vld [vmem:[#allocation2 + $0x240] sm:$0xff] }
 0x61e   :  { %4194 = vmatmul.mubr.f32.gmra.mrb[128].mxu1 %v8435_v63 }
 0x61f   :  { %4198 = vmatprep.mubr.f32.mxu1 %v3345_v22  ;;  %v12527_v22 = vld [vmem:[#allocation2 + $0x248] sm:$0xff] }
 0x622   :  { %4199 = vmatmul.mubr.f32.gmra.mrb[130].mxu1 %v8435_v63  ;;  %v3358_v63 = vld [vmem:[#allocation2 + $0x259] sm:$0xff] }
 0x623   :  { %4203 = vmatprep.mubr.f32.mxu1 %v14568_v8  ;;  %v12530_v8 = vld [vmem:[#allocation2 + $0x258] sm:$0xff] }
 0x626   :  { %4204 = vmatmul.mubr.f32.gmra.mrb[132].mxu1 %v12474_v48 }
 0x627   :  { %4208 = vmatprep.mubr.f32.mxu1 %v14569_v13  ;;  %v3359_v13 = vld [vmem:[#allocation2 + $0x261] sm:$0xff] }
 0x62a   :  { %4209 = vmatmul.mubr.f32.gmra.mrb[134].mxu1 %v12479_v60 }
 0x62b   :  { %4213 = vmatprep.mubr.f32.mxu1 %v14570_v27  ;;  %v12533_v27 = vld [vmem:[#allocation2 + $0x260] sm:$0xff] }
 0x62c   :  { %14581 = vst [vmem:[#allocation9_spill] sm:$0xff] %v12533_v27 }
 0x62e   :  { %4214 = vmatmul.mubr.f32.gmra.mrb[136].mxu1 %v12484_v11 }
 0x62f   :  { %4218 = vmatprep.mubr.f32.mxu1 %v14571_v9  ;;  %v3360_v9 = vld [vmem:[#allocation2 + $0x271] sm:$0xff] }
 0x632   :  { %4219 = vmatmul.mubr.f32.gmra.mrb[138].mxu1 %v12489_v16 }
 0x633   :  { %4223 = vmatprep.mubr.f32.mxu1 %v14572_v62  ;;  %v12536_v62 = vld [vmem:[#allocation2 + $0x270] sm:$0xff] }
 0x634   :  { %14582 = vst [vmem:[#allocation10_spill] sm:$0xff] %v12536_v62 }
 0x636   :  { %4224 = vmatmul.mubr.f32.gmra.mrb[140].mxu1 %v12494_v33 }
 0x637   :  { %4228 = vmatprep.mubr.f32.mxu1 %v14573_v38  ;;  %v3361_v38 = vld [vmem:[#allocation2 + $0x279] sm:$0xff] }
 0x63a   :  { %4229 = vmatmul.mubr.f32.gmra.mrb[142].mxu1 %v12499_v39 }
 0x63b   :  { %4233 = vmatprep.mubr.f32.mxu1 %v14574_v41  ;;  %v12539_v41 = vld [vmem:[#allocation2 + $0x278] sm:$0xff] }
 0x63c   :  { %14583 = vst [vmem:[#allocation24_spill] sm:$0xff] %v12539_v41 }
 0x63e   :  { %4234 = vmatmul.mubr.f32.gmra.mrb[144].mxu1 %v12504_v32 }
 0x63f   :  { %4238 = vmatprep.mubr.f32.mxu1 %v14575_v45  ;;  %v3362_v45 = vld [vmem:[#allocation2 + $0x289] sm:$0xff] }
 0x642   :  { %4239 = vmatmul.mubr.f32.gmra.mrb[146].mxu1 %v12509_v36 }
 0x643   :  { %4243 = vmatprep.mubr.f32.mxu1 %v14576_v51  ;;  %v12542_v51 = vld [vmem:[#allocation2 + $0x288] sm:$0xff] }
 0x644   :  { %14584 = vst [vmem:[#allocation27_spill] sm:$0xff] %v12542_v51 }
 0x646   :  { %4244 = vmatmul.mubr.f32.gmra.mrb[148].mxu1 %v12514_v56 }
 0x647   :  { %4248 = vmatprep.mubr.f32.mxu1 %v14578_v57  ;;  %v12545_v57 = vld [vmem:[#allocation2 + $0x290] sm:$0xff] }
 0x648   :  { %14585 = vst [vmem:[#allocation28_spill] sm:$0xff] %v12545_v57 }
 0x64a   :  { %4249 = vmatmul.mubr.f32.gmra.mrb[150].mxu1 %v12519_v61 }
 0x64b   :  { %4253 = vmatprep.mubr.f32.mxu1 %v14580_v3  ;;  %v12548_v3 = vld [vmem:[#allocation2 + $0x2a0] sm:$0xff] }
 0x64c   :  { %14586 = vst [vmem:[#allocation29_spill] sm:$0xff] %v12548_v3 }
 0x64e   :  { %4254 = vmatmul.mubr.f32.gmra.mrb[152].mxu1 %v12524_v6 }
 0x64f   :  { %4258 = vmatprep.mubr.f32.mxu1 %v3357_v14  ;;  %v3365_v14 = vld [vmem:[#allocation2 + $0x2a9] sm:$0xff] }
 0x652   :  { %4259 = vmatmul.mubr.f32.gmra.mrb[154].mxu1 %v12527_v22 }
 0x653   :  { %4263 = vmatprep.mubr.f32.mxu1 %v3358_v63  ;;  %v12551_v63 = vld [vmem:[#allocation2 + $0x2a8] sm:$0xff] }
 0x654   :  { %14587 = vst [vmem:[#allocation32_spill] sm:$0xff] %v12551_v63 }
 0x656   :  { %4264 = vmatmul.mubr.f32.gmra.mrb[156].mxu1 %v12530_v8 }
 0x657   :  { %4268 = vmatprep.mubr.f32.mxu1 %v3359_v13  ;;  %v3366_v13 = vld [vmem:[#allocation2 + $0x2b9] sm:$0xff] }
 0x65a   :  { %4269 = vmatmul.mubr.f32.gmra.mrb[158].mxu1 %v12533_v27 }
 0x65b   :  { %4273 = vmatprep.mubr.f32.mxu1 %v3360_v9  ;;  %v12554_v9 = vld [vmem:[#allocation2 + $0x2b8] sm:$0xff] }
 0x65c   :  { %14588 = vst [vmem:[#allocation33_spill] sm:$0xff] %v12554_v9 }
 0x65e   :  { %4274 = vmatmul.mubr.f32.gmra.mrb[160].mxu1 %v12536_v62  ;;  %v3892_v62 = vld [vmem:[#allocation3 + $0x218] sm:$0xff] }
 0x65f   :  { %4278 = vmatprep.mubr.f32.mxu1 %v3361_v38  ;;  %v3367_v38 = vld [vmem:[#allocation2 + $0x2c1] sm:$0xff] }
 0x662   :  { %4279 = vmatmul.mubr.f32.gmra.mrb[162].mxu1 %v12539_v41 }
 0x663   :  { %4283 = vmatprep.mubr.f32.mxu1 %v3362_v45  ;;  %v12557_v45 = vld [vmem:[#allocation2 + $0x2c0] sm:$0xff] }
 0x664   :  { %14589 = vst [vmem:[#allocation34_spill] sm:$0xff] %v12557_v45 }
 0x666   :  { %4284 = vmatmul.mubr.f32.gmra.mrb[164].mxu1 %v12542_v51  ;;  %v12613_v51 = vld [vmem:[#allocation2 + $0x320] sm:$0xff] }
 0x667   :  { %4288 = vmatprep.mubr.f32.mxu1 %v3363_v47  ;;  %v3368_v47 = vld [vmem:[#allocation2 + $0x2d1] sm:$0xff] }
 0x66a   :  { %4289 = vmatmul.mubr.f32.gmra.mrb[166].mxu1 %v12545_v57 }
 0x66b   :  { %4293 = vmatprep.mubr.f32.mxu1 %v3364_v59 }
 0x66e   :  { %4294 = vmatmul.mubr.f32.gmra.mrb[168].mxu1 %v12548_v3  ;;  %v12564_v3 = vld [vmem:[#allocation2 + $0x2d0] sm:$0xff] }
 0x66f   :  { %4298 = vmatprep.mubr.f32.mxu1 %v3365_v14  ;;  %14592 = vst [vmem:[#allocation14_spill] sm:$0xff] %v12564_v3 }
 0x672   :  { %4299 = vmatmul.mubr.f32.gmra.mrb[170].mxu1 %v12551_v63 }
 0x673   :  { %4303 = vmatprep.mubr.f32.mxu1 %v3366_v13  ;;  %v3369_v13 = vld [vmem:[#allocation2 + $0x2d9] sm:$0xff] }
 0x676   :  { %4304 = vmatmul.mubr.f32.gmra.mrb[172].mxu1 %v12554_v9  ;;  %v12560_v59 = vpop.f32.mrb[128].mxu0 }
 0x677   :  { %4308 = vmatprep.mubr.f32.mxu1 %v3367_v38  ;;  %14590 = vst [vmem:[#allocation12_spill] sm:$0xff] %v12560_v59  ;;  %v12562_v14 = vpop.f32.mrb[129].mxu0  ;;  %v12571_v38 = vld [vmem:[#allocation2 + $0x2d8] sm:$0xff]  ;;  %v12578_v59 = vld [vmem:[#allocation2 + $0x2e8] sm:$0xff] }
 0x678   :  { %14591 = vst [vmem:[#allocation15_spill] sm:$0xff] %v12562_v14  ;;  %14595 = vst [vmem:[#allocation18_spill] sm:$0xff] %v12571_v38  ;;  %v3371_v14 = vld [vmem:[#allocation2 + $0x2f1] sm:$0xff] }
 0x679   :  { %14598 = vst [vmem:[#allocation31_spill] sm:$0xff] %v12578_v59 }
 0x67a   :  { %4309 = vmatmul.mubr.f32.gmra.mrb[174].mxu1 %v12557_v45  ;;  %v3370_v45 = vld [vmem:[#allocation2 + $0x2e9] sm:$0xff] }
 0x67b   :  { %4313 = vmatprep.mubr.f32.mxu1 %v3368_v47 }
 0x67c   :  { %v12567_v63 = vpop.f32.mrb[130].mxu0 }
 0x67d   :  { %14593 = vst [vmem:[#allocation16_spill] sm:$0xff] %v12567_v63  ;;  %v12569_v9 = vpop.f32.mrb[131].mxu0  ;;  %v12585_v63 = vld [vmem:[#allocation2 + $0x2f0] sm:$0xff] }
 0x67e   :  { %4314 = vmatmul.mubr.f32.gmra.mrb[176].mxu1 %v12564_v3  ;;  %14594 = vst [vmem:[#allocation19_spill] sm:$0xff] %v12569_v9  ;;  %14601 = vst [vmem:[#allocation42_spill] sm:$0xff] %v12585_v63  ;;  %v3372_v9 = vld [vmem:[#allocation2 + $0x301] sm:$0xff] }
 0x67f   :  { %4318 = vmatprep.mubr.f32.mxu1 %v3369_v13 }
 0x681   :  { %v12574_v57 = vpop.f32.mrb[132].mxu0 }
 0x682   :  { %4319 = vmatmul.mubr.f32.gmra.mrb[178].mxu1 %v12571_v38  ;;  %14596 = vst [vmem:[#allocation21_spill] sm:$0xff] %v12574_v57  ;;  %v12576_v47 = vpop.f32.mrb[133].mxu0  ;;  %v12592_v57 = vld [vmem:[#allocation2 + $0x300] sm:$0xff] }
 0x683   :  { %4323 = vmatprep.mubr.f32.mxu1 %v3370_v45  ;;  %14597 = vst [vmem:[#allocation30_spill] sm:$0xff] %v12576_v47  ;;  %14604 = vst [vmem:[#allocation45_spill] sm:$0xff] %v12592_v57  ;;  %v3373_v47 = vld [vmem:[#allocation2 + $0x309] sm:$0xff] }
 0x685   :  { %v12581_v3 = vpop.f32.mrb[134].mxu0 }
 0x686   :  { %4324 = vmatmul.mubr.f32.gmra.mrb[180].mxu1 %v12578_v59  ;;  %14599 = vst [vmem:[#allocation40_spill] sm:$0xff] %v12581_v3  ;;  %v12583_v13 = vpop.f32.mrb[135].mxu0  ;;  %v12599_v3 = vld [vmem:[#allocation2 + $0x308] sm:$0xff] }
 0x687   :  { %4328 = vmatprep.mubr.f32.mxu1 %v3371_v14  ;;  %14600 = vst [vmem:[#allocation41_spill] sm:$0xff] %v12583_v13  ;;  %14607 = vst [vmem:[#allocation48_spill] sm:$0xff] %v12599_v3  ;;  %v3374_v13 = vld [vmem:[#allocation2 + $0x319] sm:$0xff] }
 0x68a   :  { %4329 = vmatmul.mubr.f32.gmra.mrb[182].mxu1 %v12585_v63  ;;  %v12588_v38 = vpop.f32.mrb[136].mxu0 }
 0x68b   :  { %14602 = vst [vmem:[#allocation43_spill] sm:$0xff] %v12588_v38  ;;  %4333 = vmatprep.mubr.f32.mxu1 %v3372_v9  ;;  %v12590_v45 = vpop.f32.mrb[137].mxu0  ;;  %v12606_v38 = vld [vmem:[#allocation2 + $0x318] sm:$0xff] }
 0x68c   :  { %14603 = vst [vmem:[#allocation44_spill] sm:$0xff] %v12590_v45  ;;  %14610 = vst [vmem:[#allocation51_spill] sm:$0xff] %v12606_v38  ;;  %v3375_v45 = vld [vmem:[#allocation2 + $0x321] sm:$0xff] }
 0x68e   :  { %4334 = vmatmul.mubr.f32.gmra.mrb[184].mxu1 %v12592_v57  ;;  %v12595_v59 = vpop.f32.mrb[138].mxu0 }
 0x68f   :  { %14605 = vst [vmem:[#allocation46_spill] sm:$0xff] %v12595_v59  ;;  %4338 = vmatprep.mubr.f32.mxu1 %v3373_v47  ;;  %v12597_v14 = vpop.f32.mrb[139].mxu0  ;;  %v3889_v59 = vld [vmem:[#allocation3 + $0x200] sm:$0xff] }
 0x690   :  { %14606 = vst [vmem:[#allocation47_spill] sm:$0xff] %v12597_v14  ;;  %v3890_v14 = vld [vmem:[#allocation3 + $0x208] sm:$0xff] }
 0x692   :  { %4339 = vmatmul.mubr.f32.gmra.mrb[186].mxu1 %v12599_v3  ;;  %v12602_v63 = vpop.f32.mrb[140].mxu0  ;;  %v7514_v3 = vpack.c.bf16 %v3890_v14, %v3889_v59 }
 0x693   :  { %14608 = vst [vmem:[#allocation49_spill] sm:$0xff] %v12602_v63  ;;  %4343 = vmatprep.mubr.f32.mxu1 %v3374_v13  ;;  %v12604_v9 = vpop.f32.mrb[141].mxu0  ;;  %v14614_v13 = vld [vmem:[#allocation20_spill] sm:$0xff] }
 0x694   :  { %14609 = vst [vmem:[#allocation50_spill] sm:$0xff] %v12604_v9  ;;  %v3376_v9 = vld [vmem:[#allocation2 + $0x2] sm:$0xff] }
 0x696   :  { %4344 = vmatmul.mubr.f32.gmra.mrb[188].mxu1 %v12606_v38  ;;  %v12609_v57 = vpop.f32.mrb[142].mxu0  ;;  %v3891_v38 = vld [vmem:[#allocation3 + $0x210] sm:$0xff] }
 0x697   :  { %14611 = vst [vmem:[#allocation52_spill] sm:$0xff] %v12609_v57  ;;  %4348 = vmatprep.mubr.f32.mxu1 %v3375_v45  ;;  %v12611_v47 = vpop.f32.mrb[143].mxu0  ;;  %v3377_v57 = vld [vmem:[#allocation2 + $0xa] sm:$0xff] }
 0x698   :  { %14612 = vst [vmem:[#allocation53_spill] sm:$0xff] %v12611_v47  ;;  %v7517_v47 = vpack.c.bf16 %v3892_v62, %v3891_v38  ;;  %v12633_v62 = vld [vmem:[#allocation2 + $0x1a] sm:$0xff] }
 0x69a   :  { %4349 = vmatmul.mubr.f32.gmra.mrb[190].mxu1 %v12613_v51  ;;  %v12616_v63 = vpop.f32.mrb[144].mxu0 }
 0x69b   :  { %14613 = vst [vmem:[#allocation54_spill] sm:$0xff] %v12616_v63  ;;  %4418 = vmatprep.mubr.f32.mxu1 %v14614_v13  ;;  %v12619_v41 = vpop.f32.mrb[145].mxu0  ;;  %v3893_v63 = vld [vmem:[#allocation3 + $0x220] sm:$0xff]  ;;  %v3894_v13 = vld [vmem:[#allocation3 + $0x228] sm:$0xff] }
 0x69c   :  { %14615 = vst [vmem:[#allocation20_spill] sm:$0xff] %v12619_v41  ;;  %v7520_v14 = vpack.c.bf16 %v3894_v13, %v3893_v63  ;;  %v3898_v63 = vld [vmem:[#allocation3 + $0x248] sm:$0xff]  ;;  %v12948_v41 = vld [vmem:[#allocation2 + $0x51] sm:$0xff] }
 0x69e   :  { %4419 = vmatmul.mubr.f32.vlgmr.msra.gmra.mrb[64].mxu1 %v3376_v9  ;;  %v12621_v45 = vpop.f32.mrb[146].mxu0 }
 0x69f   :  { %14616 = vst [vmem:[#allocation55_spill] sm:$0xff] %v12621_v45  ;;  %4423 = vmatprep.mubr.f32.mxu1 %v12288_v21  ;;  %7515 = vmatpush1.bf16.msra.mxu1 %v7514_v3  ;;  %v12624_v27 = vpop.f32.mrb[147].mxu0  ;;  %v3895_v21 = vld [vmem:[#allocation3 + $0x230] sm:$0xff]  ;;  %v3896_v3 = vld [vmem:[#allocation3 + $0x238] sm:$0xff] }
 0x6a0   :  { %14617 = vst [vmem:[#allocation56_spill] sm:$0xff] %v12624_v27  ;;  %7516 = vmatprep.subr.bf16.mxu1 %v14541_v5 }
 0x6a2   :  { %4424 = vmatmul.mubr.f32.gmra.mrb[66].mxu1 %v3377_v57  ;;  %v12627_v59 = vpop.f32.mrb[148].mxu0  ;;  %v7523_v57 = vpack.c.bf16 %v3896_v3, %v3895_v21  ;;  %v14624_v21 = vld [vmem:[#allocation23_spill] sm:$0xff] }
 0x6a3   :  { %14618 = vst [vmem:[#allocation57_spill] sm:$0xff] %v12627_v59  ;;  %4428 = vmatprep.mubr.f32.mxu1 %v12309_v4  ;;  %7518 = vmatpush1.bf16.msra.mxu1 %v7517_v47  ;;  %v12630_v9 = vpop.f32.mrb[149].mxu0  ;;  %v3897_v4 = vld [vmem:[#allocation3 + $0x240] sm:$0xff] }
 0x6a4   :  { %14619 = vst [vmem:[#allocation58_spill] sm:$0xff] %v12630_v9  ;;  %7519 = vmatprep.subr.bf16.mxu1 %v14541_v5  ;;  %v12642_v47 = vld [vmem:[#allocation2 + $0x22] sm:$0xff] }
 0x6a6   :  { %4429 = vmatmul.mubr.f32.gmra.mrb[68].mxu1 %v12633_v62  ;;  %v12636_v38 = vpop.f32.mrb[150].mxu0 }
 0x6a7   :  { %14620 = vst [vmem:[#allocation59_spill] sm:$0xff] %v12636_v38  ;;  %4433 = vmatprep.mubr.f32.mxu1 %v12321_v10  ;;  %7521 = vmatpush1.bf16.msra.mxu1 %v7520_v14  ;;  %v12639_v59 = vpop.f32.mrb[151].mxu0  ;;  %v7526_v38 = vpack.c.bf16 %v3898_v63, %v3897_v4  ;;  %v3899_v10 = vld [vmem:[#allocation3 + $0x250] sm:$0xff]  ;;  %v3900_v14 = vld [vmem:[#allocation3 + $0x258] sm:$0xff]  ;;  %v14627_v4 = vld [vmem:[#allocation22_spill] sm:$0xff] }
 0x6a8   :  { %14621 = vst [vmem:[#allocation60_spill] sm:$0xff] %v12639_v59  ;;  %7522 = vmatprep.subr.bf16.mxu1 %v14541_v5  ;;  %v7529_v59 = vpack.c.bf16 %v3900_v14, %v3899_v10  ;;  %v14630_v10 = vld [vmem:[#allocation26_spill] sm:$0xff] }
 0x6aa   :  { %4434 = vmatmul.mubr.f32.gmra.mrb[70].mxu1 %v12642_v47  ;;  %v12645_v13 = vpop.f32.mrb[152].mxu0 }
 0x6ab   :  { %14622 = vst [vmem:[#allocation61_spill] sm:$0xff] %v12645_v13  ;;  %4438 = vmatprep.mubr.f32.mxu1 %v12333_v25  ;;  %7524 = vmatpush1.bf16.msra.mxu1 %v7523_v57  ;;  %v12648_v9 = vpop.f32.mrb[153].mxu0  ;;  %v3901_v25 = vld [vmem:[#allocation3 + $0x260] sm:$0xff]  ;;  %v3902_v57 = vld [vmem:[#allocation3 + $0x268] sm:$0xff] }
 0x6ac   :  { %14623 = vst [vmem:[#allocation62_spill] sm:$0xff] %v12648_v9  ;;  %7525 = vmatprep.subr.bf16.mxu1 %v14541_v5  ;;  %v3570_v9 = vld [vmem:[#allocation2 + $0x32] sm:$0xff] }
 0x6ae   :  { %4439 = vmatmul.mubr.f32.gmra.mrb[72].mxu1 %v14624_v21  ;;  %v12652_v3 = vpop.f32.mrb[154].mxu0  ;;  %v7532_v21 = vpack.c.bf16 %v3902_v57, %v3901_v25 }
 0x6af   :  { %14625 = vst [vmem:[#allocation23_spill] sm:$0xff] %v12652_v3  ;;  %4443 = vmatprep.mubr.f32.mxu1 %v12342_v12  ;;  %7527 = vmatpush1.bf16.msra.mxu1 %v7526_v38  ;;  %v12655_v45 = vpop.f32.mrb[155].mxu0  ;;  %v3903_v12 = vld [vmem:[#allocation3 + $0x270] sm:$0xff]  ;;  %v3904_v38 = vld [vmem:[#allocation3 + $0x278] sm:$0xff] }
 0x6b0   :  { %14626 = vst [vmem:[#allocation63_spill] sm:$0xff] %v12655_v45  ;;  %7528 = vmatprep.subr.bf16.mxu1 %v14541_v5  ;;  %v3505_v45 = vld [vmem:[#allocation2 + $0x21] sm:$0xff] }
 0x6b2   :  { %4444 = vmatmul.mubr.f32.gmra.mrb[74].mxu1 %v14627_v4  ;;  %v12659_v63 = vpop.f32.mrb[156].mxu0  ;;  %v7535_v4 = vpack.c.bf16 %v3904_v38, %v3903_v12 }
 0x6b3   :  { %14628 = vst [vmem:[#allocation22_spill] sm:$0xff] %v12659_v63  ;;  %4448 = vmatprep.mubr.f32.mxu1 %v12347_v35  ;;  %7530 = vmatpush1.bf16.msra.mxu1 %v7529_v59  ;;  %v12662_v13 = vpop.f32.mrb[157].mxu0  ;;  %v3905_v35 = vld [vmem:[#allocation3 + $0x280] sm:$0xff]  ;;  %v3906_v59 = vld [vmem:[#allocation3 + $0x288] sm:$0xff] }
 0x6b4   :  { %14629 = vst [vmem:[#allocation64_spill] sm:$0xff] %v12662_v13  ;;  %7531 = vmatprep.subr.bf16.mxu1 %v14541_v5  ;;  %v7538_v57 = vpack.c.bf16 %v3906_v59, %v3905_v35  ;;  %v3504_v63 = vld [vmem:[#allocation2 + $0x19] sm:$0xff]  ;;  %v3926_v13 = vld [vmem:[#allocation3 + $0x328] sm:$0xff] }
 0x6b6   :  { %4449 = vmatmul.mubr.f32.gmra.mrb[76].mxu1 %v14630_v10  ;;  %v12667_v14 = vpop.f32.mrb[158].mxu0 }
 0x6b7   :  { %4453 = vmatprep.mubr.f32.mxu1 %v12352_v49  ;;  %14631 = vst [vmem:[#allocation26_spill] sm:$0xff] %v12667_v14  ;;  %7533 = vmatpush1.bf16.msra.mxu1 %v7532_v21  ;;  %v12669_v3 = vpop.f32.mrb[159].mxu0  ;;  %v3907_v49 = vld [vmem:[#allocation3 + $0x290] sm:$0xff]  ;;  %v3908_v21 = vld [vmem:[#allocation3 + $0x298] sm:$0xff] }
 0x6b8   :  { %14632 = vst [vmem:[#allocation65_spill] sm:$0xff] %v12669_v3  ;;  %7534 = vmatprep.subr.bf16.mxu1 %v14541_v5  ;;  %v3923_v14 = vld [vmem:[#allocation3 + $0x310] sm:$0xff]  ;;  %v3924_v3 = vld [vmem:[#allocation3 + $0x318] sm:$0xff] }
 0x6ba   :  { %4454 = vmatmul.mubr.f32.gmra.mrb[78].mxu1 %v12299_v40  ;;  %v12673_v25 = vpop.f32.mrb[160].mxu0  ;;  %v7541_v40 = vpack.c.bf16 %v3908_v21, %v3907_v49  ;;  %v3912_v49 = vld [vmem:[#allocation3 + $0x2b8] sm:$0xff] }
 0x6bb   :  { %14633 = vst [vmem:[#allocation66_spill] sm:$0xff] %v12673_v25  ;;  %4458 = vmatprep.mubr.f32.mxu1 %v12357_v1  ;;  %7536 = vmatpush1.bf16.msra.mxu1 %v7535_v4  ;;  %v12676_v10 = vpop.f32.mrb[161].mxu0  ;;  %v3909_v1 = vld [vmem:[#allocation3 + $0x2a0] sm:$0xff]  ;;  %v3910_v4 = vld [vmem:[#allocation3 + $0x2a8] sm:$0xff] }
 0x6bc   :  { %14634 = vst [vmem:[#allocation67_spill] sm:$0xff] %v12676_v10  ;;  %7537 = vmatprep.subr.bf16.mxu1 %v14541_v5  ;;  %v3921_v25 = vld [vmem:[#allocation3 + $0x300] sm:$0xff] }
 0x6bd   :  { %v12929_v10 = vld [vmem:[#allocation2 + $0x322] sm:$0xff] }
 0x6be   :  { %4459 = vmatmul.mubr.f32.gmra.mrb[80].mxu1 %v12306_v18  ;;  %v12680_v12 = vpop.f32.mrb[162].mxu0  ;;  %v7544_v18 = vpack.c.bf16 %v3910_v4, %v3909_v1 }
 0x6bf   :  { %14635 = vst [vmem:[#allocation68_spill] sm:$0xff] %v12680_v12  ;;  %4463 = vmatprep.mubr.f32.mxu1 %v12362_v20  ;;  %7539 = vmatpush1.bf16.msra.mxu1 %v7538_v57  ;;  %v12683_v38 = vpop.f32.mrb[163].mxu0  ;;  %v12919_v12 = vld [vmem:[#allocation2 + $0x302] sm:$0xff] }
 0x6c0   :  { %14636 = vst [vmem:[#allocation69_spill] sm:$0xff] %v12683_v38  ;;  %7540 = vmatprep.subr.bf16.mxu1 %v14541_v5  ;;  %v12926_v38 = vld [vmem:[#allocation2 + $0x31a] sm:$0xff] }
 0x6c2   :  { %4464 = vmatmul.mubr.f32.gmra.mrb[82].mxu1 %v12312_v2  ;;  %v12687_v35 = vpop.f32.mrb[164].mxu0 }
 0x6c3   :  { %14637 = vst [vmem:[#allocation70_spill] sm:$0xff] %v12687_v35  ;;  %4468 = vmatprep.mubr.f32.mxu1 %v12368_v37  ;;  %7542 = vmatpush1.bf16.msra.mxu1 %v7541_v40  ;;  %v12690_v59 = vpop.f32.mrb[165].mxu0  ;;  %v12911_v35 = vld [vmem:[#allocation2 + $0x2ea] sm:$0xff] }
 0x6c4   :  { %14638 = vst [vmem:[#allocation71_spill] sm:$0xff] %v12690_v59  ;;  %7543 = vmatprep.subr.bf16.mxu1 %v14541_v5  ;;  %v12915_v59 = vld [vmem:[#allocation2 + $0x2f2] sm:$0xff] }
 0x6c6   :  { %4469 = vmatmul.mubr.f32.gmra.mrb[84].mxu1 %v12317_v7  ;;  %v12694_v20 = vpop.f32.mrb[166].mxu0 }
 0x6c7   :  { %14639 = vst [vmem:[#allocation72_spill] sm:$0xff] %v12694_v20  ;;  %4473 = vmatprep.mubr.f32.mxu1 %v12374_v58  ;;  %7545 = vmatpush1.bf16.msra.mxu1 %v7544_v18  ;;  %v12697_v57 = vpop.f32.mrb[167].mxu0  ;;  %v3911_v58 = vld [vmem:[#allocation3 + $0x2b0] sm:$0xff]  ;;  %v12735_v18 = vld [vmem:[#allocation2 + $0xc2] sm:$0xff] }
 0x6c8   :  { %14640 = vst [vmem:[#allocation73_spill] sm:$0xff] %v12697_v57  ;;  %7546 = vmatprep.subr.bf16.mxu1 %v14541_v5  ;;  %v7547_v40 = vpack.c.bf16 %v3912_v49, %v3911_v58  ;;  %v3914_v49 = vld [vmem:[#allocation3 + $0x2c8] sm:$0xff]  ;;  %v12903_v20 = vld [vmem:[#allocation2 + $0x2d2] sm:$0xff]  ;;  %v12907_v57 = vld [vmem:[#allocation2 + $0x2da] sm:$0xff] }
 0x6ca   :  { %4474 = vmatmul.mubr.f32.gmra.mrb[86].mxu1 %v12324_v52  ;;  %v12701_v2 = vpop.f32.mrb[168].mxu0 }
 0x6cb   :  { %14641 = vst [vmem:[#allocation74_spill] sm:$0xff] %v12701_v2  ;;  %4478 = vmatprep.mubr.f32.mxu1 %v12380_v54  ;;  %v12704_v37 = vpop.f32.mrb[169].mxu0  ;;  %7548 = vmatpush1.bf16.msra.mxu1 %v7547_v40  ;;  %v12895_v2 = vld [vmem:[#allocation2 + $0x2ba] sm:$0xff] }
 0x6cc   :  { %14642 = vst [vmem:[#allocation75_spill] sm:$0xff] %v12704_v37  ;;  %7549 = vmatprep.subr.bf16.mxu1 %v14541_v5  ;;  %v12899_v37 = vld [vmem:[#allocation2 + $0x2c2] sm:$0xff] }
 0x6ce   :  { %4479 = vmatmul.mubr.f32.gmra.mrb[88].mxu1 %v12329_v26  ;;  %v12707_v7 = vpop.f32.mrb[170].mxu0  ;;  %v12719_v26 = vld [vmem:[#allocation2 + $0xaa] sm:$0xff] }
 0x6cf   :  { %14643 = vst [vmem:[#allocation76_spill] sm:$0xff] %v12707_v7  ;;  %4483 = vmatprep.mubr.f32.mxu1 %v12385_v50  ;;  %v12710_v21 = vpop.f32.mrb[171].mxu0  ;;  %v12887_v7 = vld [vmem:[#allocation2 + $0x2a2] sm:$0xff] }
 0x6d0   :  { %14644 = vst [vmem:[#allocation77_spill] sm:$0xff] %v12710_v21  ;;  %v12891_v21 = vld [vmem:[#allocation2 + $0x2aa] sm:$0xff] }
 0x6d2   :  { %4484 = vmatmul.mubr.f32.gmra.mrb[90].mxu1 %v12336_v53  ;;  %v12713_v52 = vpop.f32.mrb[172].mxu0  ;;  %v12727_v53 = vld [vmem:[#allocation2 + $0xb2] sm:$0xff] }
 0x6d3   :  { %14645 = vst [vmem:[#allocation78_spill] sm:$0xff] %v12713_v52  ;;  %4488 = vmatprep.mubr.f32.mxu1 %v12390_v42  ;;  %v12716_v54 = vpop.f32.mrb[173].mxu0  ;;  %v12879_v52 = vld [vmem:[#allocation2 + $0x28a] sm:$0xff] }
 0x6d4   :  { %14646 = vst [vmem:[#allocation79_spill] sm:$0xff] %v12716_v54  ;;  %v12883_v54 = vld [vmem:[#allocation2 + $0x292] sm:$0xff] }
 0x6d6   :  { %4489 = vmatmul.mubr.f32.gmra.mrb[92].mxu1 %v12719_v26  ;;  %v12722_v50 = vpop.f32.mrb[174].mxu0 }
 0x6d7   :  { %14647 = vst [vmem:[#allocation80_spill] sm:$0xff] %v12722_v50  ;;  %4493 = vmatprep.mubr.f32.mxu1 %v12395_v44  ;;  %v12725_v1 = vpop.f32.mrb[175].mxu0  ;;  %v3913_v44 = vld [vmem:[#allocation3 + $0x2c0] sm:$0xff] }
 0x6d8   :  { %14648 = vst [vmem:[#allocation81_spill] sm:$0xff] %v12725_v1  ;;  %v7550_v50 = vpack.c.bf16 %v3914_v49, %v3913_v44  ;;  %v12743_v1 = vld [vmem:[#allocation2 + $0xca] sm:$0xff]  ;;  %v12760_v49 = vld [vmem:[#allocation2 + $0xe2] sm:$0xff] }
 0x6da   :  { %4494 = vmatmul.mubr.f32.gmra.mrb[94].mxu1 %v12727_v53  ;;  %v12730_v42 = vpop.f32.mrb[176].mxu0 }
 0x6db   :  { %14649 = vst [vmem:[#allocation82_spill] sm:$0xff] %v12730_v42  ;;  %4498 = vmatprep.mubr.f32.mxu1 %v12401_v17  ;;  %v12733_v4 = vpop.f32.mrb[177].mxu0  ;;  %7551 = vmatpush1.bf16.msra.mxu1 %v7550_v50  ;;  %v3915_v50 = vld [vmem:[#allocation3 + $0x2d0] sm:$0xff] }
 0x6dc   :  { %14650 = vst [vmem:[#allocation83_spill] sm:$0xff] %v12733_v4  ;;  %7552 = vmatprep.subr.bf16.mxu1 %v14541_v5  ;;  %v12875_v4 = vld [vmem:[#allocation2 + $0x27a] sm:$0xff] }
 0x6de   :  { %4499 = vmatmul.mubr.f32.gmra.mrb[96].mxu1 %v12735_v18  ;;  %v12738_v58 = vpop.f32.mrb[178].mxu0 }
 0x6df   :  { %14651 = vst [vmem:[#allocation84_spill] sm:$0xff] %v12738_v58  ;;  %4503 = vmatprep.mubr.f32.mxu1 %v12406_v29  ;;  %v12741_v40 = vpop.f32.mrb[179].mxu0  ;;  %v12752_v58 = vld [vmem:[#allocation2 + $0xda] sm:$0xff] }
 0x6e0   :  { %14652 = vst [vmem:[#allocation85_spill] sm:$0xff] %v12741_v40  ;;  %v12809_v40 = vld [vmem:[#allocation2 + $0x172] sm:$0xff] }
 0x6e2   :  { %4504 = vmatmul.mubr.f32.gmra.mrb[98].mxu1 %v12743_v1  ;;  %v12746_v17 = vpop.f32.mrb[180].mxu0 }
 0x6e3   :  { %14653 = vst [vmem:[#allocation86_spill] sm:$0xff] %v12746_v17  ;;  %4508 = vmatprep.mubr.f32.mxu1 %v12411_v23  ;;  %v12749_v42 = vpop.f32.mrb[181].mxu0  ;;  %v12764_v23 = vld [vmem:[#allocation2 + $0xf2] sm:$0xff] }
 0x6e4   :  { %14654 = vst [vmem:[#allocation87_spill] sm:$0xff] %v12749_v42  ;;  %v3916_v17 = vld [vmem:[#allocation3 + $0x2d8] sm:$0xff] }
 0x6e5   :  { %v7553_v42 = vpack.c.bf16 %v3916_v17, %v3915_v50  ;;  %v12785_v50 = vld [vmem:[#allocation2 + $0x12a] sm:$0xff] }
 0x6e6   :  { %4509 = vmatmul.mubr.f32.gmra.mrb[100].mxu1 %v12752_v58  ;;  %v12755_v29 = vpop.f32.mrb[182].mxu0 }
 0x6e7   :  { %14655 = vst [vmem:[#allocation88_spill] sm:$0xff] %v12755_v29  ;;  %4513 = vmatprep.mubr.f32.mxu1 %v12416_v46  ;;  %v12758_v44 = vpop.f32.mrb[183].mxu0  ;;  %v12768_v29 = vld [vmem:[#allocation2 + $0xfa] sm:$0xff]  ;;  %7554 = vmatpush1.bf16.msra.mxu1 %v7553_v42  ;;  %v12773_v46 = vld [vmem:[#allocation2 + $0x10a] sm:$0xff] }
 0x6e8   :  { %14656 = vst [vmem:[#allocation89_spill] sm:$0xff] %v12758_v44  ;;  %7555 = vmatprep.subr.bf16.mxu1 %v14541_v5  ;;  %v3918_v42 = vld [vmem:[#allocation3 + $0x2e8] sm:$0xff] }
 0x6e9   :  { %v12806_v44 = vld [vmem:[#allocation2 + $0x16a] sm:$0xff] }
 0x6ea   :  { %4514 = vmatmul.mubr.f32.gmra.mrb[102].mxu1 %v12760_v49 }
 0x6eb   :  { %4518 = vmatprep.mubr.f32.mxu1 %v12422_v31  ;;  %v12777_v31 = vld [vmem:[#allocation2 + $0x112] sm:$0xff] }
 0x6ee   :  { %4519 = vmatmul.mubr.f32.gmra.mrb[104].mxu1 %v12764_v23 }
 0x6ef   :  { %4523 = vmatprep.mubr.f32.mxu1 %v12427_v0  ;;  %v12781_v0 = vld [vmem:[#allocation2 + $0x122] sm:$0xff] }
 0x6f2   :  { %4524 = vmatmul.mubr.f32.gmra.mrb[106].mxu1 %v12768_v29 }
 0x6f3   :  { %4528 = vmatprep.mubr.f32.mxu1 %v12432_v43  ;;  %v3917_v43 = vld [vmem:[#allocation3 + $0x2e0] sm:$0xff] }
 0x6f4   :  { %v7556_v17 = vpack.c.bf16 %v3918_v42, %v3917_v43  ;;  %v3920_v43 = vld [vmem:[#allocation3 + $0x2f8] sm:$0xff] }
 0x6f6   :  { %4529 = vmatmul.mubr.f32.gmra.mrb[108].mxu1 %v12773_v46 }
 0x6f7   :  { %4533 = vmatprep.mubr.f32.mxu1 %v12437_v28  ;;  %7557 = vmatpush1.bf16.msra.mxu1 %v7556_v17  ;;  %v12790_v28 = vld [vmem:[#allocation2 + $0x13a] sm:$0xff] }
 0x6f8   :  { %7558 = vmatprep.subr.bf16.mxu1 %v14541_v5  ;;  %v12802_v17 = vld [vmem:[#allocation2 + $0x15a] sm:$0xff] }
 0x6fa   :  { %4534 = vmatmul.mubr.f32.gmra.mrb[110].mxu1 %v12777_v31 }
 0x6fb   :  { %4538 = vmatprep.mubr.f32.mxu1 %v12443_v15  ;;  %v12794_v15 = vld [vmem:[#allocation2 + $0x142] sm:$0xff] }
 0x6fe   :  { %4539 = vmatmul.mubr.f32.gmra.mrb[112].mxu1 %v12781_v0 }
 0x6ff   :  { %4543 = vmatprep.mubr.f32.mxu1 %v12448_v19  ;;  %v12798_v19 = vld [vmem:[#allocation2 + $0x152] sm:$0xff] }
 0x702   :  { %4544 = vmatmul.mubr.f32.gmra.mrb[114].mxu1 %v12785_v50 }
 0x703   :  { %4548 = vmatprep.mubr.f32.mxu1 %v12453_v34  ;;  %v3919_v34 = vld [vmem:[#allocation3 + $0x2f0] sm:$0xff] }
 0x704   :  { %v7559_v42 = vpack.c.bf16 %v3920_v43, %v3919_v34  ;;  %v3409_v34 = vld [vmem:[#allocation2 + $0x1ba] sm:$0xff]  ;;  %v12815_v43 = vld [vmem:[#allocation2 + $0x1ca] sm:$0xff] }
 0x706   :  { %4549 = vmatmul.mubr.f32.gmra.mrb[116].mxu1 %v12790_v28 }
 0x707   :  { %4553 = vmatprep.mubr.f32.mxu1 %v12458_v30  ;;  %v3470_v30 = vld [vmem:[#allocation2 + $0x180] sm:$0xff]  ;;  %7560 = vmatpush1.bf16.msra.mxu1 %v7559_v42  ;;  %v12819_v42 = vld [vmem:[#allocation2 + $0x1d2] sm:$0xff] }
 0x708   :  { %7561 = vmatprep.subr.bf16.mxu1 %v14541_v5 }
 0x70a   :  { %4554 = vmatmul.mubr.f32.gmra.mrb[118].mxu1 %v12794_v15 }
 0x70b   :  { %4558 = vmatprep.mubr.f32.mxu1 %v12464_v24  ;;  %v3471_v24 = vld [vmem:[#allocation2 + $0x188] sm:$0xff] }
 0x70e   :  { %4559 = vmatmul.mubr.f32.gmra.mrb[120].mxu1 %v12798_v19 }
 0x70f   :  { %4563 = vmatprep.mubr.f32.mxu1 %v12469_v55  ;;  %v3408_v55 = vld [vmem:[#allocation2 + $0x1b2] sm:$0xff] }
 0x712   :  { %4564 = vmatmul.mubr.f32.gmra.mrb[122].mxu1 %v12802_v17 }
 0x713   :  { %4568 = vmatprep.mubr.f32.mxu1 %v3470_v30  ;;  %v12859_v30 = vld [vmem:[#allocation2 + $0x24a] sm:$0xff] }
 0x716   :  { %4569 = vmatmul.mubr.f32.gmra.mrb[124].mxu1 %v12806_v44 }
 0x717   :  { %4573 = vmatprep.mubr.f32.mxu1 %v3471_v24  ;;  %v12863_v24 = vld [vmem:[#allocation2 + $0x25a] sm:$0xff] }
 0x71a   :  { %4574 = vmatmul.mubr.f32.gmra.mrb[126].mxu1 %v12809_v40 }
 0x71b   :  { %4578 = vmatprep.mubr.f32.mxu1 %v12474_v48  ;;  %v12823_v48 = vld [vmem:[#allocation2 + $0x1e2] sm:$0xff] }
 0x71e   :  { %4579 = vmatmul.mubr.f32.gmra.mrb[128].mxu1 %v3408_v55  ;;  %v12867_v55 = vld [vmem:[#allocation2 + $0x262] sm:$0xff] }
 0x71f   :  { %4583 = vmatprep.mubr.f32.mxu1 %v12479_v60  ;;  %v12827_v60 = vld [vmem:[#allocation2 + $0x1ea] sm:$0xff] }
 0x722   :  { %4584 = vmatmul.mubr.f32.gmra.mrb[130].mxu1 %v3409_v34  ;;  %v12871_v34 = vld [vmem:[#allocation2 + $0x272] sm:$0xff] }
 0x723   :  { %4588 = vmatprep.mubr.f32.mxu1 %v12484_v11  ;;  %v12831_v11 = vld [vmem:[#allocation2 + $0x1fa] sm:$0xff] }
 0x726   :  { %4589 = vmatmul.mubr.f32.gmra.mrb[132].mxu1 %v12815_v43 }
 0x727   :  { %4593 = vmatprep.mubr.f32.mxu1 %v12489_v16  ;;  %v12835_v16 = vld [vmem:[#allocation2 + $0x202] sm:$0xff] }
 0x72a   :  { %4594 = vmatmul.mubr.f32.gmra.mrb[134].mxu1 %v12819_v42 }
 0x72b   :  { %4598 = vmatprep.mubr.f32.mxu1 %v12494_v33  ;;  %v12839_v33 = vld [vmem:[#allocation2 + $0x212] sm:$0xff] }
 0x72e   :  { %4599 = vmatmul.mubr.f32.gmra.mrb[136].mxu1 %v12823_v48 }
 0x72f   :  { %4603 = vmatprep.mubr.f32.mxu1 %v12499_v39  ;;  %v12843_v39 = vld [vmem:[#allocation2 + $0x21a] sm:$0xff] }
 0x732   :  { %4604 = vmatmul.mubr.f32.gmra.mrb[138].mxu1 %v12827_v60 }
 0x733   :  { %4608 = vmatprep.mubr.f32.mxu1 %v12504_v32  ;;  %v12847_v32 = vld [vmem:[#allocation2 + $0x22a] sm:$0xff] }
 0x736   :  { %4609 = vmatmul.mubr.f32.gmra.mrb[140].mxu1 %v12831_v11 }
 0x737   :  { %4613 = vmatprep.mubr.f32.mxu1 %v12509_v36  ;;  %v12851_v36 = vld [vmem:[#allocation2 + $0x232] sm:$0xff] }
 0x73a   :  { %4614 = vmatmul.mubr.f32.gmra.mrb[142].mxu1 %v12835_v16 }
 0x73b   :  { %4618 = vmatprep.mubr.f32.mxu1 %v12514_v56  ;;  %v12855_v56 = vld [vmem:[#allocation2 + $0x242] sm:$0xff] }
 0x73e   :  { %4619 = vmatmul.mubr.f32.gmra.mrb[144].mxu1 %v12839_v33 }
 0x73f   :  { %4623 = vmatprep.mubr.f32.mxu1 %v12519_v61  ;;  %v14657_v61 = vld [vmem:[#allocation9_spill] sm:$0xff] }
 0x742   :  { %4624 = vmatmul.mubr.f32.gmra.mrb[146].mxu1 %v12843_v39 }
 0x743   :  { %4628 = vmatprep.mubr.f32.mxu1 %v12524_v6  ;;  %v14658_v6 = vld [vmem:[#allocation10_spill] sm:$0xff] }
 0x744   :  { %14674 = vst [vmem:[#allocation10_spill] sm:$0xff] %v12948_v41 }
 0x746   :  { %4629 = vmatmul.mubr.f32.gmra.mrb[148].mxu1 %v12847_v32 }
 0x747   :  { %4633 = vmatprep.mubr.f32.mxu1 %v12527_v22  ;;  %v14659_v22 = vld [vmem:[#allocation24_spill] sm:$0xff] }
 0x74a   :  { %4634 = vmatmul.mubr.f32.gmra.mrb[150].mxu1 %v12851_v36 }
 0x74b   :  { %4638 = vmatprep.mubr.f32.mxu1 %v12530_v8  ;;  %v14660_v8 = vld [vmem:[#allocation27_spill] sm:$0xff] }
 0x74e   :  { %4639 = vmatmul.mubr.f32.gmra.mrb[152].mxu1 %v12855_v56 }
 0x74f   :  { %4643 = vmatprep.mubr.f32.mxu1 %v14657_v61  ;;  %v14661_v61 = vld [vmem:[#allocation28_spill] sm:$0xff] }
 0x752   :  { %4644 = vmatmul.mubr.f32.gmra.mrb[154].mxu1 %v12859_v30 }
 0x753   :  { %4648 = vmatprep.mubr.f32.mxu1 %v14658_v6  ;;  %v14662_v6 = vld [vmem:[#allocation29_spill] sm:$0xff] }
 0x756   :  { %4649 = vmatmul.mubr.f32.gmra.mrb[156].mxu1 %v12863_v24 }
 0x757   :  { %4653 = vmatprep.mubr.f32.mxu1 %v14659_v22  ;;  %v14663_v22 = vld [vmem:[#allocation32_spill] sm:$0xff] }
 0x75a   :  { %4654 = vmatmul.mubr.f32.gmra.mrb[158].mxu1 %v12867_v55 }
 0x75b   :  { %4658 = vmatprep.mubr.f32.mxu1 %v14660_v8  ;;  %v14664_v8 = vld [vmem:[#allocation33_spill] sm:$0xff] }
 0x75e   :  { %4659 = vmatmul.mubr.f32.gmra.mrb[160].mxu1 %v12871_v34 }
 0x75f   :  { %4663 = vmatprep.mubr.f32.mxu1 %v14661_v61  ;;  %v14665_v61 = vld [vmem:[#allocation34_spill] sm:$0xff] }
 0x762   :  { %4664 = vmatmul.mubr.f32.gmra.mrb[162].mxu1 %v12875_v4 }
 0x763   :  { %4668 = vmatprep.mubr.f32.mxu1 %v14662_v6  ;;  %v14666_v6 = vld [vmem:[#allocation14_spill] sm:$0xff] }
 0x766   :  { %4669 = vmatmul.mubr.f32.gmra.mrb[164].mxu1 %v12879_v52 }
 0x767   :  { %4673 = vmatprep.mubr.f32.mxu1 %v14663_v22  ;;  %v14667_v22 = vld [vmem:[#allocation18_spill] sm:$0xff] }
 0x76a   :  { %4674 = vmatmul.mubr.f32.gmra.mrb[166].mxu1 %v12883_v54 }
 0x76b   :  { %4678 = vmatprep.mubr.f32.mxu1 %v14664_v8  ;;  %v14668_v8 = vld [vmem:[#allocation31_spill] sm:$0xff] }
 0x76e   :  { %4679 = vmatmul.mubr.f32.gmra.mrb[168].mxu1 %v12887_v7 }
 0x76f   :  { %4683 = vmatprep.mubr.f32.mxu1 %v14665_v61  ;;  %v14669_v61 = vld [vmem:[#allocation42_spill] sm:$0xff] }
 0x772   :  { %4684 = vmatmul.mubr.f32.gmra.mrb[170].mxu1 %v12891_v21 }
 0x773   :  { %4688 = vmatprep.mubr.f32.mxu1 %v14666_v6  ;;  %v14670_v6 = vld [vmem:[#allocation45_spill] sm:$0xff] }
 0x776   :  { %4689 = vmatmul.mubr.f32.gmra.mrb[172].mxu1 %v12895_v2 }
 0x777   :  { %4693 = vmatprep.mubr.f32.mxu1 %v14667_v22  ;;  %v14671_v22 = vld [vmem:[#allocation48_spill] sm:$0xff] }
 0x77a   :  { %4694 = vmatmul.mubr.f32.gmra.mrb[174].mxu1 %v12899_v37 }
 0x77b   :  { %4698 = vmatprep.mubr.f32.mxu1 %v14668_v8  ;;  %v14672_v8 = vld [vmem:[#allocation51_spill] sm:$0xff] }
 0x77e   :  { %4699 = vmatmul.mubr.f32.gmra.mrb[176].mxu1 %v12903_v20 }
 0x77f   :  { %4703 = vmatprep.mubr.f32.mxu1 %v14669_v61  ;;  %v12923_v61 = vld [vmem:[#allocation2 + $0x30a] sm:$0xff] }
 0x782   :  { %4704 = vmatmul.mubr.f32.gmra.mrb[178].mxu1 %v12907_v57 }
 0x783   :  { %4708 = vmatprep.mubr.f32.mxu1 %v14670_v6  ;;  %v3502_v6 = vld [vmem:[#allocation2 + $0x330] sm:$0xff] }
 0x786   :  { %4709 = vmatmul.mubr.f32.gmra.mrb[180].mxu1 %v12911_v35 }
 0x787   :  { %4713 = vmatprep.mubr.f32.mxu1 %v14671_v22  ;;  %v3503_v22 = vld [vmem:[#allocation2 + $0x338] sm:$0xff] }
 0x78a   :  { %4714 = vmatmul.mubr.f32.gmra.mrb[182].mxu1 %v12915_v59 }
 0x78b   :  { %4718 = vmatprep.mubr.f32.mxu1 %v14672_v8  ;;  %v3922_v8 = vld [vmem:[#allocation3 + $0x308] sm:$0xff] }
 0x78e   :  { %4719 = vmatmul.mubr.f32.gmra.mrb[184].mxu1 %v12919_v12 }
 0x78f   :  { %4723 = vmatprep.mubr.f32.mxu1 %v12613_v51  ;;  %v7562_v51 = vpack.c.bf16 %v3922_v8, %v3921_v25  ;;  %v3928_v25 = vld [vmem:[#allocation3 + $0x338] sm:$0xff] }
 0x790   :  { %v12936_v8 = vld [vmem:[#allocation2 + $0x31] sm:$0xff] }
 0x792   :  { %4724 = vmatmul.mubr.f32.gmra.mrb[186].mxu1 %v12923_v61 }
 0x793   :  { %4728 = vmatprep.mubr.f32.mxu1 %v3502_v6  ;;  %v7565_v6 = vpack.c.bf16 %v3924_v3, %v3923_v14  ;;  %v12940_v14 = vld [vmem:[#allocation2 + $0x39] sm:$0xff] }
 0x796   :  { %4729 = vmatmul.mubr.f32.gmra.mrb[188].mxu1 %v12926_v38 }
 0x797   :  { %4733 = vmatprep.mubr.f32.mxu1 %v3503_v22  ;;  %v3925_v22 = vld [vmem:[#allocation3 + $0x320] sm:$0xff] }
 0x798   :  { %v7568_v27 = vpack.c.bf16 %v3926_v13, %v3925_v22  ;;  %v12944_v22 = vld [vmem:[#allocation2 + $0x49] sm:$0xff] }
 0x799   :  { %14673 = vst [vmem:[#allocation9_spill] sm:$0xff] %v12944_v22 }
 0x79a   :  { %4734 = vmatmul.mubr.f32.gmra.mrb[190].mxu1 %v12929_v10 }
 0x79b   :  { %4803 = vmatprep.mubr.f32.mxu1 %v12633_v62  ;;  %v3927_v62 = vld [vmem:[#allocation3 + $0x330] sm:$0xff] }
 0x79c   :  { %v7571_v3 = vpack.c.bf16 %v3928_v25, %v3927_v62  ;;  %v3933_v25 = vld [vmem:[#allocation3 + $0x360] sm:$0xff] }
 0x79e   :  { %4804 = vmatmul.mubr.f32.vlgmr.msra.gmra.mrb[64].mxu1 %v3504_v63  ;;  %v3929_v63 = vld [vmem:[#allocation3 + $0x340] sm:$0xff] }
 0x79f   :  { %4808 = vmatprep.mubr.f32.mxu1 %v12642_v47  ;;  %7563 = vmatpush1.bf16.msra.mxu1 %v7562_v51  ;;  %v3571_v47 = vld [vmem:[#allocation2 + $0x3a] sm:$0xff]  ;;  %v3931_v51 = vld [vmem:[#allocation3 + $0x350] sm:$0xff] }
 0x7a0   :  { %7564 = vmatprep.subr.bf16.mxu1 %v14541_v5 }
 0x7a2   :  { %4809 = vmatmul.mubr.f32.gmra.mrb[66].mxu1 %v3505_v45  ;;  %v3930_v45 = vld [vmem:[#allocation3 + $0x348] sm:$0xff] }
 0x7a3   :  { %4813 = vmatprep.mubr.f32.mxu1 %v3570_v9  ;;  %7566 = vmatpush1.bf16.msra.mxu1 %v7565_v6  ;;  %v3572_v9 = vld [vmem:[#allocation2 + $0x4a] sm:$0xff]  ;;  %v7574_v13 = vpack.c.bf16 %v3930_v45, %v3929_v63  ;;  %v3932_v6 = vld [vmem:[#allocation3 + $0x358] sm:$0xff] }
 0x7a4   :  { %7567 = vmatprep.subr.bf16.mxu1 %v14541_v5  ;;  %v7577_v62 = vpack.c.bf16 %v3932_v6, %v3931_v51  ;;  %v3935_v45 = vld [vmem:[#allocation3 + $0x370] sm:$0xff]  ;;  %v3937_v6 = vld [vmem:[#allocation3 + $0x380] sm:$0xff] }
 0x7a6   :  { %4814 = vmatmul.mubr.f32.gmra.mrb[68].mxu1 %v12936_v8 }
 0x7a7   :  { %4818 = vmatprep.mubr.f32.mxu1 %v3571_v47  ;;  %7569 = vmatpush1.bf16.msra.mxu1 %v7568_v27  ;;  %v3573_v27 = vld [vmem:[#allocation2 + $0x52] sm:$0xff]  ;;  %v3934_v47 = vld [vmem:[#allocation3 + $0x368] sm:$0xff] }
 0x7a8   :  { %7570 = vmatprep.subr.bf16.mxu1 %v14541_v5  ;;  %v7580_v63 = vpack.c.bf16 %v3934_v47, %v3933_v25  ;;  %v3939_v47 = vld [vmem:[#allocation3 + $0x390] sm:$0xff] }
 0x7aa   :  { %4819 = vmatmul.mubr.f32.gmra.mrb[70].mxu1 %v12940_v14 }
 0x7ab   :  { %4823 = vmatprep.mubr.f32.mxu1 %v3572_v9  ;;  %7572 = vmatpush1.bf16.msra.mxu1 %v7571_v3  ;;  %v3574_v3 = vld [vmem:[#allocation2 + $0x62] sm:$0xff]  ;;  %v3936_v9 = vld [vmem:[#allocation3 + $0x378] sm:$0xff] }
 0x7ac   :  { %7573 = vmatprep.subr.bf16.mxu1 %v14541_v5  ;;  %v7583_v51 = vpack.c.bf16 %v3936_v9, %v3935_v45  ;;  %v3941_v9 = vld [vmem:[#allocation3 + $0x3a0] sm:$0xff] }
 0x7ae   :  { %4824 = vmatmul.mubr.f32.gmra.mrb[72].mxu1 %v12944_v22  ;;  %v12952_v22 = vld [vmem:[#allocation2 + $0x61] sm:$0xff] }
 0x7af   :  { %4828 = vmatprep.mubr.f32.mxu1 %v3573_v27  ;;  %7575 = vmatpush1.bf16.msra.mxu1 %v7574_v13  ;;  %14675 = vst [vmem:[#allocation24_spill] sm:$0xff] %v12952_v22  ;;  %v3575_v13 = vld [vmem:[#allocation2 + $0x6a] sm:$0xff] }
 0x7b0   :  { %7576 = vmatprep.subr.bf16.mxu1 %v14541_v5  ;;  %v3938_v27 = vld [vmem:[#allocation3 + $0x388] sm:$0xff] }
 0x7b1   :  { %v7586_v25 = vpack.c.bf16 %v3938_v27, %v3937_v6  ;;  %v12968_v27 = vld [vmem:[#allocation2 + $0x91] sm:$0xff] }
 0x7b2   :  { %4829 = vmatmul.mubr.f32.gmra.mrb[74].mxu1 %v12948_v41  ;;  %v12956_v41 = vld [vmem:[#allocation2 + $0x69] sm:$0xff] }
 0x7b3   :  { %4833 = vmatprep.mubr.f32.mxu1 %v3574_v3  ;;  %7578 = vmatpush1.bf16.msra.mxu1 %v7577_v62  ;;  %14676 = vst [vmem:[#allocation27_spill] sm:$0xff] %v12956_v41  ;;  %v3576_v62 = vld [vmem:[#allocation2 + $0x7a] sm:$0xff] }
 0x7b4   :  { %7579 = vmatprep.subr.bf16.mxu1 %v14541_v5  ;;  %v3940_v3 = vld [vmem:[#allocation3 + $0x398] sm:$0xff] }
 0x7b5   :  { %v7589_v45 = vpack.c.bf16 %v3940_v3, %v3939_v47  ;;  %v12976_v47 = vld [vmem:[#allocation2 + $0xa9] sm:$0xff] }
 0x7b6   :  { %4834 = vmatmul.mubr.f32.gmra.mrb[76].mxu1 %v12952_v22  ;;  %v12960_v22 = vld [vmem:[#allocation2 + $0x79] sm:$0xff]  ;;  %v3943_v3 = vld [vmem:[#allocation3 + $0x3b0] sm:$0xff] }
 0x7b7   :  { %4838 = vmatprep.mubr.f32.mxu1 %v3575_v13  ;;  %7581 = vmatpush1.bf16.msra.mxu1 %v7580_v63  ;;  %v3577_v63 = vld [vmem:[#allocation2 + $0x82] sm:$0xff] }
 0x7b8   :  { %7582 = vmatprep.subr.bf16.mxu1 %v14541_v5  ;;  %v3942_v13 = vld [vmem:[#allocation3 + $0x3a8] sm:$0xff] }
 0x7b9   :  { %v7592_v6 = vpack.c.bf16 %v3942_v13, %v3941_v9  ;;  %v12980_v9 = vld [vmem:[#allocation2 + $0xb1] sm:$0xff]  ;;  %v12985_v13 = vld [vmem:[#allocation2 + $0xc1] sm:$0xff] }
 0x7ba   :  { %4839 = vmatmul.mubr.f32.gmra.mrb[78].mxu1 %v12956_v41  ;;  %v12964_v41 = vld [vmem:[#allocation2 + $0x81] sm:$0xff] }
 0x7bb   :  { %4843 = vmatprep.mubr.f32.mxu1 %v3576_v62  ;;  %7584 = vmatpush1.bf16.msra.mxu1 %v7583_v51  ;;  %v3578_v51 = vld [vmem:[#allocation2 + $0x92] sm:$0xff]  ;;  %v3579_v62 = vld [vmem:[#allocation2 + $0x9a] sm:$0xff] }
 0x7bc   :  { %7585 = vmatprep.subr.bf16.mxu1 %v14541_v5 }
 0x7be   :  { %4844 = vmatmul.mubr.f32.gmra.mrb[80].mxu1 %v12960_v22 }
 0x7bf   :  { %4848 = vmatprep.mubr.f32.mxu1 %v3577_v63  ;;  %7587 = vmatpush1.bf16.msra.mxu1 %v7586_v25  ;;  %v12972_v25 = vld [vmem:[#allocation2 + $0x99] sm:$0xff] }
 0x7c0   :  { %7588 = vmatprep.subr.bf16.mxu1 %v14541_v5  ;;  %v3944_v63 = vld [vmem:[#allocation3 + $0x3b8] sm:$0xff] }
 0x7c2   :  { %4849 = vmatmul.mubr.f32.gmra.mrb[82].mxu1 %v12964_v41 }
 0x7c3   :  { %4853 = vmatprep.mubr.f32.mxu1 %v3578_v51  ;;  %7590 = vmatpush1.bf16.msra.mxu1 %v7589_v45  ;;  %v7595_v45 = vpack.c.bf16 %v3944_v63, %v3943_v3  ;;  %v3946_v51 = vld [vmem:[#allocation3 + $0x3c8] sm:$0xff]  ;;  %v3948_v3 = vld [vmem:[#allocation3 + $0x3d8] sm:$0xff] }
 0x7c4   :  { %7591 = vmatprep.subr.bf16.mxu1 %v14541_v5 }
 0x7c6   :  { %4854 = vmatmul.mubr.f32.gmra.mrb[84].mxu1 %v12968_v27 }
 0x7c7   :  { %4858 = vmatprep.mubr.f32.mxu1 %v3579_v62  ;;  %7593 = vmatpush1.bf16.msra.mxu1 %v7592_v6  ;;  %v12997_v62 = vld [vmem:[#allocation2 + $0xe1] sm:$0xff] }
 0x7c8   :  { %7594 = vmatprep.subr.bf16.mxu1 %v14541_v5 }
 0x7ca   :  { %4859 = vmatmul.mubr.f32.gmra.mrb[86].mxu1 %v12972_v25 }
 0x7cb   :  { %4863 = vmatprep.mubr.f32.mxu1 %v12719_v26  ;;  %7596 = vmatpush1.bf16.msra.mxu1 %v7595_v45  ;;  %v12989_v26 = vld [vmem:[#allocation2 + $0xc9] sm:$0xff]  ;;  %v13014_v45 = vld [vmem:[#allocation2 + $0x111] sm:$0xff] }
 0x7cc   :  { %7597 = vmatprep.subr.bf16.mxu1 %v14541_v5 }
 0x7ce   :  { %4864 = vmatmul.mubr.f32.gmra.mrb[88].mxu1 %v12976_v47 }
 0x7cf   :  { %4868 = vmatprep.mubr.f32.mxu1 %v12727_v53  ;;  %v12993_v53 = vld [vmem:[#allocation2 + $0xd9] sm:$0xff] }
 0x7d2   :  { %4869 = vmatmul.mubr.f32.gmra.mrb[90].mxu1 %v12980_v9 }
 0x7d3   :  { %4873 = vmatprep.mubr.f32.mxu1 %v12735_v18  ;;  %v3945_v18 = vld [vmem:[#allocation3 + $0x3c0] sm:$0xff] }
 0x7d4   :  { %v7598_v6 = vpack.c.bf16 %v3946_v51, %v3945_v18  ;;  %v3950_v18 = vld [vmem:[#allocation3 + $0x3e8] sm:$0xff] }
 0x7d6   :  { %4874 = vmatmul.mubr.f32.gmra.mrb[92].mxu1 %v12985_v13 }
 0x7d7   :  { %4878 = vmatprep.mubr.f32.mxu1 %v12743_v1  ;;  %7599 = vmatpush1.bf16.msra.mxu1 %v7598_v6  ;;  %v13002_v1 = vld [vmem:[#allocation2 + $0xf1] sm:$0xff]  ;;  %v13031_v6 = vld [vmem:[#allocation2 + $0x141] sm:$0xff] }
 0x7d8   :  { %7600 = vmatprep.subr.bf16.mxu1 %v14541_v5 }
 0x7da   :  { %4879 = vmatmul.mubr.f32.gmra.mrb[94].mxu1 %v12989_v26 }
 0x7db   :  { %4883 = vmatprep.mubr.f32.mxu1 %v12752_v58  ;;  %v13006_v58 = vld [vmem:[#allocation2 + $0xf9] sm:$0xff] }
 0x7de   :  { %4884 = vmatmul.mubr.f32.gmra.mrb[96].mxu1 %v12993_v53 }
 0x7df   :  { %4888 = vmatprep.mubr.f32.mxu1 %v12760_v49  ;;  %v13010_v49 = vld [vmem:[#allocation2 + $0x109] sm:$0xff] }
 0x7e2   :  { %4889 = vmatmul.mubr.f32.gmra.mrb[98].mxu1 %v12997_v62 }
 0x7e3   :  { %4893 = vmatprep.mubr.f32.mxu1 %v12764_v23  ;;  %v3947_v23 = vld [vmem:[#allocation3 + $0x3d0] sm:$0xff] }
 0x7e4   :  { %v7601_v63 = vpack.c.bf16 %v3948_v3, %v3947_v23  ;;  %v13048_v3 = vld [vmem:[#allocation2 + $0x171] sm:$0xff] }
 0x7e6   :  { %4894 = vmatmul.mubr.f32.gmra.mrb[100].mxu1 %v13002_v1 }
 0x7e7   :  { %4898 = vmatprep.mubr.f32.mxu1 %v12768_v29  ;;  %7602 = vmatpush1.bf16.msra.mxu1 %v7601_v63  ;;  %v13019_v29 = vld [vmem:[#allocation2 + $0x121] sm:$0xff]  ;;  %v14677_v63 = vld [vmem:[#allocation35_spill] sm:$0xff] }
 0x7e8   :  { %7603 = vmatprep.subr.bf16.mxu1 %v14541_v5 }
 0x7ea   :  { %4899 = vmatmul.mubr.f32.gmra.mrb[102].mxu1 %v13006_v58 }
 0x7eb   :  { %4903 = vmatprep.mubr.f32.mxu1 %v12773_v46  ;;  %v13023_v46 = vld [vmem:[#allocation2 + $0x129] sm:$0xff] }
 0x7ee   :  { %4904 = vmatmul.mubr.f32.gmra.mrb[104].mxu1 %v13010_v49 }
 0x7ef   :  { %4908 = vmatprep.mubr.f32.mxu1 %v12777_v31  ;;  %v13027_v31 = vld [vmem:[#allocation2 + $0x139] sm:$0xff] }
 0x7f2   :  { %4909 = vmatmul.mubr.f32.gmra.mrb[106].mxu1 %v13014_v45 }
 0x7f3   :  { %4913 = vmatprep.mubr.f32.mxu1 %v12781_v0  ;;  %v3949_v0 = vld [vmem:[#allocation3 + $0x3e0] sm:$0xff] }
 0x7f4   :  { %v7604_v51 = vpack.c.bf16 %v3950_v18, %v3949_v0  ;;  %v13052_v0 = vld [vmem:[#allocation2 + $0x181] sm:$0xff]  ;;  %v13055_v18 = vld [vmem:[#allocation2 + $0x189] sm:$0xff] }
 0x7f6   :  { %4914 = vmatmul.mubr.f32.gmra.mrb[108].mxu1 %v13019_v29 }
 0x7f7   :  { %4918 = vmatprep.mubr.f32.mxu1 %v12785_v50  ;;  %7605 = vmatpush1.bf16.msra.mxu1 %v7604_v51  ;;  %v13036_v50 = vld [vmem:[#allocation2 + $0x151] sm:$0xff] }
 0x7f8   :  { %7606 = vmatprep.subr.bf16.mxu1 %v14541_v5  ;;  %v3952_v5 = vld [vmem:[#allocation3 + $0x3f8] sm:$0xff] }
 0x7f9   :  { %v3537_v51 = vld [vmem:[#allocation2 + $0x1d1] sm:$0xff] }
 0x7fa   :  { %4919 = vmatmul.mubr.f32.gmra.mrb[110].mxu1 %v13023_v46 }
 0x7fb   :  { %4923 = vmatprep.mubr.f32.mxu1 %v12790_v28  ;;  %v13040_v28 = vld [vmem:[#allocation2 + $0x159] sm:$0xff] }
 0x7fe   :  { %4924 = vmatmul.mubr.f32.gmra.mrb[112].mxu1 %v13027_v31 }
 0x7ff   :  { %4928 = vmatprep.mubr.f32.mxu1 %v12794_v15  ;;  %v13044_v15 = vld [vmem:[#allocation2 + $0x169] sm:$0xff] }
 0x802   :  { %4929 = vmatmul.mubr.f32.gmra.mrb[114].mxu1 %v13031_v6 }
 0x803   :  { %4933 = vmatprep.mubr.f32.mxu1 %v12798_v19  ;;  %v3951_v19 = vld [vmem:[#allocation3 + $0x3f0] sm:$0xff] }
 0x804   :  { %v7607_v23 = vpack.c.bf16 %v3952_v5, %v3951_v19  ;;  %v13061_v19 = vld [vmem:[#allocation2 + $0x1e1] sm:$0xff]  ;;  %v13065_v5 = vld [vmem:[#allocation2 + $0x1e9] sm:$0xff] }
 0x806   :  { %4934 = vmatmul.mubr.f32.gmra.mrb[116].mxu1 %v13036_v50 }
 0x807   :  { %4938 = vmatprep.mubr.f32.mxu1 %v12802_v17  ;;  %v3598_v17 = vld [vmem:[#allocation2 + $0x182] sm:$0xff]  ;;  %7608 = vmatpush1.bf16.msra.mxu1 %v7607_v23  ;;  %v13178_v23 = vld [vmem:[#allocation2 + $0x33a] sm:$0xff] }
 0x808   :  { %7641 = vmatprep.subr.bf16.mxu1 %v14677_v63  ;;  %14679 = vst [vmem:[#allocation29_spill] sm:$0xff] %v13178_v23 }
 0x80a   :  { %4939 = vmatmul.mubr.f32.gmra.mrb[118].mxu1 %v13040_v28 }
 0x80b   :  { %4943 = vmatprep.mubr.f32.mxu1 %v12806_v44  ;;  %v3599_v44 = vld [vmem:[#allocation2 + $0x18a] sm:$0xff] }
 0x80e   :  { %4944 = vmatmul.mubr.f32.gmra.mrb[120].mxu1 %v13044_v15 }
 0x80f   :  { %4948 = vmatprep.mubr.f32.mxu1 %v12809_v40  ;;  %v3536_v40 = vld [vmem:[#allocation2 + $0x1c9] sm:$0xff] }
 0x812   :  { %4949 = vmatmul.mubr.f32.gmra.mrb[122].mxu1 %v13048_v3 }
 0x813   :  { %4953 = vmatprep.mubr.f32.mxu1 %v3598_v17  ;;  %v14680_v17 = vld [vmem:[#allocation36_spill] sm:$0xff] }
 0x816   :  { %4954 = vmatmul.mubr.f32.gmra.mrb[124].mxu1 %v13052_v0 }
 0x817   :  { %4958 = vmatprep.mubr.f32.mxu1 %v3599_v44  ;;  %v3634_v44 = vld [vmem:[#allocation2 + $0x38] sm:$0xff] }
 0x81a   :  { %4959 = vmatmul.mubr.f32.gmra.mrb[126].mxu1 %v13055_v18 }
 0x81b   :  { %4963 = vmatprep.mubr.f32.mxu1 %v12815_v43  ;;  %v13069_v43 = vld [vmem:[#allocation2 + $0x1f9] sm:$0xff] }
 0x81e   :  { %4964 = vmatmul.mubr.f32.gmra.mrb[128].mxu1 %v3536_v40  ;;  %v14681_v40 = vld [vmem:[#allocation9_spill] sm:$0xff] }
 0x81f   :  { %4968 = vmatprep.mubr.f32.mxu1 %v12819_v42  ;;  %v13073_v42 = vld [vmem:[#allocation2 + $0x201] sm:$0xff] }
 0x822   :  { %4969 = vmatmul.mubr.f32.gmra.mrb[130].mxu1 %v3537_v51  ;;  %v14682_v51 = vld [vmem:[#allocation11_spill] sm:$0xff] }
 0x823   :  { %4973 = vmatprep.mubr.f32.mxu1 %v12823_v48  ;;  %v13077_v48 = vld [vmem:[#allocation2 + $0x211] sm:$0xff] }
 0x826   :  { %4974 = vmatmul.mubr.f32.gmra.mrb[132].mxu1 %v13061_v19 }
 0x827   :  { %4978 = vmatprep.mubr.f32.mxu1 %v12827_v60  ;;  %v13081_v60 = vld [vmem:[#allocation2 + $0x219] sm:$0xff] }
 0x82a   :  { %4979 = vmatmul.mubr.f32.gmra.mrb[134].mxu1 %v13065_v5 }
 0x82b   :  { %4983 = vmatprep.mubr.f32.mxu1 %v12831_v11  ;;  %v13085_v11 = vld [vmem:[#allocation2 + $0x229] sm:$0xff] }
 0x82e   :  { %4984 = vmatmul.mubr.f32.gmra.mrb[136].mxu1 %v13069_v43 }
 0x82f   :  { %4988 = vmatprep.mubr.f32.mxu1 %v12835_v16  ;;  %v13089_v16 = vld [vmem:[#allocation2 + $0x231] sm:$0xff] }
 0x832   :  { %4989 = vmatmul.mubr.f32.gmra.mrb[138].mxu1 %v13073_v42 }
 0x833   :  { %4993 = vmatprep.mubr.f32.mxu1 %v12839_v33  ;;  %v13093_v33 = vld [vmem:[#allocation2 + $0x241] sm:$0xff] }
 0x836   :  { %4994 = vmatmul.mubr.f32.gmra.mrb[140].mxu1 %v13077_v48 }
 0x837   :  { %4998 = vmatprep.mubr.f32.mxu1 %v12843_v39  ;;  %v13097_v39 = vld [vmem:[#allocation2 + $0x249] sm:$0xff] }
 0x83a   :  { %4999 = vmatmul.mubr.f32.gmra.mrb[142].mxu1 %v13081_v60 }
 0x83b   :  { %5003 = vmatprep.mubr.f32.mxu1 %v12847_v32  ;;  %v13101_v32 = vld [vmem:[#allocation2 + $0x259] sm:$0xff] }
 0x83e   :  { %5004 = vmatmul.mubr.f32.gmra.mrb[144].mxu1 %v13085_v11 }
 0x83f   :  { %5008 = vmatprep.mubr.f32.mxu1 %v12851_v36  ;;  %v13105_v36 = vld [vmem:[#allocation2 + $0x261] sm:$0xff] }
 0x842   :  { %5009 = vmatmul.mubr.f32.gmra.mrb[146].mxu1 %v13089_v16 }
 0x843   :  { %5013 = vmatprep.mubr.f32.mxu1 %v12855_v56  ;;  %v13109_v56 = vld [vmem:[#allocation2 + $0x271] sm:$0xff] }
 0x846   :  { %5014 = vmatmul.mubr.f32.gmra.mrb[148].mxu1 %v13093_v33 }
 0x847   :  { %5018 = vmatprep.mubr.f32.mxu1 %v12859_v30  ;;  %v13113_v30 = vld [vmem:[#allocation2 + $0x279] sm:$0xff] }
 0x84a   :  { %5019 = vmatmul.mubr.f32.gmra.mrb[150].mxu1 %v13097_v39 }
 0x84b   :  { %5023 = vmatprep.mubr.f32.mxu1 %v12863_v24  ;;  %v13117_v24 = vld [vmem:[#allocation2 + $0x289] sm:$0xff] }
 0x84e   :  { %5024 = vmatmul.mubr.f32.gmra.mrb[152].mxu1 %v13101_v32 }
 0x84f   :  { %5028 = vmatprep.mubr.f32.mxu1 %v12867_v55  ;;  %v13121_v55 = vld [vmem:[#allocation2 + $0x291] sm:$0xff] }
 0x852   :  { %5029 = vmatmul.mubr.f32.gmra.mrb[154].mxu1 %v13105_v36 }
 0x853   :  { %5033 = vmatprep.mubr.f32.mxu1 %v12871_v34  ;;  %v13125_v34 = vld [vmem:[#allocation2 + $0x2a1] sm:$0xff] }
 0x856   :  { %5034 = vmatmul.mubr.f32.gmra.mrb[156].mxu1 %v13109_v56 }
 0x857   :  { %5038 = vmatprep.mubr.f32.mxu1 %v12875_v4  ;;  %v13129_v4 = vld [vmem:[#allocation2 + $0x2a9] sm:$0xff] }
 0x85a   :  { %5039 = vmatmul.mubr.f32.gmra.mrb[158].mxu1 %v13113_v30 }
 0x85b   :  { %5043 = vmatprep.mubr.f32.mxu1 %v12879_v52  ;;  %v13133_v52 = vld [vmem:[#allocation2 + $0x2b9] sm:$0xff] }
 0x85e   :  { %5044 = vmatmul.mubr.f32.gmra.mrb[160].mxu1 %v13117_v24 }
 0x85f   :  { %5048 = vmatprep.mubr.f32.mxu1 %v12883_v54  ;;  %v13137_v54 = vld [vmem:[#allocation2 + $0x2c1] sm:$0xff] }
 0x862   :  { %5049 = vmatmul.mubr.f32.gmra.mrb[162].mxu1 %v13121_v55 }
 0x863   :  { %5053 = vmatprep.mubr.f32.mxu1 %v12887_v7  ;;  %v13141_v7 = vld [vmem:[#allocation2 + $0x2d1] sm:$0xff] }
 0x866   :  { %5054 = vmatmul.mubr.f32.gmra.mrb[164].mxu1 %v13125_v34 }
 0x867   :  { %5058 = vmatprep.mubr.f32.mxu1 %v12891_v21  ;;  %v13145_v21 = vld [vmem:[#allocation2 + $0x2d9] sm:$0xff] }
 0x86a   :  { %5059 = vmatmul.mubr.f32.gmra.mrb[166].mxu1 %v13129_v4 }
 0x86b   :  { %5063 = vmatprep.mubr.f32.mxu1 %v12895_v2  ;;  %v13149_v2 = vld [vmem:[#allocation2 + $0x2e9] sm:$0xff] }
 0x86e   :  { %5064 = vmatmul.mubr.f32.gmra.mrb[168].mxu1 %v13133_v52 }
 0x86f   :  { %5068 = vmatprep.mubr.f32.mxu1 %v12899_v37  ;;  %v13153_v37 = vld [vmem:[#allocation2 + $0x2f1] sm:$0xff] }
 0x872   :  { %5069 = vmatmul.mubr.f32.gmra.mrb[170].mxu1 %v13137_v54 }
 0x873   :  { %5073 = vmatprep.mubr.f32.mxu1 %v12903_v20  ;;  %v13157_v20 = vld [vmem:[#allocation2 + $0x301] sm:$0xff] }
 0x876   :  { %5074 = vmatmul.mubr.f32.gmra.mrb[172].mxu1 %v13141_v7 }
 0x877   :  { %5078 = vmatprep.mubr.f32.mxu1 %v12907_v57  ;;  %v13161_v57 = vld [vmem:[#allocation2 + $0x309] sm:$0xff] }
 0x87a   :  { %5079 = vmatmul.mubr.f32.gmra.mrb[174].mxu1 %v13145_v21 }
 0x87b   :  { %5083 = vmatprep.mubr.f32.mxu1 %v12911_v35  ;;  %v13165_v35 = vld [vmem:[#allocation2 + $0x319] sm:$0xff] }
 0x87e   :  { %5084 = vmatmul.mubr.f32.gmra.mrb[176].mxu1 %v13149_v2 }
 0x87f   :  { %5088 = vmatprep.mubr.f32.mxu1 %v12915_v59  ;;  %v13169_v59 = vld [vmem:[#allocation2 + $0x321] sm:$0xff] }
 0x882   :  { %5089 = vmatmul.mubr.f32.gmra.mrb[178].mxu1 %v13153_v37 }
 0x883   :  { %5093 = vmatprep.mubr.f32.mxu1 %v12919_v12  ;;  %v13172_v12 = vld [vmem:[#allocation2 + $0x332] sm:$0xff] }
 0x884   :  { %14678 = vst [vmem:[#allocation28_spill] sm:$0xff] %v13172_v12 }
 0x886   :  { %5094 = vmatmul.mubr.f32.gmra.mrb[180].mxu1 %v13157_v20 }
 0x887   :  { %5098 = vmatprep.mubr.f32.mxu1 %v12923_v61  ;;  %v13175_v61 = vld [vmem:[#allocation2 + $0x331] sm:$0xff] }
 0x88a   :  { %5099 = vmatmul.mubr.f32.gmra.mrb[182].mxu1 %v13161_v57 }
 0x88b   :  { %5103 = vmatprep.mubr.f32.mxu1 %v12926_v38  ;;  %v13181_v38 = vld [vmem:[#allocation2 + $0x339] sm:$0xff] }
 0x88e   :  { %5104 = vmatmul.mubr.f32.gmra.mrb[184].mxu1 %v13165_v35 }
 0x88f   :  { %5108 = vmatprep.mubr.f32.mxu1 %v12929_v10  ;;  %v3633_v10 = vld [vmem:[#allocation2 + $0x30] sm:$0xff] }
 0x892   :  { %5109 = vmatmul.mubr.f32.gmra.mrb[186].mxu1 %v13169_v59 }
 0x893   :  { %5113 = vmatprep.mubr.f32.mxu1 %v13172_v12  ;;  %v14683_v12 = vld [vmem:[#allocation10_spill] sm:$0xff] }
 0x896   :  { %5114 = vmatmul.mubr.f32.gmra.mrb[188].mxu1 %v13175_v61 }
 0x897   :  { %5118 = vmatprep.mubr.f32.mxu1 %v13178_v23  ;;  %v3635_v23 = vld [vmem:[#allocation2 + $0x48] sm:$0xff] }
 0x89a   :  { %5119 = vmatmul.mubr.f32.gmra.mrb[190].mxu1 %v13181_v38 }
 0x89b   :  { %5188 = vmatprep.mubr.f32.mxu1 %v12936_v8  ;;  %v14684_v8 = vld [vmem:[#allocation13_spill] sm:$0xff] }
 0x89e   :  { %5189 = vmatmul.mubr.f32.vlgmr.msra.gmra.mrb[64].mxu1 %v3633_v10  ;;  %v14686_v10 = vld [vmem:[#allocation37_spill] sm:$0xff] }
 0x89f   :  { %5193 = vmatprep.mubr.f32.mxu1 %v12940_v14  ;;  %7649 = vmatpush3.bf16.msra.mxu1 %v14677_v63  ;;  %v3636_v14 = vld [vmem:[#allocation2 + $0x50] sm:$0xff]  ;;  %v14685_v63 = vld [vmem:[#allocation24_spill] sm:$0xff] }
 0x8a0   :  { %7642 = vmatprep.subr.bf16.mxu1 %v14680_v17 }
 0x8a2   :  { %5194 = vmatmul.mubr.f32.gmra.mrb[66].mxu1 %v3634_v44  ;;  %v3637_v44 = vld [vmem:[#allocation2 + $0x60] sm:$0xff] }
 0x8a3   :  { %5198 = vmatprep.mubr.f32.mxu1 %v14681_v40  ;;  %7650 = vmatpush3.bf16.msra.mxu1 %v14680_v17  ;;  %v14687_v17 = vld [vmem:[#allocation27_spill] sm:$0xff] }
 0x8a4   :  { %7643 = vmatprep.subr.bf16.mxu1 %v14682_v51  ;;  %v14689_v40 = vld [vmem:[#allocation39_spill] sm:$0xff] }
 0x8a6   :  { %5199 = vmatmul.mubr.f32.gmra.mrb[68].mxu1 %v3635_v23  ;;  %v14688_v23 = vld [vmem:[#allocation38_spill] sm:$0xff] }
 0x8a7   :  { %5203 = vmatprep.mubr.f32.mxu1 %v14683_v12  ;;  %7651 = vmatpush3.bf16.msra.mxu1 %v14682_v51  ;;  %v3638_v12 = vld [vmem:[#allocation2 + $0x68] sm:$0xff]  ;;  %v3639_v51 = vld [vmem:[#allocation2 + $0x78] sm:$0xff] }
 0x8a8   :  { %7644 = vmatprep.subr.bf16.mxu1 %v14684_v8 }
 0x8aa   :  { %5204 = vmatmul.mubr.f32.gmra.mrb[70].mxu1 %v3636_v14  ;;  %v3640_v14 = vld [vmem:[#allocation2 + $0x80] sm:$0xff] }
 0x8ab   :  { %5208 = vmatprep.mubr.f32.mxu1 %v14685_v63  ;;  %7652 = vmatpush3.bf16.msra.mxu1 %v14684_v8  ;;  %v14690_v8 = vld [vmem:[#allocation17_spill] sm:$0xff]  ;;  %v3641_v63 = vld [vmem:[#allocation2 + $0x90] sm:$0xff] }
 0x8ac   :  { %7645 = vmatprep.subr.bf16.mxu1 %v14686_v10 }
 0x8ae   :  { %5209 = vmatmul.mubr.f32.gmra.mrb[72].mxu1 %v3637_v44  ;;  %v3645_v44 = vld [vmem:[#allocation2 + $0xc0] sm:$0xff] }
 0x8af   :  { %5213 = vmatprep.mubr.f32.mxu1 %v14687_v17  ;;  %7653 = vmatpush3.bf16.msra.mxu1 %v14686_v10  ;;  %v3643_v10 = vld [vmem:[#allocation2 + $0xa8] sm:$0xff] }
 0x8b0   :  { %7646 = vmatprep.subr.bf16.mxu1 %v14688_v23  ;;  %v3662_v17 = vld [vmem:[#allocation2 + $0x188] sm:$0xff] }
 0x8b2   :  { %5214 = vmatmul.mubr.f32.gmra.mrb[74].mxu1 %v3638_v12  ;;  %v3669_v12 = vld [vmem:[#allocation2 + $0x210] sm:$0xff] }
 0x8b3   :  { %5218 = vmatprep.mubr.f32.mxu1 %v12960_v22  ;;  %7654 = vmatpush3.bf16.msra.mxu1 %v14688_v23  ;;  %v3642_v22 = vld [vmem:[#allocation2 + $0x98] sm:$0xff]  ;;  %v13229_v23 = vld [vmem:[#allocation2] sm:$0xff] }
 0x8b4   :  { %7647 = vmatprep.subr.bf16.mxu1 %v14689_v40 }
 0x8b6   :  { %5219 = vmatmul.mubr.f32.gmra.mrb[76].mxu1 %v3639_v51  ;;  %v14691_v51 = vld [vmem:[#allocation15_spill] sm:$0xff] }
 0x8b7   :  { %5223 = vmatprep.mubr.f32.mxu1 %v12964_v41  ;;  %7655 = vmatpush3.bf16.msra.mxu1 %v14689_v40  ;;  %v3644_v41 = vld [vmem:[#allocation2 + $0xb0] sm:$0xff]  ;;  %v3686_v40 = vld [vmem:[#allocation2 + $0x2d8] sm:$0xff] }
 0x8b8   :  { %7648 = vmatprep.subr.bf16.mxu1 %v14690_v8 }
 0x8ba   :  { %5224 = vmatmul.mubr.f32.gmra.mrb[78].mxu1 %v3640_v14  ;;  %v3687_v14 = vld [vmem:[#allocation2 + $0x2e8] sm:$0xff] }
 0x8bb   :  { %5228 = vmatprep.mubr.f32.mxu1 %v12968_v27  ;;  %7656 = vmatpush3.bf16.msra.mxu1 %v14690_v8  ;;  %v3646_v27 = vld [vmem:[#allocation2 + $0xc8] sm:$0xff] }
 0x8be   :  { %5229 = vmatmul.mubr.f32.gmra.mrb[80].mxu1 %v3641_v63 }
 0x8bf   :  { %5233 = vmatprep.mubr.f32.mxu1 %v12972_v25  ;;  %v3647_v25 = vld [vmem:[#allocation2 + $0xd8] sm:$0xff] }
 0x8c2   :  { %5234 = vmatmul.mubr.f32.gmra.mrb[82].mxu1 %v3642_v22 }
 0x8c3   :  { %5238 = vmatprep.mubr.f32.mxu1 %v12976_v47  ;;  %v3648_v47 = vld [vmem:[#allocation2 + $0xe0] sm:$0xff] }
 0x8c6   :  { %5239 = vmatmul.mubr.f32.gmra.mrb[84].mxu1 %v3643_v10  ;;  %v14693_v10 = vld [vmem:[#allocation19_spill] sm:$0xff] }
 0x8c7   :  { %5243 = vmatprep.mubr.f32.mxu1 %v12980_v9  ;;  %v3649_v9 = vld [vmem:[#allocation2 + $0xf0] sm:$0xff] }
 0x8ca   :  { %5244 = vmatmul.mubr.f32.gmra.mrb[86].mxu1 %v3644_v41 }
 0x8cb   :  { %5248 = vmatprep.mubr.f32.mxu1 %v12985_v13  ;;  %v3650_v13 = vld [vmem:[#allocation2 + $0xf8] sm:$0xff] }
 0x8ce   :  { %5249 = vmatmul.mubr.f32.gmra.mrb[88].mxu1 %v3645_v44 }
 0x8cf   :  { %5253 = vmatprep.mubr.f32.mxu1 %v12989_v26  ;;  %v3651_v26 = vld [vmem:[#allocation2 + $0x108] sm:$0xff] }
 0x8d2   :  { %5254 = vmatmul.mubr.f32.gmra.mrb[90].mxu1 %v3646_v27 }
 0x8d3   :  { %5258 = vmatprep.mubr.f32.mxu1 %v12993_v53  ;;  %v3652_v53 = vld [vmem:[#allocation2 + $0x110] sm:$0xff] }
 0x8d6   :  { %5259 = vmatmul.mubr.f32.gmra.mrb[92].mxu1 %v3647_v25  ;;  %v14694_v25 = vld [vmem:[#allocation16_spill] sm:$0xff] }
 0x8d7   :  { %5263 = vmatprep.mubr.f32.mxu1 %v12997_v62  ;;  %v3653_v62 = vld [vmem:[#allocation2 + $0x120] sm:$0xff] }
 0x8da   :  { %5264 = vmatmul.mubr.f32.gmra.mrb[94].mxu1 %v3648_v47 }
 0x8db   :  { %5268 = vmatprep.mubr.f32.mxu1 %v13002_v1  ;;  %v3654_v1 = vld [vmem:[#allocation2 + $0x128] sm:$0xff] }
 0x8de   :  { %5269 = vmatmul.mubr.f32.gmra.mrb[96].mxu1 %v3649_v9 }
 0x8df   :  { %5273 = vmatprep.mubr.f32.mxu1 %v13006_v58  ;;  %v3655_v58 = vld [vmem:[#allocation2 + $0x138] sm:$0xff] }
 0x8e2   :  { %5274 = vmatmul.mubr.f32.gmra.mrb[98].mxu1 %v3650_v13 }
 0x8e3   :  { %5278 = vmatprep.mubr.f32.mxu1 %v13010_v49  ;;  %v3656_v49 = vld [vmem:[#allocation2 + $0x140] sm:$0xff] }
 0x8e6   :  { %5279 = vmatmul.mubr.f32.gmra.mrb[100].mxu1 %v3651_v26  ;;  %v14695_v26 = vld [vmem:[#allocation30_spill] sm:$0xff] }
 0x8e7   :  { %5283 = vmatprep.mubr.f32.mxu1 %v13014_v45  ;;  %v3657_v45 = vld [vmem:[#allocation2 + $0x150] sm:$0xff] }
 0x8ea   :  { %5284 = vmatmul.mubr.f32.gmra.mrb[102].mxu1 %v3652_v53 }
 0x8eb   :  { %5288 = vmatprep.mubr.f32.mxu1 %v13019_v29  ;;  %v3658_v29 = vld [vmem:[#allocation2 + $0x158] sm:$0xff] }
 0x8ee   :  { %5289 = vmatmul.mubr.f32.gmra.mrb[104].mxu1 %v3653_v62 }
 0x8ef   :  { %5293 = vmatprep.mubr.f32.mxu1 %v13023_v46  ;;  %v3659_v46 = vld [vmem:[#allocation2 + $0x168] sm:$0xff] }
 0x8f2   :  { %5294 = vmatmul.mubr.f32.gmra.mrb[106].mxu1 %v3654_v1 }
 0x8f3   :  { %5298 = vmatprep.mubr.f32.mxu1 %v13027_v31  ;;  %v3660_v31 = vld [vmem:[#allocation2 + $0x170] sm:$0xff] }
 0x8f6   :  { %5299 = vmatmul.mubr.f32.gmra.mrb[108].mxu1 %v3655_v58  ;;  %v14696_v58 = vld [vmem:[#allocation21_spill] sm:$0xff] }
 0x8f7   :  { %5303 = vmatprep.mubr.f32.mxu1 %v13031_v6  ;;  %v3661_v6 = vld [vmem:[#allocation2 + $0x180] sm:$0xff] }
 0x8fa   :  { %5304 = vmatmul.mubr.f32.gmra.mrb[110].mxu1 %v3656_v49 }
 0x8fb   :  { %5308 = vmatprep.mubr.f32.mxu1 %v13036_v50  ;;  %v3727_v50 = vld [vmem:[#allocation2 + $0x199] sm:$0xff] }
 0x8fe   :  { %5309 = vmatmul.mubr.f32.gmra.mrb[112].mxu1 %v3657_v45 }
 0x8ff   :  { %5313 = vmatprep.mubr.f32.mxu1 %v13040_v28  ;;  %v3728_v28 = vld [vmem:[#allocation2 + $0x1a1] sm:$0xff] }
 0x902   :  { %5314 = vmatmul.mubr.f32.gmra.mrb[114].mxu1 %v3658_v29 }
 0x903   :  { %5318 = vmatprep.mubr.f32.mxu1 %v13044_v15  ;;  %v3665_v15 = vld [vmem:[#allocation2 + $0x1e0] sm:$0xff] }
 0x906   :  { %5319 = vmatmul.mubr.f32.gmra.mrb[116].mxu1 %v3659_v46  ;;  %v14697_v46 = vld [vmem:[#allocation41_spill] sm:$0xff] }
 0x907   :  { %5323 = vmatprep.mubr.f32.mxu1 %v13048_v3  ;;  %v3666_v3 = vld [vmem:[#allocation2 + $0x1e8] sm:$0xff] }
 0x90a   :  { %5324 = vmatmul.mubr.f32.gmra.mrb[118].mxu1 %v3660_v31 }
 0x90b   :  { %5328 = vmatprep.mubr.f32.mxu1 %v13052_v0  ;;  %v3667_v0 = vld [vmem:[#allocation2 + $0x1f8] sm:$0xff] }
 0x90e   :  { %5329 = vmatmul.mubr.f32.gmra.mrb[120].mxu1 %v3661_v6 }
 0x90f   :  { %5333 = vmatprep.mubr.f32.mxu1 %v13055_v18  ;;  %v3668_v18 = vld [vmem:[#allocation2 + $0x200] sm:$0xff] }
 0x912   :  { %5334 = vmatmul.mubr.f32.gmra.mrb[122].mxu1 %v3662_v17  ;;  %v14698_v17 = vld [vmem:[#allocation40_spill] sm:$0xff] }
 0x913   :  { %5338 = vmatprep.mubr.f32.mxu1 %v3727_v50 }
 0x916   :  { %5339 = vmatmul.mubr.f32.gmra.mrb[124].mxu1 %v13229_v23 }
 0x917   :  { %5343 = vmatprep.mubr.f32.mxu1 %v3728_v28 }
 0x91a   :  { %5344 = vmatmul.mubr.f32.gmra.mrb[126].mxu1 %v13229_v23 }
 0x91b   :  { %5348 = vmatprep.mubr.f32.mxu1 %v13061_v19  ;;  %v3670_v19 = vld [vmem:[#allocation2 + $0x218] sm:$0xff] }
 0x91e   :  { %5349 = vmatmul.mubr.f32.gmra.mrb[128].mxu1 %v3665_v15 }
 0x91f   :  { %5353 = vmatprep.mubr.f32.mxu1 %v13065_v5  ;;  %v3671_v5 = vld [vmem:[#allocation2 + $0x228] sm:$0xff] }
 0x922   :  { %5354 = vmatmul.mubr.f32.gmra.mrb[130].mxu1 %v3666_v3  ;;  %v3759_v3 = vld [vmem:[#allocation2 + $0x349] sm:$0xff] }
 0x923   :  { %5358 = vmatprep.mubr.f32.mxu1 %v13069_v43  ;;  %v3672_v43 = vld [vmem:[#allocation2 + $0x230] sm:$0xff] }
 0x926   :  { %5359 = vmatmul.mubr.f32.gmra.mrb[132].mxu1 %v3667_v0  ;;  %v3694_v0 = vld [vmem:[#allocation2 + $0x338] sm:$0xff] }
 0x927   :  { %5363 = vmatprep.mubr.f32.mxu1 %v13073_v42  ;;  %v3673_v42 = vld [vmem:[#allocation2 + $0x240] sm:$0xff] }
 0x92a   :  { %5364 = vmatmul.mubr.f32.gmra.mrb[134].mxu1 %v3668_v18  ;;  %v14699_v18 = vld [vmem:[#allocation44_spill] sm:$0xff] }
 0x92b   :  { %5368 = vmatprep.mubr.f32.mxu1 %v13077_v48  ;;  %v3674_v48 = vld [vmem:[#allocation2 + $0x248] sm:$0xff] }
 0x92e   :  { %5369 = vmatmul.mubr.f32.gmra.mrb[136].mxu1 %v3669_v12 }
 0x92f   :  { %5373 = vmatprep.mubr.f32.mxu1 %v13081_v60  ;;  %v3675_v60 = vld [vmem:[#allocation2 + $0x258] sm:$0xff] }
 0x932   :  { %5374 = vmatmul.mubr.f32.gmra.mrb[138].mxu1 %v3670_v19 }
 0x933   :  { %5378 = vmatprep.mubr.f32.mxu1 %v13085_v11  ;;  %v3676_v11 = vld [vmem:[#allocation2 + $0x260] sm:$0xff] }
 0x936   :  { %5379 = vmatmul.mubr.f32.gmra.mrb[140].mxu1 %v3671_v5  ;;  %v3760_v5 = vld [vmem:[#allocation2 + $0x351] sm:$0xff] }
 0x937   :  { %5383 = vmatprep.mubr.f32.mxu1 %v13089_v16  ;;  %v3677_v16 = vld [vmem:[#allocation2 + $0x270] sm:$0xff] }
 0x93a   :  { %5384 = vmatmul.mubr.f32.gmra.mrb[142].mxu1 %v3672_v43  ;;  %v14700_v43 = vld [vmem:[#allocation43_spill] sm:$0xff] }
 0x93b   :  { %5388 = vmatprep.mubr.f32.mxu1 %v13093_v33  ;;  %v3678_v33 = vld [vmem:[#allocation2 + $0x278] sm:$0xff] }
 0x93e   :  { %5389 = vmatmul.mubr.f32.gmra.mrb[144].mxu1 %v3673_v42 }
 0x93f   :  { %5393 = vmatprep.mubr.f32.mxu1 %v13097_v39  ;;  %v3679_v39 = vld [vmem:[#allocation2 + $0x288] sm:$0xff] }
 0x942   :  { %5394 = vmatmul.mubr.f32.gmra.mrb[146].mxu1 %v3674_v48 }
 0x943   :  { %5398 = vmatprep.mubr.f32.mxu1 %v13101_v32  ;;  %v3680_v32 = vld [vmem:[#allocation2 + $0x290] sm:$0xff] }
 0x946   :  { %5399 = vmatmul.mubr.f32.gmra.mrb[148].mxu1 %v3675_v60 }
 0x947   :  { %5403 = vmatprep.mubr.f32.mxu1 %v13105_v36  ;;  %v3681_v36 = vld [vmem:[#allocation2 + $0x2a0] sm:$0xff] }
 0x94a   :  { %5404 = vmatmul.mubr.f32.gmra.mrb[150].mxu1 %v3676_v11 }
 0x94b   :  { %5408 = vmatprep.mubr.f32.mxu1 %v13109_v56  ;;  %v3682_v56 = vld [vmem:[#allocation2 + $0x2a8] sm:$0xff] }
 0x94e   :  { %5409 = vmatmul.mubr.f32.gmra.mrb[152].mxu1 %v3677_v16 }
 0x94f   :  { %5413 = vmatprep.mubr.f32.mxu1 %v13113_v30  ;;  %v3683_v30 = vld [vmem:[#allocation2 + $0x2b8] sm:$0xff] }
 0x952   :  { %5414 = vmatmul.mubr.f32.gmra.mrb[154].mxu1 %v3678_v33  ;;  %v3817_v33 = vld [vmem:[#allocation2 + $0x302] sm:$0xff] }
 0x953   :  { %5418 = vmatprep.mubr.f32.mxu1 %v13117_v24  ;;  %v3684_v24 = vld [vmem:[#allocation2 + $0x2c0] sm:$0xff] }
 0x956   :  { %5419 = vmatmul.mubr.f32.gmra.mrb[156].mxu1 %v3679_v39 }
 0x957   :  { %5423 = vmatprep.mubr.f32.mxu1 %v13121_v55  ;;  %v3685_v55 = vld [vmem:[#allocation2 + $0x2d0] sm:$0xff] }
 0x95a   :  { %5424 = vmatmul.mubr.f32.gmra.mrb[158].mxu1 %v3680_v32  ;;  %v3818_v32 = vld [vmem:[#allocation2 + $0x30a] sm:$0xff] }
 0x95b   :  { %5428 = vmatprep.mubr.f32.mxu1 %v13125_v34 }
 0x95e   :  { %5429 = vmatmul.mubr.f32.gmra.mrb[160].mxu1 %v3681_v36  ;;  %v14702_v36 = vld [vmem:[#allocation46_spill] sm:$0xff] }
 0x95f   :  { %5433 = vmatprep.mubr.f32.mxu1 %v13129_v4 }
 0x962   :  { %5434 = vmatmul.mubr.f32.gmra.mrb[162].mxu1 %v3682_v56 }
 0x963   :  { %5438 = vmatprep.mubr.f32.mxu1 %v13133_v52 }
 0x966   :  { %5439 = vmatmul.mubr.f32.gmra.mrb[164].mxu1 %v3683_v30 }
 0x967   :  { %5443 = vmatprep.mubr.f32.mxu1 %v13137_v54  ;;  %v14692_v54 = vld [vmem:[#allocation12_spill] sm:$0xff] }
 0x96a   :  { %5444 = vmatmul.mubr.f32.gmra.mrb[166].mxu1 %v3684_v24  ;;  %v3819_v24 = vld [vmem:[#allocation2 + $0x31a] sm:$0xff] }
 0x96b   :  { %5448 = vmatprep.mubr.f32.mxu1 %v13141_v7 }
 0x96e   :  { %5449 = vmatmul.mubr.f32.gmra.mrb[168].mxu1 %v3685_v55 }
 0x96f   :  { %5453 = vmatprep.mubr.f32.mxu1 %v13145_v21  ;;  %v3688_v21 = vld [vmem:[#allocation2 + $0x2f0] sm:$0xff] }
 0x971   :  { %v5190_v34 = vpop.f32.mrb[64].mxu1 }
 0x972   :  { %v13256_v4 = vadd.f32 %v14691_v51, %v5190_v34  ;;  %v5192_v8 = vpop.f32.mrb[65].mxu1  ;;  %5454 = vmatmul.mubr.f32.gmra.mrb[170].mxu1 %v3686_v40  ;;  %v3820_v34 = vld [vmem:[#allocation2 + $0x322] sm:$0xff] }
 0x973   :  { %5458 = vmatprep.mubr.f32.mxu1 %v13149_v2  ;;  %v3689_v2 = vld [vmem:[#allocation2 + $0x300] sm:$0xff]  ;;  %v14703_v40 = vld [vmem:[#allocation50_spill] sm:$0xff] }
 0x975   :  { %v5195_v52 = vpop.f32.mrb[66].mxu1 }
 0x976   :  { %v13260_v63 = vadd.f32 %v14692_v54, %v5195_v52  ;;  %v5197_v22 = vpop.f32.mrb[67].mxu1  ;;  %5459 = vmatmul.mubr.f32.gmra.mrb[172].mxu1 %v3687_v14  ;;  %v14704_v52 = vld [vmem:[#allocation28_spill] sm:$0xff]  ;;  %v14705_v54 = vld [vmem:[#allocation49_spill] sm:$0xff] }
 0x977   :  { %5463 = vmatprep.mubr.f32.mxu1 %v13153_v37  ;;  %v3690_v37 = vld [vmem:[#allocation2 + $0x308] sm:$0xff] }
 0x979   :  { %v5200_v7 = vpop.f32.mrb[68].mxu1 }
 0x97a   :  { %v13264_v41 = vadd.f32 %v14693_v10, %v5200_v7  ;;  %v5202_v44 = vpop.f32.mrb[69].mxu1  ;;  %5464 = vmatmul.mubr.f32.gmra.mrb[174].mxu1 %v3688_v21  ;;  %v14706_v21 = vld [vmem:[#allocation29_spill] sm:$0xff]  ;;  %v3824_v10 = vld [vmem:[#allocation2 + $0x352] sm:$0xff] }
 0x97b   :  { %5468 = vmatprep.mubr.f32.mxu1 %v13157_v20  ;;  %v3691_v20 = vld [vmem:[#allocation2 + $0x318] sm:$0xff] }
 0x97d   :  { %v5205_v27 = vpop.f32.mrb[70].mxu1 }
 0x97e   :  { %v13268_v47 = vadd.f32 %v14694_v25, %v5205_v27  ;;  %v5207_v9 = vpop.f32.mrb[71].mxu1  ;;  %5469 = vmatmul.mubr.f32.gmra.mrb[176].mxu1 %v3689_v2  ;;  %v14707_v27 = vld [vmem:[#allocation53_spill] sm:$0xff] }
 0x97f   :  { %5473 = vmatprep.mubr.f32.mxu1 %v13161_v57  ;;  %v3692_v57 = vld [vmem:[#allocation2 + $0x320] sm:$0xff] }
 0x981   :  { %v5210_v13 = vpop.f32.mrb[72].mxu1 }
 0x982   :  { %v13272_v53 = vadd.f32 %v14695_v26, %v5210_v13  ;;  %v5212_v62 = vpop.f32.mrb[73].mxu1  ;;  %5474 = vmatmul.mubr.f32.gmra.mrb[178].mxu1 %v3690_v37  ;;  %v14708_v13 = vld [vmem:[#allocation52_spill] sm:$0xff] }
 0x983   :  { %5478 = vmatprep.mubr.f32.mxu1 %v13165_v35  ;;  %v3693_v35 = vld [vmem:[#allocation2 + $0x330] sm:$0xff] }
 0x985   :  { %v5215_v1 = vpop.f32.mrb[74].mxu1 }
 0x986   :  { %v13276_v49 = vadd.f32 %v14696_v58, %v5215_v1  ;;  %v5217_v45 = vpop.f32.mrb[75].mxu1  ;;  %5479 = vmatmul.mubr.f32.gmra.mrb[180].mxu1 %v3691_v20  ;;  %v14709_v1 = vld [vmem:[#allocation20_spill] sm:$0xff] }
 0x987   :  { %5483 = vmatprep.mubr.f32.mxu1 %v13169_v59 }
 0x989   :  { %v5220_v29 = vpop.f32.mrb[76].mxu1 }
 0x98a   :  { %v13280_v31 = vadd.f32 %v14697_v46, %v5220_v29  ;;  %v5222_v6 = vpop.f32.mrb[77].mxu1  ;;  %5484 = vmatmul.mubr.f32.gmra.mrb[182].mxu1 %v3692_v57  ;;  %v14710_v29 = vld [vmem:[#allocation54_spill] sm:$0xff] }
 0x98b   :  { %5488 = vmatprep.mubr.f32.mxu1 %v13175_v61 }
 0x98d   :  { %v5225_v50 = vpop.f32.mrb[78].mxu1 }
 0x98e   :  { %v13284_v28 = vadd.f32 %v14698_v17, %v5225_v50  ;;  %v5227_v15 = vpop.f32.mrb[79].mxu1  ;;  %5489 = vmatmul.mubr.f32.gmra.mrb[184].mxu1 %v3693_v35  ;;  %v14711_v50 = vld [vmem:[#allocation56_spill] sm:$0xff] }
 0x98f   :  { %5493 = vmatprep.mubr.f32.mxu1 %v13181_v38  ;;  %v14701_v38 = vld [vmem:[#allocation47_spill] sm:$0xff] }
 0x991   :  { %v5230_v59 = vpop.f32.mrb[80].mxu1 }
 0x992   :  { %v13288_v12 = vadd.f32 %v14699_v18, %v5230_v59  ;;  %v5232_v19 = vpop.f32.mrb[81].mxu1  ;;  %5494 = vmatmul.mubr.f32.gmra.mrb[186].mxu1 %v3694_v0 }
 0x993   :  { %5498 = vmatprep.mubr.f32.mxu1 %v3759_v3  ;;  %v14712_v3 = vld [vmem:[#allocation55_spill] sm:$0xff]  ;;  %v14713_v19 = vld [vmem:[#allocation58_spill] sm:$0xff] }
 0x995   :  { %v5235_v61 = vpop.f32.mrb[82].mxu1 }
 0x996   :  { %v13291_v42 = vadd.f32 %v14700_v43, %v5235_v61  ;;  %v5237_v48 = vpop.f32.mrb[83].mxu1  ;;  %5499 = vmatmul.mubr.f32.gmra.mrb[188].mxu1 %v13229_v23 }
 0x997   :  { %5503 = vmatprep.mubr.f32.mxu1 %v3760_v5  ;;  %v14715_v48 = vld [vmem:[#allocation57_spill] sm:$0xff] }
 0x999   :  { %v5240_v60 = vpop.f32.mrb[84].mxu1 }
 0x99a   :  { %v13295_v11 = vadd.f32 %v14701_v38, %v5240_v60  ;;  %v5242_v16 = vpop.f32.mrb[85].mxu1  ;;  %5504 = vmatmul.mubr.f32.gmra.mrb[190].mxu1 %v13229_v23  ;;  %v3823_v23 = vld [vmem:[#allocation2 + $0x34a] sm:$0xff] }
 0x99b   :  { %7181 = vmatprep.mubr.f32.mxu1 %v3817_v33  ;;  %v14716_v33 = vld [vmem:[#allocation60_spill] sm:$0xff] }
 0x99d   :  { %v5245_v39 = vpop.f32.mrb[86].mxu1 }
 0x99e   :  { %v13299_v56 = vadd.f32 %v14702_v36, %v5245_v39  ;;  %v5247_v30 = vpop.f32.mrb[87].mxu1  ;;  %7182 = vmatmul.mubr.f32.vlgmr.msra.gmra.mrb[192].mxu1 %v3818_v32 }
 0x99f   :  { %7184 = vmatprep.mubr.f32.mxu1 %v3819_v24  ;;  %v14718_v30 = vld [vmem:[#allocation59_spill] sm:$0xff] }
 0x9a1   :  { %v5250_v55 = vpop.f32.mrb[88].mxu1 }
 0x9a2   :  { %v13302_v51 = vadd.f32 %v14703_v40, %v5250_v55  ;;  %v5252_v8 = vpop.f32.mrb[89].mxu1  ;;  %7185 = vmatmul.mubr.f32.gmra.mrb[194].mxu1 %v3820_v34  ;;  %v14719_v40 = vld [vmem:[#allocation62_spill] sm:$0xff] }
 0x9a3   :  { %7187 = vmatprep.mubr.f32.mxu1 %v14704_v52 }
 0x9a5   :  { %v5255_v14 = vpop.f32.mrb[90].mxu1 }
 0x9a6   :  { %v13306_v22 = vadd.f32 %v14705_v54, %v5255_v14  ;;  %v5257_v7 = vpop.f32.mrb[91].mxu1  ;;  %7188 = vmatmul.mubr.f32.gmra.mrb[196].mxu1 %v14706_v21  ;;  %v14721_v14 = vld [vmem:[#allocation61_spill] sm:$0xff] }
 0x9a7   :  { %7190 = vmatprep.mubr.f32.mxu1 %v3823_v23 }
 0x9a9   :  { %v5260_v44 = vpop.f32.mrb[92].mxu1 }
 0x9aa   :  { %v13310_v2 = vadd.f32 %v14707_v27, %v5260_v44  ;;  %v5262_v25 = vpop.f32.mrb[93].mxu1  ;;  %7191 = vmatmul.mubr.f32.gmra.mrb[198].mxu1 %v3824_v10  ;;  %v14722_v10 = vld [vmem:[#allocation63_spill] sm:$0xff] }
 0x9ad   :  { %v5265_v9 = vpop.f32.mrb[94].mxu1 }
 0x9ae   :  { %v13313_v37 = vadd.f32 %v14708_v13, %v5265_v9  ;;  %v5267_v26 = vpop.f32.mrb[95].mxu1  ;;  %v14724_v9 = vld [vmem:[#allocation23_spill] sm:$0xff] }
 0x9b1   :  { %v5270_v62 = vpop.f32.mrb[96].mxu1 }
 0x9b2   :  { %v13316_v20 = vadd.f32 %v14709_v1, %v5270_v62  ;;  %v5272_v58 = vpop.f32.mrb[97].mxu1  ;;  %v14725_v1 = vld [vmem:[#allocation64_spill] sm:$0xff] }
 0x9b5   :  { %v5275_v45 = vpop.f32.mrb[98].mxu1 }
 0x9b6   :  { %v13319_v57 = vadd.f32 %v14710_v29, %v5275_v45  ;;  %v5277_v46 = vpop.f32.mrb[99].mxu1 }
 0x9b7   :  { %v14727_v46 = vld [vmem:[#allocation22_spill] sm:$0xff] }
 0x9b9   :  { %v5280_v6 = vpop.f32.mrb[100].mxu1 }
 0x9ba   :  { %v13322_v35 = vadd.f32 %v14711_v50, %v5280_v6  ;;  %v5282_v17 = vpop.f32.mrb[101].mxu1 }
 0x9bd   :  { %v5285_v15 = vpop.f32.mrb[102].mxu1 }
 0x9be   :  { %v13325_v59 = vadd.f32 %v14712_v3, %v5285_v15  ;;  %v5287_v0 = vpop.f32.mrb[103].mxu1  ;;  %v14728_v15 = vld [vmem:[#allocation65_spill] sm:$0xff] }
 0x9c1   :  { %v5290_v18 = vpop.f32.mrb[104].mxu1 }
 0x9c2   :  { %v13328_v5 = vadd.f32 %v14713_v19, %v5290_v18  ;;  %v5292_v61 = vpop.f32.mrb[105].mxu1  ;;  %v14730_v19 = vld [vmem:[#allocation26_spill] sm:$0xff] }
 0x9c4   :  { %14714 = vst [vmem:[#allocation32_spill] sm:$0xff] %v13328_v5 }
 0x9c5   :  { %v5295_v43 = vpop.f32.mrb[106].mxu1 }
 0x9c6   :  { %v13331_v60 = vadd.f32 %v14715_v48, %v5295_v43  ;;  %v5297_v38 = vpop.f32.mrb[107].mxu1 }
 0x9c7   :  { %v14731_v38 = vld [vmem:[#allocation67_spill] sm:$0xff] }
 0x9c9   :  { %v5300_v16 = vpop.f32.mrb[108].mxu1 }
 0x9ca   :  { %v13334_v39 = vadd.f32 %v14716_v33, %v5300_v16  ;;  %v5302_v32 = vpop.f32.mrb[109].mxu1 }
 0x9cc   :  { %14717 = vst [vmem:[#allocation33_spill] sm:$0xff] %v13334_v39 }
 0x9cd   :  { %v5305_v36 = vpop.f32.mrb[110].mxu1 }
 0x9ce   :  { %v13337_v24 = vadd.f32 %v14718_v30, %v5305_v36  ;;  %v5307_v55 = vpop.f32.mrb[111].mxu1  ;;  %v14733_v36 = vld [vmem:[#allocation66_spill] sm:$0xff] }
 0x9d1   :  { %v5310_v34 = vpop.f32.mrb[112].mxu1 }
 0x9d2   :  { %v13340_v8 = vadd.f32 %v14719_v40, %v5310_v34  ;;  %v5312_v52 = vpop.f32.mrb[113].mxu1  ;;  %v14734_v40 = vld [vmem:[#allocation69_spill] sm:$0xff] }
 0x9d4   :  { %14720 = vst [vmem:[#allocation34_spill] sm:$0xff] %v13340_v8 }
 0x9d5   :  { %v5315_v23 = vpop.f32.mrb[114].mxu1 }
 0x9d6   :  { %v13343_v54 = vadd.f32 %v14721_v14, %v5315_v23  ;;  %v5317_v7 = vpop.f32.mrb[115].mxu1 }
 0x9d7   :  { %v14736_v7 = vld [vmem:[#allocation68_spill] sm:$0xff] }
 0x9d9   :  { %v5320_v21 = vpop.f32.mrb[116].mxu1 }
 0x9da   :  { %v13346_v44 = vadd.f32 %v14722_v10, %v5320_v21  ;;  %v5322_v27 = vpop.f32.mrb[117].mxu1 }
 0x9dc   :  { %14723 = vst [vmem:[#allocation14_spill] sm:$0xff] %v13346_v44 }
 0x9dd   :  { %v5325_v25 = vpop.f32.mrb[118].mxu1 }
 0x9de   :  { %v13349_v13 = vadd.f32 %v14724_v9, %v5325_v25  ;;  %v5327_v26 = vpop.f32.mrb[119].mxu1  ;;  %v14737_v25 = vld [vmem:[#allocation71_spill] sm:$0xff] }
 0x9e1   :  { %v5330_v62 = vpop.f32.mrb[120].mxu1 }
 0x9e2   :  { %v13352_v58 = vadd.f32 %v14725_v1, %v5330_v62  ;;  %v5332_v45 = vpop.f32.mrb[121].mxu1  ;;  %v5967_v62 = vmul.f32 %v13260_v63, %v13260_v63 }
 0x9e3   :  { %v14738_v45 = vld [vmem:[#allocation70_spill] sm:$0xff] }
 0x9e4   :  { %14726 = vst [vmem:[#allocation18_spill] sm:$0xff] %v13352_v58 }
 0x9e5   :  { %v5335_v29 = vpop.f32.mrb[122].mxu1 }
 0x9e6   :  { %v13355_v6 = vadd.f32 %v14727_v46, %v5335_v29  ;;  %v5337_v50 = vpop.f32.mrb[123].mxu1 }
 0x9e7   :  { %v5966_v50 = vmul.f32 %v13256_v4, %v13256_v4 }
 0x9e9   :  { %v5340_v17 = vpop.f32.mrb[124].mxu1 }
 0x9ea   :  { %v13358_v3 = vadd.f32 %v14728_v15, %v5340_v17  ;;  %v5342_v0 = vpop.f32.mrb[125].mxu1  ;;  %v5896_v17 = vadd.f32 %v13260_v63, %v13256_v4  ;;  %v5968_v15 = vmul.f32 %v13264_v41, %v13264_v41 }
 0x9eb   :  { %v6030_v0 = vadd.f32 %v5967_v62, %v5966_v50  ;;  %v5972_v62 = vmul.f32 %v13280_v31, %v13280_v31 }
 0x9ec   :  { %14729 = vst [vmem:[#allocation31_spill] sm:$0xff] %v13358_v3 }
 0x9ed   :  { %v5345_v18 = vpop.f32.mrb[126].mxu1 }
 0x9ee   :  { %v13361_v61 = vadd.f32 %v14730_v19, %v5345_v18  ;;  %v5347_v43 = vpop.f32.mrb[127].mxu1  ;;  %v5897_v18 = vadd.f32 %v5896_v17, %v13264_v41  ;;  %v5969_v19 = vmul.f32 %v13268_v47, %v13268_v47  ;;  %v14741_v17 = vld [vmem:[#allocation75_spill] sm:$0xff] }
 0x9f1   :  { %v5350_v48 = vpop.f32.mrb[128].mxu1 }
 0x9f2   :  { %v13364_v16 = vadd.f32 %v14731_v38, %v5350_v48  ;;  %v5352_v33 = vpop.f32.mrb[129].mxu1  ;;  %v14739_v48 = vld [vmem:[#allocation73_spill] sm:$0xff] }
 0x9f4   :  { %14732 = vst [vmem:[#allocation42_spill] sm:$0xff] %v13364_v16 }
 0x9f5   :  { %v5355_v32 = vpop.f32.mrb[130].mxu1 }
 0x9f6   :  { %v13367_v30 = vadd.f32 %v14733_v36, %v5355_v32  ;;  %v5357_v55 = vpop.f32.mrb[131].mxu1  ;;  %v6031_v32 = vadd.f32 %v6030_v0, %v5968_v15  ;;  %v5898_v36 = vadd.f32 %v5897_v18, %v13268_v47 }
 0x9f7   :  { %v5970_v55 = vmul.f32 %v13272_v53, %v13272_v53 }
 0x9f9   :  { %v5360_v34 = vpop.f32.mrb[132].mxu1 }
 0x9fa   :  { %v13370_v52 = vadd.f32 %v14734_v40, %v5360_v34  ;;  %v5362_v23 = vpop.f32.mrb[133].mxu1  ;;  %v6032_v34 = vadd.f32 %v6031_v32, %v5969_v19  ;;  %v5899_v40 = vadd.f32 %v5898_v36, %v13272_v53  ;;  %v5975_v32 = vmul.f32 %v13291_v42, %v13291_v42 }
 0x9fb   :  { %v5971_v23 = vmul.f32 %v13276_v49, %v13276_v49 }
 0x9fc   :  { %14735 = vst [vmem:[#allocation45_spill] sm:$0xff] %v13370_v52 }
 0x9fd   :  { %v5365_v14 = vpop.f32.mrb[134].mxu1 }
 0x9fe   :  { %v13373_v21 = vadd.f32 %v14736_v7, %v5365_v14  ;;  %v5367_v10 = vpop.f32.mrb[135].mxu1  ;;  %v14740_v7 = vld [vmem:[#allocation72_spill] sm:$0xff] }
 0xa01   :  { %v5370_v27 = vpop.f32.mrb[136].mxu1 }
 0xa02   :  { %v13376_v9 = vadd.f32 %v14737_v25, %v5370_v27  ;;  %v5372_v26 = vpop.f32.mrb[137].mxu1  ;;  %v6033_v25 = vadd.f32 %v6032_v34, %v5970_v55  ;;  %v14743_v55 = vld [vmem:[#allocation74_spill] sm:$0xff] }
 0xa03   :  { %v5900_v26 = vadd.f32 %v5899_v40, %v13276_v49 }
 0xa05   :  { %v5375_v1 = vpop.f32.mrb[138].mxu1 }
 0xa06   :  { %v13381_v29 = vadd.f32 %v14738_v45, %v5375_v1  ;;  %v5377_v46 = vpop.f32.mrb[139].mxu1  ;;  %v6034_v1 = vadd.f32 %v6033_v25, %v5971_v23  ;;  %v5901_v45 = vadd.f32 %v5900_v26, %v13280_v31  ;;  %v5977_v26 = vmul.f32 %v13299_v56, %v13299_v56 }
 0xa07   :  { %v5973_v46 = vmul.f32 %v13284_v28, %v13284_v28 }
 0xa08   :  { %v6035_v18 = vadd.f32 %v6034_v1, %v5972_v62  ;;  %v5902_v19 = vadd.f32 %v5901_v45, %v13284_v28  ;;  %v14744_v1 = vld [vmem:[#allocation77_spill] sm:$0xff] }
 0xa09   :  { %v5380_v43 = vpop.f32.mrb[140].mxu1 }
 0xa0a   :  { %v13393_v38 = vadd.f32 %v14739_v48, %v5380_v43  ;;  %v5382_v33 = vpop.f32.mrb[141].mxu1  ;;  %v5974_v43 = vmul.f32 %v13288_v12, %v13288_v12  ;;  %v6036_v48 = vadd.f32 %v6035_v18, %v5973_v46 }
 0xa0b   :  { %v5903_v33 = vadd.f32 %v5902_v19, %v13288_v12 }
 0xa0c   :  { %v6037_v23 = vadd.f32 %v6036_v48, %v5974_v43  ;;  %v5979_v43 = vmul.f32 %v13306_v22, %v13306_v22 }
 0xa0d   :  { %v5385_v14 = vpop.f32.mrb[142].mxu1 }
 0xa0e   :  { %v13402_v10 = vadd.f32 %v14740_v7, %v5385_v14  ;;  %v5387_v27 = vpop.f32.mrb[143].mxu1  ;;  %v5904_v14 = vadd.f32 %v5903_v33, %v13291_v42  ;;  %v5976_v7 = vmul.f32 %v13295_v11, %v13295_v11  ;;  %v14746_v33 = vld [vmem:[#allocation76_spill] sm:$0xff] }
 0xa0f   :  { %v6038_v27 = vadd.f32 %v6037_v23, %v5975_v32  ;;  %v5980_v23 = vmul.f32 %v13310_v2, %v13310_v2 }
 0xa10   :  { %v5905_v25 = vadd.f32 %v5904_v14, %v13295_v11 }
 0xa11   :  { %v5390_v50 = vpop.f32.mrb[144].mxu1 }
 0xa12   :  { %v13411_v15 = vadd.f32 %v14741_v17, %v5390_v50  ;;  %v5392_v0 = vpop.f32.mrb[145].mxu1  ;;  %v6039_v50 = vadd.f32 %v6038_v27, %v5976_v7  ;;  %v5906_v17 = vadd.f32 %v5905_v25, %v13299_v56  ;;  %v5981_v27 = vmul.f32 %v13313_v37, %v13313_v37 }
 0xa13   :  { %v5978_v0 = vmul.f32 %v13302_v51, %v13302_v51 }
 0xa14   :  { %14742 = vst [vmem:[#allocation48_spill] sm:$0xff] %v13411_v15  ;;  %v6040_v18 = vadd.f32 %v6039_v50, %v5977_v26  ;;  %v5907_v19 = vadd.f32 %v5906_v17, %v13302_v51  ;;  %v14747_v26 = vld [vmem:[#allocation79_spill] sm:$0xff]  ;;  %v5982_v17 = vmul.f32 %v13316_v20, %v13316_v20 }
 0xa15   :  { %v5395_v36 = vpop.f32.mrb[146].mxu1 }
 0xa16   :  { %v13420_v34 = vadd.f32 %v14743_v55, %v5395_v36  ;;  %v5397_v40 = vpop.f32.mrb[147].mxu1  ;;  %v6041_v55 = vadd.f32 %v6040_v18, %v5978_v0 }
 0xa17   :  { %v5908_v40 = vadd.f32 %v5907_v19, %v13306_v22  ;;  %v5983_v19 = vmul.f32 %v13319_v57, %v13319_v57 }
 0xa18   :  { %v6042_v14 = vadd.f32 %v6041_v55, %v5979_v43 }
 0xa19   :  { %v5400_v62 = vpop.f32.mrb[148].mxu1  ;;  %v5909_v7 = vadd.f32 %v5908_v40, %v13310_v2 }
 0xa1a   :  { %v13429_v45 = vadd.f32 %v14744_v1, %v5400_v62  ;;  %v5402_v46 = vpop.f32.mrb[149].mxu1 }
 0xa1b   :  { %v6043_v46 = vadd.f32 %v6042_v14, %v5980_v23  ;;  %v5910_v50 = vadd.f32 %v5909_v7, %v13313_v37  ;;  %v5984_v23 = vmul.f32 %v13322_v35, %v13322_v35 }
 0xa1c   :  { %14745 = vst [vmem:[#allocation51_spill] sm:$0xff] %v13429_v45 }
 0xa1d   :  { %v5405_v48 = vpop.f32.mrb[150].mxu1  ;;  %v6044_v0 = vadd.f32 %v6043_v46, %v5981_v27  ;;  %v5911_v18 = vadd.f32 %v5910_v50, %v13316_v20  ;;  %v5985_v27 = vmul.f32 %v13325_v59, %v13325_v59 }
 0xa1e   :  { %v13438_v32 = vadd.f32 %v14746_v33, %v5405_v48  ;;  %v5407_v36 = vpop.f32.mrb[151].mxu1  ;;  %v14749_v48 = vld [vmem:[#allocation78_spill] sm:$0xff] }
 0xa1f   :  { %v6045_v55 = vadd.f32 %v6044_v0, %v5982_v17  ;;  %v5912_v40 = vadd.f32 %v5911_v18, %v13319_v57  ;;  %v5986_v17 = vmul.f32 %v13328_v5, %v13328_v5 }
 0xa21   :  { %v5410_v25 = vpop.f32.mrb[152].mxu1  ;;  %v6046_v14 = vadd.f32 %v6045_v55, %v5983_v19  ;;  %v5913_v7 = vadd.f32 %v5912_v40, %v13322_v35  ;;  %v5987_v19 = vmul.f32 %v13331_v60, %v13331_v60 }
 0xa22   :  { %v13447_v62 = vadd.f32 %v14747_v26, %v5410_v25  ;;  %v5412_v1 = vpop.f32.mrb[153].mxu1  ;;  %v14750_v26 = vld [vmem:[#allocation81_spill] sm:$0xff] }
 0xa23   :  { %v6047_v50 = vadd.f32 %v6046_v14, %v5984_v23  ;;  %v5988_v23 = vmul.f32 %v13334_v39, %v13334_v39 }
 0xa24   :  { %14748 = vst [vmem:[#allocation35_spill] sm:$0xff] %v13447_v62 }
 0xa25   :  { %v5415_v43 = vpop.f32.mrb[154].mxu1  ;;  %v6048_v0 = vadd.f32 %v6047_v50, %v5985_v27  ;;  %v5989_v27 = vmul.f32 %v13337_v24, %v13337_v24  ;;  %v14753_v50 = vld [vmem:[#allocation83_spill] sm:$0xff] }
 0xa26   :  { %v13456_v33 = vadd.f32 %v14749_v48, %v5415_v43  ;;  %v5417_v36 = vpop.f32.mrb[155].mxu1  ;;  %v5914_v43 = vadd.f32 %v5913_v7, %v13325_v59 }
 0xa27   :  { %v14752_v36 = vld [vmem:[#allocation80_spill] sm:$0xff] }
 0xa28   :  { %v5915_v18 = vadd.f32 %v5914_v43, %v13328_v5 }
 0xa29   :  { %v5420_v25 = vpop.f32.mrb[156].mxu1 }
 0xa2a   :  { %v13465_v1 = vadd.f32 %v14750_v26, %v5420_v25  ;;  %v5422_v46 = vpop.f32.mrb[157].mxu1  ;;  %v6049_v25 = vadd.f32 %v6048_v0, %v5986_v17  ;;  %v5916_v26 = vadd.f32 %v5915_v18, %v13331_v60  ;;  %v5990_v17 = vmul.f32 %v13340_v8, %v13340_v8 }
 0xa2c   :  { %14751 = vst [vmem:[#allocation36_spill] sm:$0xff] %v13465_v1  ;;  %v6050_v14 = vadd.f32 %v6049_v25, %v5987_v19  ;;  %v5917_v7 = vadd.f32 %v5916_v26, %v13334_v39  ;;  %v5991_v19 = vmul.f32 %v13343_v54, %v13343_v54  ;;  %v14755_v25 = vld [vmem:[#allocation82_spill] sm:$0xff] }
 0xa2d   :  { %v5425_v48 = vpop.f32.mrb[158].mxu1 }
 0xa2e   :  { %v13474_v55 = vadd.f32 %v14752_v36, %v5425_v48  ;;  %v5427_v40 = vpop.f32.mrb[159].mxu1  ;;  %v6051_v48 = vadd.f32 %v6050_v14, %v5988_v23  ;;  %v5918_v36 = vadd.f32 %v5917_v7, %v13337_v24  ;;  %v5992_v23 = vmul.f32 %v13346_v44, %v13346_v44 }
 0xa30   :  { %v6052_v0 = vadd.f32 %v6051_v48, %v5989_v27  ;;  %v5919_v18 = vadd.f32 %v5918_v36, %v13340_v8  ;;  %v5993_v27 = vmul.f32 %v13349_v13, %v13349_v13  ;;  %v14756_v48 = vld [vmem:[#allocation85_spill] sm:$0xff] }
 0xa31   :  { %v5430_v46 = vpop.f32.mrb[160].mxu1 }
 0xa32   :  { %v13483_v43 = vadd.f32 %v14753_v50, %v5430_v46  ;;  %v5432_v5 = vpop.f32.mrb[161].mxu1  ;;  %v6053_v46 = vadd.f32 %v6052_v0, %v5990_v17  ;;  %v5994_v17 = vmul.f32 %v13352_v58, %v13352_v58 }
 0xa33   :  { %v5920_v5 = vadd.f32 %v5919_v18, %v13343_v54 }
 0xa34   :  { %14754 = vst [vmem:[#allocation9_spill] sm:$0xff] %v13483_v43  ;;  %v6054_v14 = vadd.f32 %v6053_v46, %v5991_v19  ;;  %v5995_v19 = vmul.f32 %v13355_v6, %v13355_v6  ;;  %v14758_v46 = vld [vmem:[#allocation84_spill] sm:$0xff] }
 0xa35   :  { %v5435_v40 = vpop.f32.mrb[162].mxu1  ;;  %v5921_v7 = vadd.f32 %v5920_v5, %v13346_v44 }
 0xa36   :  { %v13492_v26 = vadd.f32 %v14755_v25, %v5435_v40  ;;  %v5437_v39 = vpop.f32.mrb[163].mxu1  ;;  %v6055_v40 = vadd.f32 %v6054_v14, %v5992_v23  ;;  %v5996_v23 = vmul.f32 %v13358_v3, %v13358_v3 }
 0xa37   :  { %v5922_v39 = vadd.f32 %v5921_v7, %v13349_v13 }
 0xa38   :  { %v6056_v0 = vadd.f32 %v6055_v40, %v5993_v27  ;;  %v5997_v27 = vmul.f32 %v13361_v61, %v13361_v61  ;;  %v14760_v40 = vld [vmem:[#allocation87_spill] sm:$0xff] }
 0xa39   :  { %v5440_v50 = vpop.f32.mrb[164].mxu1  ;;  %v5923_v18 = vadd.f32 %v5922_v39, %v13352_v58 }
 0xa3a   :  { %v13501_v36 = vadd.f32 %v14756_v48, %v5440_v50  ;;  %v5442_v8 = vpop.f32.mrb[165].mxu1  ;;  %v6057_v50 = vadd.f32 %v6056_v0, %v5994_v17  ;;  %v5998_v17 = vmul.f32 %v13364_v16, %v13364_v16 }
 0xa3b   :  { %v5924_v8 = vadd.f32 %v5923_v18, %v13355_v6 }
 0xa3c   :  { %14757 = vst [vmem:[#allocation11_spill] sm:$0xff] %v13501_v36  ;;  %v6058_v14 = vadd.f32 %v6057_v50, %v5995_v19  ;;  %v5999_v19 = vmul.f32 %v13367_v30, %v13367_v30  ;;  %v14762_v50 = vld [vmem:[#allocation86_spill] sm:$0xff] }
 0xa3d   :  { %v5445_v25 = vpop.f32.mrb[166].mxu1  ;;  %v5925_v7 = vadd.f32 %v5924_v8, %v13358_v3 }
 0xa3e   :  { %v13510_v5 = vadd.f32 %v14758_v46, %v5445_v25  ;;  %v5447_v44 = vpop.f32.mrb[167].mxu1  ;;  %v6059_v25 = vadd.f32 %v6058_v14, %v5996_v23  ;;  %v6000_v23 = vmul.f32 %v13370_v52, %v13370_v52 }
 0xa3f   :  { %v5926_v44 = vadd.f32 %v5925_v7, %v13361_v61 }
 0xa40   :  { %14759 = vst [vmem:[#allocation10_spill] sm:$0xff] %v13510_v5  ;;  %v6060_v0 = vadd.f32 %v6059_v25, %v5997_v27  ;;  %v6001_v27 = vmul.f32 %v13373_v21, %v13373_v21  ;;  %v14763_v25 = vld [vmem:[#allocation89_spill] sm:$0xff] }
 0xa41   :  { %v5450_v48 = vpop.f32.mrb[168].mxu1  ;;  %v5927_v18 = vadd.f32 %v5926_v44, %v13364_v16 }
 0xa42   :  { %v13519_v39 = vadd.f32 %v14760_v40, %v5450_v48  ;;  %v5452_v58 = vpop.f32.mrb[169].mxu1  ;;  %v6061_v48 = vadd.f32 %v6060_v0, %v5998_v17  ;;  %v6002_v17 = vmul.f32 %v13376_v9, %v13376_v9 }
 0xa43   :  { %v5928_v58 = vadd.f32 %v5927_v18, %v13367_v30 }
 0xa44   :  { %14761 = vst [vmem:[#allocation13_spill] sm:$0xff] %v13519_v39  ;;  %v6062_v14 = vadd.f32 %v6061_v48, %v5999_v19  ;;  %v6003_v19 = vmul.f32 %v13381_v29, %v13381_v29  ;;  %v14765_v48 = vld [vmem:[#allocation88_spill] sm:$0xff] }
 0xa45   :  { %v5455_v46 = vpop.f32.mrb[170].mxu1  ;;  %v5929_v7 = vadd.f32 %v5928_v58, %v13370_v52 }
 0xa46   :  { %v13528_v8 = vadd.f32 %v14762_v50, %v5455_v46  ;;  %v5457_v3 = vpop.f32.mrb[171].mxu1  ;;  %v6063_v46 = vadd.f32 %v6062_v14, %v6000_v23  ;;  %v6004_v23 = vmul.f32 %v13393_v38, %v13393_v38 }
 0xa47   :  { %v5930_v3 = vadd.f32 %v5929_v7, %v13373_v21 }
 0xa48   :  { %v6064_v0 = vadd.f32 %v6063_v46, %v6001_v27  ;;  %v6005_v27 = vmul.f32 %v13402_v10, %v13402_v10 }
 0xa49   :  { %v5460_v40 = vpop.f32.mrb[172].mxu1  ;;  %v5931_v18 = vadd.f32 %v5930_v3, %v13376_v9 }
 0xa4a   :  { %v13537_v44 = vadd.f32 %v14763_v25, %v5460_v40  ;;  %v5462_v16 = vpop.f32.mrb[173].mxu1  ;;  %v6065_v40 = vadd.f32 %v6064_v0, %v6002_v17 }
 0xa4b   :  { %v5932_v16 = vadd.f32 %v5931_v18, %v13381_v29  ;;  %v6007_v18 = vmul.f32 %v13420_v34, %v13420_v34 }
 0xa4c   :  { %14764 = vst [vmem:[#allocation24_spill] sm:$0xff] %v13537_v44  ;;  %v6066_v14 = vadd.f32 %v6065_v40, %v6003_v19 }
 0xa4d   :  { %v5465_v50 = vpop.f32.mrb[174].mxu1  ;;  %v5933_v7 = vadd.f32 %v5932_v16, %v13393_v38 }
 0xa4e   :  { %v13546_v58 = vadd.f32 %v14765_v48, %v5465_v50  ;;  %v5467_v52 = vpop.f32.mrb[175].mxu1  ;;  %v6067_v3 = vadd.f32 %v6066_v14, %v6004_v23 }
 0xa4f   :  { %v5934_v50 = vadd.f32 %v5933_v7, %v13402_v10  ;;  %v6006_v52 = vmul.f32 %v13411_v15, %v13411_v15  ;;  %v6009_v7 = vmul.f32 %v13438_v32, %v13438_v32 }
 0xa50   :  { %14766 = vst [vmem:[#allocation37_spill] sm:$0xff] %v13546_v58  ;;  %v6068_v17 = vadd.f32 %v6067_v3, %v6005_v27 }
 0xa51   :  { %v13554_v25 = vpop.f32.mrb[176].mxu1  ;;  %v5935_v0 = vadd.f32 %v5934_v50, %v13411_v15 }
 0xa52   :  { %v5472_v46 = vpop.f32.mrb[177].mxu1  ;;  %v6069_v40 = vadd.f32 %v6068_v17, %v6006_v52 }
 0xa53   :  { %v5936_v16 = vadd.f32 %v5935_v0, %v13420_v34  ;;  %v6008_v46 = vmul.f32 %v13429_v45, %v13429_v45  ;;  %v6011_v0 = vmul.f32 %v13456_v33, %v13456_v33 }
 0xa54   :  { %v6070_v23 = vadd.f32 %v6069_v40, %v6007_v18 }
 0xa55   :  { %v5475_v19 = vpop.f32.mrb[178].mxu1  ;;  %v5937_v14 = vadd.f32 %v5936_v16, %v13429_v45 }
 0xa56   :  { %v5477_v48 = vpop.f32.mrb[179].mxu1  ;;  %v6071_v50 = vadd.f32 %v6070_v23, %v6008_v46 }
 0xa57   :  { %v5938_v15 = vadd.f32 %v5937_v14, %v13438_v32  ;;  %v6010_v48 = vmul.f32 %v13447_v62, %v13447_v62  ;;  %v6013_v14 = vmul.f32 %v13474_v55, %v13474_v55 }
 0xa58   :  { %v6072_v52 = vadd.f32 %v6071_v50, %v6009_v7 }
 0xa59   :  { %v5480_v27 = vpop.f32.mrb[180].mxu1  ;;  %v5939_v17 = vadd.f32 %v5938_v15, %v13447_v62 }
 0xa5a   :  { %v5482_v3 = vpop.f32.mrb[181].mxu1  ;;  %v6073_v16 = vadd.f32 %v6072_v52, %v6010_v48 }
 0xa5b   :  { %v5940_v45 = vadd.f32 %v5939_v17, %v13456_v33  ;;  %v6012_v3 = vmul.f32 %v13465_v1, %v13465_v1  ;;  %v6015_v17 = vmul.f32 %v13492_v26, %v13492_v26 }
 0xa5c   :  { %v6074_v46 = vadd.f32 %v6073_v16, %v6011_v0 }
 0xa5d   :  { %v5485_v18 = vpop.f32.mrb[182].mxu1  ;;  %v5941_v23 = vadd.f32 %v5940_v45, %v13465_v1 }
 0xa5e   :  { %v5487_v40 = vpop.f32.mrb[183].mxu1  ;;  %v6075_v15 = vadd.f32 %v6074_v46, %v6012_v3 }
 0xa5f   :  { %v5942_v62 = vadd.f32 %v5941_v23, %v13474_v55  ;;  %v6014_v40 = vmul.f32 %v13483_v43, %v13483_v43  ;;  %v6017_v23 = vmul.f32 %v13510_v5, %v13510_v5 }
 0xa60   :  { %v6076_v48 = vadd.f32 %v6075_v15, %v6013_v14 }
 0xa61   :  { %v5490_v7 = vpop.f32.mrb[184].mxu1  ;;  %v5943_v52 = vadd.f32 %v5942_v62, %v13483_v43 }
 0xa62   :  { %v5492_v50 = vpop.f32.mrb[185].mxu1  ;;  %v6077_v45 = vadd.f32 %v6076_v48, %v6014_v40 }
 0xa63   :  { %v5944_v1 = vadd.f32 %v5943_v52, %v13492_v26  ;;  %v6016_v50 = vmul.f32 %v13501_v36, %v13501_v36  ;;  %v6019_v52 = vmul.f32 %v13528_v8, %v13528_v8 }
 0xa64   :  { %v6078_v3 = vadd.f32 %v6077_v45, %v6015_v17 }
 0xa65   :  { %v5495_v0 = vpop.f32.mrb[186].mxu1  ;;  %v5945_v46 = vadd.f32 %v5944_v1, %v13501_v36 }
 0xa66   :  { %v5497_v16 = vpop.f32.mrb[187].mxu1  ;;  %v6079_v62 = vadd.f32 %v6078_v3, %v6016_v50 }
 0xa67   :  { %v5946_v43 = vadd.f32 %v5945_v46, %v13510_v5  ;;  %v6018_v16 = vmul.f32 %v13519_v39, %v13519_v39  ;;  %v6021_v46 = vmul.f32 %v13546_v58, %v13546_v58 }
 0xa68   :  { %v6080_v40 = vadd.f32 %v6079_v62, %v6017_v23 }
 0xa69   :  { %v5500_v14 = vpop.f32.mrb[188].mxu1  ;;  %v5947_v48 = vadd.f32 %v5946_v43, %v13519_v39 }
 0xa6a   :  { %v5502_v15 = vpop.f32.mrb[189].mxu1  ;;  %v6081_v1 = vadd.f32 %v6080_v40, %v6018_v16 }
 0xa6b   :  { %v5948_v36 = vadd.f32 %v5947_v48, %v13528_v8  ;;  %v6020_v15 = vmul.f32 %v13537_v44, %v13537_v44 }
 0xa6c   :  { %v6082_v50 = vadd.f32 %v6081_v1, %v6019_v52 }
 0xa6d   :  { %v5505_v17 = vpop.f32.mrb[190].mxu1  ;;  %v5949_v3 = vadd.f32 %v5948_v36, %v13537_v44 }
 0xa6e   :  { %v5507_v45 = vpop.f32.mrb[191].mxu1  ;;  %v6083_v39 = vadd.f32 %v6082_v50, %v6020_v15 }
 0xa6f   :  { %v5950_v5 = vadd.f32 %v5949_v3, %v13546_v58 }
 0xa70   :  { %v6084_v40 = vadd.f32 %v6083_v39, %v6021_v46 }
 0xa71   :  { %v7183_v23 = vpop.f32.mrb[192].mxu1 }
 0xa72   :  { %v13604_v62 = vadd.f32 %v7183_v23, %v5475_v19  ;;  %v5855_v43 = vpop.f32.mrb[193].mxu1 }
 0xa73   :  { %v13608_v16 = vadd.f32 %v5855_v43, %v13554_v25 }
 0xa74   :  { %14767 = vst [vmem:[#allocation27_spill] sm:$0xff] %v13604_v62  ;;  %v6023_v19 = vmul.f32 %v13604_v62, %v13604_v62 }
 0xa75   :  { %14768 = vst [vmem:[#allocation38_spill] sm:$0xff] %v13608_v16  ;;  %v5951_v48 = vadd.f32 %v5950_v5, %v13608_v16  ;;  %v6022_v52 = vmul.f32 %v13608_v16, %v13608_v16  ;;  %v7186_v36 = vpop.f32.mrb[194].mxu1 }
 0xa76   :  { %v13613_v45 = vadd.f32 %v7186_v36, %v5485_v18  ;;  %v5865_v1 = vpop.f32.mrb[195].mxu1 }
 0xa77   :  { %v6085_v23 = vadd.f32 %v6084_v40, %v6022_v52  ;;  %v13617_v15 = vadd.f32 %v5865_v1, %v5480_v27  ;;  %v5952_v50 = vadd.f32 %v5951_v48, %v13604_v62 }
 0xa78   :  { %14769 = vst [vmem:[#allocation39_spill] sm:$0xff] %v13613_v45  ;;  %v6025_v43 = vmul.f32 %v13613_v45, %v13613_v45 }
 0xa79   :  { %14770 = vst [vmem:[#allocation17_spill] sm:$0xff] %v13617_v15  ;;  %v5953_v25 = vadd.f32 %v5952_v50, %v13617_v15  ;;  %v6024_v5 = vmul.f32 %v13617_v15, %v13617_v15  ;;  %v6086_v39 = vadd.f32 %v6085_v23, %v6023_v19  ;;  %v7189_v3 = vpop.f32.mrb[196].mxu1 }
 0xa7a   :  { %v13623_v46 = vadd.f32 %v7189_v3, %v5495_v0  ;;  %v5875_v18 = vpop.f32.mrb[197].mxu1 }
 0xa7b   :  { %v6087_v36 = vadd.f32 %v6086_v39, %v6024_v5  ;;  %v13627_v16 = vadd.f32 %v5875_v18, %v5490_v7  ;;  %v5954_v27 = vadd.f32 %v5953_v25, %v13613_v45 }
 0xa7c   :  { %14771 = vst [vmem:[#allocation15_spill] sm:$0xff] %v13623_v46  ;;  %v6027_v23 = vmul.f32 %v13623_v46, %v13623_v46 }
 0xa7d   :  { %14772 = vst [vmem:[#allocation12_spill] sm:$0xff] %v13627_v16  ;;  %v5955_v40 = vadd.f32 %v5954_v27, %v13627_v16  ;;  %v6026_v48 = vmul.f32 %v13627_v16, %v13627_v16  ;;  %v6088_v52 = vadd.f32 %v6087_v36, %v6025_v43  ;;  %v7192_v1 = vpop.f32.mrb[198].mxu1 }
 0xa7e   :  { %v13633_v19 = vadd.f32 %v7192_v1, %v5505_v17  ;;  %v5885_v0 = vpop.f32.mrb[199].mxu1 }
 0xa7f   :  { %v6089_v50 = vadd.f32 %v6088_v52, %v6026_v48  ;;  %v5886_v3 = vadd.f32 %v5885_v0, %v5500_v14  ;;  %v5956_v7 = vadd.f32 %v5955_v40, %v13623_v46 }
 0xa80   :  { %v6029_v18 = vmul.f32 %v13633_v19, %v13633_v19 }
 0xa81   :  { %v5957_v5 = vadd.f32 %v5956_v7, %v5886_v3  ;;  %v6028_v39 = vmul.f32 %v5886_v3, %v5886_v3  ;;  %v6090_v25 = vadd.f32 %v6089_v50, %v6027_v23 }
 0xa83   :  { %v5958_v27 = vadd.f32 %v5957_v5, %v13633_v19  ;;  %v6091_v43 = vadd.f32 %v6090_v25, %v6028_v39  ;;  %v5894_v39 = vld [vmem:[%s14242_s5] sm:$0x1]  ;;  %s8490_s5 = smov [#allocation6]  }
 0xa85   :  { %v5959_v36 = vrot.slane %v5958_v27, 4  ;;  %v6092_v17 = vadd.f32 %v6091_v43, %v6029_v18 }
 0xa87   :  { %v5960_v1 = vadd.f32 %v5959_v36, %v5958_v27  ;;  %v6093_v16 = vrot.slane %v6092_v17, 4 }
 0xa89   :  { %v5961_v45 = vrot.slane %v5960_v1, 2  ;;  %v6094_v15 = vadd.f32 %v6093_v16, %v6092_v17 }
 0xa8b   :  { %v5962_v62 = vadd.f32 %v5961_v45, %v5960_v1  ;;  %v6095_v48 = vrot.slane %v6094_v15, 2  ;;  %v5895_v45 = vld [vmem:[%s14243_s6] sm:$0x1]  ;;  %s6381_s6 = sshll.u32 %s8490_s5, 4  ;;  %s6382_s6 = int_to_ptr.vmem [resolvable:$true] %s6381_s6 }
 0xa8c   :  { %s8459_s21 = scalar_lea.vmem %s6382_s6, 8192  ;;  %p8464_p9 = scmp.lt.s32.totalorder %s6382_s6, %s6382_s6 }
 0xa8d   :  { %v5963_v14 = vrot.slane %v5962_v62, 1  ;;  %v6096_v52 = vadd.f32 %v6095_v48, %v6094_v15  ;;  %v14773_v15 = vld [vmem:[#allocation25_spill] sm:$0xff]  ;;  %p8460_p8 = scmp.ne.s32.totalorder %s6382_s6, %s8459_s21  ;;  %p8465_p10 = scmp.lt.s32.totalorder %s8459_s21, %s8459_s21 }
 0xa8f   :  { %v5964_v40 = vadd.f32 %v5963_v14, %v5962_v62  ;;  %v6097_v0 = vrot.slane %v6096_v52, 1  ;;  %v14774_v14 = vld [vmem:[#allocation32_spill] sm:$0xff]  ;;  %p8466_p11 = por %p8465_p10, %p8464_p9 }
 0xa91   :  { %v5965_v7 = vmul.f32 0.001953125, %v5964_v40  ;;  %v6098_v23 = vadd.f32 %v6097_v0, %v6096_v52  ;;  %v14775_v52 = vld [vmem:[#allocation33_spill] sm:$0xff]  ;;  %v14776_v40 = vld [vmem:[#allocation34_spill] sm:$0xff]  ;;  %p8467_p12 = pnand %p8466_p11, %p8460_p8 }
 0xa93   :  { %v6099_v50 = vmul.f32 0.001953125, %v6098_v23  ;;  %v6100_v46 = vmul.f32 %v5965_v7, %v5965_v7 }
 0xa95   :  { %v6101_v58 = vsub.f32 %v6099_v50, %v6100_v46  ;;  %v14778_v50 = vld [vmem:[#allocation18_spill] sm:$0xff] }
 0xa97   :  { %v6102_v44 = vmax.f32 %v6101_v58, 0.0 }
 0xa99   :  { %v6103_v5 = vadd.f32 1e-05, %v6102_v44 }
 0xa9b   :  { %8433 = vrsqrt.f32 %v6103_v5 }
 0xaa5   :  { %v8434_v25 = vpop.eup %8433 }
 0xaa6   :  { %v6105_v16 = vmul.f32 %v8434_v25, %v5894_v39  ;;  %v14779_v39 = vld [vmem:[#allocation31_spill] sm:$0xff] }
 0xaa8   :  { %v6106_v62 = vmul.f32 %v6105_v16, %v5965_v7  ;;  %v13648_v18 = vrot.slane %v6105_v16, %v14773_v15  ;;  %v14777_v7 = vld [vmem:[#allocation14_spill] sm:$0xff] }
 0xaa9   :  { %v14780_v16 = vld [vmem:[#allocation42_spill] sm:$0xff] }
 0xaaa   :  { %v6107_v27 = vsub.f32 %v5895_v45, %v6106_v62  ;;  %v6176_v46 = vmul.f32 %v13648_v18, %v5886_v3  ;;  %v13653_v44 = vmul.f32 %v13648_v18, %v13256_v4  ;;  %v13657_v58 = vmul.f32 %v13648_v18, %v13260_v63  ;;  %v14781_v62 = vld [vmem:[#allocation45_spill] sm:$0xff] }
 0xaab   :  { %v13661_v43 = vmul.f32 %v13648_v18, %v13264_v41  ;;  %v13665_v36 = vmul.f32 %v13648_v18, %v13268_v47  ;;  %v13669_v17 = vmul.f32 %v13648_v18, %v13272_v53  ;;  %v13673_v4 = vmul.f32 %v13648_v18, %v13276_v49 }
 0xaac   :  { %v13676_v3 = vrot.slane %v6107_v27, %v14773_v15  ;;  %v13680_v63 = vmul.f32 %v13648_v18, %v13280_v31  ;;  %v13684_v41 = vmul.f32 %v13648_v18, %v13284_v28  ;;  %v13688_v47 = vmul.f32 %v13648_v18, %v13288_v12 }
 0xaad   :  { %v13692_v53 = vmul.f32 %v13648_v18, %v13291_v42  ;;  %v13696_v49 = vmul.f32 %v13648_v18, %v13295_v11  ;;  %v13700_v31 = vmul.f32 %v13648_v18, %v13299_v56  ;;  %v13704_v28 = vmul.f32 %v13648_v18, %v13302_v51 }
 0xaae   :  { %v6246_v1 = vadd.f32 %v13676_v3, %v6176_v46  ;;  %v13709_v12 = vmul.f32 %v13648_v18, %v13306_v22  ;;  %v13713_v42 = vmul.f32 %v13648_v18, %v13310_v2  ;;  %v13717_v11 = vmul.f32 %v13648_v18, %v13313_v37 }
 0xaaf   :  { %v13721_v56 = vmul.f32 %v13648_v18, %v13316_v20  ;;  %v13725_v51 = vmul.f32 %v13648_v18, %v13319_v57  ;;  %v13729_v22 = vmul.f32 %v13648_v18, %v13322_v35  ;;  %v13733_v2 = vmul.f32 %v13648_v18, %v13325_v59 }
 0xab0   :  { %v6310_v48 = vmax.f32 %v6246_v1, 0.0  ;;  %v13737_v37 = vmul.f32 %v13648_v18, %v14774_v14  ;;  %v13741_v20 = vmul.f32 %v13648_v18, %v13331_v60  ;;  %v13745_v57 = vmul.f32 %v13648_v18, %v14775_v52  ;;  %v14782_v1 = vld [vmem:[#allocation48_spill] sm:$0xff]  ;;  %v14784_v14 = vld [vmem:[#allocation35_spill] sm:$0xff] }
 0xab1   :  { %v13749_v35 = vmul.f32 %v13648_v18, %v13337_v24  ;;  %v13753_v59 = vmul.f32 %v13648_v18, %v14776_v40  ;;  %v13757_v0 = vmul.f32 %v13648_v18, %v13343_v54  ;;  %v13761_v60 = vmul.f32 %v13648_v18, %v14777_v7  ;;  %v14785_v40 = vld [vmem:[#allocation36_spill] sm:$0xff] }
 0xab2   :  { %6374 = vst [vmem:[#allocation6 + $0x1f0] sm:$0xff] %v6310_v48  ;;  %v13765_v23 = vmul.f32 %v13648_v18, %v13349_v13  ;;  %v13769_v24 = vmul.f32 %v13648_v18, %v14778_v50  ;;  %v13773_v5 = vmul.f32 %v13648_v18, %v13355_v6  ;;  %v13777_v54 = vmul.f32 %v13648_v18, %v14779_v39  ;;  %v14783_v48 = vld [vmem:[#allocation51_spill] sm:$0xff]  ;;  %v14786_v50 = vld [vmem:[#allocation9_spill] sm:$0xff] }
 0xab3   :  { %v13781_v25 = vmul.f32 %v13648_v18, %v13361_v61  ;;  %v13785_v13 = vmul.f32 %v13648_v18, %v14780_v16  ;;  %v13789_v45 = vmul.f32 %v13648_v18, %v13367_v30  ;;  %v13793_v6 = vmul.f32 %v13648_v18, %v14781_v62  ;;  %v14787_v16 = vld [vmem:[#allocation11_spill] sm:$0xff]  ;;  %v14789_v62 = vld [vmem:[#allocation10_spill] sm:$0xff] }
 0xab4   :  { %v13797_v15 = vmul.f32 %v13648_v18, %v13373_v21  ;;  %v13801_v61 = vmul.f32 %v13648_v18, %v13376_v9  ;;  %v13805_v27 = vmul.f32 %v13648_v18, %v13381_v29  ;;  %v13809_v30 = vmul.f32 %v13648_v18, %v13393_v38 }
 0xab5   :  { %v13813_v46 = vmul.f32 %v13648_v18, %v13402_v10  ;;  %v13817_v21 = vmul.f32 %v13648_v18, %v14782_v1  ;;  %v13821_v9 = vmul.f32 %v13648_v18, %v13420_v34  ;;  %v13825_v29 = vmul.f32 %v13648_v18, %v14783_v48  ;;  %v14791_v48 = vld [vmem:[#allocation13_spill] sm:$0xff] }
 0xab6   :  { %v13829_v38 = vmul.f32 %v13648_v18, %v13438_v32  ;;  %v13833_v10 = vmul.f32 %v13648_v18, %v14784_v14  ;;  %v13837_v52 = vmul.f32 %v13648_v18, %v13456_v33  ;;  %v13841_v34 = vmul.f32 %v13648_v18, %v14785_v40  ;;  %v14794_v40 = vld [vmem:[#allocation24_spill] sm:$0xff] }
 0xab7   :  { %v13845_v7 = vmul.f32 %v13648_v18, %v13474_v55  ;;  %v13849_v32 = vmul.f32 %v13648_v18, %v14786_v50  ;;  %v13853_v39 = vmul.f32 %v13648_v18, %v13492_v26  ;;  %v13857_v33 = vmul.f32 %v13648_v18, %v14787_v16  ;;  %v14796_v50 = vld [vmem:[#allocation37_spill] sm:$0xff] }
 0xab8   :  { %v13861_v1 = vmul.f32 %v13648_v18, %v14789_v62  ;;  %v13865_v55 = vmul.f32 %v13648_v18, %v14791_v48  ;;  %v13869_v14 = vmul.f32 %v13648_v18, %v13528_v8  ;;  %v13873_v26 = vmul.f32 %v13648_v18, %v14794_v40 }
 0xab9   :  { %14788 = vst [vmem:[#allocation19_spill] sm:$0xff] %v13857_v33  ;;  %v13877_v16 = vmul.f32 %v13648_v18, %v14796_v50  ;;  %v14798_v33 = vld [vmem:[#allocation38_spill] sm:$0xff] }
 0xaba   :  { %14790 = vst [vmem:[#allocation16_spill] sm:$0xff] %v13861_v1  ;;  %14792 = vst [vmem:[#allocation30_spill] sm:$0xff] %v13865_v55  ;;  %v13881_v62 = vmul.f32 %v13648_v18, %v14798_v33  ;;  %v14799_v1 = vld [vmem:[#allocation27_spill] sm:$0xff]  ;;  %v14800_v55 = vld [vmem:[#allocation17_spill] sm:$0xff] }
 0xabb   :  { %14793 = vst [vmem:[#allocation21_spill] sm:$0xff] %v13869_v14  ;;  %14795 = vst [vmem:[#allocation41_spill] sm:$0xff] %v13873_v26  ;;  %v13885_v48 = vmul.f32 %v13648_v18, %v14799_v1  ;;  %v13889_v8 = vmul.f32 %v13648_v18, %v14800_v55  ;;  %v14801_v14 = vld [vmem:[#allocation39_spill] sm:$0xff]  ;;  %v14802_v26 = vld [vmem:[#allocation12_spill] sm:$0xff]  ;;  %v13905_v1 = vmul.f32 %v13648_v18, %v13633_v19 }
 0xabc   :  { %14797 = vst [vmem:[#allocation40_spill] sm:$0xff] %v13877_v16  ;;  %v13893_v40 = vmul.f32 %v13648_v18, %v14801_v14  ;;  %v13897_v50 = vmul.f32 %v13648_v18, %v14802_v26  ;;  %v14803_v16 = vld [vmem:[#allocation15_spill] sm:$0xff]  ;;  %v13909_v55 = vadd.f32 %v13676_v3, %v13653_v44  ;;  %v13913_v14 = vadd.f32 %v13676_v3, %v13657_v58 }
 0xabd   :  { %v13901_v33 = vmul.f32 %v13648_v18, %v14803_v16  ;;  %v13917_v26 = vadd.f32 %v13676_v3, %v13661_v43  ;;  %v13921_v16 = vadd.f32 %v13676_v3, %v13665_v36  ;;  %v13925_v19 = vadd.f32 %v13676_v3, %v13669_v17 }
 0xabe   :  { %v13929_v18 = vadd.f32 %v13676_v3, %v13673_v4  ;;  %v13933_v44 = vadd.f32 %v13676_v3, %v13680_v63  ;;  %v13937_v58 = vadd.f32 %v13676_v3, %v13684_v41  ;;  %v13941_v43 = vadd.f32 %v13676_v3, %v13688_v47 }
 0xabf   :  { %v13945_v36 = vadd.f32 %v13676_v3, %v13692_v53  ;;  %v13949_v17 = vadd.f32 %v13676_v3, %v13696_v49  ;;  %v13953_v4 = vadd.f32 %v13676_v3, %v13700_v31  ;;  %v13957_v63 = vadd.f32 %v13676_v3, %v13704_v28 }
 0xac0   :  { %v13961_v41 = vadd.f32 %v13676_v3, %v13709_v12  ;;  %v13965_v47 = vadd.f32 %v13676_v3, %v13713_v42  ;;  %v13969_v53 = vadd.f32 %v13676_v3, %v13717_v11  ;;  %v13973_v49 = vadd.f32 %v13676_v3, %v13721_v56 }
 0xac1   :  { %v13977_v31 = vadd.f32 %v13676_v3, %v13725_v51  ;;  %v13981_v28 = vadd.f32 %v13676_v3, %v13729_v22  ;;  %v13985_v12 = vadd.f32 %v13676_v3, %v13733_v2  ;;  %v13989_v42 = vadd.f32 %v13676_v3, %v13737_v37 }
 0xac2   :  { %v13993_v11 = vadd.f32 %v13676_v3, %v13741_v20  ;;  %v13997_v56 = vadd.f32 %v13676_v3, %v13745_v57  ;;  %v14001_v51 = vadd.f32 %v13676_v3, %v13749_v35  ;;  %v14005_v22 = vadd.f32 %v13676_v3, %v13753_v59 }
 0xac3   :  { %v14009_v2 = vadd.f32 %v13676_v3, %v13757_v0  ;;  %v14013_v37 = vadd.f32 %v13676_v3, %v13761_v60  ;;  %v14017_v20 = vadd.f32 %v13676_v3, %v13765_v23  ;;  %v14021_v57 = vadd.f32 %v13676_v3, %v13769_v24 }
 0xac4   :  { %v14025_v35 = vadd.f32 %v13676_v3, %v13773_v5  ;;  %v14029_v59 = vadd.f32 %v13676_v3, %v13777_v54  ;;  %v14033_v0 = vadd.f32 %v13676_v3, %v13781_v25  ;;  %v14037_v60 = vadd.f32 %v13676_v3, %v13785_v13 }
 0xac5   :  { %v14041_v23 = vadd.f32 %v13676_v3, %v13789_v45  ;;  %v14045_v24 = vadd.f32 %v13676_v3, %v13793_v6  ;;  %v14049_v5 = vadd.f32 %v13676_v3, %v13797_v15  ;;  %v14053_v54 = vadd.f32 %v13676_v3, %v13801_v61 }
 0xac6   :  { %v14057_v25 = vadd.f32 %v13676_v3, %v13805_v27  ;;  %v14061_v13 = vadd.f32 %v13676_v3, %v13809_v30  ;;  %v14065_v45 = vadd.f32 %v13676_v3, %v13813_v46  ;;  %v14069_v6 = vadd.f32 %v13676_v3, %v13817_v21 }
 0xac7   :  { %v14073_v15 = vadd.f32 %v13676_v3, %v13821_v9  ;;  %v14077_v61 = vadd.f32 %v13676_v3, %v13825_v29  ;;  %v14081_v27 = vadd.f32 %v13676_v3, %v13829_v38  ;;  %v14085_v30 = vadd.f32 %v13676_v3, %v13833_v10  ;;  %v14809_v10 = vld [vmem:[#allocation19_spill] sm:$0xff] }
 0xac8   :  { %v14089_v46 = vadd.f32 %v13676_v3, %v13837_v52  ;;  %v14093_v21 = vadd.f32 %v13676_v3, %v13841_v34  ;;  %v14097_v9 = vadd.f32 %v13676_v3, %v13845_v7  ;;  %v14101_v29 = vadd.f32 %v13676_v3, %v13849_v32 }
 0xac9   :  { %v14105_v38 = vadd.f32 %v13676_v3, %v13853_v39  ;;  %v14109_v52 = vadd.f32 %v13676_v3, %v14809_v10 }
 0xaca   :  { %14804 = vst [vmem:[#allocation44_spill] sm:$0xff] %v14089_v46  ;;  %14805 = vst [vmem:[#allocation43_spill] sm:$0xff] %v14093_v21  ;;  %v14810_v46 = vld [vmem:[#allocation16_spill] sm:$0xff]  ;;  %v14811_v21 = vld [vmem:[#allocation30_spill] sm:$0xff] }
 0xacb   :  { %14806 = vst [vmem:[#allocation47_spill] sm:$0xff] %v14097_v9  ;;  %14807 = vst [vmem:[#allocation46_spill] sm:$0xff] %v14101_v29  ;;  %v14113_v34 = vadd.f32 %v13676_v3, %v14810_v46  ;;  %v14117_v7 = vadd.f32 %v13676_v3, %v14811_v21  ;;  %v14812_v9 = vld [vmem:[#allocation21_spill] sm:$0xff]  ;;  %v14133_v46 = vadd.f32 %v13676_v3, %v13881_v62 }
 0xacc   :  { %14808 = vst [vmem:[#allocation50_spill] sm:$0xff] %v14105_v38  ;;  %v14121_v32 = vadd.f32 %v13676_v3, %v14812_v9  ;;  %v14813_v29 = vld [vmem:[#allocation41_spill] sm:$0xff]  ;;  %v14814_v38 = vld [vmem:[#allocation40_spill] sm:$0xff]  ;;  %v14137_v21 = vadd.f32 %v13676_v3, %v13885_v48  ;;  %v14141_v9 = vadd.f32 %v13676_v3, %v13889_v8  ;;  %v14153_v62 = vadd.f32 %v13676_v3, %v13901_v33 }
 0xacd   :  { %v14125_v39 = vadd.f32 %v13676_v3, %v14813_v29  ;;  %v14129_v10 = vadd.f32 %v13676_v3, %v14814_v38  ;;  %v14145_v29 = vadd.f32 %v13676_v3, %v13893_v40  ;;  %v14149_v38 = vadd.f32 %v13676_v3, %v13897_v50 }
 0xace   :  { %14815 = vst [vmem:[#allocation28_spill] sm:$0xff] %v14137_v21  ;;  %14816 = vst [vmem:[#allocation49_spill] sm:$0xff] %v14141_v9  ;;  %v14157_v48 = vadd.f32 %v13676_v3, %v13905_v1  ;;  %v6248_v21 = vmax.f32 %v13909_v55, 0.0  ;;  %v6249_v8 = vmax.f32 %v13913_v14, 0.0  ;;  %v6250_v9 = vmax.f32 %v13917_v26, 0.0 }
 0xacf   :  { %14817 = vst [vmem:[#allocation29_spill] sm:$0xff] %v14145_v29  ;;  %14818 = vst [vmem:[#allocation53_spill] sm:$0xff] %v14149_v38  ;;  %v6251_v40 = vmax.f32 %v13921_v16, 0.0  ;;  %v6252_v29 = vmax.f32 %v13925_v19, 0.0  ;;  %v6253_v50 = vmax.f32 %v13929_v18, 0.0  ;;  %v6254_v38 = vmax.f32 %v13933_v44, 0.0 }
 0xad0   :  { %14819 = vst [vmem:[#allocation52_spill] sm:$0xff] %v14153_v62  ;;  %v6255_v33 = vmax.f32 %v13937_v58, 0.0  ;;  %v6256_v62 = vmax.f32 %v13941_v43, 0.0  ;;  %6312 = vst [vmem:[#allocation6] sm:$0xff] %v6248_v21  ;;  %v6257_v3 = vmax.f32 %v13945_v36, 0.0  ;;  %v6258_v1 = vmax.f32 %v13949_v17, 0.0 }
 0xad1   :  { %v6259_v55 = vmax.f32 %v13953_v4, 0.0  ;;  %v6260_v14 = vmax.f32 %v13957_v63, 0.0  ;;  %6313 = vst [vmem:[#allocation6 + $0x8] sm:$0xff] %v6249_v8  ;;  %6314 = vst [vmem:[#allocation6 + $0x10] sm:$0xff] %v6250_v9  ;;  %v6261_v26 = vmax.f32 %v13961_v41, 0.0  ;;  %v6262_v16 = vmax.f32 %v13965_v47, 0.0 }
 0xad2   :  { %6315 = vst [vmem:[#allocation6 + $0x18] sm:$0xff] %v6251_v40  ;;  %6316 = vst [vmem:[#allocation6 + $0x20] sm:$0xff] %v6252_v29  ;;  %v6263_v19 = vmax.f32 %v13969_v53, 0.0  ;;  %v6264_v18 = vmax.f32 %v13973_v49, 0.0  ;;  %v6265_v44 = vmax.f32 %v13977_v31, 0.0  ;;  %v6266_v58 = vmax.f32 %v13981_v28, 0.0 }
 0xad3   :  { %6317 = vst [vmem:[#allocation6 + $0x28] sm:$0xff] %v6253_v50  ;;  %6318 = vst [vmem:[#allocation6 + $0x30] sm:$0xff] %v6254_v38  ;;  %v6267_v43 = vmax.f32 %v13985_v12, 0.0  ;;  %v6268_v36 = vmax.f32 %v13989_v42, 0.0  ;;  %v6269_v17 = vmax.f32 %v13993_v11, 0.0  ;;  %v6270_v4 = vmax.f32 %v13997_v56, 0.0 }
 0xad4   :  { %6319 = vst [vmem:[#allocation6 + $0x38] sm:$0xff] %v6255_v33  ;;  %6320 = vst [vmem:[#allocation6 + $0x40] sm:$0xff] %v6256_v62  ;;  %v6271_v63 = vmax.f32 %v14001_v51, 0.0  ;;  %v6272_v41 = vmax.f32 %v14005_v22, 0.0  ;;  %v6273_v47 = vmax.f32 %v14009_v2, 0.0  ;;  %v6274_v53 = vmax.f32 %v14013_v37, 0.0 }
 0xad5   :  { %6321 = vst [vmem:[#allocation6 + $0x48] sm:$0xff] %v6257_v3  ;;  %6322 = vst [vmem:[#allocation6 + $0x50] sm:$0xff] %v6258_v1  ;;  %v6275_v49 = vmax.f32 %v14017_v20, 0.0  ;;  %v6276_v31 = vmax.f32 %v14021_v57, 0.0  ;;  %v6277_v28 = vmax.f32 %v14025_v35, 0.0  ;;  %v6278_v12 = vmax.f32 %v14029_v59, 0.0 }
 0xad6   :  { %6323 = vst [vmem:[#allocation6 + $0x58] sm:$0xff] %v6259_v55  ;;  %6324 = vst [vmem:[#allocation6 + $0x60] sm:$0xff] %v6260_v14  ;;  %v6279_v42 = vmax.f32 %v14033_v0, 0.0  ;;  %v6280_v11 = vmax.f32 %v14037_v60, 0.0  ;;  %v6281_v56 = vmax.f32 %v14041_v23, 0.0  ;;  %v6282_v51 = vmax.f32 %v14045_v24, 0.0 }
 0xad7   :  { %6325 = vst [vmem:[#allocation6 + $0x68] sm:$0xff] %v6261_v26  ;;  %6326 = vst [vmem:[#allocation6 + $0x70] sm:$0xff] %v6262_v16  ;;  %v6283_v22 = vmax.f32 %v14049_v5, 0.0  ;;  %v6284_v2 = vmax.f32 %v14053_v54, 0.0  ;;  %v6285_v37 = vmax.f32 %v14057_v25, 0.0  ;;  %v6286_v20 = vmax.f32 %v14061_v13, 0.0 }
 0xad8   :  { %6327 = vst [vmem:[#allocation6 + $0x78] sm:$0xff] %v6263_v19  ;;  %6328 = vst [vmem:[#allocation6 + $0x80] sm:$0xff] %v6264_v18  ;;  %v6287_v57 = vmax.f32 %v14065_v45, 0.0  ;;  %v6288_v35 = vmax.f32 %v14069_v6, 0.0  ;;  %v6289_v59 = vmax.f32 %v14073_v15, 0.0  ;;  %v6290_v0 = vmax.f32 %v14077_v61, 0.0 }
 0xad9   :  { %6329 = vst [vmem:[#allocation6 + $0x88] sm:$0xff] %v6265_v44  ;;  %6330 = vst [vmem:[#allocation6 + $0x90] sm:$0xff] %v6266_v58  ;;  %v6291_v60 = vmax.f32 %v14081_v27, 0.0  ;;  %v6292_v23 = vmax.f32 %v14085_v30, 0.0  ;;  %v14820_v24 = vld [vmem:[#allocation44_spill] sm:$0xff]  ;;  %v14821_v54 = vld [vmem:[#allocation43_spill] sm:$0xff] }
 0xada   :  { %6331 = vst [vmem:[#allocation6 + $0x98] sm:$0xff] %v6267_v43  ;;  %6332 = vst [vmem:[#allocation6 + $0xa0] sm:$0xff] %v6268_v36  ;;  %v6293_v5 = vmax.f32 %v14820_v24, 0.0  ;;  %v6294_v25 = vmax.f32 %v14821_v54, 0.0  ;;  %v14822_v13 = vld [vmem:[#allocation47_spill] sm:$0xff]  ;;  %v14823_v6 = vld [vmem:[#allocation46_spill] sm:$0xff] }
 0xadb   :  { %6333 = vst [vmem:[#allocation6 + $0xa8] sm:$0xff] %v6269_v17  ;;  %6334 = vst [vmem:[#allocation6 + $0xb0] sm:$0xff] %v6270_v4  ;;  %v6295_v45 = vmax.f32 %v14822_v13, 0.0  ;;  %v6296_v21 = vmax.f32 %v14823_v6, 0.0  ;;  %v14824_v15 = vld [vmem:[#allocation50_spill] sm:$0xff]  ;;  %v6298_v27 = vmax.f32 %v14109_v52, 0.0 }
 0xadc   :  { %6335 = vst [vmem:[#allocation6 + $0xb8] sm:$0xff] %v6271_v63  ;;  %6336 = vst [vmem:[#allocation6 + $0xc0] sm:$0xff] %v6272_v41  ;;  %v6297_v61 = vmax.f32 %v14824_v15, 0.0  ;;  %v6299_v30 = vmax.f32 %v14113_v34, 0.0  ;;  %v6300_v9 = vmax.f32 %v14117_v7, 0.0  ;;  %v6301_v29 = vmax.f32 %v14121_v32, 0.0 }
 0xadd   :  { %6337 = vst [vmem:[#allocation6 + $0xc8] sm:$0xff] %v6273_v47  ;;  %6338 = vst [vmem:[#allocation6 + $0xd0] sm:$0xff] %v6274_v53  ;;  %v6302_v38 = vmax.f32 %v14125_v39, 0.0  ;;  %v6303_v62 = vmax.f32 %v14129_v10, 0.0  ;;  %v6304_v8 = vmax.f32 %v14133_v46, 0.0  ;;  %v14825_v52 = vld [vmem:[#allocation28_spill] sm:$0xff] }
 0xade   :  { %6339 = vst [vmem:[#allocation6 + $0xd8] sm:$0xff] %v6275_v49  ;;  %6340 = vst [vmem:[#allocation6 + $0xe0] sm:$0xff] %v6276_v31  ;;  %v6305_v34 = vmax.f32 %v14825_v52, 0.0  ;;  %v14826_v7 = vld [vmem:[#allocation49_spill] sm:$0xff]  ;;  %v14829_v32 = vld [vmem:[#allocation52_spill] sm:$0xff]  ;;  %v6311_v10 = vmax.f32 %v14157_v48, 0.0 }
 0xadf   :  { %6341 = vst [vmem:[#allocation6 + $0xe8] sm:$0xff] %v6277_v28  ;;  %6342 = vst [vmem:[#allocation6 + $0xf0] sm:$0xff] %v6278_v12  ;;  %v6306_v40 = vmax.f32 %v14826_v7, 0.0  ;;  %v14827_v50 = vld [vmem:[#allocation29_spill] sm:$0xff]  ;;  %v6309_v39 = vmax.f32 %v14829_v32, 0.0 }
 0xae0   :  { %6343 = vst [vmem:[#allocation6 + $0xf8] sm:$0xff] %v6279_v42  ;;  %6344 = vst [vmem:[#allocation6 + $0x100] sm:$0xff] %v6280_v11  ;;  %v6307_v33 = vmax.f32 %v14827_v50, 0.0  ;;  %v14828_v3 = vld [vmem:[#allocation53_spill] sm:$0xff] }
 0xae1   :  { %6345 = vst [vmem:[#allocation6 + $0x108] sm:$0xff] %v6281_v56  ;;  %6346 = vst [vmem:[#allocation6 + $0x110] sm:$0xff] %v6282_v51  ;;  %v6308_v1 = vmax.f32 %v14828_v3, 0.0 }
 0xae2   :  { %6347 = vst [vmem:[#allocation6 + $0x118] sm:$0xff] %v6283_v22  ;;  %6348 = vst [vmem:[#allocation6 + $0x120] sm:$0xff] %v6284_v2 }
 0xae3   :  { %6349 = vst [vmem:[#allocation6 + $0x128] sm:$0xff] %v6285_v37  ;;  %6350 = vst [vmem:[#allocation6 + $0x130] sm:$0xff] %v6286_v20 }
 0xae4   :  { %6351 = vst [vmem:[#allocation6 + $0x138] sm:$0xff] %v6287_v57  ;;  %6352 = vst [vmem:[#allocation6 + $0x140] sm:$0xff] %v6288_v35 }
 0xae5   :  { %6353 = vst [vmem:[#allocation6 + $0x148] sm:$0xff] %v6289_v59  ;;  %6354 = vst [vmem:[#allocation6 + $0x150] sm:$0xff] %v6290_v0 }
 0xae6   :  { %6355 = vst [vmem:[#allocation6 + $0x158] sm:$0xff] %v6291_v60  ;;  %6356 = vst [vmem:[#allocation6 + $0x160] sm:$0xff] %v6292_v23 }
 0xae7   :  { %6357 = vst [vmem:[#allocation6 + $0x168] sm:$0xff] %v6293_v5  ;;  %6358 = vst [vmem:[#allocation6 + $0x170] sm:$0xff] %v6294_v25 }
 0xae8   :  { %6359 = vst [vmem:[#allocation6 + $0x178] sm:$0xff] %v6295_v45  ;;  %6360 = vst [vmem:[#allocation6 + $0x180] sm:$0xff] %v6296_v21 }
 0xae9   :  { %6361 = vst [vmem:[#allocation6 + $0x188] sm:$0xff] %v6297_v61  ;;  %6362 = vst [vmem:[#allocation6 + $0x190] sm:$0xff] %v6298_v27 }
 0xaea   :  { %6363 = vst [vmem:[#allocation6 + $0x198] sm:$0xff] %v6299_v30  ;;  %6364 = vst [vmem:[#allocation6 + $0x1a0] sm:$0xff] %v6300_v9 }
 0xaeb   :  { %6365 = vst [vmem:[#allocation6 + $0x1a8] sm:$0xff] %v6301_v29  ;;  %6366 = vst [vmem:[#allocation6 + $0x1b0] sm:$0xff] %v6302_v38 }
 0xaec   :  { %6367 = vst [vmem:[#allocation6 + $0x1b8] sm:$0xff] %v6303_v62  ;;  %6368 = vst [vmem:[#allocation6 + $0x1c0] sm:$0xff] %v6304_v8 }
 0xaed   :  { %6369 = vst [vmem:[#allocation6 + $0x1c8] sm:$0xff] %v6305_v34  ;;  %6370 = vst [vmem:[#allocation6 + $0x1d0] sm:$0xff] %v6306_v40 }
 0xaee   :  { %6371 = vst [vmem:[#allocation6 + $0x1d8] sm:$0xff] %v6307_v33  ;;  %6372 = vst [vmem:[#allocation6 + $0x1e0] sm:$0xff] %v6308_v1 }
 0xaef   :  { %6373 = vst [vmem:[#allocation6 + $0x1e8] sm:$0xff] %v6309_v39  ;;  %6375 = vst [vmem:[#allocation6 + $0x1f8] sm:$0xff] %v6311_v10 }
 0xaf0   :  { %8470 = shalt.err (!%p8467_p12)
}
 0xaf1   :  { %s8471_s23 = scalar_lea.hbm %s14244_s7, 8192 }
 0xaf2   :  { %p8472_p13 = scmp.ne.s32.totalorder %s14244_s7, %s8471_s23  ;;  %p8475_p0 = scmp.lt.u32.totalorder %s8471_s23, %s14244_s7 }
 0xaf4   :  { %p8477_p1 = pnand %p8475_p0, %p8472_p13 }
 0xaf6   :  { %8480 = shalt.err (!%p8477_p1)
}
 0xaf7   :  { %6387 = dma.vmem_to_hbm [thread:$0]  %s6382_s6, 8192, %s14244_s7, [#allocation5], %s8486_s11, %s8486_s11, %s8487_s12  }
 0xaf8   :  { %8483 = dma.done.wait [#allocation5], 8192  }
 0xaf9   :  { %8484 = vsyncadd [#allocation5], 4294959104 }
 0xafa   :  { %6391 = vsyncpa [#allocation4], 1 }
 0xafb   :  { %6392 = vsyncpa [#allocation5], 1 }

</bundles_post_ra>
